<compile_context>
chip_gen: v7x
topology: tpu7x:2x2x1
jax: 0.10.0
libtpu: 0.0.40
codegen_flags: <defaults>
</compile_context>

<pallas_src>
import numpy as np
import jax
import jax.numpy as jnp
from jax import lax
from jax.experimental import pallas as pl
from jax.experimental.pallas import tpu as pltpu

B      = 2            # batch
C_IN   = 6            # conv in channels
L_IN   = 6            # input length
C_OUT  = 32           # conv out channels == LSTM sequence length
K      = 3            # conv kernel size
T      = C_OUT        # LSTM timesteps
F      = L_IN // 2    # 3 = LSTM input_size (pooled length)
H      = 8            # LSTM hidden size
NG     = 4 * H        # stacked gate width per sample
OUT_F  = 4            # linear out features

BH  = B * H           # batch-wide hidden width (lanes)
BF  = B * F           # batch-wide feature width (lanes)
BNG = 4 * BH          # batch-wide gate width (lanes), cols = gate*BH + b*H + j
YW  = B * OUT_F       # batch-wide linear-output width

GATE_ORDER = (0, 1, 3, 2)   # PyTorch gate rows [i, f, g, o] -> kernel cols [i, f, o, g]


def _sigmoid(v):
    return 1.0 / (1.0 + jnp.exp(-v))


def hybrid_kernel(xcol_ref, wconv_ref, bconv_ref, wih_ref, whh_ref, blstm_ref,
                  seg_ref, segt_ref, wlin_ref, blin_ref,
                  out_ref,
                  gx_scr, xl_scr):
    f32 = jnp.float32

    # ---- Conv1d + ReLU as one im2col matmul; MaxPool(2,2) as lane-half max ----
    conv = jnp.dot(wconv_ref[...], xcol_ref[...], preferred_element_type=f32)
    conv = jnp.maximum(conv + bconv_ref[...], 0.0)            # (T, 2*BF)
    pooled = jnp.maximum(conv[:, :BF], conv[:, BF:])          # (T, BF), cols b*F+f

    # ---- input->gate projection for ALL timesteps in one MXU matmul ----
    gx_scr[...] = (jnp.dot(pooled, wih_ref[...], preferred_element_type=f32)
                   + blstm_ref[...])                          # (T, BNG)

    # Hoist recurrent-weight rows once; W_hh is never re-pushed to the MXU.
    whh_rows = [whh_ref[pl.ds(k, 1), :] for k in range(BH)]   # each (1, BNG)

    h = jnp.zeros((1, BH), f32)
    c = jnp.zeros((1, BH), f32)

    # ---- fully unrolled LSTM recurrence (recurrent matvec on the VPU) ----
    for t in range(T):
        g = gx_scr[pl.ds(t, 1), :]                            # (1, BNG)
        if t > 0:
            for k in range(BH):                               # VPU broadcast-FMAs
                g = g + h[:, k:k + 1] * whh_rows[k]
        # sigmoid(i|f|o) as one contiguous slab via tanh; tanh(g) separately
        sig = 0.5 * jnp.tanh(0.5 * g[:, :3 * BH]) + 0.5       # (1, 3*BH)
        g_g = jnp.tanh(g[:, 3 * BH:])                         # (1, BH)
        i_g = sig[:, 0:BH]
        f_g = sig[:, BH:2 * BH]
        o_g = sig[:, 2 * BH:3 * BH]
        c = f_g * c + i_g * g_g
        h = o_g * jnp.tanh(c)
        xl_scr[pl.ds(t, 1), :] = h                            # (T, BH) hidden history

    # ---- soft attention over timesteps (reductions via tiny MXU dots) ----
    xl = xl_scr[...]                                          # (T, BH)
    prod = xl * h                                             # h == h_n, bcast over T
    logits = jnp.dot(prod, seg_ref[...], preferred_element_type=f32)     # (T, B)
    m = jnp.max(logits, axis=0, keepdims=True)
    e = jnp.exp(logits - m)
    score = e / jnp.sum(e, axis=0, keepdims=True)             # softmax over time, (T, B)
    score_w = jnp.dot(score, segt_ref[...], preferred_element_type=f32)  # (T, BH)
    xl_p = jnp.sum(xl * score_w, axis=0, keepdims=True)       # (1, BH)

    y = jnp.dot(xl_p, wlin_ref[...], preferred_element_type=f32) + blin_ref[...]  # (1, YW)

    # ---- single output writeback: [ y | h_n | c_n ] ----
    out_ref[:, pl.ds(0, YW)] = y
    out_ref[:, pl.ds(YW, BH)] = h
    out_ref[:, pl.ds(YW + BH, BH)] = c


def _gate_perm_cols(w):
    """Permute gate columns (b, [i f g o], j) -> ([i f o g], b, j)."""
    r = w.shape[0]
    w4 = w.reshape(r, B, 4, H)[:, :, np.array(GATE_ORDER), :]
    return jnp.transpose(w4, (0, 2, 1, 3)).reshape(r, BNG)


def hybrid_forward(x, params):
    assert x.shape == (B, C_IN, L_IN)
    f32 = jnp.float32
    eye_b = jnp.eye(B, dtype=f32)

    # ---- im2col (padding + window extraction) done wrapper-side ----
    xp = jnp.pad(x, ((0, 0), (0, 0), (1, 1)))                          # (B, C_IN, L_IN+2)
    patches = jnp.stack([xp[:, :, l:l + K] for l in range(L_IN)], axis=-1)  # (B, C_IN, K, L_IN)
    patches = patches.reshape(B, C_IN * K, F, 2)                       # (B, CK, pool-pos, elem)
    xcol = jnp.transpose(patches, (3, 0, 2, 1)).reshape(2 * BF, C_IN * K).T  # (CK, 2*BF)

    w2d    = params["conv_w"].reshape(C_OUT, C_IN * K)                 # (C_OUT, CK)
    b_conv = params["conv_b"].reshape(C_OUT, 1)

    # ---- batch-block-diagonal LSTM / linear weights (gate cols -> [i|f|o|g]) ----
    wih_p  = _gate_perm_cols(jnp.kron(eye_b, params["w_ih"].T))        # (BF, BNG)
    whh_p  = _gate_perm_cols(jnp.kron(eye_b, params["w_hh"].T))        # (BH, BNG)
    b_lstm = _gate_perm_cols(
        jnp.tile(params["b_ih"] + params["b_hh"], (B,))[None, :])      # (1, BNG)

    seg    = jnp.kron(eye_b, jnp.ones((H, 1), f32))                    # (BH, B)   segment-sum
    seg_t  = jnp.kron(eye_b, jnp.ones((1, H), f32))                    # (B, BH)   segment-bcast
    wlin_p = jnp.kron(eye_b, params["lin_w"].T)                        # (BH, YW)
    b_lin  = jnp.tile(params["lin_b"], (B,))[None, :]                  # (1, YW)

    out_w = YW + 2 * BH                                                # 40 lanes
    full = lambda shape: pl.BlockSpec(shape, lambda i: (0, 0))

    grid_spec = pltpu.PrefetchScalarGridSpec(
        num_scalar_prefetch=0,
        grid=(1,),
        in_specs=[
            full(xcol.shape), full(w2d.shape), full(b_conv.shape),
            full(wih_p.shape), full(whh_p.shape), full(b_lstm.shape),
            full(seg.shape), full(seg_t.shape),
            full(wlin_p.shape), full(b_lin.shape),
        ],
        out_specs=pl.BlockSpec((1, out_w), lambda i: (0, 0)),
        scratch_shapes=[
            pltpu.VMEM((T, BNG), jnp.float32),   # input->gate projections
            pltpu.VMEM((T, BH), jnp.float32),    # per-step hidden outputs Xl
        ],
    )

    out = pl.pallas_call(
        hybrid_kernel,
        out_shape=jax.ShapeDtypeStruct((1, out_w), jnp.float32),
        grid_spec=grid_spec,
        compiler_params=pltpu.CompilerParams(
            dimension_semantics=("arbitrary",)),
    )(xcol, w2d, b_conv, wih_p, whh_p, b_lstm, seg, seg_t, wlin_p, b_lin)

    flat = out[0]
    y   = flat[:YW].reshape(B, OUT_F)
    h_n = flat[YW:YW + BH].reshape(1, B, H)       # (num_layers=1, B, H) like PyTorch
    c_n = flat[YW + BH:YW + 2 * BH].reshape(1, B, H)
    return y, (h_n, c_n)


def ref_forward(x, p):
    """Pure-JAX reference mirroring the PyTorch forward (eval, state=None)."""
    xp = jnp.pad(x, ((0, 0), (0, 0), (1, 1)))
    conv = jnp.stack(
        [jnp.einsum('oik,bik->bo', p["conv_w"], xp[:, :, l:l + K])
         for l in range(L_IN)], axis=-1)                       # (B, C_OUT, L_IN)
    conv = jnp.maximum(conv + p["conv_b"][None, :, None], 0.0)
    pooled = jnp.max(conv.reshape(B, C_OUT, F, 2), axis=-1)    # (B, T, F)

    def step(carry, xt):
        h, c = carry
        gates = xt @ p["w_ih"].T + h @ p["w_hh"].T + p["b_ih"] + p["b_hh"]
        i, f, g, o = jnp.split(gates, 4, axis=-1)
        i = _sigmoid(i); f = _sigmoid(f); g = jnp.tanh(g); o = _sigmoid(o)
        c = f * c + i * g
        h = o * jnp.tanh(c)
        return (h, c), h

    xs = jnp.transpose(pooled, (1, 0, 2))                      # (T, B, F)
    (h_n, c_n), hs = lax.scan(
        step, (jnp.zeros((B, H)), jnp.zeros((B, H))), xs)
    Xl = jnp.transpose(hs, (1, 0, 2))                          # (B, T, H)
    logits = jnp.sum(Xl * h_n[:, None, :], axis=2)
    score = jax.nn.softmax(logits, axis=1)
    xl_p = jnp.sum(Xl * score[:, :, None], axis=1)
    y = xl_p @ p["lin_w"].T + p["lin_b"]
    return y, (h_n[None], c_n[None])


if __name__ == "__main__":
    # TODO(synk): LSTM dropout=0.2 is inert (num_layers=1 / eval) and the
    # soft_attention=False hard-argmax branch is not implemented (default path only).
    key = jax.random.PRNGKey(0)
    kx, kp = jax.random.split(key)
    x = jax.random.normal(kx, (B, C_IN, L_IN), jnp.float32)

    ks = jax.random.split(kp, 8)

    def u(k, shape, fan_in):
        bound = 1.0 / np.sqrt(fan_in)
        return jax.random.uniform(k, shape, jnp.float32, -bound, bound)

    params = {
        "conv_w": u(ks[0], (C_OUT, C_IN, K), C_IN * K),   # nn.Conv1d(6,32,3)
        "conv_b": u(ks[1], (C_OUT,), C_IN * K),
        "w_ih":   u(ks[2], (NG, F), H),                   # LSTM weight_ih_l0 (32,3)
        "w_hh":   u(ks[3], (NG, H), H),                   # LSTM weight_hh_l0 (32,8)
        "b_ih":   u(ks[4], (NG,), H),
        "b_hh":   u(ks[5], (NG,), H),
        "lin_w":  u(ks[6], (OUT_F, H), H),                # nn.Linear(8,4)
        "lin_b":  u(ks[7], (OUT_F,), H),
    }

    y, (h_n, c_n) = hybrid_forward(x, params)
    jax.block_until_ready((y, h_n, c_n))

    y_ref, (h_ref, c_ref) = ref_forward(x, params)
    np.testing.assert_allclose(np.asarray(y), np.asarray(y_ref), atol=2e-4, rtol=2e-4)
    np.testing.assert_allclose(np.asarray(h_n), np.asarray(h_ref), atol=2e-4, rtol=2e-4)
    np.testing.assert_allclose(np.asarray(c_n), np.asarray(c_ref), atol=2e-4, rtol=2e-4)
    print("KERNEL_OK")
</pallas_src>

<mosaic_0001>
module attributes {stable_mosaic.version = 11 : i64} {
  func.func @hybrid_kernel(%arg0: i32, %arg1: memref<18x12xf32, #tpu.memory_space<vmem>>, %arg2: memref<32x18xf32, #tpu.memory_space<vmem>>, %arg3: memref<32x1xf32, #tpu.memory_space<vmem>>, %arg4: memref<6x64xf32, #tpu.memory_space<vmem>>, %arg5: memref<16x64xf32, #tpu.memory_space<vmem>>, %arg6: memref<1x64xf32, #tpu.memory_space<vmem>>, %arg7: memref<16x2xf32, #tpu.memory_space<vmem>>, %arg8: memref<2x16xf32, #tpu.memory_space<vmem>>, %arg9: memref<16x8xf32, #tpu.memory_space<vmem>>, %arg10: memref<1x8xf32, #tpu.memory_space<vmem>>, %arg11: memref<1x40xf32, #tpu.memory_space<vmem>>, %arg12: memref<32x64xf32, #tpu.memory_space<vmem>>, %arg13: memref<32x16xf32, #tpu.memory_space<vmem>>) attributes {dimension_semantics = [#tpu.dimension_semantics<arbitrary>], iteration_bounds = array<i64: 1>, scalar_prefetch = 0 : i64, scratch_operands = 2 : i64, tpu.core_type = #tpu.core_type<tc>, window_params = [{pipeline_mode = #tpu.pipeline_mode<synchronous>, transform_indices = @transform_0, window_bounds = array<i64: 18, 12>}, {pipeline_mode = #tpu.pipeline_mode<synchronous>, transform_indices = @transform_1, window_bounds = array<i64: 32, 18>}, {pipeline_mode = #tpu.pipeline_mode<synchronous>, transform_indices = @transform_2, window_bounds = array<i64: 32, 1>}, {pipeline_mode = #tpu.pipeline_mode<synchronous>, transform_indices = @transform_3, window_bounds = array<i64: 6, 64>}, {pipeline_mode = #tpu.pipeline_mode<synchronous>, transform_indices = @transform_4, window_bounds = array<i64: 16, 64>}, {pipeline_mode = #tpu.pipeline_mode<synchronous>, transform_indices = @transform_5, window_bounds = array<i64: 1, 64>}, {pipeline_mode = #tpu.pipeline_mode<synchronous>, transform_indices = @transform_6, window_bounds = array<i64: 16, 2>}, {pipeline_mode = #tpu.pipeline_mode<synchronous>, transform_indices = @transform_7, window_bounds = array<i64: 2, 16>}, {pipeline_mode = #tpu.pipeline_mode<synchronous>, transform_indices = @transform_8, window_bounds = array<i64: 16, 8>}, {pipeline_mode = #tpu.pipeline_mode<synchronous>, transform_indices = @transform_9, window_bounds = array<i64: 1, 8>}, {pipeline_mode = #tpu.pipeline_mode<synchronous>, transform_indices = @transform_10, window_bounds = array<i64: 1, 40>}]} {
    %c0 = arith.constant 0 : index
    %c0_0 = arith.constant 0 : index
    %0 = vector.load %arg2[%c0, %c0_0] : memref<32x18xf32, #tpu.memory_space<vmem>>, vector<32x18xf32>
    %c0_1 = arith.constant 0 : index
    %c0_2 = arith.constant 0 : index
    %1 = vector.load %arg1[%c0_1, %c0_2] : memref<18x12xf32, #tpu.memory_space<vmem>>, vector<18x12xf32>
    %cst = arith.constant dense<0.000000e+00> : vector<32x12xf32>
    %2 = tpu.matmul %0, %1, %cst {dimension_numbers = #tpu.dot_dimension_numbers<[1], [0], [0], [1], [0, 0, 1, 1], [], []>} : vector<32x18xf32>, vector<18x12xf32>, vector<32x12xf32> -> vector<32x12xf32>
    %c0_3 = arith.constant 0 : index
    %c0_4 = arith.constant 0 : index
    %3 = vector.load %arg3[%c0_3, %c0_4] : memref<32x1xf32, #tpu.memory_space<vmem>>, vector<32x1xf32>
    %4 = vector.broadcast %3 : vector<32x1xf32> to vector<32x12xf32>
    %5 = arith.addf %2, %4 : vector<32x12xf32>
    %cst_5 = arith.constant 0.000000e+00 : f32
    %6 = vector.broadcast %cst_5 : f32 to vector<32x12xf32>
    %7 = arith.maximumf %5, %6 : vector<32x12xf32>
    %8 = vector.extract_strided_slice %7 {offsets = [0, 0], sizes = [32, 6], strides = [1, 1]} : vector<32x12xf32> to vector<32x6xf32>
    %9 = vector.extract_strided_slice %7 {offsets = [0, 6], sizes = [32, 6], strides = [1, 1]} : vector<32x12xf32> to vector<32x6xf32>
    %10 = arith.maximumf %8, %9 : vector<32x6xf32>
    %c0_6 = arith.constant 0 : index
    %c0_7 = arith.constant 0 : index
    %11 = vector.load %arg4[%c0_6, %c0_7] : memref<6x64xf32, #tpu.memory_space<vmem>>, vector<6x64xf32>
    %cst_8 = arith.constant dense<0.000000e+00> : vector<32x64xf32>
    %12 = tpu.matmul %10, %11, %cst_8 {dimension_numbers = #tpu.dot_dimension_numbers<[1], [0], [0], [1], [0, 0, 1, 1], [], []>} : vector<32x6xf32>, vector<6x64xf32>, vector<32x64xf32> -> vector<32x64xf32>
    %c0_9 = arith.constant 0 : index
    %c0_10 = arith.constant 0 : index
    %13 = vector.load %arg6[%c0_9, %c0_10] : memref<1x64xf32, #tpu.memory_space<vmem>>, vector<1x64xf32>
    %14 = vector.broadcast %13 : vector<1x64xf32> to vector<32x64xf32>
    %15 = arith.addf %12, %14 : vector<32x64xf32>
    %c0_11 = arith.constant 0 : index
    %c0_12 = arith.constant 0 : index
    %16 = vector.load %arg12[%c0_11, %c0_12] : memref<32x64xf32, #tpu.memory_space<vmem>>, vector<32x64xf32>
    tpu.vector_store %arg12[%c0_11, %c0_12], %15 {strides = array<i32>} : memref<32x64xf32, #tpu.memory_space<vmem>>, vector<32x64xf32>,
    %c0_13 = arith.constant 0 : index
    %c0_14 = arith.constant 0 : index
    %17 = vector.load %arg5[%c0_13, %c0_14] : memref<16x64xf32, #tpu.memory_space<vmem>>, vector<1x64xf32>
    %c1 = arith.constant 1 : index
    %c0_15 = arith.constant 0 : index
    %18 = vector.load %arg5[%c1, %c0_15] : memref<16x64xf32, #tpu.memory_space<vmem>>, vector<1x64xf32>
    %c2 = arith.constant 2 : index
    %c0_16 = arith.constant 0 : index
    %19 = vector.load %arg5[%c2, %c0_16] : memref<16x64xf32, #tpu.memory_space<vmem>>, vector<1x64xf32>
    %c3 = arith.constant 3 : index
    %c0_17 = arith.constant 0 : index
    %20 = vector.load %arg5[%c3, %c0_17] : memref<16x64xf32, #tpu.memory_space<vmem>>, vector<1x64xf32>
    %c4 = arith.constant 4 : index
    %c0_18 = arith.constant 0 : index
    %21 = vector.load %arg5[%c4, %c0_18] : memref<16x64xf32, #tpu.memory_space<vmem>>, vector<1x64xf32>
    %c5 = arith.constant 5 : index
    %c0_19 = arith.constant 0 : index
    %22 = vector.load %arg5[%c5, %c0_19] : memref<16x64xf32, #tpu.memory_space<vmem>>, vector<1x64xf32>
    %c6 = arith.constant 6 : index
    %c0_20 = arith.constant 0 : index
    %23 = vector.load %arg5[%c6, %c0_20] : memref<16x64xf32, #tpu.memory_space<vmem>>, vector<1x64xf32>
    %c7 = arith.constant 7 : index
    %c0_21 = arith.constant 0 : index
    %24 = vector.load %arg5[%c7, %c0_21] : memref<16x64xf32, #tpu.memory_space<vmem>>, vector<1x64xf32>
    %c8 = arith.constant 8 : index
    %c0_22 = arith.constant 0 : index
    %25 = vector.load %arg5[%c8, %c0_22] : memref<16x64xf32, #tpu.memory_space<vmem>>, vector<1x64xf32>
    %c9 = arith.constant 9 : index
    %c0_23 = arith.constant 0 : index
    %26 = vector.load %arg5[%c9, %c0_23] : memref<16x64xf32, #tpu.memory_space<vmem>>, vector<1x64xf32>
    %c10 = arith.constant 10 : index
    %c0_24 = arith.constant 0 : index
    %27 = vector.load %arg5[%c10, %c0_24] : memref<16x64xf32, #tpu.memory_space<vmem>>, vector<1x64xf32>
    %c11 = arith.constant 11 : index
    %c0_25 = arith.constant 0 : index
    %28 = vector.load %arg5[%c11, %c0_25] : memref<16x64xf32, #tpu.memory_space<vmem>>, vector<1x64xf32>
    %c12 = arith.constant 12 : index
    %c0_26 = arith.constant 0 : index
    %29 = vector.load %arg5[%c12, %c0_26] : memref<16x64xf32, #tpu.memory_space<vmem>>, vector<1x64xf32>
    %c13 = arith.constant 13 : index
    %c0_27 = arith.constant 0 : index
    %30 = vector.load %arg5[%c13, %c0_27] : memref<16x64xf32, #tpu.memory_space<vmem>>, vector<1x64xf32>
    %c14 = arith.constant 14 : index
    %c0_28 = arith.constant 0 : index
    %31 = vector.load %arg5[%c14, %c0_28] : memref<16x64xf32, #tpu.memory_space<vmem>>, vector<1x64xf32>
    %c15 = arith.constant 15 : index
    %c0_29 = arith.constant 0 : index
    %32 = vector.load %arg5[%c15, %c0_29] : memref<16x64xf32, #tpu.memory_space<vmem>>, vector<1x64xf32>
    %cst_30 = arith.constant 0.000000e+00 : f32
    %33 = vector.broadcast %cst_30 : f32 to vector<1x16xf32>
    %c0_31 = arith.constant 0 : index
    %c0_32 = arith.constant 0 : index
    %34 = vector.load %arg12[%c0_31, %c0_32] : memref<32x64xf32, #tpu.memory_space<vmem>>, vector<1x64xf32>
    %35 = vector.extract_strided_slice %34 {offsets = [0, 0], sizes = [1, 48], strides = [1, 1]} : vector<1x64xf32> to vector<1x48xf32>
    %cst_33 = arith.constant 5.000000e-01 : f32
    %36 = vector.broadcast %cst_33 : f32 to vector<1x48xf32>
    %37 = arith.mulf %36, %35 : vector<1x48xf32>
    %38 = math.tanh %37 : vector<1x48xf32>
    %cst_34 = arith.constant 5.000000e-01 : f32
    %39 = vector.broadcast %cst_34 : f32 to vector<1x48xf32>
    %40 = arith.mulf %39, %38 : vector<1x48xf32>
    %cst_35 = arith.constant 5.000000e-01 : f32
    %41 = vector.broadcast %cst_35 : f32 to vector<1x48xf32>
    %42 = arith.addf %40, %41 : vector<1x48xf32>
    %43 = vector.extract_strided_slice %34 {offsets = [0, 48], sizes = [1, 16], strides = [1, 1]} : vector<1x64xf32> to vector<1x16xf32>
    %44 = math.tanh %43 : vector<1x16xf32>
    %45 = vector.extract_strided_slice %42 {offsets = [0, 0], sizes = [1, 16], strides = [1, 1]} : vector<1x48xf32> to vector<1x16xf32>
    %46 = vector.extract_strided_slice %42 {offsets = [0, 16], sizes = [1, 16], strides = [1, 1]} : vector<1x48xf32> to vector<1x16xf32>
    %47 = vector.extract_strided_slice %42 {offsets = [0, 32], sizes = [1, 16], strides = [1, 1]} : vector<1x48xf32> to vector<1x16xf32>
    %48 = arith.mulf %46, %33 : vector<1x16xf32>
    %49 = arith.mulf %45, %44 : vector<1x16xf32>
    %50 = arith.addf %48, %49 : vector<1x16xf32>
    %51 = math.tanh %50 : vector<1x16xf32>
    %52 = arith.mulf %47, %51 : vector<1x16xf32>
    %c0_36 = arith.constant 0 : index
    %c0_37 = arith.constant 0 : index
    %53 = vector.load %arg13[%c0_36, %c0_37] : memref<32x16xf32, #tpu.memory_space<vmem>>, vector<1x16xf32>
    tpu.vector_store %arg13[%c0_36, %c0_37], %52 {strides = array<i32>} : memref<32x16xf32, #tpu.memory_space<vmem>>, vector<1x16xf32>,
    %c1_38 = arith.constant 1 : index
    %c0_39 = arith.constant 0 : index
    %54 = vector.load %arg12[%c1_38, %c0_39] : memref<32x64xf32, #tpu.memory_space<vmem>>, vector<1x64xf32>
    %55 = vector.extract_strided_slice %52 {offsets = [0, 0], sizes = [1, 1], strides = [1, 1]} : vector<1x16xf32> to vector<1x1xf32>
    %56 = vector.broadcast %55 : vector<1x1xf32> to vector<1x64xf32>
    %57 = arith.mulf %56, %17 : vector<1x64xf32>
    %58 = arith.addf %54, %57 : vector<1x64xf32>
    %59 = vector.extract_strided_slice %52 {offsets = [0, 1], sizes = [1, 1], strides = [1, 1]} : vector<1x16xf32> to vector<1x1xf32>
    %60 = vector.broadcast %59 : vector<1x1xf32> to vector<1x64xf32>
    %61 = arith.mulf %60, %18 : vector<1x64xf32>
    %62 = arith.addf %58, %61 : vector<1x64xf32>
    %63 = vector.extract_strided_slice %52 {offsets = [0, 2], sizes = [1, 1], strides = [1, 1]} : vector<1x16xf32> to vector<1x1xf32>
    %64 = vector.broadcast %63 : vector<1x1xf32> to vector<1x64xf32>
    %65 = arith.mulf %64, %19 : vector<1x64xf32>
    %66 = arith.addf %62, %65 : vector<1x64xf32>
    %67 = vector.extract_strided_slice %52 {offsets = [0, 3], sizes = [1, 1], strides = [1, 1]} : vector<1x16xf32> to vector<1x1xf32>
    %68 = vector.broadcast %67 : vector<1x1xf32> to vector<1x64xf32>
    %69 = arith.mulf %68, %20 : vector<1x64xf32>
    %70 = arith.addf %66, %69 : vector<1x64xf32>
    %71 = vector.extract_strided_slice %52 {offsets = [0, 4], sizes = [1, 1], strides = [1, 1]} : vector<1x16xf32> to vector<1x1xf32>
    %72 = vector.broadcast %71 : vector<1x1xf32> to vector<1x64xf32>
    %73 = arith.mulf %72, %21 : vector<1x64xf32>
    %74 = arith.addf %70, %73 : vector<1x64xf32>
    %75 = vector.extract_strided_slice %52 {offsets = [0, 5], sizes = [1, 1], strides = [1, 1]} : vector<1x16xf32> to vector<1x1xf32>
    %76 = vector.broadcast %75 : vector<1x1xf32> to vector<1x64xf32>
    %77 = arith.mulf %76, %22 : vector<1x64xf32>
    %78 = arith.addf %74, %77 : vector<1x64xf32>
    %79 = vector.extract_strided_slice %52 {offsets = [0, 6], sizes = [1, 1], strides = [1, 1]} : vector<1x16xf32> to vector<1x1xf32>
    %80 = vector.broadcast %79 : vector<1x1xf32> to vector<1x64xf32>
    %81 = arith.mulf %80, %23 : vector<1x64xf32>
    %82 = arith.addf %78, %81 : vector<1x64xf32>
    %83 = vector.extract_strided_slice %52 {offsets = [0, 7], sizes = [1, 1], strides = [1, 1]} : vector<1x16xf32> to vector<1x1xf32>
    %84 = vector.broadcast %83 : vector<1x1xf32> to vector<1x64xf32>
    %85 = arith.mulf %84, %24 : vector<1x64xf32>
    %86 = arith.addf %82, %85 : vector<1x64xf32>
    %87 = vector.extract_strided_slice %52 {offsets = [0, 8], sizes = [1, 1], strides = [1, 1]} : vector<1x16xf32> to vector<1x1xf32>
    %88 = vector.broadcast %87 : vector<1x1xf32> to vector<1x64xf32>
    %89 = arith.mulf %88, %25 : vector<1x64xf32>
    %90 = arith.addf %86, %89 : vector<1x64xf32>
    %91 = vector.extract_strided_slice %52 {offsets = [0, 9], sizes = [1, 1], strides = [1, 1]} : vector<1x16xf32> to vector<1x1xf32>
    %92 = vector.broadcast %91 : vector<1x1xf32> to vector<1x64xf32>
    %93 = arith.mulf %92, %26 : vector<1x64xf32>
    %94 = arith.addf %90, %93 : vector<1x64xf32>
    %95 = vector.extract_strided_slice %52 {offsets = [0, 10], sizes = [1, 1], strides = [1, 1]} : vector<1x16xf32> to vector<1x1xf32>
    %96 = vector.broadcast %95 : vector<1x1xf32> to vector<1x64xf32>
    %97 = arith.mulf %96, %27 : vector<1x64xf32>
    %98 = arith.addf %94, %97 : vector<1x64xf32>
    %99 = vector.extract_strided_slice %52 {offsets = [0, 11], sizes = [1, 1], strides = [1, 1]} : vector<1x16xf32> to vector<1x1xf32>
    %100 = vector.broadcast %99 : vector<1x1xf32> to vector<1x64xf32>
    %101 = arith.mulf %100, %28 : vector<1x64xf32>
    %102 = arith.addf %98, %101 : vector<1x64xf32>
    %103 = vector.extract_strided_slice %52 {offsets = [0, 12], sizes = [1, 1], strides = [1, 1]} : vector<1x16xf32> to vector<1x1xf32>
    %104 = vector.broadcast %103 : vector<1x1xf32> to vector<1x64xf32>
    %105 = arith.mulf %104, %29 : vector<1x64xf32>
    %106 = arith.addf %102, %105 : vector<1x64xf32>
    %107 = vector.extract_strided_slice %52 {offsets = [0, 13], sizes = [1, 1], strides = [1, 1]} : vector<1x16xf32> to vector<1x1xf32>
    %108 = vector.broadcast %107 : vector<1x1xf32> to vector<1x64xf32>
    %109 = arith.mulf %108, %30 : vector<1x64xf32>
    %110 = arith.addf %106, %109 : vector<1x64xf32>
    %111 = vector.extract_strided_slice %52 {offsets = [0, 14], sizes = [1, 1], strides = [1, 1]} : vector<1x16xf32> to vector<1x1xf32>
    %112 = vector.broadcast %111 : vector<1x1xf32> to vector<1x64xf32>
    %113 = arith.mulf %112, %31 : vector<1x64xf32>
    %114 = arith.addf %110, %113 : vector<1x64xf32>
    %115 = vector.extract_strided_slice %52 {offsets = [0, 15], sizes = [1, 1], strides = [1, 1]} : vector<1x16xf32> to vector<1x1xf32>
    %116 = vector.broadcast %115 : vector<1x1xf32> to vector<1x64xf32>
    %117 = arith.mulf %116, %32 : vector<1x64xf32>
    %118 = arith.addf %114, %117 : vector<1x64xf32>
    %119 = vector.extract_strided_slice %118 {offsets = [0, 0], sizes = [1, 48], strides = [1, 1]} : vector<1x64xf32> to vector<1x48xf32>
    %cst_40 = arith.constant 5.000000e-01 : f32
    %120 = vector.broadcast %cst_40 : f32 to vector<1x48xf32>
    %121 = arith.mulf %120, %119 : vector<1x48xf32>
    %122 = math.tanh %121 : vector<1x48xf32>
    %cst_41 = arith.constant 5.000000e-01 : f32
    %123 = vector.broadcast %cst_41 : f32 to vector<1x48xf32>
    %124 = arith.mulf %123, %122 : vector<1x48xf32>
    %cst_42 = arith.constant 5.000000e-01 : f32
    %125 = vector.broadcast %cst_42 : f32 to vector<1x48xf32>
    %126 = arith.addf %124, %125 : vector<1x48xf32>
    %127 = vector.extract_strided_slice %118 {offsets = [0, 48], sizes = [1, 16], strides = [1, 1]} : vector<1x64xf32> to vector<1x16xf32>
    %128 = math.tanh %127 : vector<1x16xf32>
    %129 = vector.extract_strided_slice %126 {offsets = [0, 0], sizes = [1, 16], strides = [1, 1]} : vector<1x48xf32> to vector<1x16xf32>
    %130 = vector.extract_strided_slice %126 {offsets = [0, 16], sizes = [1, 16], strides = [1, 1]} : vector<1x48xf32> to vector<1x16xf32>
    %131 = vector.extract_strided_slice %126 {offsets = [0, 32], sizes = [1, 16], strides = [1, 1]} : vector<1x48xf32> to vector<1x16xf32>
    %132 = arith.mulf %130, %50 : vector<1x16xf32>
    %133 = arith.mulf %129, %128 : vector<1x16xf32>
    %134 = arith.addf %132, %133 : vector<1x16xf32>
    %135 = math.tanh %134 : vector<1x16xf32>
    %136 = arith.mulf %131, %135 : vector<1x16xf32>
    %c1_43 = arith.constant 1 : index
    %c0_44 = arith.constant 0 : index
    %137 = vector.load %arg13[%c1_43, %c0_44] : memref<32x16xf32, #tpu.memory_space<vmem>>, vector<1x16xf32>
    tpu.vector_store %arg13[%c1_43, %c0_44], %136 {strides = array<i32>} : memref<32x16xf32, #tpu.memory_space<vmem>>, vector<1x16xf32>,
    %c2_45 = arith.constant 2 : index
    %c0_46 = arith.constant 0 : index
    %138 = vector.load %arg12[%c2_45, %c0_46] : memref<32x64xf32, #tpu.memory_space<vmem>>, vector<1x64xf32>
    %139 = vector.extract_strided_slice %136 {offsets = [0, 0], sizes = [1, 1], strides = [1, 1]} : vector<1x16xf32> to vector<1x1xf32>
    %140 = vector.broadcast %139 : vector<1x1xf32> to vector<1x64xf32>
    %141 = arith.mulf %140, %17 : vector<1x64xf32>
    %142 = arith.addf %138, %141 : vector<1x64xf32>
    %143 = vector.extract_strided_slice %136 {offsets = [0, 1], sizes = [1, 1], strides = [1, 1]} : vector<1x16xf32> to vector<1x1xf32>
    %144 = vector.broadcast %143 : vector<1x1xf32> to vector<1x64xf32>
    %145 = arith.mulf %144, %18 : vector<1x64xf32>
    %146 = arith.addf %142, %145 : vector<1x64xf32>
    %147 = vector.extract_strided_slice %136 {offsets = [0, 2], sizes = [1, 1], strides = [1, 1]} : vector<1x16xf32> to vector<1x1xf32>
    %148 = vector.broadcast %147 : vector<1x1xf32> to vector<1x64xf32>
    %149 = arith.mulf %148, %19 : vector<1x64xf32>
    %150 = arith.addf %146, %149 : vector<1x64xf32>
    %151 = vector.extract_strided_slice %136 {offsets = [0, 3], sizes = [1, 1], strides = [1, 1]} : vector<1x16xf32> to vector<1x1xf32>
    %152 = vector.broadcast %151 : vector<1x1xf32> to vector<1x64xf32>
    %153 = arith.mulf %152, %20 : vector<1x64xf32>
    %154 = arith.addf %150, %153 : vector<1x64xf32>
    %155 = vector.extract_strided_slice %136 {offsets = [0, 4], sizes = [1, 1], strides = [1, 1]} : vector<1x16xf32> to vector<1x1xf32>
    %156 = vector.broadcast %155 : vector<1x1xf32> to vector<1x64xf32>
    %157 = arith.mulf %156, %21 : vector<1x64xf32>
    %158 = arith.addf %154, %157 : vector<1x64xf32>
    %159 = vector.extract_strided_slice %136 {offsets = [0, 5], sizes = [1, 1], strides = [1, 1]} : vector<1x16xf32> to vector<1x1xf32>
    %160 = vector.broadcast %159 : vector<1x1xf32> to vector<1x64xf32>
    %161 = arith.mulf %160, %22 : vector<1x64xf32>
    %162 = arith.addf %158, %161 : vector<1x64xf32>
    %163 = vector.extract_strided_slice %136 {offsets = [0, 6], sizes = [1, 1], strides = [1, 1]} : vector<1x16xf32> to vector<1x1xf32>
    %164 = vector.broadcast %163 : vector<1x1xf32> to vector<1x64xf32>
    %165 = arith.mulf %164, %23 : vector<1x64xf32>
    %166 = arith.addf %162, %165 : vector<1x64xf32>
    %167 = vector.extract_strided_slice %136 {offsets = [0, 7], sizes = [1, 1], strides = [1, 1]} : vector<1x16xf32> to vector<1x1xf32>
    %168 = vector.broadcast %167 : vector<1x1xf32> to vector<1x64xf32>
    %169 = arith.mulf %168, %24 : vector<1x64xf32>
    %170 = arith.addf %166, %169 : vector<1x64xf32>
    %171 = vector.extract_strided_slice %136 {offsets = [0, 8], sizes = [1, 1], strides = [1, 1]} : vector<1x16xf32> to vector<1x1xf32>
    %172 = vector.broadcast %171 : vector<1x1xf32> to vector<1x64xf32>
    %173 = arith.mulf %172, %25 : vector<1x64xf32>
    %174 = arith.addf %170, %173 : vector<1x64xf32>
    %175 = vector.extract_strided_slice %136 {offsets = [0, 9], sizes = [1, 1], strides = [1, 1]} : vector<1x16xf32> to vector<1x1xf32>
    %176 = vector.broadcast %175 : vector<1x1xf32> to vector<1x64xf32>
    %177 = arith.mulf %176, %26 : vector<1x64xf32>
    %178 = arith.addf %174, %177 : vector<1x64xf32>
    %179 = vector.extract_strided_slice %136 {offsets = [0, 10], sizes = [1, 1], strides = [1, 1]} : vector<1x16xf32> to vector<1x1xf32>
    %180 = vector.broadcast %179 : vector<1x1xf32> to vector<1x64xf32>
    %181 = arith.mulf %180, %27 : vector<1x64xf32>
    %182 = arith.addf %178, %181 : vector<1x64xf32>
    %183 = vector.extract_strided_slice %136 {offsets = [0, 11], sizes = [1, 1], strides = [1, 1]} : vector<1x16xf32> to vector<1x1xf32>
    %184 = vector.broadcast %183 : vector<1x1xf32> to vector<1x64xf32>
    %185 = arith.mulf %184, %28 : vector<1x64xf32>
    %186 = arith.addf %182, %185 : vector<1x64xf32>
    %187 = vector.extract_strided_slice %136 {offsets = [0, 12], sizes = [1, 1], strides = [1, 1]} : vector<1x16xf32> to vector<1x1xf32>
    %188 = vector.broadcast %187 : vector<1x1xf32> to vector<1x64xf32>
    %189 = arith.mulf %188, %29 : vector<1x64xf32>
    %190 = arith.addf %186, %189 : vector<1x64xf32>
    %191 = vector.extract_strided_slice %136 {offsets = [0, 13], sizes = [1, 1], strides = [1, 1]} : vector<1x16xf32> to vector<1x1xf32>
    %192 = vector.broadcast %191 : vector<1x1xf32> to vector<1x64xf32>
    %193 = arith.mulf %192, %30 : vector<1x64xf32>
    %194 = arith.addf %190, %193 : vector<1x64xf32>
    %195 = vector.extract_strided_slice %136 {offsets = [0, 14], sizes = [1, 1], strides = [1, 1]} : vector<1x16xf32> to vector<1x1xf32>
    %196 = vector.broadcast %195 : vector<1x1xf32> to vector<1x64xf32>
    %197 = arith.mulf %196, %31 : vector<1x64xf32>
    %198 = arith.addf %194, %197 : vector<1x64xf32>
    %199 = vector.extract_strided_slice %136 {offsets = [0, 15], sizes = [1, 1], strides = [1, 1]} : vector<1x16xf32> to vector<1x1xf32>
    %200 = vector.broadcast %199 : vector<1x1xf32> to vector<1x64xf32>
    %201 = arith.mulf %200, %32 : vector<1x64xf32>
    %202 = arith.addf %198, %201 : vector<1x64xf32>
    %203 = vector.extract_strided_slice %202 {offsets = [0, 0], sizes = [1, 48], strides = [1, 1]} : vector<1x64xf32> to vector<1x48xf32>
    %cst_47 = arith.constant 5.000000e-01 : f32
    %204 = vector.broadcast %cst_47 : f32 to vector<1x48xf32>
    %205 = arith.mulf %204, %203 : vector<1x48xf32>
    %206 = math.tanh %205 : vector<1x48xf32>
    %cst_48 = arith.constant 5.000000e-01 : f32
    %207 = vector.broadcast %cst_48 : f32 to vector<1x48xf32>
    %208 = arith.mulf %207, %206 : vector<1x48xf32>
    %cst_49 = arith.constant 5.000000e-01 : f32
    %209 = vector.broadcast %cst_49 : f32 to vector<1x48xf32>
    %210 = arith.addf %208, %209 : vector<1x48xf32>
    %211 = vector.extract_strided_slice %202 {offsets = [0, 48], sizes = [1, 16], strides = [1, 1]} : vector<1x64xf32> to vector<1x16xf32>
    %212 = math.tanh %211 : vector<1x16xf32>
    %213 = vector.extract_strided_slice %210 {offsets = [0, 0], sizes = [1, 16], strides = [1, 1]} : vector<1x48xf32> to vector<1x16xf32>
    %214 = vector.extract_strided_slice %210 {offsets = [0, 16], sizes = [1, 16], strides = [1, 1]} : vector<1x48xf32> to vector<1x16xf32>
    %215 = vector.extract_strided_slice %210 {offsets = [0, 32], sizes = [1, 16], strides = [1, 1]} : vector<1x48xf32> to vector<1x16xf32>
    %216 = arith.mulf %214, %134 : vector<1x16xf32>
    %217 = arith.mulf %213, %212 : vector<1x16xf32>
    %218 = arith.addf %216, %217 : vector<1x16xf32>
    %219 = math.tanh %218 : vector<1x16xf32>
    %220 = arith.mulf %215, %219 : vector<1x16xf32>
    %c2_50 = arith.constant 2 : index
    %c0_51 = arith.constant 0 : index
    %221 = vector.load %arg13[%c2_50, %c0_51] : memref<32x16xf32, #tpu.memory_space<vmem>>, vector<1x16xf32>
    tpu.vector_store %arg13[%c2_50, %c0_51], %220 {strides = array<i32>} : memref<32x16xf32, #tpu.memory_space<vmem>>, vector<1x16xf32>,
    %c3_52 = arith.constant 3 : index
    %c0_53 = arith.constant 0 : index
    %222 = vector.load %arg12[%c3_52, %c0_53] : memref<32x64xf32, #tpu.memory_space<vmem>>, vector<1x64xf32>
    %223 = vector.extract_strided_slice %220 {offsets = [0, 0], sizes = [1, 1], strides = [1, 1]} : vector<1x16xf32> to vector<1x1xf32>
    %224 = vector.broadcast %223 : vector<1x1xf32> to vector<1x64xf32>
    %225 = arith.mulf %224, %17 : vector<1x64xf32>
    %226 = arith.addf %222, %225 : vector<1x64xf32>
    %227 = vector.extract_strided_slice %220 {offsets = [0, 1], sizes = [1, 1], strides = [1, 1]} : vector<1x16xf32> to vector<1x1xf32>
    %228 = vector.broadcast %227 : vector<1x1xf32> to vector<1x64xf32>
    %229 = arith.mulf %228, %18 : vector<1x64xf32>
    %230 = arith.addf %226, %229 : vector<1x64xf32>
    %231 = vector.extract_strided_slice %220 {offsets = [0, 2], sizes = [1, 1], strides = [1, 1]} : vector<1x16xf32> to vector<1x1xf32>
    %232 = vector.broadcast %231 : vector<1x1xf32> to vector<1x64xf32>
    %233 = arith.mulf %232, %19 : vector<1x64xf32>
    %234 = arith.addf %230, %233 : vector<1x64xf32>
    %235 = vector.extract_strided_slice %220 {offsets = [0, 3], sizes = [1, 1], strides = [1, 1]} : vector<1x16xf32> to vector<1x1xf32>
    %236 = vector.broadcast %235 : vector<1x1xf32> to vector<1x64xf32>
    %237 = arith.mulf %236, %20 : vector<1x64xf32>
    %238 = arith.addf %234, %237 : vector<1x64xf32>
    %239 = vector.extract_strided_slice %220 {offsets = [0, 4], sizes = [1, 1], strides = [1, 1]} : vector<1x16xf32> to vector<1x1xf32>
    %240 = vector.broadcast %239 : vector<1x1xf32> to vector<1x64xf32>
    %241 = arith.mulf %240, %21 : vector<1x64xf32>
    %242 = arith.addf %238, %241 : vector<1x64xf32>
    %243 = vector.extract_strided_slice %220 {offsets = [0, 5], sizes = [1, 1], strides = [1, 1]} : vector<1x16xf32> to vector<1x1xf32>
    %244 = vector.broadcast %243 : vector<1x1xf32> to vector<1x64xf32>
    %245 = arith.mulf %244, %22 : vector<1x64xf32>
    %246 = arith.addf %242, %245 : vector<1x64xf32>
    %247 = vector.extract_strided_slice %220 {offsets = [0, 6], sizes = [1, 1], strides = [1, 1]} : vector<1x16xf32> to vector<1x1xf32>
    %248 = vector.broadcast %247 : vector<1x1xf32> to vector<1x64xf32>
    %249 = arith.mulf %248, %23 : vector<1x64xf32>
    %250 = arith.addf %246, %249 : vector<1x64xf32>
    %251 = vector.extract_strided_slice %220 {offsets = [0, 7], sizes = [1, 1], strides = [1, 1]} : vector<1x16xf32> to vector<1x1xf32>
    %252 = vector.broadcast %251 : vector<1x1xf32> to vector<1x64xf32>
    %253 = arith.mulf %252, %24 : vector<1x64xf32>
    %254 = arith.addf %250, %253 : vector<1x64xf32>
    %255 = vector.extract_strided_slice %220 {offsets = [0, 8], sizes = [1, 1], strides = [1, 1]} : vector<1x16xf32> to vector<1x1xf32>
    %256 = vector.broadcast %255 : vector<1x1xf32> to vector<1x64xf32>
    %257 = arith.mulf %256, %25 : vector<1x64xf32>
    %258 = arith.addf %254, %257 : vector<1x64xf32>
    %259 = vector.extract_strided_slice %220 {offsets = [0, 9], sizes = [1, 1], strides = [1, 1]} : vector<1x16xf32> to vector<1x1xf32>
    %260 = vector.broadcast %259 : vector<1x1xf32> to vector<1x64xf32>
    %261 = arith.mulf %260, %26 : vector<1x64xf32>
    %262 = arith.addf %258, %261 : vector<1x64xf32>
    %263 = vector.extract_strided_slice %220 {offsets = [0, 10], sizes = [1, 1], strides = [1, 1]} : vector<1x16xf32> to vector<1x1xf32>
    %264 = vector.broadcast %263 : vector<1x1xf32> to vector<1x64xf32>
    %265 = arith.mulf %264, %27 : vector<1x64xf32>
    %266 = arith.addf %262, %265 : vector<1x64xf32>
    %267 = vector.extract_strided_slice %220 {offsets = [0, 11], sizes = [1, 1], strides = [1, 1]} : vector<1x16xf32> to vector<1x1xf32>
    %268 = vector.broadcast %267 : vector<1x1xf32> to vector<1x64xf32>
    %269 = arith.mulf %268, %28 : vector<1x64xf32>
    %270 = arith.addf %266, %269 : vector<1x64xf32>
    %271 = vector.extract_strided_slice %220 {offsets = [0, 12], sizes = [1, 1], strides = [1, 1]} : vector<1x16xf32> to vector<1x1xf32>
    %272 = vector.broadcast %271 : vector<1x1xf32> to vector<1x64xf32>
    %273 = arith.mulf %272, %29 : vector<1x64xf32>
    %274 = arith.addf %270, %273 : vector<1x64xf32>
    %275 = vector.extract_strided_slice %220 {offsets = [0, 13], sizes = [1, 1], strides = [1, 1]} : vector<1x16xf32> to vector<1x1xf32>
    %276 = vector.broadcast %275 : vector<1x1xf32> to vector<1x64xf32>
    %277 = arith.mulf %276, %30 : vector<1x64xf32>
    %278 = arith.addf %274, %277 : vector<1x64xf32>
    %279 = vector.extract_strided_slice %220 {offsets = [0, 14], sizes = [1, 1], strides = [1, 1]} : vector<1x16xf32> to vector<1x1xf32>
    %280 = vector.broadcast %279 : vector<1x1xf32> to vector<1x64xf32>
    %281 = arith.mulf %280, %31 : vector<1x64xf32>
    %282 = arith.addf %278, %281 : vector<1x64xf32>
    %283 = vector.extract_strided_slice %220 {offsets = [0, 15], sizes = [1, 1], strides = [1, 1]} : vector<1x16xf32> to vector<1x1xf32>
    %284 = vector.broadcast %283 : vector<1x1xf32> to vector<1x64xf32>
    %285 = arith.mulf %284, %32 : vector<1x64xf32>
    %286 = arith.addf %282, %285 : vector<1x64xf32>
    %287 = vector.extract_strided_slice %286 {offsets = [0, 0], sizes = [1, 48], strides = [1, 1]} : vector<1x64xf32> to vector<1x48xf32>
    %cst_54 = arith.constant 5.000000e-01 : f32
    %288 = vector.broadcast %cst_54 : f32 to vector<1x48xf32>
    %289 = arith.mulf %288, %287 : vector<1x48xf32>
    %290 = math.tanh %289 : vector<1x48xf32>
    %cst_55 = arith.constant 5.000000e-01 : f32
    %291 = vector.broadcast %cst_55 : f32 to vector<1x48xf32>
    %292 = arith.mulf %291, %290 : vector<1x48xf32>
    %cst_56 = arith.constant 5.000000e-01 : f32
    %293 = vector.broadcast %cst_56 : f32 to vector<1x48xf32>
    %294 = arith.addf %292, %293 : vector<1x48xf32>
    %295 = vector.extract_strided_slice %286 {offsets = [0, 48], sizes = [1, 16], strides = [1, 1]} : vector<1x64xf32> to vector<1x16xf32>
    %296 = math.tanh %295 : vector<1x16xf32>
    %297 = vector.extract_strided_slice %294 {offsets = [0, 0], sizes = [1, 16], strides = [1, 1]} : vector<1x48xf32> to vector<1x16xf32>
    %298 = vector.extract_strided_slice %294 {offsets = [0, 16], sizes = [1, 16], strides = [1, 1]} : vector<1x48xf32> to vector<1x16xf32>
    %299 = vector.extract_strided_slice %294 {offsets = [0, 32], sizes = [1, 16], strides = [1, 1]} : vector<1x48xf32> to vector<1x16xf32>
    %300 = arith.mulf %298, %218 : vector<1x16xf32>
    %301 = arith.mulf %297, %296 : vector<1x16xf32>
    %302 = arith.addf %300, %301 : vector<1x16xf32>
    %303 = math.tanh %302 : vector<1x16xf32>
    %304 = arith.mulf %299, %303 : vector<1x16xf32>
    %c3_57 = arith.constant 3 : index
    %c0_58 = arith.constant 0 : index
    %305 = vector.load %arg13[%c3_57, %c0_58] : memref<32x16xf32, #tpu.memory_space<vmem>>, vector<1x16xf32>
    tpu.vector_store %arg13[%c3_57, %c0_58], %304 {strides = array<i32>} : memref<32x16xf32, #tpu.memory_space<vmem>>, vector<1x16xf32>,
    %c4_59 = arith.constant 4 : index
    %c0_60 = arith.constant 0 : index
    %306 = vector.load %arg12[%c4_59, %c0_60] : memref<32x64xf32, #tpu.memory_space<vmem>>, vector<1x64xf32>
    %307 = vector.extract_strided_slice %304 {offsets = [0, 0], sizes = [1, 1], strides = [1, 1]} : vector<1x16xf32> to vector<1x1xf32>
    %308 = vector.broadcast %307 : vector<1x1xf32> to vector<1x64xf32>
    %309 = arith.mulf %308, %17 : vector<1x64xf32>
    %310 = arith.addf %306, %309 : vector<1x64xf32>
    %311 = vector.extract_strided_slice %304 {offsets = [0, 1], sizes = [1, 1], strides = [1, 1]} : vector<1x16xf32> to vector<1x1xf32>
    %312 = vector.broadcast %311 : vector<1x1xf32> to vector<1x64xf32>
    %313 = arith.mulf %312, %18 : vector<1x64xf32>
    %314 = arith.addf %310, %313 : vector<1x64xf32>
    %315 = vector.extract_strided_slice %304 {offsets = [0, 2], sizes = [1, 1], strides = [1, 1]} : vector<1x16xf32> to vector<1x1xf32>
    %316 = vector.broadcast %315 : vector<1x1xf32> to vector<1x64xf32>
    %317 = arith.mulf %316, %19 : vector<1x64xf32>
    %318 = arith.addf %314, %317 : vector<1x64xf32>
    %319 = vector.extract_strided_slice %304 {offsets = [0, 3], sizes = [1, 1], strides = [1, 1]} : vector<1x16xf32> to vector<1x1xf32>
    %320 = vector.broadcast %319 : vector<1x1xf32> to vector<1x64xf32>
    %321 = arith.mulf %320, %20 : vector<1x64xf32>
    %322 = arith.addf %318, %321 : vector<1x64xf32>
    %323 = vector.extract_strided_slice %304 {offsets = [0, 4], sizes = [1, 1], strides = [1, 1]} : vector<1x16xf32> to vector<1x1xf32>
    %324 = vector.broadcast %323 : vector<1x1xf32> to vector<1x64xf32>
    %325 = arith.mulf %324, %21 : vector<1x64xf32>
    %326 = arith.addf %322, %325 : vector<1x64xf32>
    %327 = vector.extract_strided_slice %304 {offsets = [0, 5], sizes = [1, 1], strides = [1, 1]} : vector<1x16xf32> to vector<1x1xf32>
    %328 = vector.broadcast %327 : vector<1x1xf32> to vector<1x64xf32>
    %329 = arith.mulf %328, %22 : vector<1x64xf32>
    %330 = arith.addf %326, %329 : vector<1x64xf32>
    %331 = vector.extract_strided_slice %304 {offsets = [0, 6], sizes = [1, 1], strides = [1, 1]} : vector<1x16xf32> to vector<1x1xf32>
    %332 = vector.broadcast %331 : vector<1x1xf32> to vector<1x64xf32>
    %333 = arith.mulf %332, %23 : vector<1x64xf32>
    %334 = arith.addf %330, %333 : vector<1x64xf32>
    %335 = vector.extract_strided_slice %304 {offsets = [0, 7], sizes = [1, 1], strides = [1, 1]} : vector<1x16xf32> to vector<1x1xf32>
    %336 = vector.broadcast %335 : vector<1x1xf32> to vector<1x64xf32>
    %337 = arith.mulf %336, %24 : vector<1x64xf32>
    %338 = arith.addf %334, %337 : vector<1x64xf32>
    %339 = vector.extract_strided_slice %304 {offsets = [0, 8], sizes = [1, 1], strides = [1, 1]} : vector<1x16xf32> to vector<1x1xf32>
    %340 = vector.broadcast %339 : vector<1x1xf32> to vector<1x64xf32>
    %341 = arith.mulf %340, %25 : vector<1x64xf32>
    %342 = arith.addf %338, %341 : vector<1x64xf32>
    %343 = vector.extract_strided_slice %304 {offsets = [0, 9], sizes = [1, 1], strides = [1, 1]} : vector<1x16xf32> to vector<1x1xf32>
    %344 = vector.broadcast %343 : vector<1x1xf32> to vector<1x64xf32>
    %345 = arith.mulf %344, %26 : vector<1x64xf32>
    %346 = arith.addf %342, %345 : vector<1x64xf32>
    %347 = vector.extract_strided_slice %304 {offsets = [0, 10], sizes = [1, 1], strides = [1, 1]} : vector<1x16xf32> to vector<1x1xf32>
    %348 = vector.broadcast %347 : vector<1x1xf32> to vector<1x64xf32>
    %349 = arith.mulf %348, %27 : vector<1x64xf32>
    %350 = arith.addf %346, %349 : vector<1x64xf32>
    %351 = vector.extract_strided_slice %304 {offsets = [0, 11], sizes = [1, 1], strides = [1, 1]} : vector<1x16xf32> to vector<1x1xf32>
    %352 = vector.broadcast %351 : vector<1x1xf32> to vector<1x64xf32>
    %353 = arith.mulf %352, %28 : vector<1x64xf32>
    %354 = arith.addf %350, %353 : vector<1x64xf32>
    %355 = vector.extract_strided_slice %304 {offsets = [0, 12], sizes = [1, 1], strides = [1, 1]} : vector<1x16xf32> to vector<1x1xf32>
    %356 = vector.broadcast %355 : vector<1x1xf32> to vector<1x64xf32>
    %357 = arith.mulf %356, %29 : vector<1x64xf32>
    %358 = arith.addf %354, %357 : vector<1x64xf32>
    %359 = vector.extract_strided_slice %304 {offsets = [0, 13], sizes = [1, 1], strides = [1, 1]} : vector<1x16xf32> to vector<1x1xf32>
    %360 = vector.broadcast %359 : vector<1x1xf32> to vector<1x64xf32>
    %361 = arith.mulf %360, %30 : vector<1x64xf32>
    %362 = arith.addf %358, %361 : vector<1x64xf32>
    %363 = vector.extract_strided_slice %304 {offsets = [0, 14], sizes = [1, 1], strides = [1, 1]} : vector<1x16xf32> to vector<1x1xf32>
    %364 = vector.broadcast %363 : vector<1x1xf32> to vector<1x64xf32>
    %365 = arith.mulf %364, %31 : vector<1x64xf32>
    %366 = arith.addf %362, %365 : vector<1x64xf32>
    %367 = vector.extract_strided_slice %304 {offsets = [0, 15], sizes = [1, 1], strides = [1, 1]} : vector<1x16xf32> to vector<1x1xf32>
    %368 = vector.broadcast %367 : vector<1x1xf32> to vector<1x64xf32>
    %369 = arith.mulf %368, %32 : vector<1x64xf32>
    %370 = arith.addf %366, %369 : vector<1x64xf32>
    %371 = vector.extract_strided_slice %370 {offsets = [0, 0], sizes = [1, 48], strides = [1, 1]} : vector<1x64xf32> to vector<1x48xf32>
    %cst_61 = arith.constant 5.000000e-01 : f32
    %372 = vector.broadcast %cst_61 : f32 to vector<1x48xf32>
    %373 = arith.mulf %372, %371 : vector<1x48xf32>
    %374 = math.tanh %373 : vector<1x48xf32>
    %cst_62 = arith.constant 5.000000e-01 : f32
    %375 = vector.broadcast %cst_62 : f32 to vector<1x48xf32>
    %376 = arith.mulf %375, %374 : vector<1x48xf32>
    %cst_63 = arith.constant 5.000000e-01 : f32
    %377 = vector.broadcast %cst_63 : f32 to vector<1x48xf32>
    %378 = arith.addf %376, %377 : vector<1x48xf32>
    %379 = vector.extract_strided_slice %370 {offsets = [0, 48], sizes = [1, 16], strides = [1, 1]} : vector<1x64xf32> to vector<1x16xf32>
    %380 = math.tanh %379 : vector<1x16xf32>
    %381 = vector.extract_strided_slice %378 {offsets = [0, 0], sizes = [1, 16], strides = [1, 1]} : vector<1x48xf32> to vector<1x16xf32>
    %382 = vector.extract_strided_slice %378 {offsets = [0, 16], sizes = [1, 16], strides = [1, 1]} : vector<1x48xf32> to vector<1x16xf32>
    %383 = vector.extract_strided_slice %378 {offsets = [0, 32], sizes = [1, 16], strides = [1, 1]} : vector<1x48xf32> to vector<1x16xf32>
    %384 = arith.mulf %382, %302 : vector<1x16xf32>
    %385 = arith.mulf %381, %380 : vector<1x16xf32>
    %386 = arith.addf %384, %385 : vector<1x16xf32>
    %387 = math.tanh %386 : vector<1x16xf32>
    %388 = arith.mulf %383, %387 : vector<1x16xf32>
    %c4_64 = arith.constant 4 : index
    %c0_65 = arith.constant 0 : index
    %389 = vector.load %arg13[%c4_64, %c0_65] : memref<32x16xf32, #tpu.memory_space<vmem>>, vector<1x16xf32>
    tpu.vector_store %arg13[%c4_64, %c0_65], %388 {strides = array<i32>} : memref<32x16xf32, #tpu.memory_space<vmem>>, vector<1x16xf32>,
    %c5_66 = arith.constant 5 : index
    %c0_67 = arith.constant 0 : index
    %390 = vector.load %arg12[%c5_66, %c0_67] : memref<32x64xf32, #tpu.memory_space<vmem>>, vector<1x64xf32>
    %391 = vector.extract_strided_slice %388 {offsets = [0, 0], sizes = [1, 1], strides = [1, 1]} : vector<1x16xf32> to vector<1x1xf32>
    %392 = vector.broadcast %391 : vector<1x1xf32> to vector<1x64xf32>
    %393 = arith.mulf %392, %17 : vector<1x64xf32>
    %394 = arith.addf %390, %393 : vector<1x64xf32>
    %395 = vector.extract_strided_slice %388 {offsets = [0, 1], sizes = [1, 1], strides = [1, 1]} : vector<1x16xf32> to vector<1x1xf32>
    %396 = vector.broadcast %395 : vector<1x1xf32> to vector<1x64xf32>
    %397 = arith.mulf %396, %18 : vector<1x64xf32>
    %398 = arith.addf %394, %397 : vector<1x64xf32>
    %399 = vector.extract_strided_slice %388 {offsets = [0, 2], sizes = [1, 1], strides = [1, 1]} : vector<1x16xf32> to vector<1x1xf32>
    %400 = vector.broadcast %399 : vector<1x1xf32> to vector<1x64xf32>
    %401 = arith.mulf %400, %19 : vector<1x64xf32>
    %402 = arith.addf %398, %401 : vector<1x64xf32>
    %403 = vector.extract_strided_slice %388 {offsets = [0, 3], sizes = [1, 1], strides = [1, 1]} : vector<1x16xf32> to vector<1x1xf32>
    %404 = vector.broadcast %403 : vector<1x1xf32> to vector<1x64xf32>
    %405 = arith.mulf %404, %20 : vector<1x64xf32>
    %406 = arith.addf %402, %405 : vector<1x64xf32>
    %407 = vector.extract_strided_slice %388 {offsets = [0, 4], sizes = [1, 1], strides = [1, 1]} : vector<1x16xf32> to vector<1x1xf32>
    %408 = vector.broadcast %407 : vector<1x1xf32> to vector<1x64xf32>
    %409 = arith.mulf %408, %21 : vector<1x64xf32>
    %410 = arith.addf %406, %409 : vector<1x64xf32>
    %411 = vector.extract_strided_slice %388 {offsets = [0, 5], sizes = [1, 1], strides = [1, 1]} : vector<1x16xf32> to vector<1x1xf32>
    %412 = vector.broadcast %411 : vector<1x1xf32> to vector<1x64xf32>
    %413 = arith.mulf %412, %22 : vector<1x64xf32>
    %414 = arith.addf %410, %413 : vector<1x64xf32>
    %415 = vector.extract_strided_slice %388 {offsets = [0, 6], sizes = [1, 1], strides = [1, 1]} : vector<1x16xf32> to vector<1x1xf32>
    %416 = vector.broadcast %415 : vector<1x1xf32> to vector<1x64xf32>
    %417 = arith.mulf %416, %23 : vector<1x64xf32>
    %418 = arith.addf %414, %417 : vector<1x64xf32>
    %419 = vector.extract_strided_slice %388 {offsets = [0, 7], sizes = [1, 1], strides = [1, 1]} : vector<1x16xf32> to vector<1x1xf32>
    %420 = vector.broadcast %419 : vector<1x1xf32> to vector<1x64xf32>
    %421 = arith.mulf %420, %24 : vector<1x64xf32>
    %422 = arith.addf %418, %421 : vector<1x64xf32>
    %423 = vector.extract_strided_slice %388 {offsets = [0, 8], sizes = [1, 1], strides = [1, 1]} : vector<1x16xf32> to vector<1x1xf32>
    %424 = vector.broadcast %423 : vector<1x1xf32> to vector<1x64xf32>
    %425 = arith.mulf %424, %25 : vector<1x64xf32>
    %426 = arith.addf %422, %425 : vector<1x64xf32>
    %427 = vector.extract_strided_slice %388 {offsets = [0, 9], sizes = [1, 1], strides = [1, 1]} : vector<1x16xf32> to vector<1x1xf32>
    %428 = vector.broadcast %427 : vector<1x1xf32> to vector<1x64xf32>
    %429 = arith.mulf %428, %26 : vector<1x64xf32>
    %430 = arith.addf %426, %429 : vector<1x64xf32>
    %431 = vector.extract_strided_slice %388 {offsets = [0, 10], sizes = [1, 1], strides = [1, 1]} : vector<1x16xf32> to vector<1x1xf32>
    %432 = vector.broadcast %431 : vector<1x1xf32> to vector<1x64xf32>
    %433 = arith.mulf %432, %27 : vector<1x64xf32>
    %434 = arith.addf %430, %433 : vector<1x64xf32>
    %435 = vector.extract_strided_slice %388 {offsets = [0, 11], sizes = [1, 1], strides = [1, 1]} : vector<1x16xf32> to vector<1x1xf32>
    %436 = vector.broadcast %435 : vector<1x1xf32> to vector<1x64xf32>
    %437 = arith.mulf %436, %28 : vector<1x64xf32>
    %438 = arith.addf %434, %437 : vector<1x64xf32>
    %439 = vector.extract_strided_slice %388 {offsets = [0, 12], sizes = [1, 1], strides = [1, 1]} : vector<1x16xf32> to vector<1x1xf32>
    %440 = vector.broadcast %439 : vector<1x1xf32> to vector<1x64xf32>
    %441 = arith.mulf %440, %29 : vector<1x64xf32>
    %442 = arith.addf %438, %441 : vector<1x64xf32>
    %443 = vector.extract_strided_slice %388 {offsets = [0, 13], sizes = [1, 1], strides = [1, 1]} : vector<1x16xf32> to vector<1x1xf32>
    %444 = vector.broadcast %443 : vector<1x1xf32> to vector<1x64xf32>
    %445 = arith.mulf %444, %30 : vector<1x64xf32>
    %446 = arith.addf %442, %445 : vector<1x64xf32>
    %447 = vector.extract_strided_slice %388 {offsets = [0, 14], sizes = [1, 1], strides = [1, 1]} : vector<1x16xf32> to vector<1x1xf32>
    %448 = vector.broadcast %447 : vector<1x1xf32> to vector<1x64xf32>
    %449 = arith.mulf %448, %31 : vector<1x64xf32>
    %450 = arith.addf %446, %449 : vector<1x64xf32>
    %451 = vector.extract_strided_slice %388 {offsets = [0, 15], sizes = [1, 1], strides = [1, 1]} : vector<1x16xf32> to vector<1x1xf32>
    %452 = vector.broadcast %451 : vector<1x1xf32> to vector<1x64xf32>
    %453 = arith.mulf %452, %32 : vector<1x64xf32>
    %454 = arith.addf %450, %453 : vector<1x64xf32>
    %455 = vector.extract_strided_slice %454 {offsets = [0, 0], sizes = [1, 48], strides = [1, 1]} : vector<1x64xf32> to vector<1x48xf32>
    %cst_68 = arith.constant 5.000000e-01 : f32
    %456 = vector.broadcast %cst_68 : f32 to vector<1x48xf32>
    %457 = arith.mulf %456, %455 : vector<1x48xf32>
    %458 = math.tanh %457 : vector<1x48xf32>
    %cst_69 = arith.constant 5.000000e-01 : f32
    %459 = vector.broadcast %cst_69 : f32 to vector<1x48xf32>
    %460 = arith.mulf %459, %458 : vector<1x48xf32>
    %cst_70 = arith.constant 5.000000e-01 : f32
    %461 = vector.broadcast %cst_70 : f32 to vector<1x48xf32>
    %462 = arith.addf %460, %461 : vector<1x48xf32>
    %463 = vector.extract_strided_slice %454 {offsets = [0, 48], sizes = [1, 16], strides = [1, 1]} : vector<1x64xf32> to vector<1x16xf32>
    %464 = math.tanh %463 : vector<1x16xf32>
    %465 = vector.extract_strided_slice %462 {offsets = [0, 0], sizes = [1, 16], strides = [1, 1]} : vector<1x48xf32> to vector<1x16xf32>
    %466 = vector.extract_strided_slice %462 {offsets = [0, 16], sizes = [1, 16], strides = [1, 1]} : vector<1x48xf32> to vector<1x16xf32>
    %467 = vector.extract_strided_slice %462 {offsets = [0, 32], sizes = [1, 16], strides = [1, 1]} : vector<1x48xf32> to vector<1x16xf32>
    %468 = arith.mulf %466, %386 : vector<1x16xf32>
    %469 = arith.mulf %465, %464 : vector<1x16xf32>
    %470 = arith.addf %468, %469 : vector<1x16xf32>
    %471 = math.tanh %470 : vector<1x16xf32>
    %472 = arith.mulf %467, %471 : vector<1x16xf32>
    %c5_71 = arith.constant 5 : index
    %c0_72 = arith.constant 0 : index
    %473 = vector.load %arg13[%c5_71, %c0_72] : memref<32x16xf32, #tpu.memory_space<vmem>>, vector<1x16xf32>
    tpu.vector_store %arg13[%c5_71, %c0_72], %472 {strides = array<i32>} : memref<32x16xf32, #tpu.memory_space<vmem>>, vector<1x16xf32>,
    %c6_73 = arith.constant 6 : index
    %c0_74 = arith.constant 0 : index
    %474 = vector.load %arg12[%c6_73, %c0_74] : memref<32x64xf32, #tpu.memory_space<vmem>>, vector<1x64xf32>
    %475 = vector.extract_strided_slice %472 {offsets = [0, 0], sizes = [1, 1], strides = [1, 1]} : vector<1x16xf32> to vector<1x1xf32>
    %476 = vector.broadcast %475 : vector<1x1xf32> to vector<1x64xf32>
    %477 = arith.mulf %476, %17 : vector<1x64xf32>
    %478 = arith.addf %474, %477 : vector<1x64xf32>
    %479 = vector.extract_strided_slice %472 {offsets = [0, 1], sizes = [1, 1], strides = [1, 1]} : vector<1x16xf32> to vector<1x1xf32>
    %480 = vector.broadcast %479 : vector<1x1xf32> to vector<1x64xf32>
    %481 = arith.mulf %480, %18 : vector<1x64xf32>
    %482 = arith.addf %478, %481 : vector<1x64xf32>
    %483 = vector.extract_strided_slice %472 {offsets = [0, 2], sizes = [1, 1], strides = [1, 1]} : vector<1x16xf32> to vector<1x1xf32>
    %484 = vector.broadcast %483 : vector<1x1xf32> to vector<1x64xf32>
    %485 = arith.mulf %484, %19 : vector<1x64xf32>
    %486 = arith.addf %482, %485 : vector<1x64xf32>
    %487 = vector.extract_strided_slice %472 {offsets = [0, 3], sizes = [1, 1], strides = [1, 1]} : vector<1x16xf32> to vector<1x1xf32>
    %488 = vector.broadcast %487 : vector<1x1xf32> to vector<1x64xf32>
    %489 = arith.mulf %488, %20 : vector<1x64xf32>
    %490 = arith.addf %486, %489 : vector<1x64xf32>
    %491 = vector.extract_strided_slice %472 {offsets = [0, 4], sizes = [1, 1], strides = [1, 1]} : vector<1x16xf32> to vector<1x1xf32>
    %492 = vector.broadcast %491 : vector<1x1xf32> to vector<1x64xf32>
    %493 = arith.mulf %492, %21 : vector<1x64xf32>
    %494 = arith.addf %490, %493 : vector<1x64xf32>
    %495 = vector.extract_strided_slice %472 {offsets = [0, 5], sizes = [1, 1], strides = [1, 1]} : vector<1x16xf32> to vector<1x1xf32>
    %496 = vector.broadcast %495 : vector<1x1xf32> to vector<1x64xf32>
    %497 = arith.mulf %496, %22 : vector<1x64xf32>
    %498 = arith.addf %494, %497 : vector<1x64xf32>
    %499 = vector.extract_strided_slice %472 {offsets = [0, 6], sizes = [1, 1], strides = [1, 1]} : vector<1x16xf32> to vector<1x1xf32>
    %500 = vector.broadcast %499 : vector<1x1xf32> to vector<1x64xf32>
    %501 = arith.mulf %500, %23 : vector<1x64xf32>
    %502 = arith.addf %498, %501 : vector<1x64xf32>
    %503 = vector.extract_strided_slice %472 {offsets = [0, 7], sizes = [1, 1], strides = [1, 1]} : vector<1x16xf32> to vector<1x1xf32>
    %504 = vector.broadcast %503 : vector<1x1xf32> to vector<1x64xf32>
    %505 = arith.mulf %504, %24 : vector<1x64xf32>
    %506 = arith.addf %502, %505 : vector<1x64xf32>
    %507 = vector.extract_strided_slice %472 {offsets = [0, 8], sizes = [1, 1], strides = [1, 1]} : vector<1x16xf32> to vector<1x1xf32>
    %508 = vector.broadcast %507 : vector<1x1xf32> to vector<1x64xf32>
    %509 = arith.mulf %508, %25 : vector<1x64xf32>
    %510 = arith.addf %506, %509 : vector<1x64xf32>
    %511 = vector.extract_strided_slice %472 {offsets = [0, 9], sizes = [1, 1], strides = [1, 1]} : vector<1x16xf32> to vector<1x1xf32>
    %512 = vector.broadcast %511 : vector<1x1xf32> to vector<1x64xf32>
    %513 = arith.mulf %512, %26 : vector<1x64xf32>
    %514 = arith.addf %510, %513 : vector<1x64xf32>
    %515 = vector.extract_strided_slice %472 {offsets = [0, 10], sizes = [1, 1], strides = [1, 1]} : vector<1x16xf32> to vector<1x1xf32>
    %516 = vector.broadcast %515 : vector<1x1xf32> to vector<1x64xf32>
    %517 = arith.mulf %516, %27 : vector<1x64xf32>
    %518 = arith.addf %514, %517 : vector<1x64xf32>
    %519 = vector.extract_strided_slice %472 {offsets = [0, 11], sizes = [1, 1], strides = [1, 1]} : vector<1x16xf32> to vector<1x1xf32>
    %520 = vector.broadcast %519 : vector<1x1xf32> to vector<1x64xf32>
    %521 = arith.mulf %520, %28 : vector<1x64xf32>
    %522 = arith.addf %518, %521 : vector<1x64xf32>
    %523 = vector.extract_strided_slice %472 {offsets = [0, 12], sizes = [1, 1], strides = [1, 1]} : vector<1x16xf32> to vector<1x1xf32>
    %524 = vector.broadcast %523 : vector<1x1xf32> to vector<1x64xf32>
    %525 = arith.mulf %524, %29 : vector<1x64xf32>
    %526 = arith.addf %522, %525 : vector<1x64xf32>
    %527 = vector.extract_strided_slice %472 {offsets = [0, 13], sizes = [1, 1], strides = [1, 1]} : vector<1x16xf32> to vector<1x1xf32>
    %528 = vector.broadcast %527 : vector<1x1xf32> to vector<1x64xf32>
    %529 = arith.mulf %528, %30 : vector<1x64xf32>
    %530 = arith.addf %526, %529 : vector<1x64xf32>
    %531 = vector.extract_strided_slice %472 {offsets = [0, 14], sizes = [1, 1], strides = [1, 1]} : vector<1x16xf32> to vector<1x1xf32>
    %532 = vector.broadcast %531 : vector<1x1xf32> to vector<1x64xf32>
    %533 = arith.mulf %532, %31 : vector<1x64xf32>
    %534 = arith.addf %530, %533 : vector<1x64xf32>
    %535 = vector.extract_strided_slice %472 {offsets = [0, 15], sizes = [1, 1], strides = [1, 1]} : vector<1x16xf32> to vector<1x1xf32>
    %536 = vector.broadcast %535 : vector<1x1xf32> to vector<1x64xf32>
    %537 = arith.mulf %536, %32 : vector<1x64xf32>
    %538 = arith.addf %534, %537 : vector<1x64xf32>
    %539 = vector.extract_strided_slice %538 {offsets = [0, 0], sizes = [1, 48], strides = [1, 1]} : vector<1x64xf32> to vector<1x48xf32>
    %cst_75 = arith.constant 5.000000e-01 : f32
    %540 = vector.broadcast %cst_75 : f32 to vector<1x48xf32>
    %541 = arith.mulf %540, %539 : vector<1x48xf32>
    %542 = math.tanh %541 : vector<1x48xf32>
    %cst_76 = arith.constant 5.000000e-01 : f32
    %543 = vector.broadcast %cst_76 : f32 to vector<1x48xf32>
    %544 = arith.mulf %543, %542 : vector<1x48xf32>
    %cst_77 = arith.constant 5.000000e-01 : f32
    %545 = vector.broadcast %cst_77 : f32 to vector<1x48xf32>
    %546 = arith.addf %544, %545 : vector<1x48xf32>
    %547 = vector.extract_strided_slice %538 {offsets = [0, 48], sizes = [1, 16], strides = [1, 1]} : vector<1x64xf32> to vector<1x16xf32>
    %548 = math.tanh %547 : vector<1x16xf32>
    %549 = vector.extract_strided_slice %546 {offsets = [0, 0], sizes = [1, 16], strides = [1, 1]} : vector<1x48xf32> to vector<1x16xf32>
    %550 = vector.extract_strided_slice %546 {offsets = [0, 16], sizes = [1, 16], strides = [1, 1]} : vector<1x48xf32> to vector<1x16xf32>
    %551 = vector.extract_strided_slice %546 {offsets = [0, 32], sizes = [1, 16], strides = [1, 1]} : vector<1x48xf32> to vector<1x16xf32>
    %552 = arith.mulf %550, %470 : vector<1x16xf32>
    %553 = arith.mulf %549, %548 : vector<1x16xf32>
    %554 = arith.addf %552, %553 : vector<1x16xf32>
    %555 = math.tanh %554 : vector<1x16xf32>
    %556 = arith.mulf %551, %555 : vector<1x16xf32>
    %c6_78 = arith.constant 6 : index
    %c0_79 = arith.constant 0 : index
    %557 = vector.load %arg13[%c6_78, %c0_79] : memref<32x16xf32, #tpu.memory_space<vmem>>, vector<1x16xf32>
    tpu.vector_store %arg13[%c6_78, %c0_79], %556 {strides = array<i32>} : memref<32x16xf32, #tpu.memory_space<vmem>>, vector<1x16xf32>,
    %c7_80 = arith.constant 7 : index
    %c0_81 = arith.constant 0 : index
    %558 = vector.load %arg12[%c7_80, %c0_81] : memref<32x64xf32, #tpu.memory_space<vmem>>, vector<1x64xf32>
    %559 = vector.extract_strided_slice %556 {offsets = [0, 0], sizes = [1, 1], strides = [1, 1]} : vector<1x16xf32> to vector<1x1xf32>
    %560 = vector.broadcast %559 : vector<1x1xf32> to vector<1x64xf32>
    %561 = arith.mulf %560, %17 : vector<1x64xf32>
    %562 = arith.addf %558, %561 : vector<1x64xf32>
    %563 = vector.extract_strided_slice %556 {offsets = [0, 1], sizes = [1, 1], strides = [1, 1]} : vector<1x16xf32> to vector<1x1xf32>
    %564 = vector.broadcast %563 : vector<1x1xf32> to vector<1x64xf32>
    %565 = arith.mulf %564, %18 : vector<1x64xf32>
    %566 = arith.addf %562, %565 : vector<1x64xf32>
    %567 = vector.extract_strided_slice %556 {offsets = [0, 2], sizes = [1, 1], strides = [1, 1]} : vector<1x16xf32> to vector<1x1xf32>
    %568 = vector.broadcast %567 : vector<1x1xf32> to vector<1x64xf32>
    %569 = arith.mulf %568, %19 : vector<1x64xf32>
    %570 = arith.addf %566, %569 : vector<1x64xf32>
    %571 = vector.extract_strided_slice %556 {offsets = [0, 3], sizes = [1, 1], strides = [1, 1]} : vector<1x16xf32> to vector<1x1xf32>
    %572 = vector.broadcast %571 : vector<1x1xf32> to vector<1x64xf32>
    %573 = arith.mulf %572, %20 : vector<1x64xf32>
    %574 = arith.addf %570, %573 : vector<1x64xf32>
    %575 = vector.extract_strided_slice %556 {offsets = [0, 4], sizes = [1, 1], strides = [1, 1]} : vector<1x16xf32> to vector<1x1xf32>
    %576 = vector.broadcast %575 : vector<1x1xf32> to vector<1x64xf32>
    %577 = arith.mulf %576, %21 : vector<1x64xf32>
    %578 = arith.addf %574, %577 : vector<1x64xf32>
    %579 = vector.extract_strided_slice %556 {offsets = [0, 5], sizes = [1, 1], strides = [1, 1]} : vector<1x16xf32> to vector<1x1xf32>
    %580 = vector.broadcast %579 : vector<1x1xf32> to vector<1x64xf32>
    %581 = arith.mulf %580, %22 : vector<1x64xf32>
    %582 = arith.addf %578, %581 : vector<1x64xf32>
    %583 = vector.extract_strided_slice %556 {offsets = [0, 6], sizes = [1, 1], strides = [1, 1]} : vector<1x16xf32> to vector<1x1xf32>
    %584 = vector.broadcast %583 : vector<1x1xf32> to vector<1x64xf32>
    %585 = arith.mulf %584, %23 : vector<1x64xf32>
    %586 = arith.addf %582, %585 : vector<1x64xf32>
    %587 = vector.extract_strided_slice %556 {offsets = [0, 7], sizes = [1, 1], strides = [1, 1]} : vector<1x16xf32> to vector<1x1xf32>
    %588 = vector.broadcast %587 : vector<1x1xf32> to vector<1x64xf32>
    %589 = arith.mulf %588, %24 : vector<1x64xf32>
    %590 = arith.addf %586, %589 : vector<1x64xf32>
    %591 = vector.extract_strided_slice %556 {offsets = [0, 8], sizes = [1, 1], strides = [1, 1]} : vector<1x16xf32> to vector<1x1xf32>
    %592 = vector.broadcast %591 : vector<1x1xf32> to vector<1x64xf32>
    %593 = arith.mulf %592, %25 : vector<1x64xf32>
    %594 = arith.addf %590, %593 : vector<1x64xf32>
    %595 = vector.extract_strided_slice %556 {offsets = [0, 9], sizes = [1, 1], strides = [1, 1]} : vector<1x16xf32> to vector<1x1xf32>
    %596 = vector.broadcast %595 : vector<1x1xf32> to vector<1x64xf32>
    %597 = arith.mulf %596, %26 : vector<1x64xf32>
    %598 = arith.addf %594, %597 : vector<1x64xf32>
    %599 = vector.extract_strided_slice %556 {offsets = [0, 10], sizes = [1, 1], strides = [1, 1]} : vector<1x16xf32> to vector<1x1xf32>
    %600 = vector.broadcast %599 : vector<1x1xf32> to vector<1x64xf32>
    %601 = arith.mulf %600, %27 : vector<1x64xf32>
    %602 = arith.addf %598, %601 : vector<1x64xf32>
    %603 = vector.extract_strided_slice %556 {offsets = [0, 11], sizes = [1, 1], strides = [1, 1]} : vector<1x16xf32> to vector<1x1xf32>
    %604 = vector.broadcast %603 : vector<1x1xf32> to vector<1x64xf32>
    %605 = arith.mulf %604, %28 : vector<1x64xf32>
    %606 = arith.addf %602, %605 : vector<1x64xf32>
    %607 = vector.extract_strided_slice %556 {offsets = [0, 12], sizes = [1, 1], strides = [1, 1]} : vector<1x16xf32> to vector<1x1xf32>
    %608 = vector.broadcast %607 : vector<1x1xf32> to vector<1x64xf32>
    %609 = arith.mulf %608, %29 : vector<1x64xf32>
    %610 = arith.addf %606, %609 : vector<1x64xf32>
    %611 = vector.extract_strided_slice %556 {offsets = [0, 13], sizes = [1, 1], strides = [1, 1]} : vector<1x16xf32> to vector<1x1xf32>
    %612 = vector.broadcast %611 : vector<1x1xf32> to vector<1x64xf32>
    %613 = arith.mulf %612, %30 : vector<1x64xf32>
    %614 = arith.addf %610, %613 : vector<1x64xf32>
    %615 = vector.extract_strided_slice %556 {offsets = [0, 14], sizes = [1, 1], strides = [1, 1]} : vector<1x16xf32> to vector<1x1xf32>
    %616 = vector.broadcast %615 : vector<1x1xf32> to vector<1x64xf32>
    %617 = arith.mulf %616, %31 : vector<1x64xf32>
    %618 = arith.addf %614, %617 : vector<1x64xf32>
    %619 = vector.extract_strided_slice %556 {offsets = [0, 15], sizes = [1, 1], strides = [1, 1]} : vector<1x16xf32> to vector<1x1xf32>
    %620 = vector.broadcast %619 : vector<1x1xf32> to vector<1x64xf32>
    %621 = arith.mulf %620, %32 : vector<1x64xf32>
    %622 = arith.addf %618, %621 : vector<1x64xf32>
    %623 = vector.extract_strided_slice %622 {offsets = [0, 0], sizes = [1, 48], strides = [1, 1]} : vector<1x64xf32> to vector<1x48xf32>
    %cst_82 = arith.constant 5.000000e-01 : f32
    %624 = vector.broadcast %cst_82 : f32 to vector<1x48xf32>
    %625 = arith.mulf %624, %623 : vector<1x48xf32>
    %626 = math.tanh %625 : vector<1x48xf32>
    %cst_83 = arith.constant 5.000000e-01 : f32
    %627 = vector.broadcast %cst_83 : f32 to vector<1x48xf32>
    %628 = arith.mulf %627, %626 : vector<1x48xf32>
    %cst_84 = arith.constant 5.000000e-01 : f32
    %629 = vector.broadcast %cst_84 : f32 to vector<1x48xf32>
    %630 = arith.addf %628, %629 : vector<1x48xf32>
    %631 = vector.extract_strided_slice %622 {offsets = [0, 48], sizes = [1, 16], strides = [1, 1]} : vector<1x64xf32> to vector<1x16xf32>
    %632 = math.tanh %631 : vector<1x16xf32>
    %633 = vector.extract_strided_slice %630 {offsets = [0, 0], sizes = [1, 16], strides = [1, 1]} : vector<1x48xf32> to vector<1x16xf32>
    %634 = vector.extract_strided_slice %630 {offsets = [0, 16], sizes = [1, 16], strides = [1, 1]} : vector<1x48xf32> to vector<1x16xf32>
    %635 = vector.extract_strided_slice %630 {offsets = [0, 32], sizes = [1, 16], strides = [1, 1]} : vector<1x48xf32> to vector<1x16xf32>
    %636 = arith.mulf %634, %554 : vector<1x16xf32>
    %637 = arith.mulf %633, %632 : vector<1x16xf32>
    %638 = arith.addf %636, %637 : vector<1x16xf32>
    %639 = math.tanh %638 : vector<1x16xf32>
    %640 = arith.mulf %635, %639 : vector<1x16xf32>
    %c7_85 = arith.constant 7 : index
    %c0_86 = arith.constant 0 : index
    %641 = vector.load %arg13[%c7_85, %c0_86] : memref<32x16xf32, #tpu.memory_space<vmem>>, vector<1x16xf32>
    tpu.vector_store %arg13[%c7_85, %c0_86], %640 {strides = array<i32>} : memref<32x16xf32, #tpu.memory_space<vmem>>, vector<1x16xf32>,
    %c8_87 = arith.constant 8 : index
    %c0_88 = arith.constant 0 : index
    %642 = vector.load %arg12[%c8_87, %c0_88] : memref<32x64xf32, #tpu.memory_space<vmem>>, vector<1x64xf32>
    %643 = vector.extract_strided_slice %640 {offsets = [0, 0], sizes = [1, 1], strides = [1, 1]} : vector<1x16xf32> to vector<1x1xf32>
    %644 = vector.broadcast %643 : vector<1x1xf32> to vector<1x64xf32>
    %645 = arith.mulf %644, %17 : vector<1x64xf32>
    %646 = arith.addf %642, %645 : vector<1x64xf32>
    %647 = vector.extract_strided_slice %640 {offsets = [0, 1], sizes = [1, 1], strides = [1, 1]} : vector<1x16xf32> to vector<1x1xf32>
    %648 = vector.broadcast %647 : vector<1x1xf32> to vector<1x64xf32>
    %649 = arith.mulf %648, %18 : vector<1x64xf32>
    %650 = arith.addf %646, %649 : vector<1x64xf32>
    %651 = vector.extract_strided_slice %640 {offsets = [0, 2], sizes = [1, 1], strides = [1, 1]} : vector<1x16xf32> to vector<1x1xf32>
    %652 = vector.broadcast %651 : vector<1x1xf32> to vector<1x64xf32>
    %653 = arith.mulf %652, %19 : vector<1x64xf32>
    %654 = arith.addf %650, %653 : vector<1x64xf32>
    %655 = vector.extract_strided_slice %640 {offsets = [0, 3], sizes = [1, 1], strides = [1, 1]} : vector<1x16xf32> to vector<1x1xf32>
    %656 = vector.broadcast %655 : vector<1x1xf32> to vector<1x64xf32>
    %657 = arith.mulf %656, %20 : vector<1x64xf32>
    %658 = arith.addf %654, %657 : vector<1x64xf32>
    %659 = vector.extract_strided_slice %640 {offsets = [0, 4], sizes = [1, 1], strides = [1, 1]} : vector<1x16xf32> to vector<1x1xf32>
    %660 = vector.broadcast %659 : vector<1x1xf32> to vector<1x64xf32>
    %661 = arith.mulf %660, %21 : vector<1x64xf32>
    %662 = arith.addf %658, %661 : vector<1x64xf32>
    %663 = vector.extract_strided_slice %640 {offsets = [0, 5], sizes = [1, 1], strides = [1, 1]} : vector<1x16xf32> to vector<1x1xf32>
    %664 = vector.broadcast %663 : vector<1x1xf32> to vector<1x64xf32>
    %665 = arith.mulf %664, %22 : vector<1x64xf32>
    %666 = arith.addf %662, %665 : vector<1x64xf32>
    %667 = vector.extract_strided_slice %640 {offsets = [0, 6], sizes = [1, 1], strides = [1, 1]} : vector<1x16xf32> to vector<1x1xf32>
    %668 = vector.broadcast %667 : vector<1x1xf32> to vector<1x64xf32>
    %669 = arith.mulf %668, %23 : vector<1x64xf32>
    %670 = arith.addf %666, %669 : vector<1x64xf32>
    %671 = vector.extract_strided_slice %640 {offsets = [0, 7], sizes = [1, 1], strides = [1, 1]} : vector<1x16xf32> to vector<1x1xf32>
    %672 = vector.broadcast %671 : vector<1x1xf32> to vector<1x64xf32>
    %673 = arith.mulf %672, %24 : vector<1x64xf32>
    %674 = arith.addf %670, %673 : vector<1x64xf32>
    %675 = vector.extract_strided_slice %640 {offsets = [0, 8], sizes = [1, 1], strides = [1, 1]} : vector<1x16xf32> to vector<1x1xf32>
    %676 = vector.broadcast %675 : vector<1x1xf32> to vector<1x64xf32>
    %677 = arith.mulf %676, %25 : vector<1x64xf32>
    %678 = arith.addf %674, %677 : vector<1x64xf32>
    %679 = vector.extract_strided_slice %640 {offsets = [0, 9], sizes = [1, 1], strides = [1, 1]} : vector<1x16xf32> to vector<1x1xf32>
    %680 = vector.broadcast %679 : vector<1x1xf32> to vector<1x64xf32>
    %681 = arith.mulf %680, %26 : vector<1x64xf32>
    %682 = arith.addf %678, %681 : vector<1x64xf32>
    %683 = vector.extract_strided_slice %640 {offsets = [0, 10], sizes = [1, 1], strides = [1, 1]} : vector<1x16xf32> to vector<1x1xf32>
    %684 = vector.broadcast %683 : vector<1x1xf32> to vector<1x64xf32>
    %685 = arith.mulf %684, %27 : vector<1x64xf32>
    %686 = arith.addf %682, %685 : vector<1x64xf32>
    %687 = vector.extract_strided_slice %640 {offsets = [0, 11], sizes = [1, 1], strides = [1, 1]} : vector<1x16xf32> to vector<1x1xf32>
    %688 = vector.broadcast %687 : vector<1x1xf32> to vector<1x64xf32>
    %689 = arith.mulf %688, %28 : vector<1x64xf32>
    %690 = arith.addf %686, %689 : vector<1x64xf32>
    %691 = vector.extract_strided_slice %640 {offsets = [0, 12], sizes = [1, 1], strides = [1, 1]} : vector<1x16xf32> to vector<1x1xf32>
    %692 = vector.broadcast %691 : vector<1x1xf32> to vector<1x64xf32>
    %693 = arith.mulf %692, %29 : vector<1x64xf32>
    %694 = arith.addf %690, %693 : vector<1x64xf32>
    %695 = vector.extract_strided_slice %640 {offsets = [0, 13], sizes = [1, 1], strides = [1, 1]} : vector<1x16xf32> to vector<1x1xf32>
    %696 = vector.broadcast %695 : vector<1x1xf32> to vector<1x64xf32>
    %697 = arith.mulf %696, %30 : vector<1x64xf32>
    %698 = arith.addf %694, %697 : vector<1x64xf32>
    %699 = vector.extract_strided_slice %640 {offsets = [0, 14], sizes = [1, 1], strides = [1, 1]} : vector<1x16xf32> to vector<1x1xf32>
    %700 = vector.broadcast %699 : vector<1x1xf32> to vector<1x64xf32>
    %701 = arith.mulf %700, %31 : vector<1x64xf32>
    %702 = arith.addf %698, %701 : vector<1x64xf32>
    %703 = vector.extract_strided_slice %640 {offsets = [0, 15], sizes = [1, 1], strides = [1, 1]} : vector<1x16xf32> to vector<1x1xf32>
    %704 = vector.broadcast %703 : vector<1x1xf32> to vector<1x64xf32>
    %705 = arith.mulf %704, %32 : vector<1x64xf32>
    %706 = arith.addf %702, %705 : vector<1x64xf32>
    %707 = vector.extract_strided_slice %706 {offsets = [0, 0], sizes = [1, 48], strides = [1, 1]} : vector<1x64xf32> to vector<1x48xf32>
    %cst_89 = arith.constant 5.000000e-01 : f32
    %708 = vector.broadcast %cst_89 : f32 to vector<1x48xf32>
    %709 = arith.mulf %708, %707 : vector<1x48xf32>
    %710 = math.tanh %709 : vector<1x48xf32>
    %cst_90 = arith.constant 5.000000e-01 : f32
    %711 = vector.broadcast %cst_90 : f32 to vector<1x48xf32>
    %712 = arith.mulf %711, %710 : vector<1x48xf32>
    %cst_91 = arith.constant 5.000000e-01 : f32
    %713 = vector.broadcast %cst_91 : f32 to vector<1x48xf32>
    %714 = arith.addf %712, %713 : vector<1x48xf32>
    %715 = vector.extract_strided_slice %706 {offsets = [0, 48], sizes = [1, 16], strides = [1, 1]} : vector<1x64xf32> to vector<1x16xf32>
    %716 = math.tanh %715 : vector<1x16xf32>
    %717 = vector.extract_strided_slice %714 {offsets = [0, 0], sizes = [1, 16], strides = [1, 1]} : vector<1x48xf32> to vector<1x16xf32>
    %718 = vector.extract_strided_slice %714 {offsets = [0, 16], sizes = [1, 16], strides = [1, 1]} : vector<1x48xf32> to vector<1x16xf32>
    %719 = vector.extract_strided_slice %714 {offsets = [0, 32], sizes = [1, 16], strides = [1, 1]} : vector<1x48xf32> to vector<1x16xf32>
    %720 = arith.mulf %718, %638 : vector<1x16xf32>
    %721 = arith.mulf %717, %716 : vector<1x16xf32>
    %722 = arith.addf %720, %721 : vector<1x16xf32>
    %723 = math.tanh %722 : vector<1x16xf32>
    %724 = arith.mulf %719, %723 : vector<1x16xf32>
    %c8_92 = arith.constant 8 : index
    %c0_93 = arith.constant 0 : index
    %725 = vector.load %arg13[%c8_92, %c0_93] : memref<32x16xf32, #tpu.memory_space<vmem>>, vector<1x16xf32>
    tpu.vector_store %arg13[%c8_92, %c0_93], %724 {strides = array<i32>} : memref<32x16xf32, #tpu.memory_space<vmem>>, vector<1x16xf32>,
    %c9_94 = arith.constant 9 : index
    %c0_95 = arith.constant 0 : index
    %726 = vector.load %arg12[%c9_94, %c0_95] : memref<32x64xf32, #tpu.memory_space<vmem>>, vector<1x64xf32>
    %727 = vector.extract_strided_slice %724 {offsets = [0, 0], sizes = [1, 1], strides = [1, 1]} : vector<1x16xf32> to vector<1x1xf32>
    %728 = vector.broadcast %727 : vector<1x1xf32> to vector<1x64xf32>
    %729 = arith.mulf %728, %17 : vector<1x64xf32>
    %730 = arith.addf %726, %729 : vector<1x64xf32>
    %731 = vector.extract_strided_slice %724 {offsets = [0, 1], sizes = [1, 1], strides = [1, 1]} : vector<1x16xf32> to vector<1x1xf32>
    %732 = vector.broadcast %731 : vector<1x1xf32> to vector<1x64xf32>
    %733 = arith.mulf %732, %18 : vector<1x64xf32>
    %734 = arith.addf %730, %733 : vector<1x64xf32>
    %735 = vector.extract_strided_slice %724 {offsets = [0, 2], sizes = [1, 1], strides = [1, 1]} : vector<1x16xf32> to vector<1x1xf32>
    %736 = vector.broadcast %735 : vector<1x1xf32> to vector<1x64xf32>
    %737 = arith.mulf %736, %19 : vector<1x64xf32>
    %738 = arith.addf %734, %737 : vector<1x64xf32>
    %739 = vector.extract_strided_slice %724 {offsets = [0, 3], sizes = [1, 1], strides = [1, 1]} : vector<1x16xf32> to vector<1x1xf32>
    %740 = vector.broadcast %739 : vector<1x1xf32> to vector<1x64xf32>
    %741 = arith.mulf %740, %20 : vector<1x64xf32>
    %742 = arith.addf %738, %741 : vector<1x64xf32>
    %743 = vector.extract_strided_slice %724 {offsets = [0, 4], sizes = [1, 1], strides = [1, 1]} : vector<1x16xf32> to vector<1x1xf32>
    %744 = vector.broadcast %743 : vector<1x1xf32> to vector<1x64xf32>
    %745 = arith.mulf %744, %21 : vector<1x64xf32>
    %746 = arith.addf %742, %745 : vector<1x64xf32>
    %747 = vector.extract_strided_slice %724 {offsets = [0, 5], sizes = [1, 1], strides = [1, 1]} : vector<1x16xf32> to vector<1x1xf32>
    %748 = vector.broadcast %747 : vector<1x1xf32> to vector<1x64xf32>
    %749 = arith.mulf %748, %22 : vector<1x64xf32>
    %750 = arith.addf %746, %749 : vector<1x64xf32>
    %751 = vector.extract_strided_slice %724 {offsets = [0, 6], sizes = [1, 1], strides = [1, 1]} : vector<1x16xf32> to vector<1x1xf32>
    %752 = vector.broadcast %751 : vector<1x1xf32> to vector<1x64xf32>
    %753 = arith.mulf %752, %23 : vector<1x64xf32>
    %754 = arith.addf %750, %753 : vector<1x64xf32>
    %755 = vector.extract_strided_slice %724 {offsets = [0, 7], sizes = [1, 1], strides = [1, 1]} : vector<1x16xf32> to vector<1x1xf32>
    %756 = vector.broadcast %755 : vector<1x1xf32> to vector<1x64xf32>
    %757 = arith.mulf %756, %24 : vector<1x64xf32>
    %758 = arith.addf %754, %757 : vector<1x64xf32>
    %759 = vector.extract_strided_slice %724 {offsets = [0, 8], sizes = [1, 1], strides = [1, 1]} : vector<1x16xf32> to vector<1x1xf32>
    %760 = vector.broadcast %759 : vector<1x1xf32> to vector<1x64xf32>
    %761 = arith.mulf %760, %25 : vector<1x64xf32>
    %762 = arith.addf %758, %761 : vector<1x64xf32>
    %763 = vector.extract_strided_slice %724 {offsets = [0, 9], sizes = [1, 1], strides = [1, 1]} : vector<1x16xf32> to vector<1x1xf32>
    %764 = vector.broadcast %763 : vector<1x1xf32> to vector<1x64xf32>
    %765 = arith.mulf %764, %26 : vector<1x64xf32>
    %766 = arith.addf %762, %765 : vector<1x64xf32>
    %767 = vector.extract_strided_slice %724 {offsets = [0, 10], sizes = [1, 1], strides = [1, 1]} : vector<1x16xf32> to vector<1x1xf32>
    %768 = vector.broadcast %767 : vector<1x1xf32> to vector<1x64xf32>
    %769 = arith.mulf %768, %27 : vector<1x64xf32>
    %770 = arith.addf %766, %769 : vector<1x64xf32>
    %771 = vector.extract_strided_slice %724 {offsets = [0, 11], sizes = [1, 1], strides = [1, 1]} : vector<1x16xf32> to vector<1x1xf32>
    %772 = vector.broadcast %771 : vector<1x1xf32> to vector<1x64xf32>
    %773 = arith.mulf %772, %28 : vector<1x64xf32>
    %774 = arith.addf %770, %773 : vector<1x64xf32>
    %775 = vector.extract_strided_slice %724 {offsets = [0, 12], sizes = [1, 1], strides = [1, 1]} : vector<1x16xf32> to vector<1x1xf32>
    %776 = vector.broadcast %775 : vector<1x1xf32> to vector<1x64xf32>
    %777 = arith.mulf %776, %29 : vector<1x64xf32>
    %778 = arith.addf %774, %777 : vector<1x64xf32>
    %779 = vector.extract_strided_slice %724 {offsets = [0, 13], sizes = [1, 1], strides = [1, 1]} : vector<1x16xf32> to vector<1x1xf32>
    %780 = vector.broadcast %779 : vector<1x1xf32> to vector<1x64xf32>
    %781 = arith.mulf %780, %30 : vector<1x64xf32>
    %782 = arith.addf %778, %781 : vector<1x64xf32>
    %783 = vector.extract_strided_slice %724 {offsets = [0, 14], sizes = [1, 1], strides = [1, 1]} : vector<1x16xf32> to vector<1x1xf32>
    %784 = vector.broadcast %783 : vector<1x1xf32> to vector<1x64xf32>
    %785 = arith.mulf %784, %31 : vector<1x64xf32>
    %786 = arith.addf %782, %785 : vector<1x64xf32>
    %787 = vector.extract_strided_slice %724 {offsets = [0, 15], sizes = [1, 1], strides = [1, 1]} : vector<1x16xf32> to vector<1x1xf32>
    %788 = vector.broadcast %787 : vector<1x1xf32> to vector<1x64xf32>
    %789 = arith.mulf %788, %32 : vector<1x64xf32>
    %790 = arith.addf %786, %789 : vector<1x64xf32>
    %791 = vector.extract_strided_slice %790 {offsets = [0, 0], sizes = [1, 48], strides = [1, 1]} : vector<1x64xf32> to vector<1x48xf32>
    %cst_96 = arith.constant 5.000000e-01 : f32
    %792 = vector.broadcast %cst_96 : f32 to vector<1x48xf32>
    %793 = arith.mulf %792, %791 : vector<1x48xf32>
    %794 = math.tanh %793 : vector<1x48xf32>
    %cst_97 = arith.constant 5.000000e-01 : f32
    %795 = vector.broadcast %cst_97 : f32 to vector<1x48xf32>
    %796 = arith.mulf %795, %794 : vector<1x48xf32>
    %cst_98 = arith.constant 5.000000e-01 : f32
    %797 = vector.broadcast %cst_98 : f32 to vector<1x48xf32>
    %798 = arith.addf %796, %797 : vector<1x48xf32>
    %799 = vector.extract_strided_slice %790 {offsets = [0, 48], sizes = [1, 16], strides = [1, 1]} : vector<1x64xf32> to vector<1x16xf32>
    %800 = math.tanh %799 : vector<1x16xf32>
    %801 = vector.extract_strided_slice %798 {offsets = [0, 0], sizes = [1, 16], strides = [1, 1]} : vector<1x48xf32> to vector<1x16xf32>
    %802 = vector.extract_strided_slice %798 {offsets = [0, 16], sizes = [1, 16], strides = [1, 1]} : vector<1x48xf32> to vector<1x16xf32>
    %803 = vector.extract_strided_slice %798 {offsets = [0, 32], sizes = [1, 16], strides = [1, 1]} : vector<1x48xf32> to vector<1x16xf32>
    %804 = arith.mulf %802, %722 : vector<1x16xf32>
    %805 = arith.mulf %801, %800 : vector<1x16xf32>
    %806 = arith.addf %804, %805 : vector<1x16xf32>
    %807 = math.tanh %806 : vector<1x16xf32>
    %808 = arith.mulf %803, %807 : vector<1x16xf32>
    %c9_99 = arith.constant 9 : index
    %c0_100 = arith.constant 0 : index
    %809 = vector.load %arg13[%c9_99, %c0_100] : memref<32x16xf32, #tpu.memory_space<vmem>>, vector<1x16xf32>
    tpu.vector_store %arg13[%c9_99, %c0_100], %808 {strides = array<i32>} : memref<32x16xf32, #tpu.memory_space<vmem>>, vector<1x16xf32>,
    %c10_101 = arith.constant 10 : index
    %c0_102 = arith.constant 0 : index
    %810 = vector.load %arg12[%c10_101, %c0_102] : memref<32x64xf32, #tpu.memory_space<vmem>>, vector<1x64xf32>
    %811 = vector.extract_strided_slice %808 {offsets = [0, 0], sizes = [1, 1], strides = [1, 1]} : vector<1x16xf32> to vector<1x1xf32>
    %812 = vector.broadcast %811 : vector<1x1xf32> to vector<1x64xf32>
    %813 = arith.mulf %812, %17 : vector<1x64xf32>
    %814 = arith.addf %810, %813 : vector<1x64xf32>
    %815 = vector.extract_strided_slice %808 {offsets = [0, 1], sizes = [1, 1], strides = [1, 1]} : vector<1x16xf32> to vector<1x1xf32>
    %816 = vector.broadcast %815 : vector<1x1xf32> to vector<1x64xf32>
    %817 = arith.mulf %816, %18 : vector<1x64xf32>
    %818 = arith.addf %814, %817 : vector<1x64xf32>
    %819 = vector.extract_strided_slice %808 {offsets = [0, 2], sizes = [1, 1], strides = [1, 1]} : vector<1x16xf32> to vector<1x1xf32>
    %820 = vector.broadcast %819 : vector<1x1xf32> to vector<1x64xf32>
    %821 = arith.mulf %820, %19 : vector<1x64xf32>
    %822 = arith.addf %818, %821 : vector<1x64xf32>
    %823 = vector.extract_strided_slice %808 {offsets = [0, 3], sizes = [1, 1], strides = [1, 1]} : vector<1x16xf32> to vector<1x1xf32>
    %824 = vector.broadcast %823 : vector<1x1xf32> to vector<1x64xf32>
    %825 = arith.mulf %824, %20 : vector<1x64xf32>
    %826 = arith.addf %822, %825 : vector<1x64xf32>
    %827 = vector.extract_strided_slice %808 {offsets = [0, 4], sizes = [1, 1], strides = [1, 1]} : vector<1x16xf32> to vector<1x1xf32>
    %828 = vector.broadcast %827 : vector<1x1xf32> to vector<1x64xf32>
    %829 = arith.mulf %828, %21 : vector<1x64xf32>
    %830 = arith.addf %826, %829 : vector<1x64xf32>
    %831 = vector.extract_strided_slice %808 {offsets = [0, 5], sizes = [1, 1], strides = [1, 1]} : vector<1x16xf32> to vector<1x1xf32>
    %832 = vector.broadcast %831 : vector<1x1xf32> to vector<1x64xf32>
    %833 = arith.mulf %832, %22 : vector<1x64xf32>
    %834 = arith.addf %830, %833 : vector<1x64xf32>
    %835 = vector.extract_strided_slice %808 {offsets = [0, 6], sizes = [1, 1], strides = [1, 1]} : vector<1x16xf32> to vector<1x1xf32>
    %836 = vector.broadcast %835 : vector<1x1xf32> to vector<1x64xf32>
    %837 = arith.mulf %836, %23 : vector<1x64xf32>
    %838 = arith.addf %834, %837 : vector<1x64xf32>
    %839 = vector.extract_strided_slice %808 {offsets = [0, 7], sizes = [1, 1], strides = [1, 1]} : vector<1x16xf32> to vector<1x1xf32>
    %840 = vector.broadcast %839 : vector<1x1xf32> to vector<1x64xf32>
    %841 = arith.mulf %840, %24 : vector<1x64xf32>
    %842 = arith.addf %838, %841 : vector<1x64xf32>
    %843 = vector.extract_strided_slice %808 {offsets = [0, 8], sizes = [1, 1], strides = [1, 1]} : vector<1x16xf32> to vector<1x1xf32>
    %844 = vector.broadcast %843 : vector<1x1xf32> to vector<1x64xf32>
    %845 = arith.mulf %844, %25 : vector<1x64xf32>
    %846 = arith.addf %842, %845 : vector<1x64xf32>
    %847 = vector.extract_strided_slice %808 {offsets = [0, 9], sizes = [1, 1], strides = [1, 1]} : vector<1x16xf32> to vector<1x1xf32>
    %848 = vector.broadcast %847 : vector<1x1xf32> to vector<1x64xf32>
    %849 = arith.mulf %848, %26 : vector<1x64xf32>
    %850 = arith.addf %846, %849 : vector<1x64xf32>
    %851 = vector.extract_strided_slice %808 {offsets = [0, 10], sizes = [1, 1], strides = [1, 1]} : vector<1x16xf32> to vector<1x1xf32>
    %852 = vector.broadcast %851 : vector<1x1xf32> to vector<1x64xf32>
    %853 = arith.mulf %852, %27 : vector<1x64xf32>
    %854 = arith.addf %850, %853 : vector<1x64xf32>
    %855 = vector.extract_strided_slice %808 {offsets = [0, 11], sizes = [1, 1], strides = [1, 1]} : vector<1x16xf32> to vector<1x1xf32>
    %856 = vector.broadcast %855 : vector<1x1xf32> to vector<1x64xf32>
    %857 = arith.mulf %856, %28 : vector<1x64xf32>
    %858 = arith.addf %854, %857 : vector<1x64xf32>
    %859 = vector.extract_strided_slice %808 {offsets = [0, 12], sizes = [1, 1], strides = [1, 1]} : vector<1x16xf32> to vector<1x1xf32>
    %860 = vector.broadcast %859 : vector<1x1xf32> to vector<1x64xf32>
    %861 = arith.mulf %860, %29 : vector<1x64xf32>
    %862 = arith.addf %858, %861 : vector<1x64xf32>
    %863 = vector.extract_strided_slice %808 {offsets = [0, 13], sizes = [1, 1], strides = [1, 1]} : vector<1x16xf32> to vector<1x1xf32>
    %864 = vector.broadcast %863 : vector<1x1xf32> to vector<1x64xf32>
    %865 = arith.mulf %864, %30 : vector<1x64xf32>
    %866 = arith.addf %862, %865 : vector<1x64xf32>
    %867 = vector.extract_strided_slice %808 {offsets = [0, 14], sizes = [1, 1], strides = [1, 1]} : vector<1x16xf32> to vector<1x1xf32>
    %868 = vector.broadcast %867 : vector<1x1xf32> to vector<1x64xf32>
    %869 = arith.mulf %868, %31 : vector<1x64xf32>
    %870 = arith.addf %866, %869 : vector<1x64xf32>
    %871 = vector.extract_strided_slice %808 {offsets = [0, 15], sizes = [1, 1], strides = [1, 1]} : vector<1x16xf32> to vector<1x1xf32>
    %872 = vector.broadcast %871 : vector<1x1xf32> to vector<1x64xf32>
    %873 = arith.mulf %872, %32 : vector<1x64xf32>
    %874 = arith.addf %870, %873 : vector<1x64xf32>
    %875 = vector.extract_strided_slice %874 {offsets = [0, 0], sizes = [1, 48], strides = [1, 1]} : vector<1x64xf32> to vector<1x48xf32>
    %cst_103 = arith.constant 5.000000e-01 : f32
    %876 = vector.broadcast %cst_103 : f32 to vector<1x48xf32>
    %877 = arith.mulf %876, %875 : vector<1x48xf32>
    %878 = math.tanh %877 : vector<1x48xf32>
    %cst_104 = arith.constant 5.000000e-01 : f32
    %879 = vector.broadcast %cst_104 : f32 to vector<1x48xf32>
    %880 = arith.mulf %879, %878 : vector<1x48xf32>
    %cst_105 = arith.constant 5.000000e-01 : f32
    %881 = vector.broadcast %cst_105 : f32 to vector<1x48xf32>
    %882 = arith.addf %880, %881 : vector<1x48xf32>
    %883 = vector.extract_strided_slice %874 {offsets = [0, 48], sizes = [1, 16], strides = [1, 1]} : vector<1x64xf32> to vector<1x16xf32>
    %884 = math.tanh %883 : vector<1x16xf32>
    %885 = vector.extract_strided_slice %882 {offsets = [0, 0], sizes = [1, 16], strides = [1, 1]} : vector<1x48xf32> to vector<1x16xf32>
    %886 = vector.extract_strided_slice %882 {offsets = [0, 16], sizes = [1, 16], strides = [1, 1]} : vector<1x48xf32> to vector<1x16xf32>
    %887 = vector.extract_strided_slice %882 {offsets = [0, 32], sizes = [1, 16], strides = [1, 1]} : vector<1x48xf32> to vector<1x16xf32>
    %888 = arith.mulf %886, %806 : vector<1x16xf32>
    %889 = arith.mulf %885, %884 : vector<1x16xf32>
    %890 = arith.addf %888, %889 : vector<1x16xf32>
    %891 = math.tanh %890 : vector<1x16xf32>
    %892 = arith.mulf %887, %891 : vector<1x16xf32>
    %c10_106 = arith.constant 10 : index
    %c0_107 = arith.constant 0 : index
    %893 = vector.load %arg13[%c10_106, %c0_107] : memref<32x16xf32, #tpu.memory_space<vmem>>, vector<1x16xf32>
    tpu.vector_store %arg13[%c10_106, %c0_107], %892 {strides = array<i32>} : memref<32x16xf32, #tpu.memory_space<vmem>>, vector<1x16xf32>,
    %c11_108 = arith.constant 11 : index
    %c0_109 = arith.constant 0 : index
    %894 = vector.load %arg12[%c11_108, %c0_109] : memref<32x64xf32, #tpu.memory_space<vmem>>, vector<1x64xf32>
    %895 = vector.extract_strided_slice %892 {offsets = [0, 0], sizes = [1, 1], strides = [1, 1]} : vector<1x16xf32> to vector<1x1xf32>
    %896 = vector.broadcast %895 : vector<1x1xf32> to vector<1x64xf32>
    %897 = arith.mulf %896, %17 : vector<1x64xf32>
    %898 = arith.addf %894, %897 : vector<1x64xf32>
    %899 = vector.extract_strided_slice %892 {offsets = [0, 1], sizes = [1, 1], strides = [1, 1]} : vector<1x16xf32> to vector<1x1xf32>
    %900 = vector.broadcast %899 : vector<1x1xf32> to vector<1x64xf32>
    %901 = arith.mulf %900, %18 : vector<1x64xf32>
    %902 = arith.addf %898, %901 : vector<1x64xf32>
    %903 = vector.extract_strided_slice %892 {offsets = [0, 2], sizes = [1, 1], strides = [1, 1]} : vector<1x16xf32> to vector<1x1xf32>
    %904 = vector.broadcast %903 : vector<1x1xf32> to vector<1x64xf32>
    %905 = arith.mulf %904, %19 : vector<1x64xf32>
    %906 = arith.addf %902, %905 : vector<1x64xf32>
    %907 = vector.extract_strided_slice %892 {offsets = [0, 3], sizes = [1, 1], strides = [1, 1]} : vector<1x16xf32> to vector<1x1xf32>
    %908 = vector.broadcast %907 : vector<1x1xf32> to vector<1x64xf32>
    %909 = arith.mulf %908, %20 : vector<1x64xf32>
    %910 = arith.addf %906, %909 : vector<1x64xf32>
    %911 = vector.extract_strided_slice %892 {offsets = [0, 4], sizes = [1, 1], strides = [1, 1]} : vector<1x16xf32> to vector<1x1xf32>
    %912 = vector.broadcast %911 : vector<1x1xf32> to vector<1x64xf32>
    %913 = arith.mulf %912, %21 : vector<1x64xf32>
    %914 = arith.addf %910, %913 : vector<1x64xf32>
    %915 = vector.extract_strided_slice %892 {offsets = [0, 5], sizes = [1, 1], strides = [1, 1]} : vector<1x16xf32> to vector<1x1xf32>
    %916 = vector.broadcast %915 : vector<1x1xf32> to vector<1x64xf32>
    %917 = arith.mulf %916, %22 : vector<1x64xf32>
    %918 = arith.addf %914, %917 : vector<1x64xf32>
    %919 = vector.extract_strided_slice %892 {offsets = [0, 6], sizes = [1, 1], strides = [1, 1]} : vector<1x16xf32> to vector<1x1xf32>
    %920 = vector.broadcast %919 : vector<1x1xf32> to vector<1x64xf32>
    %921 = arith.mulf %920, %23 : vector<1x64xf32>
    %922 = arith.addf %918, %921 : vector<1x64xf32>
    %923 = vector.extract_strided_slice %892 {offsets = [0, 7], sizes = [1, 1], strides = [1, 1]} : vector<1x16xf32> to vector<1x1xf32>
    %924 = vector.broadcast %923 : vector<1x1xf32> to vector<1x64xf32>
    %925 = arith.mulf %924, %24 : vector<1x64xf32>
    %926 = arith.addf %922, %925 : vector<1x64xf32>
    %927 = vector.extract_strided_slice %892 {offsets = [0, 8], sizes = [1, 1], strides = [1, 1]} : vector<1x16xf32> to vector<1x1xf32>
    %928 = vector.broadcast %927 : vector<1x1xf32> to vector<1x64xf32>
    %929 = arith.mulf %928, %25 : vector<1x64xf32>
    %930 = arith.addf %926, %929 : vector<1x64xf32>
    %931 = vector.extract_strided_slice %892 {offsets = [0, 9], sizes = [1, 1], strides = [1, 1]} : vector<1x16xf32> to vector<1x1xf32>
    %932 = vector.broadcast %931 : vector<1x1xf32> to vector<1x64xf32>
    %933 = arith.mulf %932, %26 : vector<1x64xf32>
    %934 = arith.addf %930, %933 : vector<1x64xf32>
    %935 = vector.extract_strided_slice %892 {offsets = [0, 10], sizes = [1, 1], strides = [1, 1]} : vector<1x16xf32> to vector<1x1xf32>
    %936 = vector.broadcast %935 : vector<1x1xf32> to vector<1x64xf32>
    %937 = arith.mulf %936, %27 : vector<1x64xf32>
    %938 = arith.addf %934, %937 : vector<1x64xf32>
    %939 = vector.extract_strided_slice %892 {offsets = [0, 11], sizes = [1, 1], strides = [1, 1]} : vector<1x16xf32> to vector<1x1xf32>
    %940 = vector.broadcast %939 : vector<1x1xf32> to vector<1x64xf32>
    %941 = arith.mulf %940, %28 : vector<1x64xf32>
    %942 = arith.addf %938, %941 : vector<1x64xf32>
    %943 = vector.extract_strided_slice %892 {offsets = [0, 12], sizes = [1, 1], strides = [1, 1]} : vector<1x16xf32> to vector<1x1xf32>
    %944 = vector.broadcast %943 : vector<1x1xf32> to vector<1x64xf32>
    %945 = arith.mulf %944, %29 : vector<1x64xf32>
    %946 = arith.addf %942, %945 : vector<1x64xf32>
    %947 = vector.extract_strided_slice %892 {offsets = [0, 13], sizes = [1, 1], strides = [1, 1]} : vector<1x16xf32> to vector<1x1xf32>
    %948 = vector.broadcast %947 : vector<1x1xf32> to vector<1x64xf32>
    %949 = arith.mulf %948, %30 : vector<1x64xf32>
    %950 = arith.addf %946, %949 : vector<1x64xf32>
    %951 = vector.extract_strided_slice %892 {offsets = [0, 14], sizes = [1, 1], strides = [1, 1]} : vector<1x16xf32> to vector<1x1xf32>
    %952 = vector.broadcast %951 : vector<1x1xf32> to vector<1x64xf32>
    %953 = arith.mulf %952, %31 : vector<1x64xf32>
    %954 = arith.addf %950, %953 : vector<1x64xf32>
    %955 = vector.extract_strided_slice %892 {offsets = [0, 15], sizes = [1, 1], strides = [1, 1]} : vector<1x16xf32> to vector<1x1xf32>
    %956 = vector.broadcast %955 : vector<1x1xf32> to vector<1x64xf32>
    %957 = arith.mulf %956, %32 : vector<1x64xf32>
    %958 = arith.addf %954, %957 : vector<1x64xf32>
    %959 = vector.extract_strided_slice %958 {offsets = [0, 0], sizes = [1, 48], strides = [1, 1]} : vector<1x64xf32> to vector<1x48xf32>
    %cst_110 = arith.constant 5.000000e-01 : f32
    %960 = vector.broadcast %cst_110 : f32 to vector<1x48xf32>
    %961 = arith.mulf %960, %959 : vector<1x48xf32>
    %962 = math.tanh %961 : vector<1x48xf32>
    %cst_111 = arith.constant 5.000000e-01 : f32
    %963 = vector.broadcast %cst_111 : f32 to vector<1x48xf32>
    %964 = arith.mulf %963, %962 : vector<1x48xf32>
    %cst_112 = arith.constant 5.000000e-01 : f32
    %965 = vector.broadcast %cst_112 : f32 to vector<1x48xf32>
    %966 = arith.addf %964, %965 : vector<1x48xf32>
    %967 = vector.extract_strided_slice %958 {offsets = [0, 48], sizes = [1, 16], strides = [1, 1]} : vector<1x64xf32> to vector<1x16xf32>
    %968 = math.tanh %967 : vector<1x16xf32>
    %969 = vector.extract_strided_slice %966 {offsets = [0, 0], sizes = [1, 16], strides = [1, 1]} : vector<1x48xf32> to vector<1x16xf32>
    %970 = vector.extract_strided_slice %966 {offsets = [0, 16], sizes = [1, 16], strides = [1, 1]} : vector<1x48xf32> to vector<1x16xf32>
    %971 = vector.extract_strided_slice %966 {offsets = [0, 32], sizes = [1, 16], strides = [1, 1]} : vector<1x48xf32> to vector<1x16xf32>
    %972 = arith.mulf %970, %890 : vector<1x16xf32>
    %973 = arith.mulf %969, %968 : vector<1x16xf32>
    %974 = arith.addf %972, %973 : vector<1x16xf32>
    %975 = math.tanh %974 : vector<1x16xf32>
    %976 = arith.mulf %971, %975 : vector<1x16xf32>
    %c11_113 = arith.constant 11 : index
    %c0_114 = arith.constant 0 : index
    %977 = vector.load %arg13[%c11_113, %c0_114] : memref<32x16xf32, #tpu.memory_space<vmem>>, vector<1x16xf32>
    tpu.vector_store %arg13[%c11_113, %c0_114], %976 {strides = array<i32>} : memref<32x16xf32, #tpu.memory_space<vmem>>, vector<1x16xf32>,
    %c12_115 = arith.constant 12 : index
    %c0_116 = arith.constant 0 : index
    %978 = vector.load %arg12[%c12_115, %c0_116] : memref<32x64xf32, #tpu.memory_space<vmem>>, vector<1x64xf32>
    %979 = vector.extract_strided_slice %976 {offsets = [0, 0], sizes = [1, 1], strides = [1, 1]} : vector<1x16xf32> to vector<1x1xf32>
    %980 = vector.broadcast %979 : vector<1x1xf32> to vector<1x64xf32>
    %981 = arith.mulf %980, %17 : vector<1x64xf32>
    %982 = arith.addf %978, %981 : vector<1x64xf32>
    %983 = vector.extract_strided_slice %976 {offsets = [0, 1], sizes = [1, 1], strides = [1, 1]} : vector<1x16xf32> to vector<1x1xf32>
    %984 = vector.broadcast %983 : vector<1x1xf32> to vector<1x64xf32>
    %985 = arith.mulf %984, %18 : vector<1x64xf32>
    %986 = arith.addf %982, %985 : vector<1x64xf32>
    %987 = vector.extract_strided_slice %976 {offsets = [0, 2], sizes = [1, 1], strides = [1, 1]} : vector<1x16xf32> to vector<1x1xf32>
    %988 = vector.broadcast %987 : vector<1x1xf32> to vector<1x64xf32>
    %989 = arith.mulf %988, %19 : vector<1x64xf32>
    %990 = arith.addf %986, %989 : vector<1x64xf32>
    %991 = vector.extract_strided_slice %976 {offsets = [0, 3], sizes = [1, 1], strides = [1, 1]} : vector<1x16xf32> to vector<1x1xf32>
    %992 = vector.broadcast %991 : vector<1x1xf32> to vector<1x64xf32>
    %993 = arith.mulf %992, %20 : vector<1x64xf32>
    %994 = arith.addf %990, %993 : vector<1x64xf32>
    %995 = vector.extract_strided_slice %976 {offsets = [0, 4], sizes = [1, 1], strides = [1, 1]} : vector<1x16xf32> to vector<1x1xf32>
    %996 = vector.broadcast %995 : vector<1x1xf32> to vector<1x64xf32>
    %997 = arith.mulf %996, %21 : vector<1x64xf32>
    %998 = arith.addf %994, %997 : vector<1x64xf32>
    %999 = vector.extract_strided_slice %976 {offsets = [0, 5], sizes = [1, 1], strides = [1, 1]} : vector<1x16xf32> to vector<1x1xf32>
    %1000 = vector.broadcast %999 : vector<1x1xf32> to vector<1x64xf32>
    %1001 = arith.mulf %1000, %22 : vector<1x64xf32>
    %1002 = arith.addf %998, %1001 : vector<1x64xf32>
    %1003 = vector.extract_strided_slice %976 {offsets = [0, 6], sizes = [1, 1], strides = [1, 1]} : vector<1x16xf32> to vector<1x1xf32>
    %1004 = vector.broadcast %1003 : vector<1x1xf32> to vector<1x64xf32>
    %1005 = arith.mulf %1004, %23 : vector<1x64xf32>
    %1006 = arith.addf %1002, %1005 : vector<1x64xf32>
    %1007 = vector.extract_strided_slice %976 {offsets = [0, 7], sizes = [1, 1], strides = [1, 1]} : vector<1x16xf32> to vector<1x1xf32>
    %1008 = vector.broadcast %1007 : vector<1x1xf32> to vector<1x64xf32>
    %1009 = arith.mulf %1008, %24 : vector<1x64xf32>
    %1010 = arith.addf %1006, %1009 : vector<1x64xf32>
    %1011 = vector.extract_strided_slice %976 {offsets = [0, 8], sizes = [1, 1], strides = [1, 1]} : vector<1x16xf32> to vector<1x1xf32>
    %1012 = vector.broadcast %1011 : vector<1x1xf32> to vector<1x64xf32>
    %1013 = arith.mulf %1012, %25 : vector<1x64xf32>
    %1014 = arith.addf %1010, %1013 : vector<1x64xf32>
    %1015 = vector.extract_strided_slice %976 {offsets = [0, 9], sizes = [1, 1], strides = [1, 1]} : vector<1x16xf32> to vector<1x1xf32>
    %1016 = vector.broadcast %1015 : vector<1x1xf32> to vector<1x64xf32>
    %1017 = arith.mulf %1016, %26 : vector<1x64xf32>
    %1018 = arith.addf %1014, %1017 : vector<1x64xf32>
    %1019 = vector.extract_strided_slice %976 {offsets = [0, 10], sizes = [1, 1], strides = [1, 1]} : vector<1x16xf32> to vector<1x1xf32>
    %1020 = vector.broadcast %1019 : vector<1x1xf32> to vector<1x64xf32>
    %1021 = arith.mulf %1020, %27 : vector<1x64xf32>
    %1022 = arith.addf %1018, %1021 : vector<1x64xf32>
    %1023 = vector.extract_strided_slice %976 {offsets = [0, 11], sizes = [1, 1], strides = [1, 1]} : vector<1x16xf32> to vector<1x1xf32>
    %1024 = vector.broadcast %1023 : vector<1x1xf32> to vector<1x64xf32>
    %1025 = arith.mulf %1024, %28 : vector<1x64xf32>
    %1026 = arith.addf %1022, %1025 : vector<1x64xf32>
    %1027 = vector.extract_strided_slice %976 {offsets = [0, 12], sizes = [1, 1], strides = [1, 1]} : vector<1x16xf32> to vector<1x1xf32>
    %1028 = vector.broadcast %1027 : vector<1x1xf32> to vector<1x64xf32>
    %1029 = arith.mulf %1028, %29 : vector<1x64xf32>
    %1030 = arith.addf %1026, %1029 : vector<1x64xf32>
    %1031 = vector.extract_strided_slice %976 {offsets = [0, 13], sizes = [1, 1], strides = [1, 1]} : vector<1x16xf32> to vector<1x1xf32>
    %1032 = vector.broadcast %1031 : vector<1x1xf32> to vector<1x64xf32>
    %1033 = arith.mulf %1032, %30 : vector<1x64xf32>
    %1034 = arith.addf %1030, %1033 : vector<1x64xf32>
    %1035 = vector.extract_strided_slice %976 {offsets = [0, 14], sizes = [1, 1], strides = [1, 1]} : vector<1x16xf32> to vector<1x1xf32>
    %1036 = vector.broadcast %1035 : vector<1x1xf32> to vector<1x64xf32>
    %1037 = arith.mulf %1036, %31 : vector<1x64xf32>
    %1038 = arith.addf %1034, %1037 : vector<1x64xf32>
    %1039 = vector.extract_strided_slice %976 {offsets = [0, 15], sizes = [1, 1], strides = [1, 1]} : vector<1x16xf32> to vector<1x1xf32>
    %1040 = vector.broadcast %1039 : vector<1x1xf32> to vector<1x64xf32>
    %1041 = arith.mulf %1040, %32 : vector<1x64xf32>
    %1042 = arith.addf %1038, %1041 : vector<1x64xf32>
    %1043 = vector.extract_strided_slice %1042 {offsets = [0, 0], sizes = [1, 48], strides = [1, 1]} : vector<1x64xf32> to vector<1x48xf32>
    %cst_117 = arith.constant 5.000000e-01 : f32
    %1044 = vector.broadcast %cst_117 : f32 to vector<1x48xf32>
    %1045 = arith.mulf %1044, %1043 : vector<1x48xf32>
    %1046 = math.tanh %1045 : vector<1x48xf32>
    %cst_118 = arith.constant 5.000000e-01 : f32
    %1047 = vector.broadcast %cst_118 : f32 to vector<1x48xf32>
    %1048 = arith.mulf %1047, %1046 : vector<1x48xf32>
    %cst_119 = arith.constant 5.000000e-01 : f32
    %1049 = vector.broadcast %cst_119 : f32 to vector<1x48xf32>
    %1050 = arith.addf %1048, %1049 : vector<1x48xf32>
    %1051 = vector.extract_strided_slice %1042 {offsets = [0, 48], sizes = [1, 16], strides = [1, 1]} : vector<1x64xf32> to vector<1x16xf32>
    %1052 = math.tanh %1051 : vector<1x16xf32>
    %1053 = vector.extract_strided_slice %1050 {offsets = [0, 0], sizes = [1, 16], strides = [1, 1]} : vector<1x48xf32> to vector<1x16xf32>
    %1054 = vector.extract_strided_slice %1050 {offsets = [0, 16], sizes = [1, 16], strides = [1, 1]} : vector<1x48xf32> to vector<1x16xf32>
    %1055 = vector.extract_strided_slice %1050 {offsets = [0, 32], sizes = [1, 16], strides = [1, 1]} : vector<1x48xf32> to vector<1x16xf32>
    %1056 = arith.mulf %1054, %974 : vector<1x16xf32>
    %1057 = arith.mulf %1053, %1052 : vector<1x16xf32>
    %1058 = arith.addf %1056, %1057 : vector<1x16xf32>
    %1059 = math.tanh %1058 : vector<1x16xf32>
    %1060 = arith.mulf %1055, %1059 : vector<1x16xf32>
    %c12_120 = arith.constant 12 : index
    %c0_121 = arith.constant 0 : index
    %1061 = vector.load %arg13[%c12_120, %c0_121] : memref<32x16xf32, #tpu.memory_space<vmem>>, vector<1x16xf32>
    tpu.vector_store %arg13[%c12_120, %c0_121], %1060 {strides = array<i32>} : memref<32x16xf32, #tpu.memory_space<vmem>>, vector<1x16xf32>,
    %c13_122 = arith.constant 13 : index
    %c0_123 = arith.constant 0 : index
    %1062 = vector.load %arg12[%c13_122, %c0_123] : memref<32x64xf32, #tpu.memory_space<vmem>>, vector<1x64xf32>
    %1063 = vector.extract_strided_slice %1060 {offsets = [0, 0], sizes = [1, 1], strides = [1, 1]} : vector<1x16xf32> to vector<1x1xf32>
    %1064 = vector.broadcast %1063 : vector<1x1xf32> to vector<1x64xf32>
    %1065 = arith.mulf %1064, %17 : vector<1x64xf32>
    %1066 = arith.addf %1062, %1065 : vector<1x64xf32>
    %1067 = vector.extract_strided_slice %1060 {offsets = [0, 1], sizes = [1, 1], strides = [1, 1]} : vector<1x16xf32> to vector<1x1xf32>
    %1068 = vector.broadcast %1067 : vector<1x1xf32> to vector<1x64xf32>
    %1069 = arith.mulf %1068, %18 : vector<1x64xf32>
    %1070 = arith.addf %1066, %1069 : vector<1x64xf32>
    %1071 = vector.extract_strided_slice %1060 {offsets = [0, 2], sizes = [1, 1], strides = [1, 1]} : vector<1x16xf32> to vector<1x1xf32>
    %1072 = vector.broadcast %1071 : vector<1x1xf32> to vector<1x64xf32>
    %1073 = arith.mulf %1072, %19 : vector<1x64xf32>
    %1074 = arith.addf %1070, %1073 : vector<1x64xf32>
    %1075 = vector.extract_strided_slice %1060 {offsets = [0, 3], sizes = [1, 1], strides = [1, 1]} : vector<1x16xf32> to vector<1x1xf32>
    %1076 = vector.broadcast %1075 : vector<1x1xf32> to vector<1x64xf32>
    %1077 = arith.mulf %1076, %20 : vector<1x64xf32>
    %1078 = arith.addf %1074, %1077 : vector<1x64xf32>
    %1079 = vector.extract_strided_slice %1060 {offsets = [0, 4], sizes = [1, 1], strides = [1, 1]} : vector<1x16xf32> to vector<1x1xf32>
    %1080 = vector.broadcast %1079 : vector<1x1xf32> to vector<1x64xf32>
    %1081 = arith.mulf %1080, %21 : vector<1x64xf32>
    %1082 = arith.addf %1078, %1081 : vector<1x64xf32>
    %1083 = vector.extract_strided_slice %1060 {offsets = [0, 5], sizes = [1, 1], strides = [1, 1]} : vector<1x16xf32> to vector<1x1xf32>
    %1084 = vector.broadcast %1083 : vector<1x1xf32> to vector<1x64xf32>
    %1085 = arith.mulf %1084, %22 : vector<1x64xf32>
    %1086 = arith.addf %1082, %1085 : vector<1x64xf32>
    %1087 = vector.extract_strided_slice %1060 {offsets = [0, 6], sizes = [1, 1], strides = [1, 1]} : vector<1x16xf32> to vector<1x1xf32>
    %1088 = vector.broadcast %1087 : vector<1x1xf32> to vector<1x64xf32>
    %1089 = arith.mulf %1088, %23 : vector<1x64xf32>
    %1090 = arith.addf %1086, %1089 : vector<1x64xf32>
    %1091 = vector.extract_strided_slice %1060 {offsets = [0, 7], sizes = [1, 1], strides = [1, 1]} : vector<1x16xf32> to vector<1x1xf32>
    %1092 = vector.broadcast %1091 : vector<1x1xf32> to vector<1x64xf32>
    %1093 = arith.mulf %1092, %24 : vector<1x64xf32>
    %1094 = arith.addf %1090, %1093 : vector<1x64xf32>
    %1095 = vector.extract_strided_slice %1060 {offsets = [0, 8], sizes = [1, 1], strides = [1, 1]} : vector<1x16xf32> to vector<1x1xf32>
    %1096 = vector.broadcast %1095 : vector<1x1xf32> to vector<1x64xf32>
    %1097 = arith.mulf %1096, %25 : vector<1x64xf32>
    %1098 = arith.addf %1094, %1097 : vector<1x64xf32>
    %1099 = vector.extract_strided_slice %1060 {offsets = [0, 9], sizes = [1, 1], strides = [1, 1]} : vector<1x16xf32> to vector<1x1xf32>
    %1100 = vector.broadcast %1099 : vector<1x1xf32> to vector<1x64xf32>
    %1101 = arith.mulf %1100, %26 : vector<1x64xf32>
    %1102 = arith.addf %1098, %1101 : vector<1x64xf32>
    %1103 = vector.extract_strided_slice %1060 {offsets = [0, 10], sizes = [1, 1], strides = [1, 1]} : vector<1x16xf32> to vector<1x1xf32>
    %1104 = vector.broadcast %1103 : vector<1x1xf32> to vector<1x64xf32>
    %1105 = arith.mulf %1104, %27 : vector<1x64xf32>
    %1106 = arith.addf %1102, %1105 : vector<1x64xf32>
    %1107 = vector.extract_strided_slice %1060 {offsets = [0, 11], sizes = [1, 1], strides = [1, 1]} : vector<1x16xf32> to vector<1x1xf32>
    %1108 = vector.broadcast %1107 : vector<1x1xf32> to vector<1x64xf32>
    %1109 = arith.mulf %1108, %28 : vector<1x64xf32>
    %1110 = arith.addf %1106, %1109 : vector<1x64xf32>
    %1111 = vector.extract_strided_slice %1060 {offsets = [0, 12], sizes = [1, 1], strides = [1, 1]} : vector<1x16xf32> to vector<1x1xf32>
    %1112 = vector.broadcast %1111 : vector<1x1xf32> to vector<1x64xf32>
    %1113 = arith.mulf %1112, %29 : vector<1x64xf32>
    %1114 = arith.addf %1110, %1113 : vector<1x64xf32>
    %1115 = vector.extract_strided_slice %1060 {offsets = [0, 13], sizes = [1, 1], strides = [1, 1]} : vector<1x16xf32> to vector<1x1xf32>
    %1116 = vector.broadcast %1115 : vector<1x1xf32> to vector<1x64xf32>
    %1117 = arith.mulf %1116, %30 : vector<1x64xf32>
    %1118 = arith.addf %1114, %1117 : vector<1x64xf32>
    %1119 = vector.extract_strided_slice %1060 {offsets = [0, 14], sizes = [1, 1], strides = [1, 1]} : vector<1x16xf32> to vector<1x1xf32>
    %1120 = vector.broadcast %1119 : vector<1x1xf32> to vector<1x64xf32>
    %1121 = arith.mulf %1120, %31 : vector<1x64xf32>
    %1122 = arith.addf %1118, %1121 : vector<1x64xf32>
    %1123 = vector.extract_strided_slice %1060 {offsets = [0, 15], sizes = [1, 1], strides = [1, 1]} : vector<1x16xf32> to vector<1x1xf32>
    %1124 = vector.broadcast %1123 : vector<1x1xf32> to vector<1x64xf32>
    %1125 = arith.mulf %1124, %32 : vector<1x64xf32>
    %1126 = arith.addf %1122, %1125 : vector<1x64xf32>
    %1127 = vector.extract_strided_slice %1126 {offsets = [0, 0], sizes = [1, 48], strides = [1, 1]} : vector<1x64xf32> to vector<1x48xf32>
    %cst_124 = arith.constant 5.000000e-01 : f32
    %1128 = vector.broadcast %cst_124 : f32 to vector<1x48xf32>
    %1129 = arith.mulf %1128, %1127 : vector<1x48xf32>
    %1130 = math.tanh %1129 : vector<1x48xf32>
    %cst_125 = arith.constant 5.000000e-01 : f32
    %1131 = vector.broadcast %cst_125 : f32 to vector<1x48xf32>
    %1132 = arith.mulf %1131, %1130 : vector<1x48xf32>
    %cst_126 = arith.constant 5.000000e-01 : f32
    %1133 = vector.broadcast %cst_126 : f32 to vector<1x48xf32>
    %1134 = arith.addf %1132, %1133 : vector<1x48xf32>
    %1135 = vector.extract_strided_slice %1126 {offsets = [0, 48], sizes = [1, 16], strides = [1, 1]} : vector<1x64xf32> to vector<1x16xf32>
    %1136 = math.tanh %1135 : vector<1x16xf32>
    %1137 = vector.extract_strided_slice %1134 {offsets = [0, 0], sizes = [1, 16], strides = [1, 1]} : vector<1x48xf32> to vector<1x16xf32>
    %1138 = vector.extract_strided_slice %1134 {offsets = [0, 16], sizes = [1, 16], strides = [1, 1]} : vector<1x48xf32> to vector<1x16xf32>
    %1139 = vector.extract_strided_slice %1134 {offsets = [0, 32], sizes = [1, 16], strides = [1, 1]} : vector<1x48xf32> to vector<1x16xf32>
    %1140 = arith.mulf %1138, %1058 : vector<1x16xf32>
    %1141 = arith.mulf %1137, %1136 : vector<1x16xf32>
    %1142 = arith.addf %1140, %1141 : vector<1x16xf32>
    %1143 = math.tanh %1142 : vector<1x16xf32>
    %1144 = arith.mulf %1139, %1143 : vector<1x16xf32>
    %c13_127 = arith.constant 13 : index
    %c0_128 = arith.constant 0 : index
    %1145 = vector.load %arg13[%c13_127, %c0_128] : memref<32x16xf32, #tpu.memory_space<vmem>>, vector<1x16xf32>
    tpu.vector_store %arg13[%c13_127, %c0_128], %1144 {strides = array<i32>} : memref<32x16xf32, #tpu.memory_space<vmem>>, vector<1x16xf32>,
    %c14_129 = arith.constant 14 : index
    %c0_130 = arith.constant 0 : index
    %1146 = vector.load %arg12[%c14_129, %c0_130] : memref<32x64xf32, #tpu.memory_space<vmem>>, vector<1x64xf32>
    %1147 = vector.extract_strided_slice %1144 {offsets = [0, 0], sizes = [1, 1], strides = [1, 1]} : vector<1x16xf32> to vector<1x1xf32>
    %1148 = vector.broadcast %1147 : vector<1x1xf32> to vector<1x64xf32>
    %1149 = arith.mulf %1148, %17 : vector<1x64xf32>
    %1150 = arith.addf %1146, %1149 : vector<1x64xf32>
    %1151 = vector.extract_strided_slice %1144 {offsets = [0, 1], sizes = [1, 1], strides = [1, 1]} : vector<1x16xf32> to vector<1x1xf32>
    %1152 = vector.broadcast %1151 : vector<1x1xf32> to vector<1x64xf32>
    %1153 = arith.mulf %1152, %18 : vector<1x64xf32>
    %1154 = arith.addf %1150, %1153 : vector<1x64xf32>
    %1155 = vector.extract_strided_slice %1144 {offsets = [0, 2], sizes = [1, 1], strides = [1, 1]} : vector<1x16xf32> to vector<1x1xf32>
    %1156 = vector.broadcast %1155 : vector<1x1xf32> to vector<1x64xf32>
    %1157 = arith.mulf %1156, %19 : vector<1x64xf32>
    %1158 = arith.addf %1154, %1157 : vector<1x64xf32>
    %1159 = vector.extract_strided_slice %1144 {offsets = [0, 3], sizes = [1, 1], strides = [1, 1]} : vector<1x16xf32> to vector<1x1xf32>
    %1160 = vector.broadcast %1159 : vector<1x1xf32> to vector<1x64xf32>
    %1161 = arith.mulf %1160, %20 : vector<1x64xf32>
    %1162 = arith.addf %1158, %1161 : vector<1x64xf32>
    %1163 = vector.extract_strided_slice %1144 {offsets = [0, 4], sizes = [1, 1], strides = [1, 1]} : vector<1x16xf32> to vector<1x1xf32>
    %1164 = vector.broadcast %1163 : vector<1x1xf32> to vector<1x64xf32>
    %1165 = arith.mulf %1164, %21 : vector<1x64xf32>
    %1166 = arith.addf %1162, %1165 : vector<1x64xf32>
    %1167 = vector.extract_strided_slice %1144 {offsets = [0, 5], sizes = [1, 1], strides = [1, 1]} : vector<1x16xf32> to vector<1x1xf32>
    %1168 = vector.broadcast %1167 : vector<1x1xf32> to vector<1x64xf32>
    %1169 = arith.mulf %1168, %22 : vector<1x64xf32>
    %1170 = arith.addf %1166, %1169 : vector<1x64xf32>
    %1171 = vector.extract_strided_slice %1144 {offsets = [0, 6], sizes = [1, 1], strides = [1, 1]} : vector<1x16xf32> to vector<1x1xf32>
    %1172 = vector.broadcast %1171 : vector<1x1xf32> to vector<1x64xf32>
    %1173 = arith.mulf %1172, %23 : vector<1x64xf32>
    %1174 = arith.addf %1170, %1173 : vector<1x64xf32>
    %1175 = vector.extract_strided_slice %1144 {offsets = [0, 7], sizes = [1, 1], strides = [1, 1]} : vector<1x16xf32> to vector<1x1xf32>
    %1176 = vector.broadcast %1175 : vector<1x1xf32> to vector<1x64xf32>
    %1177 = arith.mulf %1176, %24 : vector<1x64xf32>
    %1178 = arith.addf %1174, %1177 : vector<1x64xf32>
    %1179 = vector.extract_strided_slice %1144 {offsets = [0, 8], sizes = [1, 1], strides = [1, 1]} : vector<1x16xf32> to vector<1x1xf32>
    %1180 = vector.broadcast %1179 : vector<1x1xf32> to vector<1x64xf32>
    %1181 = arith.mulf %1180, %25 : vector<1x64xf32>
    %1182 = arith.addf %1178, %1181 : vector<1x64xf32>
    %1183 = vector.extract_strided_slice %1144 {offsets = [0, 9], sizes = [1, 1], strides = [1, 1]} : vector<1x16xf32> to vector<1x1xf32>
    %1184 = vector.broadcast %1183 : vector<1x1xf32> to vector<1x64xf32>
    %1185 = arith.mulf %1184, %26 : vector<1x64xf32>
    %1186 = arith.addf %1182, %1185 : vector<1x64xf32>
    %1187 = vector.extract_strided_slice %1144 {offsets = [0, 10], sizes = [1, 1], strides = [1, 1]} : vector<1x16xf32> to vector<1x1xf32>
    %1188 = vector.broadcast %1187 : vector<1x1xf32> to vector<1x64xf32>
    %1189 = arith.mulf %1188, %27 : vector<1x64xf32>
    %1190 = arith.addf %1186, %1189 : vector<1x64xf32>
    %1191 = vector.extract_strided_slice %1144 {offsets = [0, 11], sizes = [1, 1], strides = [1, 1]} : vector<1x16xf32> to vector<1x1xf32>
    %1192 = vector.broadcast %1191 : vector<1x1xf32> to vector<1x64xf32>
    %1193 = arith.mulf %1192, %28 : vector<1x64xf32>
    %1194 = arith.addf %1190, %1193 : vector<1x64xf32>
    %1195 = vector.extract_strided_slice %1144 {offsets = [0, 12], sizes = [1, 1], strides = [1, 1]} : vector<1x16xf32> to vector<1x1xf32>
    %1196 = vector.broadcast %1195 : vector<1x1xf32> to vector<1x64xf32>
    %1197 = arith.mulf %1196, %29 : vector<1x64xf32>
    %1198 = arith.addf %1194, %1197 : vector<1x64xf32>
    %1199 = vector.extract_strided_slice %1144 {offsets = [0, 13], sizes = [1, 1], strides = [1, 1]} : vector<1x16xf32> to vector<1x1xf32>
    %1200 = vector.broadcast %1199 : vector<1x1xf32> to vector<1x64xf32>
    %1201 = arith.mulf %1200, %30 : vector<1x64xf32>
    %1202 = arith.addf %1198, %1201 : vector<1x64xf32>
    %1203 = vector.extract_strided_slice %1144 {offsets = [0, 14], sizes = [1, 1], strides = [1, 1]} : vector<1x16xf32> to vector<1x1xf32>
    %1204 = vector.broadcast %1203 : vector<1x1xf32> to vector<1x64xf32>
    %1205 = arith.mulf %1204, %31 : vector<1x64xf32>
    %1206 = arith.addf %1202, %1205 : vector<1x64xf32>
    %1207 = vector.extract_strided_slice %1144 {offsets = [0, 15], sizes = [1, 1], strides = [1, 1]} : vector<1x16xf32> to vector<1x1xf32>
    %1208 = vector.broadcast %1207 : vector<1x1xf32> to vector<1x64xf32>
    %1209 = arith.mulf %1208, %32 : vector<1x64xf32>
    %1210 = arith.addf %1206, %1209 : vector<1x64xf32>
    %1211 = vector.extract_strided_slice %1210 {offsets = [0, 0], sizes = [1, 48], strides = [1, 1]} : vector<1x64xf32> to vector<1x48xf32>
    %cst_131 = arith.constant 5.000000e-01 : f32
    %1212 = vector.broadcast %cst_131 : f32 to vector<1x48xf32>
    %1213 = arith.mulf %1212, %1211 : vector<1x48xf32>
    %1214 = math.tanh %1213 : vector<1x48xf32>
    %cst_132 = arith.constant 5.000000e-01 : f32
    %1215 = vector.broadcast %cst_132 : f32 to vector<1x48xf32>
    %1216 = arith.mulf %1215, %1214 : vector<1x48xf32>
    %cst_133 = arith.constant 5.000000e-01 : f32
    %1217 = vector.broadcast %cst_133 : f32 to vector<1x48xf32>
    %1218 = arith.addf %1216, %1217 : vector<1x48xf32>
    %1219 = vector.extract_strided_slice %1210 {offsets = [0, 48], sizes = [1, 16], strides = [1, 1]} : vector<1x64xf32> to vector<1x16xf32>
    %1220 = math.tanh %1219 : vector<1x16xf32>
    %1221 = vector.extract_strided_slice %1218 {offsets = [0, 0], sizes = [1, 16], strides = [1, 1]} : vector<1x48xf32> to vector<1x16xf32>
    %1222 = vector.extract_strided_slice %1218 {offsets = [0, 16], sizes = [1, 16], strides = [1, 1]} : vector<1x48xf32> to vector<1x16xf32>
    %1223 = vector.extract_strided_slice %1218 {offsets = [0, 32], sizes = [1, 16], strides = [1, 1]} : vector<1x48xf32> to vector<1x16xf32>
    %1224 = arith.mulf %1222, %1142 : vector<1x16xf32>
    %1225 = arith.mulf %1221, %1220 : vector<1x16xf32>
    %1226 = arith.addf %1224, %1225 : vector<1x16xf32>
    %1227 = math.tanh %1226 : vector<1x16xf32>
    %1228 = arith.mulf %1223, %1227 : vector<1x16xf32>
    %c14_134 = arith.constant 14 : index
    %c0_135 = arith.constant 0 : index
    %1229 = vector.load %arg13[%c14_134, %c0_135] : memref<32x16xf32, #tpu.memory_space<vmem>>, vector<1x16xf32>
    tpu.vector_store %arg13[%c14_134, %c0_135], %1228 {strides = array<i32>} : memref<32x16xf32, #tpu.memory_space<vmem>>, vector<1x16xf32>,
    %c15_136 = arith.constant 15 : index
    %c0_137 = arith.constant 0 : index
    %1230 = vector.load %arg12[%c15_136, %c0_137] : memref<32x64xf32, #tpu.memory_space<vmem>>, vector<1x64xf32>
    %1231 = vector.extract_strided_slice %1228 {offsets = [0, 0], sizes = [1, 1], strides = [1, 1]} : vector<1x16xf32> to vector<1x1xf32>
    %1232 = vector.broadcast %1231 : vector<1x1xf32> to vector<1x64xf32>
    %1233 = arith.mulf %1232, %17 : vector<1x64xf32>
    %1234 = arith.addf %1230, %1233 : vector<1x64xf32>
    %1235 = vector.extract_strided_slice %1228 {offsets = [0, 1], sizes = [1, 1], strides = [1, 1]} : vector<1x16xf32> to vector<1x1xf32>
    %1236 = vector.broadcast %1235 : vector<1x1xf32> to vector<1x64xf32>
    %1237 = arith.mulf %1236, %18 : vector<1x64xf32>
    %1238 = arith.addf %1234, %1237 : vector<1x64xf32>
    %1239 = vector.extract_strided_slice %1228 {offsets = [0, 2], sizes = [1, 1], strides = [1, 1]} : vector<1x16xf32> to vector<1x1xf32>
    %1240 = vector.broadcast %1239 : vector<1x1xf32> to vector<1x64xf32>
    %1241 = arith.mulf %1240, %19 : vector<1x64xf32>
    %1242 = arith.addf %1238, %1241 : vector<1x64xf32>
    %1243 = vector.extract_strided_slice %1228 {offsets = [0, 3], sizes = [1, 1], strides = [1, 1]} : vector<1x16xf32> to vector<1x1xf32>
    %1244 = vector.broadcast %1243 : vector<1x1xf32> to vector<1x64xf32>
    %1245 = arith.mulf %1244, %20 : vector<1x64xf32>
    %1246 = arith.addf %1242, %1245 : vector<1x64xf32>
    %1247 = vector.extract_strided_slice %1228 {offsets = [0, 4], sizes = [1, 1], strides = [1, 1]} : vector<1x16xf32> to vector<1x1xf32>
    %1248 = vector.broadcast %1247 : vector<1x1xf32> to vector<1x64xf32>
    %1249 = arith.mulf %1248, %21 : vector<1x64xf32>
    %1250 = arith.addf %1246, %1249 : vector<1x64xf32>
    %1251 = vector.extract_strided_slice %1228 {offsets = [0, 5], sizes = [1, 1], strides = [1, 1]} : vector<1x16xf32> to vector<1x1xf32>
    %1252 = vector.broadcast %1251 : vector<1x1xf32> to vector<1x64xf32>
    %1253 = arith.mulf %1252, %22 : vector<1x64xf32>
    %1254 = arith.addf %1250, %1253 : vector<1x64xf32>
    %1255 = vector.extract_strided_slice %1228 {offsets = [0, 6], sizes = [1, 1], strides = [1, 1]} : vector<1x16xf32> to vector<1x1xf32>
    %1256 = vector.broadcast %1255 : vector<1x1xf32> to vector<1x64xf32>
    %1257 = arith.mulf %1256, %23 : vector<1x64xf32>
    %1258 = arith.addf %1254, %1257 : vector<1x64xf32>
    %1259 = vector.extract_strided_slice %1228 {offsets = [0, 7], sizes = [1, 1], strides = [1, 1]} : vector<1x16xf32> to vector<1x1xf32>
    %1260 = vector.broadcast %1259 : vector<1x1xf32> to vector<1x64xf32>
    %1261 = arith.mulf %1260, %24 : vector<1x64xf32>
    %1262 = arith.addf %1258, %1261 : vector<1x64xf32>
    %1263 = vector.extract_strided_slice %1228 {offsets = [0, 8], sizes = [1, 1], strides = [1, 1]} : vector<1x16xf32> to vector<1x1xf32>
    %1264 = vector.broadcast %1263 : vector<1x1xf32> to vector<1x64xf32>
    %1265 = arith.mulf %1264, %25 : vector<1x64xf32>
    %1266 = arith.addf %1262, %1265 : vector<1x64xf32>
    %1267 = vector.extract_strided_slice %1228 {offsets = [0, 9], sizes = [1, 1], strides = [1, 1]} : vector<1x16xf32> to vector<1x1xf32>
    %1268 = vector.broadcast %1267 : vector<1x1xf32> to vector<1x64xf32>
    %1269 = arith.mulf %1268, %26 : vector<1x64xf32>
    %1270 = arith.addf %1266, %1269 : vector<1x64xf32>
    %1271 = vector.extract_strided_slice %1228 {offsets = [0, 10], sizes = [1, 1], strides = [1, 1]} : vector<1x16xf32> to vector<1x1xf32>
    %1272 = vector.broadcast %1271 : vector<1x1xf32> to vector<1x64xf32>
    %1273 = arith.mulf %1272, %27 : vector<1x64xf32>
    %1274 = arith.addf %1270, %1273 : vector<1x64xf32>
    %1275 = vector.extract_strided_slice %1228 {offsets = [0, 11], sizes = [1, 1], strides = [1, 1]} : vector<1x16xf32> to vector<1x1xf32>
    %1276 = vector.broadcast %1275 : vector<1x1xf32> to vector<1x64xf32>
    %1277 = arith.mulf %1276, %28 : vector<1x64xf32>
    %1278 = arith.addf %1274, %1277 : vector<1x64xf32>
    %1279 = vector.extract_strided_slice %1228 {offsets = [0, 12], sizes = [1, 1], strides = [1, 1]} : vector<1x16xf32> to vector<1x1xf32>
    %1280 = vector.broadcast %1279 : vector<1x1xf32> to vector<1x64xf32>
    %1281 = arith.mulf %1280, %29 : vector<1x64xf32>
    %1282 = arith.addf %1278, %1281 : vector<1x64xf32>
    %1283 = vector.extract_strided_slice %1228 {offsets = [0, 13], sizes = [1, 1], strides = [1, 1]} : vector<1x16xf32> to vector<1x1xf32>
    %1284 = vector.broadcast %1283 : vector<1x1xf32> to vector<1x64xf32>
    %1285 = arith.mulf %1284, %30 : vector<1x64xf32>
    %1286 = arith.addf %1282, %1285 : vector<1x64xf32>
    %1287 = vector.extract_strided_slice %1228 {offsets = [0, 14], sizes = [1, 1], strides = [1, 1]} : vector<1x16xf32> to vector<1x1xf32>
    %1288 = vector.broadcast %1287 : vector<1x1xf32> to vector<1x64xf32>
    %1289 = arith.mulf %1288, %31 : vector<1x64xf32>
    %1290 = arith.addf %1286, %1289 : vector<1x64xf32>
    %1291 = vector.extract_strided_slice %1228 {offsets = [0, 15], sizes = [1, 1], strides = [1, 1]} : vector<1x16xf32> to vector<1x1xf32>
    %1292 = vector.broadcast %1291 : vector<1x1xf32> to vector<1x64xf32>
    %1293 = arith.mulf %1292, %32 : vector<1x64xf32>
    %1294 = arith.addf %1290, %1293 : vector<1x64xf32>
    %1295 = vector.extract_strided_slice %1294 {offsets = [0, 0], sizes = [1, 48], strides = [1, 1]} : vector<1x64xf32> to vector<1x48xf32>
    %cst_138 = arith.constant 5.000000e-01 : f32
    %1296 = vector.broadcast %cst_138 : f32 to vector<1x48xf32>
    %1297 = arith.mulf %1296, %1295 : vector<1x48xf32>
    %1298 = math.tanh %1297 : vector<1x48xf32>
    %cst_139 = arith.constant 5.000000e-01 : f32
    %1299 = vector.broadcast %cst_139 : f32 to vector<1x48xf32>
    %1300 = arith.mulf %1299, %1298 : vector<1x48xf32>
    %cst_140 = arith.constant 5.000000e-01 : f32
    %1301 = vector.broadcast %cst_140 : f32 to vector<1x48xf32>
    %1302 = arith.addf %1300, %1301 : vector<1x48xf32>
    %1303 = vector.extract_strided_slice %1294 {offsets = [0, 48], sizes = [1, 16], strides = [1, 1]} : vector<1x64xf32> to vector<1x16xf32>
    %1304 = math.tanh %1303 : vector<1x16xf32>
    %1305 = vector.extract_strided_slice %1302 {offsets = [0, 0], sizes = [1, 16], strides = [1, 1]} : vector<1x48xf32> to vector<1x16xf32>
    %1306 = vector.extract_strided_slice %1302 {offsets = [0, 16], sizes = [1, 16], strides = [1, 1]} : vector<1x48xf32> to vector<1x16xf32>
    %1307 = vector.extract_strided_slice %1302 {offsets = [0, 32], sizes = [1, 16], strides = [1, 1]} : vector<1x48xf32> to vector<1x16xf32>
    %1308 = arith.mulf %1306, %1226 : vector<1x16xf32>
    %1309 = arith.mulf %1305, %1304 : vector<1x16xf32>
    %1310 = arith.addf %1308, %1309 : vector<1x16xf32>
    %1311 = math.tanh %1310 : vector<1x16xf32>
    %1312 = arith.mulf %1307, %1311 : vector<1x16xf32>
    %c15_141 = arith.constant 15 : index
    %c0_142 = arith.constant 0 : index
    %1313 = vector.load %arg13[%c15_141, %c0_142] : memref<32x16xf32, #tpu.memory_space<vmem>>, vector<1x16xf32>
    tpu.vector_store %arg13[%c15_141, %c0_142], %1312 {strides = array<i32>} : memref<32x16xf32, #tpu.memory_space<vmem>>, vector<1x16xf32>,
    %c16 = arith.constant 16 : index
    %c0_143 = arith.constant 0 : index
    %1314 = vector.load %arg12[%c16, %c0_143] : memref<32x64xf32, #tpu.memory_space<vmem>>, vector<1x64xf32>
    %1315 = vector.extract_strided_slice %1312 {offsets = [0, 0], sizes = [1, 1], strides = [1, 1]} : vector<1x16xf32> to vector<1x1xf32>
    %1316 = vector.broadcast %1315 : vector<1x1xf32> to vector<1x64xf32>
    %1317 = arith.mulf %1316, %17 : vector<1x64xf32>
    %1318 = arith.addf %1314, %1317 : vector<1x64xf32>
    %1319 = vector.extract_strided_slice %1312 {offsets = [0, 1], sizes = [1, 1], strides = [1, 1]} : vector<1x16xf32> to vector<1x1xf32>
    %1320 = vector.broadcast %1319 : vector<1x1xf32> to vector<1x64xf32>
    %1321 = arith.mulf %1320, %18 : vector<1x64xf32>
    %1322 = arith.addf %1318, %1321 : vector<1x64xf32>
    %1323 = vector.extract_strided_slice %1312 {offsets = [0, 2], sizes = [1, 1], strides = [1, 1]} : vector<1x16xf32> to vector<1x1xf32>
    %1324 = vector.broadcast %1323 : vector<1x1xf32> to vector<1x64xf32>
    %1325 = arith.mulf %1324, %19 : vector<1x64xf32>
    %1326 = arith.addf %1322, %1325 : vector<1x64xf32>
    %1327 = vector.extract_strided_slice %1312 {offsets = [0, 3], sizes = [1, 1], strides = [1, 1]} : vector<1x16xf32> to vector<1x1xf32>
    %1328 = vector.broadcast %1327 : vector<1x1xf32> to vector<1x64xf32>
    %1329 = arith.mulf %1328, %20 : vector<1x64xf32>
    %1330 = arith.addf %1326, %1329 : vector<1x64xf32>
    %1331 = vector.extract_strided_slice %1312 {offsets = [0, 4], sizes = [1, 1], strides = [1, 1]} : vector<1x16xf32> to vector<1x1xf32>
    %1332 = vector.broadcast %1331 : vector<1x1xf32> to vector<1x64xf32>
    %1333 = arith.mulf %1332, %21 : vector<1x64xf32>
    %1334 = arith.addf %1330, %1333 : vector<1x64xf32>
    %1335 = vector.extract_strided_slice %1312 {offsets = [0, 5], sizes = [1, 1], strides = [1, 1]} : vector<1x16xf32> to vector<1x1xf32>
    %1336 = vector.broadcast %1335 : vector<1x1xf32> to vector<1x64xf32>
    %1337 = arith.mulf %1336, %22 : vector<1x64xf32>
    %1338 = arith.addf %1334, %1337 : vector<1x64xf32>
    %1339 = vector.extract_strided_slice %1312 {offsets = [0, 6], sizes = [1, 1], strides = [1, 1]} : vector<1x16xf32> to vector<1x1xf32>
    %1340 = vector.broadcast %1339 : vector<1x1xf32> to vector<1x64xf32>
    %1341 = arith.mulf %1340, %23 : vector<1x64xf32>
    %1342 = arith.addf %1338, %1341 : vector<1x64xf32>
    %1343 = vector.extract_strided_slice %1312 {offsets = [0, 7], sizes = [1, 1], strides = [1, 1]} : vector<1x16xf32> to vector<1x1xf32>
    %1344 = vector.broadcast %1343 : vector<1x1xf32> to vector<1x64xf32>
    %1345 = arith.mulf %1344, %24 : vector<1x64xf32>
    %1346 = arith.addf %1342, %1345 : vector<1x64xf32>
    %1347 = vector.extract_strided_slice %1312 {offsets = [0, 8], sizes = [1, 1], strides = [1, 1]} : vector<1x16xf32> to vector<1x1xf32>
    %1348 = vector.broadcast %1347 : vector<1x1xf32> to vector<1x64xf32>
    %1349 = arith.mulf %1348, %25 : vector<1x64xf32>
    %1350 = arith.addf %1346, %1349 : vector<1x64xf32>
    %1351 = vector.extract_strided_slice %1312 {offsets = [0, 9], sizes = [1, 1], strides = [1, 1]} : vector<1x16xf32> to vector<1x1xf32>
    %1352 = vector.broadcast %1351 : vector<1x1xf32> to vector<1x64xf32>
    %1353 = arith.mulf %1352, %26 : vector<1x64xf32>
    %1354 = arith.addf %1350, %1353 : vector<1x64xf32>
    %1355 = vector.extract_strided_slice %1312 {offsets = [0, 10], sizes = [1, 1], strides = [1, 1]} : vector<1x16xf32> to vector<1x1xf32>
    %1356 = vector.broadcast %1355 : vector<1x1xf32> to vector<1x64xf32>
    %1357 = arith.mulf %1356, %27 : vector<1x64xf32>
    %1358 = arith.addf %1354, %1357 : vector<1x64xf32>
    %1359 = vector.extract_strided_slice %1312 {offsets = [0, 11], sizes = [1, 1], strides = [1, 1]} : vector<1x16xf32> to vector<1x1xf32>
    %1360 = vector.broadcast %1359 : vector<1x1xf32> to vector<1x64xf32>
    %1361 = arith.mulf %1360, %28 : vector<1x64xf32>
    %1362 = arith.addf %1358, %1361 : vector<1x64xf32>
    %1363 = vector.extract_strided_slice %1312 {offsets = [0, 12], sizes = [1, 1], strides = [1, 1]} : vector<1x16xf32> to vector<1x1xf32>
    %1364 = vector.broadcast %1363 : vector<1x1xf32> to vector<1x64xf32>
    %1365 = arith.mulf %1364, %29 : vector<1x64xf32>
    %1366 = arith.addf %1362, %1365 : vector<1x64xf32>
    %1367 = vector.extract_strided_slice %1312 {offsets = [0, 13], sizes = [1, 1], strides = [1, 1]} : vector<1x16xf32> to vector<1x1xf32>
    %1368 = vector.broadcast %1367 : vector<1x1xf32> to vector<1x64xf32>
    %1369 = arith.mulf %1368, %30 : vector<1x64xf32>
    %1370 = arith.addf %1366, %1369 : vector<1x64xf32>
    %1371 = vector.extract_strided_slice %1312 {offsets = [0, 14], sizes = [1, 1], strides = [1, 1]} : vector<1x16xf32> to vector<1x1xf32>
    %1372 = vector.broadcast %1371 : vector<1x1xf32> to vector<1x64xf32>
    %1373 = arith.mulf %1372, %31 : vector<1x64xf32>
    %1374 = arith.addf %1370, %1373 : vector<1x64xf32>
    %1375 = vector.extract_strided_slice %1312 {offsets = [0, 15], sizes = [1, 1], strides = [1, 1]} : vector<1x16xf32> to vector<1x1xf32>
    %1376 = vector.broadcast %1375 : vector<1x1xf32> to vector<1x64xf32>
    %1377 = arith.mulf %1376, %32 : vector<1x64xf32>
    %1378 = arith.addf %1374, %1377 : vector<1x64xf32>
    %1379 = vector.extract_strided_slice %1378 {offsets = [0, 0], sizes = [1, 48], strides = [1, 1]} : vector<1x64xf32> to vector<1x48xf32>
    %cst_144 = arith.constant 5.000000e-01 : f32
    %1380 = vector.broadcast %cst_144 : f32 to vector<1x48xf32>
    %1381 = arith.mulf %1380, %1379 : vector<1x48xf32>
    %1382 = math.tanh %1381 : vector<1x48xf32>
    %cst_145 = arith.constant 5.000000e-01 : f32
    %1383 = vector.broadcast %cst_145 : f32 to vector<1x48xf32>
    %1384 = arith.mulf %1383, %1382 : vector<1x48xf32>
    %cst_146 = arith.constant 5.000000e-01 : f32
    %1385 = vector.broadcast %cst_146 : f32 to vector<1x48xf32>
    %1386 = arith.addf %1384, %1385 : vector<1x48xf32>
    %1387 = vector.extract_strided_slice %1378 {offsets = [0, 48], sizes = [1, 16], strides = [1, 1]} : vector<1x64xf32> to vector<1x16xf32>
    %1388 = math.tanh %1387 : vector<1x16xf32>
    %1389 = vector.extract_strided_slice %1386 {offsets = [0, 0], sizes = [1, 16], strides = [1, 1]} : vector<1x48xf32> to vector<1x16xf32>
    %1390 = vector.extract_strided_slice %1386 {offsets = [0, 16], sizes = [1, 16], strides = [1, 1]} : vector<1x48xf32> to vector<1x16xf32>
    %1391 = vector.extract_strided_slice %1386 {offsets = [0, 32], sizes = [1, 16], strides = [1, 1]} : vector<1x48xf32> to vector<1x16xf32>
    %1392 = arith.mulf %1390, %1310 : vector<1x16xf32>
    %1393 = arith.mulf %1389, %1388 : vector<1x16xf32>
    %1394 = arith.addf %1392, %1393 : vector<1x16xf32>
    %1395 = math.tanh %1394 : vector<1x16xf32>
    %1396 = arith.mulf %1391, %1395 : vector<1x16xf32>
    %c16_147 = arith.constant 16 : index
    %c0_148 = arith.constant 0 : index
    %1397 = vector.load %arg13[%c16_147, %c0_148] : memref<32x16xf32, #tpu.memory_space<vmem>>, vector<1x16xf32>
    tpu.vector_store %arg13[%c16_147, %c0_148], %1396 {strides = array<i32>} : memref<32x16xf32, #tpu.memory_space<vmem>>, vector<1x16xf32>,
    %c17 = arith.constant 17 : index
    %c0_149 = arith.constant 0 : index
    %1398 = vector.load %arg12[%c17, %c0_149] : memref<32x64xf32, #tpu.memory_space<vmem>>, vector<1x64xf32>
    %1399 = vector.extract_strided_slice %1396 {offsets = [0, 0], sizes = [1, 1], strides = [1, 1]} : vector<1x16xf32> to vector<1x1xf32>
    %1400 = vector.broadcast %1399 : vector<1x1xf32> to vector<1x64xf32>
    %1401 = arith.mulf %1400, %17 : vector<1x64xf32>
    %1402 = arith.addf %1398, %1401 : vector<1x64xf32>
    %1403 = vector.extract_strided_slice %1396 {offsets = [0, 1], sizes = [1, 1], strides = [1, 1]} : vector<1x16xf32> to vector<1x1xf32>
    %1404 = vector.broadcast %1403 : vector<1x1xf32> to vector<1x64xf32>
    %1405 = arith.mulf %1404, %18 : vector<1x64xf32>
    %1406 = arith.addf %1402, %1405 : vector<1x64xf32>
    %1407 = vector.extract_strided_slice %1396 {offsets = [0, 2], sizes = [1, 1], strides = [1, 1]} : vector<1x16xf32> to vector<1x1xf32>
    %1408 = vector.broadcast %1407 : vector<1x1xf32> to vector<1x64xf32>
    %1409 = arith.mulf %1408, %19 : vector<1x64xf32>
    %1410 = arith.addf %1406, %1409 : vector<1x64xf32>
    %1411 = vector.extract_strided_slice %1396 {offsets = [0, 3], sizes = [1, 1], strides = [1, 1]} : vector<1x16xf32> to vector<1x1xf32>
    %1412 = vector.broadcast %1411 : vector<1x1xf32> to vector<1x64xf32>
    %1413 = arith.mulf %1412, %20 : vector<1x64xf32>
    %1414 = arith.addf %1410, %1413 : vector<1x64xf32>
    %1415 = vector.extract_strided_slice %1396 {offsets = [0, 4], sizes = [1, 1], strides = [1, 1]} : vector<1x16xf32> to vector<1x1xf32>
    %1416 = vector.broadcast %1415 : vector<1x1xf32> to vector<1x64xf32>
    %1417 = arith.mulf %1416, %21 : vector<1x64xf32>
    %1418 = arith.addf %1414, %1417 : vector<1x64xf32>
    %1419 = vector.extract_strided_slice %1396 {offsets = [0, 5], sizes = [1, 1], strides = [1, 1]} : vector<1x16xf32> to vector<1x1xf32>
    %1420 = vector.broadcast %1419 : vector<1x1xf32> to vector<1x64xf32>
    %1421 = arith.mulf %1420, %22 : vector<1x64xf32>
    %1422 = arith.addf %1418, %1421 : vector<1x64xf32>
    %1423 = vector.extract_strided_slice %1396 {offsets = [0, 6], sizes = [1, 1], strides = [1, 1]} : vector<1x16xf32> to vector<1x1xf32>
    %1424 = vector.broadcast %1423 : vector<1x1xf32> to vector<1x64xf32>
    %1425 = arith.mulf %1424, %23 : vector<1x64xf32>
    %1426 = arith.addf %1422, %1425 : vector<1x64xf32>
    %1427 = vector.extract_strided_slice %1396 {offsets = [0, 7], sizes = [1, 1], strides = [1, 1]} : vector<1x16xf32> to vector<1x1xf32>
    %1428 = vector.broadcast %1427 : vector<1x1xf32> to vector<1x64xf32>
    %1429 = arith.mulf %1428, %24 : vector<1x64xf32>
    %1430 = arith.addf %1426, %1429 : vector<1x64xf32>
    %1431 = vector.extract_strided_slice %1396 {offsets = [0, 8], sizes = [1, 1], strides = [1, 1]} : vector<1x16xf32> to vector<1x1xf32>
    %1432 = vector.broadcast %1431 : vector<1x1xf32> to vector<1x64xf32>
    %1433 = arith.mulf %1432, %25 : vector<1x64xf32>
    %1434 = arith.addf %1430, %1433 : vector<1x64xf32>
    %1435 = vector.extract_strided_slice %1396 {offsets = [0, 9], sizes = [1, 1], strides = [1, 1]} : vector<1x16xf32> to vector<1x1xf32>
    %1436 = vector.broadcast %1435 : vector<1x1xf32> to vector<1x64xf32>
    %1437 = arith.mulf %1436, %26 : vector<1x64xf32>
    %1438 = arith.addf %1434, %1437 : vector<1x64xf32>
    %1439 = vector.extract_strided_slice %1396 {offsets = [0, 10], sizes = [1, 1], strides = [1, 1]} : vector<1x16xf32> to vector<1x1xf32>
    %1440 = vector.broadcast %1439 : vector<1x1xf32> to vector<1x64xf32>
    %1441 = arith.mulf %1440, %27 : vector<1x64xf32>
    %1442 = arith.addf %1438, %1441 : vector<1x64xf32>
    %1443 = vector.extract_strided_slice %1396 {offsets = [0, 11], sizes = [1, 1], strides = [1, 1]} : vector<1x16xf32> to vector<1x1xf32>
    %1444 = vector.broadcast %1443 : vector<1x1xf32> to vector<1x64xf32>
    %1445 = arith.mulf %1444, %28 : vector<1x64xf32>
    %1446 = arith.addf %1442, %1445 : vector<1x64xf32>
    %1447 = vector.extract_strided_slice %1396 {offsets = [0, 12], sizes = [1, 1], strides = [1, 1]} : vector<1x16xf32> to vector<1x1xf32>
    %1448 = vector.broadcast %1447 : vector<1x1xf32> to vector<1x64xf32>
    %1449 = arith.mulf %1448, %29 : vector<1x64xf32>
    %1450 = arith.addf %1446, %1449 : vector<1x64xf32>
    %1451 = vector.extract_strided_slice %1396 {offsets = [0, 13], sizes = [1, 1], strides = [1, 1]} : vector<1x16xf32> to vector<1x1xf32>
    %1452 = vector.broadcast %1451 : vector<1x1xf32> to vector<1x64xf32>
    %1453 = arith.mulf %1452, %30 : vector<1x64xf32>
    %1454 = arith.addf %1450, %1453 : vector<1x64xf32>
    %1455 = vector.extract_strided_slice %1396 {offsets = [0, 14], sizes = [1, 1], strides = [1, 1]} : vector<1x16xf32> to vector<1x1xf32>
    %1456 = vector.broadcast %1455 : vector<1x1xf32> to vector<1x64xf32>
    %1457 = arith.mulf %1456, %31 : vector<1x64xf32>
    %1458 = arith.addf %1454, %1457 : vector<1x64xf32>
    %1459 = vector.extract_strided_slice %1396 {offsets = [0, 15], sizes = [1, 1], strides = [1, 1]} : vector<1x16xf32> to vector<1x1xf32>
    %1460 = vector.broadcast %1459 : vector<1x1xf32> to vector<1x64xf32>
    %1461 = arith.mulf %1460, %32 : vector<1x64xf32>
    %1462 = arith.addf %1458, %1461 : vector<1x64xf32>
    %1463 = vector.extract_strided_slice %1462 {offsets = [0, 0], sizes = [1, 48], strides = [1, 1]} : vector<1x64xf32> to vector<1x48xf32>
    %cst_150 = arith.constant 5.000000e-01 : f32
    %1464 = vector.broadcast %cst_150 : f32 to vector<1x48xf32>
    %1465 = arith.mulf %1464, %1463 : vector<1x48xf32>
    %1466 = math.tanh %1465 : vector<1x48xf32>
    %cst_151 = arith.constant 5.000000e-01 : f32
    %1467 = vector.broadcast %cst_151 : f32 to vector<1x48xf32>
    %1468 = arith.mulf %1467, %1466 : vector<1x48xf32>
    %cst_152 = arith.constant 5.000000e-01 : f32
    %1469 = vector.broadcast %cst_152 : f32 to vector<1x48xf32>
    %1470 = arith.addf %1468, %1469 : vector<1x48xf32>
    %1471 = vector.extract_strided_slice %1462 {offsets = [0, 48], sizes = [1, 16], strides = [1, 1]} : vector<1x64xf32> to vector<1x16xf32>
    %1472 = math.tanh %1471 : vector<1x16xf32>
    %1473 = vector.extract_strided_slice %1470 {offsets = [0, 0], sizes = [1, 16], strides = [1, 1]} : vector<1x48xf32> to vector<1x16xf32>
    %1474 = vector.extract_strided_slice %1470 {offsets = [0, 16], sizes = [1, 16], strides = [1, 1]} : vector<1x48xf32> to vector<1x16xf32>
    %1475 = vector.extract_strided_slice %1470 {offsets = [0, 32], sizes = [1, 16], strides = [1, 1]} : vector<1x48xf32> to vector<1x16xf32>
    %1476 = arith.mulf %1474, %1394 : vector<1x16xf32>
    %1477 = arith.mulf %1473, %1472 : vector<1x16xf32>
    %1478 = arith.addf %1476, %1477 : vector<1x16xf32>
    %1479 = math.tanh %1478 : vector<1x16xf32>
    %1480 = arith.mulf %1475, %1479 : vector<1x16xf32>
    %c17_153 = arith.constant 17 : index
    %c0_154 = arith.constant 0 : index
    %1481 = vector.load %arg13[%c17_153, %c0_154] : memref<32x16xf32, #tpu.memory_space<vmem>>, vector<1x16xf32>
    tpu.vector_store %arg13[%c17_153, %c0_154], %1480 {strides = array<i32>} : memref<32x16xf32, #tpu.memory_space<vmem>>, vector<1x16xf32>,
    %c18 = arith.constant 18 : index
    %c0_155 = arith.constant 0 : index
    %1482 = vector.load %arg12[%c18, %c0_155] : memref<32x64xf32, #tpu.memory_space<vmem>>, vector<1x64xf32>
    %1483 = vector.extract_strided_slice %1480 {offsets = [0, 0], sizes = [1, 1], strides = [1, 1]} : vector<1x16xf32> to vector<1x1xf32>
    %1484 = vector.broadcast %1483 : vector<1x1xf32> to vector<1x64xf32>
    %1485 = arith.mulf %1484, %17 : vector<1x64xf32>
    %1486 = arith.addf %1482, %1485 : vector<1x64xf32>
    %1487 = vector.extract_strided_slice %1480 {offsets = [0, 1], sizes = [1, 1], strides = [1, 1]} : vector<1x16xf32> to vector<1x1xf32>
    %1488 = vector.broadcast %1487 : vector<1x1xf32> to vector<1x64xf32>
    %1489 = arith.mulf %1488, %18 : vector<1x64xf32>
    %1490 = arith.addf %1486, %1489 : vector<1x64xf32>
    %1491 = vector.extract_strided_slice %1480 {offsets = [0, 2], sizes = [1, 1], strides = [1, 1]} : vector<1x16xf32> to vector<1x1xf32>
    %1492 = vector.broadcast %1491 : vector<1x1xf32> to vector<1x64xf32>
    %1493 = arith.mulf %1492, %19 : vector<1x64xf32>
    %1494 = arith.addf %1490, %1493 : vector<1x64xf32>
    %1495 = vector.extract_strided_slice %1480 {offsets = [0, 3], sizes = [1, 1], strides = [1, 1]} : vector<1x16xf32> to vector<1x1xf32>
    %1496 = vector.broadcast %1495 : vector<1x1xf32> to vector<1x64xf32>
    %1497 = arith.mulf %1496, %20 : vector<1x64xf32>
    %1498 = arith.addf %1494, %1497 : vector<1x64xf32>
    %1499 = vector.extract_strided_slice %1480 {offsets = [0, 4], sizes = [1, 1], strides = [1, 1]} : vector<1x16xf32> to vector<1x1xf32>
    %1500 = vector.broadcast %1499 : vector<1x1xf32> to vector<1x64xf32>
    %1501 = arith.mulf %1500, %21 : vector<1x64xf32>
    %1502 = arith.addf %1498, %1501 : vector<1x64xf32>
    %1503 = vector.extract_strided_slice %1480 {offsets = [0, 5], sizes = [1, 1], strides = [1, 1]} : vector<1x16xf32> to vector<1x1xf32>
    %1504 = vector.broadcast %1503 : vector<1x1xf32> to vector<1x64xf32>
    %1505 = arith.mulf %1504, %22 : vector<1x64xf32>
    %1506 = arith.addf %1502, %1505 : vector<1x64xf32>
    %1507 = vector.extract_strided_slice %1480 {offsets = [0, 6], sizes = [1, 1], strides = [1, 1]} : vector<1x16xf32> to vector<1x1xf32>
    %1508 = vector.broadcast %1507 : vector<1x1xf32> to vector<1x64xf32>
    %1509 = arith.mulf %1508, %23 : vector<1x64xf32>
    %1510 = arith.addf %1506, %1509 : vector<1x64xf32>
    %1511 = vector.extract_strided_slice %1480 {offsets = [0, 7], sizes = [1, 1], strides = [1, 1]} : vector<1x16xf32> to vector<1x1xf32>
    %1512 = vector.broadcast %1511 : vector<1x1xf32> to vector<1x64xf32>
    %1513 = arith.mulf %1512, %24 : vector<1x64xf32>
    %1514 = arith.addf %1510, %1513 : vector<1x64xf32>
    %1515 = vector.extract_strided_slice %1480 {offsets = [0, 8], sizes = [1, 1], strides = [1, 1]} : vector<1x16xf32> to vector<1x1xf32>
    %1516 = vector.broadcast %1515 : vector<1x1xf32> to vector<1x64xf32>
    %1517 = arith.mulf %1516, %25 : vector<1x64xf32>
    %1518 = arith.addf %1514, %1517 : vector<1x64xf32>
    %1519 = vector.extract_strided_slice %1480 {offsets = [0, 9], sizes = [1, 1], strides = [1, 1]} : vector<1x16xf32> to vector<1x1xf32>
    %1520 = vector.broadcast %1519 : vector<1x1xf32> to vector<1x64xf32>
    %1521 = arith.mulf %1520, %26 : vector<1x64xf32>
    %1522 = arith.addf %1518, %1521 : vector<1x64xf32>
    %1523 = vector.extract_strided_slice %1480 {offsets = [0, 10], sizes = [1, 1], strides = [1, 1]} : vector<1x16xf32> to vector<1x1xf32>
    %1524 = vector.broadcast %1523 : vector<1x1xf32> to vector<1x64xf32>
    %1525 = arith.mulf %1524, %27 : vector<1x64xf32>
    %1526 = arith.addf %1522, %1525 : vector<1x64xf32>
    %1527 = vector.extract_strided_slice %1480 {offsets = [0, 11], sizes = [1, 1], strides = [1, 1]} : vector<1x16xf32> to vector<1x1xf32>
    %1528 = vector.broadcast %1527 : vector<1x1xf32> to vector<1x64xf32>
    %1529 = arith.mulf %1528, %28 : vector<1x64xf32>
    %1530 = arith.addf %1526, %1529 : vector<1x64xf32>
    %1531 = vector.extract_strided_slice %1480 {offsets = [0, 12], sizes = [1, 1], strides = [1, 1]} : vector<1x16xf32> to vector<1x1xf32>
    %1532 = vector.broadcast %1531 : vector<1x1xf32> to vector<1x64xf32>
    %1533 = arith.mulf %1532, %29 : vector<1x64xf32>
    %1534 = arith.addf %1530, %1533 : vector<1x64xf32>
    %1535 = vector.extract_strided_slice %1480 {offsets = [0, 13], sizes = [1, 1], strides = [1, 1]} : vector<1x16xf32> to vector<1x1xf32>
    %1536 = vector.broadcast %1535 : vector<1x1xf32> to vector<1x64xf32>
    %1537 = arith.mulf %1536, %30 : vector<1x64xf32>
    %1538 = arith.addf %1534, %1537 : vector<1x64xf32>
    %1539 = vector.extract_strided_slice %1480 {offsets = [0, 14], sizes = [1, 1], strides = [1, 1]} : vector<1x16xf32> to vector<1x1xf32>
    %1540 = vector.broadcast %1539 : vector<1x1xf32> to vector<1x64xf32>
    %1541 = arith.mulf %1540, %31 : vector<1x64xf32>
    %1542 = arith.addf %1538, %1541 : vector<1x64xf32>
    %1543 = vector.extract_strided_slice %1480 {offsets = [0, 15], sizes = [1, 1], strides = [1, 1]} : vector<1x16xf32> to vector<1x1xf32>
    %1544 = vector.broadcast %1543 : vector<1x1xf32> to vector<1x64xf32>
    %1545 = arith.mulf %1544, %32 : vector<1x64xf32>
    %1546 = arith.addf %1542, %1545 : vector<1x64xf32>
    %1547 = vector.extract_strided_slice %1546 {offsets = [0, 0], sizes = [1, 48], strides = [1, 1]} : vector<1x64xf32> to vector<1x48xf32>
    %cst_156 = arith.constant 5.000000e-01 : f32
    %1548 = vector.broadcast %cst_156 : f32 to vector<1x48xf32>
    %1549 = arith.mulf %1548, %1547 : vector<1x48xf32>
    %1550 = math.tanh %1549 : vector<1x48xf32>
    %cst_157 = arith.constant 5.000000e-01 : f32
    %1551 = vector.broadcast %cst_157 : f32 to vector<1x48xf32>
    %1552 = arith.mulf %1551, %1550 : vector<1x48xf32>
    %cst_158 = arith.constant 5.000000e-01 : f32
    %1553 = vector.broadcast %cst_158 : f32 to vector<1x48xf32>
    %1554 = arith.addf %1552, %1553 : vector<1x48xf32>
    %1555 = vector.extract_strided_slice %1546 {offsets = [0, 48], sizes = [1, 16], strides = [1, 1]} : vector<1x64xf32> to vector<1x16xf32>
    %1556 = math.tanh %1555 : vector<1x16xf32>
    %1557 = vector.extract_strided_slice %1554 {offsets = [0, 0], sizes = [1, 16], strides = [1, 1]} : vector<1x48xf32> to vector<1x16xf32>
    %1558 = vector.extract_strided_slice %1554 {offsets = [0, 16], sizes = [1, 16], strides = [1, 1]} : vector<1x48xf32> to vector<1x16xf32>
    %1559 = vector.extract_strided_slice %1554 {offsets = [0, 32], sizes = [1, 16], strides = [1, 1]} : vector<1x48xf32> to vector<1x16xf32>
    %1560 = arith.mulf %1558, %1478 : vector<1x16xf32>
    %1561 = arith.mulf %1557, %1556 : vector<1x16xf32>
    %1562 = arith.addf %1560, %1561 : vector<1x16xf32>
    %1563 = math.tanh %1562 : vector<1x16xf32>
    %1564 = arith.mulf %1559, %1563 : vector<1x16xf32>
    %c18_159 = arith.constant 18 : index
    %c0_160 = arith.constant 0 : index
    %1565 = vector.load %arg13[%c18_159, %c0_160] : memref<32x16xf32, #tpu.memory_space<vmem>>, vector<1x16xf32>
    tpu.vector_store %arg13[%c18_159, %c0_160], %1564 {strides = array<i32>} : memref<32x16xf32, #tpu.memory_space<vmem>>, vector<1x16xf32>,
    %c19 = arith.constant 19 : index
    %c0_161 = arith.constant 0 : index
    %1566 = vector.load %arg12[%c19, %c0_161] : memref<32x64xf32, #tpu.memory_space<vmem>>, vector<1x64xf32>
    %1567 = vector.extract_strided_slice %1564 {offsets = [0, 0], sizes = [1, 1], strides = [1, 1]} : vector<1x16xf32> to vector<1x1xf32>
    %1568 = vector.broadcast %1567 : vector<1x1xf32> to vector<1x64xf32>
    %1569 = arith.mulf %1568, %17 : vector<1x64xf32>
    %1570 = arith.addf %1566, %1569 : vector<1x64xf32>
    %1571 = vector.extract_strided_slice %1564 {offsets = [0, 1], sizes = [1, 1], strides = [1, 1]} : vector<1x16xf32> to vector<1x1xf32>
    %1572 = vector.broadcast %1571 : vector<1x1xf32> to vector<1x64xf32>
    %1573 = arith.mulf %1572, %18 : vector<1x64xf32>
    %1574 = arith.addf %1570, %1573 : vector<1x64xf32>
    %1575 = vector.extract_strided_slice %1564 {offsets = [0, 2], sizes = [1, 1], strides = [1, 1]} : vector<1x16xf32> to vector<1x1xf32>
    %1576 = vector.broadcast %1575 : vector<1x1xf32> to vector<1x64xf32>
    %1577 = arith.mulf %1576, %19 : vector<1x64xf32>
    %1578 = arith.addf %1574, %1577 : vector<1x64xf32>
    %1579 = vector.extract_strided_slice %1564 {offsets = [0, 3], sizes = [1, 1], strides = [1, 1]} : vector<1x16xf32> to vector<1x1xf32>
    %1580 = vector.broadcast %1579 : vector<1x1xf32> to vector<1x64xf32>
    %1581 = arith.mulf %1580, %20 : vector<1x64xf32>
    %1582 = arith.addf %1578, %1581 : vector<1x64xf32>
    %1583 = vector.extract_strided_slice %1564 {offsets = [0, 4], sizes = [1, 1], strides = [1, 1]} : vector<1x16xf32> to vector<1x1xf32>
    %1584 = vector.broadcast %1583 : vector<1x1xf32> to vector<1x64xf32>
    %1585 = arith.mulf %1584, %21 : vector<1x64xf32>
    %1586 = arith.addf %1582, %1585 : vector<1x64xf32>
    %1587 = vector.extract_strided_slice %1564 {offsets = [0, 5], sizes = [1, 1], strides = [1, 1]} : vector<1x16xf32> to vector<1x1xf32>
    %1588 = vector.broadcast %1587 : vector<1x1xf32> to vector<1x64xf32>
    %1589 = arith.mulf %1588, %22 : vector<1x64xf32>
    %1590 = arith.addf %1586, %1589 : vector<1x64xf32>
    %1591 = vector.extract_strided_slice %1564 {offsets = [0, 6], sizes = [1, 1], strides = [1, 1]} : vector<1x16xf32> to vector<1x1xf32>
    %1592 = vector.broadcast %1591 : vector<1x1xf32> to vector<1x64xf32>
    %1593 = arith.mulf %1592, %23 : vector<1x64xf32>
    %1594 = arith.addf %1590, %1593 : vector<1x64xf32>
    %1595 = vector.extract_strided_slice %1564 {offsets = [0, 7], sizes = [1, 1], strides = [1, 1]} : vector<1x16xf32> to vector<1x1xf32>
    %1596 = vector.broadcast %1595 : vector<1x1xf32> to vector<1x64xf32>
    %1597 = arith.mulf %1596, %24 : vector<1x64xf32>
    %1598 = arith.addf %1594, %1597 : vector<1x64xf32>
    %1599 = vector.extract_strided_slice %1564 {offsets = [0, 8], sizes = [1, 1], strides = [1, 1]} : vector<1x16xf32> to vector<1x1xf32>
    %1600 = vector.broadcast %1599 : vector<1x1xf32> to vector<1x64xf32>
    %1601 = arith.mulf %1600, %25 : vector<1x64xf32>
    %1602 = arith.addf %1598, %1601 : vector<1x64xf32>
    %1603 = vector.extract_strided_slice %1564 {offsets = [0, 9], sizes = [1, 1], strides = [1, 1]} : vector<1x16xf32> to vector<1x1xf32>
    %1604 = vector.broadcast %1603 : vector<1x1xf32> to vector<1x64xf32>
    %1605 = arith.mulf %1604, %26 : vector<1x64xf32>
    %1606 = arith.addf %1602, %1605 : vector<1x64xf32>
    %1607 = vector.extract_strided_slice %1564 {offsets = [0, 10], sizes = [1, 1], strides = [1, 1]} : vector<1x16xf32> to vector<1x1xf32>
    %1608 = vector.broadcast %1607 : vector<1x1xf32> to vector<1x64xf32>
    %1609 = arith.mulf %1608, %27 : vector<1x64xf32>
    %1610 = arith.addf %1606, %1609 : vector<1x64xf32>
    %1611 = vector.extract_strided_slice %1564 {offsets = [0, 11], sizes = [1, 1], strides = [1, 1]} : vector<1x16xf32> to vector<1x1xf32>
    %1612 = vector.broadcast %1611 : vector<1x1xf32> to vector<1x64xf32>
    %1613 = arith.mulf %1612, %28 : vector<1x64xf32>
    %1614 = arith.addf %1610, %1613 : vector<1x64xf32>
    %1615 = vector.extract_strided_slice %1564 {offsets = [0, 12], sizes = [1, 1], strides = [1, 1]} : vector<1x16xf32> to vector<1x1xf32>
    %1616 = vector.broadcast %1615 : vector<1x1xf32> to vector<1x64xf32>
    %1617 = arith.mulf %1616, %29 : vector<1x64xf32>
    %1618 = arith.addf %1614, %1617 : vector<1x64xf32>
    %1619 = vector.extract_strided_slice %1564 {offsets = [0, 13], sizes = [1, 1], strides = [1, 1]} : vector<1x16xf32> to vector<1x1xf32>
    %1620 = vector.broadcast %1619 : vector<1x1xf32> to vector<1x64xf32>
    %1621 = arith.mulf %1620, %30 : vector<1x64xf32>
    %1622 = arith.addf %1618, %1621 : vector<1x64xf32>
    %1623 = vector.extract_strided_slice %1564 {offsets = [0, 14], sizes = [1, 1], strides = [1, 1]} : vector<1x16xf32> to vector<1x1xf32>
    %1624 = vector.broadcast %1623 : vector<1x1xf32> to vector<1x64xf32>
    %1625 = arith.mulf %1624, %31 : vector<1x64xf32>
    %1626 = arith.addf %1622, %1625 : vector<1x64xf32>
    %1627 = vector.extract_strided_slice %1564 {offsets = [0, 15], sizes = [1, 1], strides = [1, 1]} : vector<1x16xf32> to vector<1x1xf32>
    %1628 = vector.broadcast %1627 : vector<1x1xf32> to vector<1x64xf32>
    %1629 = arith.mulf %1628, %32 : vector<1x64xf32>
    %1630 = arith.addf %1626, %1629 : vector<1x64xf32>
    %1631 = vector.extract_strided_slice %1630 {offsets = [0, 0], sizes = [1, 48], strides = [1, 1]} : vector<1x64xf32> to vector<1x48xf32>
    %cst_162 = arith.constant 5.000000e-01 : f32
    %1632 = vector.broadcast %cst_162 : f32 to vector<1x48xf32>
    %1633 = arith.mulf %1632, %1631 : vector<1x48xf32>
    %1634 = math.tanh %1633 : vector<1x48xf32>
    %cst_163 = arith.constant 5.000000e-01 : f32
    %1635 = vector.broadcast %cst_163 : f32 to vector<1x48xf32>
    %1636 = arith.mulf %1635, %1634 : vector<1x48xf32>
    %cst_164 = arith.constant 5.000000e-01 : f32
    %1637 = vector.broadcast %cst_164 : f32 to vector<1x48xf32>
    %1638 = arith.addf %1636, %1637 : vector<1x48xf32>
    %1639 = vector.extract_strided_slice %1630 {offsets = [0, 48], sizes = [1, 16], strides = [1, 1]} : vector<1x64xf32> to vector<1x16xf32>
    %1640 = math.tanh %1639 : vector<1x16xf32>
    %1641 = vector.extract_strided_slice %1638 {offsets = [0, 0], sizes = [1, 16], strides = [1, 1]} : vector<1x48xf32> to vector<1x16xf32>
    %1642 = vector.extract_strided_slice %1638 {offsets = [0, 16], sizes = [1, 16], strides = [1, 1]} : vector<1x48xf32> to vector<1x16xf32>
    %1643 = vector.extract_strided_slice %1638 {offsets = [0, 32], sizes = [1, 16], strides = [1, 1]} : vector<1x48xf32> to vector<1x16xf32>
    %1644 = arith.mulf %1642, %1562 : vector<1x16xf32>
    %1645 = arith.mulf %1641, %1640 : vector<1x16xf32>
    %1646 = arith.addf %1644, %1645 : vector<1x16xf32>
    %1647 = math.tanh %1646 : vector<1x16xf32>
    %1648 = arith.mulf %1643, %1647 : vector<1x16xf32>
    %c19_165 = arith.constant 19 : index
    %c0_166 = arith.constant 0 : index
    %1649 = vector.load %arg13[%c19_165, %c0_166] : memref<32x16xf32, #tpu.memory_space<vmem>>, vector<1x16xf32>
    tpu.vector_store %arg13[%c19_165, %c0_166], %1648 {strides = array<i32>} : memref<32x16xf32, #tpu.memory_space<vmem>>, vector<1x16xf32>,
    %c20 = arith.constant 20 : index
    %c0_167 = arith.constant 0 : index
    %1650 = vector.load %arg12[%c20, %c0_167] : memref<32x64xf32, #tpu.memory_space<vmem>>, vector<1x64xf32>
    %1651 = vector.extract_strided_slice %1648 {offsets = [0, 0], sizes = [1, 1], strides = [1, 1]} : vector<1x16xf32> to vector<1x1xf32>
    %1652 = vector.broadcast %1651 : vector<1x1xf32> to vector<1x64xf32>
    %1653 = arith.mulf %1652, %17 : vector<1x64xf32>
    %1654 = arith.addf %1650, %1653 : vector<1x64xf32>
    %1655 = vector.extract_strided_slice %1648 {offsets = [0, 1], sizes = [1, 1], strides = [1, 1]} : vector<1x16xf32> to vector<1x1xf32>
    %1656 = vector.broadcast %1655 : vector<1x1xf32> to vector<1x64xf32>
    %1657 = arith.mulf %1656, %18 : vector<1x64xf32>
    %1658 = arith.addf %1654, %1657 : vector<1x64xf32>
    %1659 = vector.extract_strided_slice %1648 {offsets = [0, 2], sizes = [1, 1], strides = [1, 1]} : vector<1x16xf32> to vector<1x1xf32>
    %1660 = vector.broadcast %1659 : vector<1x1xf32> to vector<1x64xf32>
    %1661 = arith.mulf %1660, %19 : vector<1x64xf32>
    %1662 = arith.addf %1658, %1661 : vector<1x64xf32>
    %1663 = vector.extract_strided_slice %1648 {offsets = [0, 3], sizes = [1, 1], strides = [1, 1]} : vector<1x16xf32> to vector<1x1xf32>
    %1664 = vector.broadcast %1663 : vector<1x1xf32> to vector<1x64xf32>
    %1665 = arith.mulf %1664, %20 : vector<1x64xf32>
    %1666 = arith.addf %1662, %1665 : vector<1x64xf32>
    %1667 = vector.extract_strided_slice %1648 {offsets = [0, 4], sizes = [1, 1], strides = [1, 1]} : vector<1x16xf32> to vector<1x1xf32>
    %1668 = vector.broadcast %1667 : vector<1x1xf32> to vector<1x64xf32>
    %1669 = arith.mulf %1668, %21 : vector<1x64xf32>
    %1670 = arith.addf %1666, %1669 : vector<1x64xf32>
    %1671 = vector.extract_strided_slice %1648 {offsets = [0, 5], sizes = [1, 1], strides = [1, 1]} : vector<1x16xf32> to vector<1x1xf32>
    %1672 = vector.broadcast %1671 : vector<1x1xf32> to vector<1x64xf32>
    %1673 = arith.mulf %1672, %22 : vector<1x64xf32>
    %1674 = arith.addf %1670, %1673 : vector<1x64xf32>
    %1675 = vector.extract_strided_slice %1648 {offsets = [0, 6], sizes = [1, 1], strides = [1, 1]} : vector<1x16xf32> to vector<1x1xf32>
    %1676 = vector.broadcast %1675 : vector<1x1xf32> to vector<1x64xf32>
    %1677 = arith.mulf %1676, %23 : vector<1x64xf32>
    %1678 = arith.addf %1674, %1677 : vector<1x64xf32>
    %1679 = vector.extract_strided_slice %1648 {offsets = [0, 7], sizes = [1, 1], strides = [1, 1]} : vector<1x16xf32> to vector<1x1xf32>
    %1680 = vector.broadcast %1679 : vector<1x1xf32> to vector<1x64xf32>
    %1681 = arith.mulf %1680, %24 : vector<1x64xf32>
    %1682 = arith.addf %1678, %1681 : vector<1x64xf32>
    %1683 = vector.extract_strided_slice %1648 {offsets = [0, 8], sizes = [1, 1], strides = [1, 1]} : vector<1x16xf32> to vector<1x1xf32>
    %1684 = vector.broadcast %1683 : vector<1x1xf32> to vector<1x64xf32>
    %1685 = arith.mulf %1684, %25 : vector<1x64xf32>
    %1686 = arith.addf %1682, %1685 : vector<1x64xf32>
    %1687 = vector.extract_strided_slice %1648 {offsets = [0, 9], sizes = [1, 1], strides = [1, 1]} : vector<1x16xf32> to vector<1x1xf32>
    %1688 = vector.broadcast %1687 : vector<1x1xf32> to vector<1x64xf32>
    %1689 = arith.mulf %1688, %26 : vector<1x64xf32>
    %1690 = arith.addf %1686, %1689 : vector<1x64xf32>
    %1691 = vector.extract_strided_slice %1648 {offsets = [0, 10], sizes = [1, 1], strides = [1, 1]} : vector<1x16xf32> to vector<1x1xf32>
    %1692 = vector.broadcast %1691 : vector<1x1xf32> to vector<1x64xf32>
    %1693 = arith.mulf %1692, %27 : vector<1x64xf32>
    %1694 = arith.addf %1690, %1693 : vector<1x64xf32>
    %1695 = vector.extract_strided_slice %1648 {offsets = [0, 11], sizes = [1, 1], strides = [1, 1]} : vector<1x16xf32> to vector<1x1xf32>
    %1696 = vector.broadcast %1695 : vector<1x1xf32> to vector<1x64xf32>
    %1697 = arith.mulf %1696, %28 : vector<1x64xf32>
    %1698 = arith.addf %1694, %1697 : vector<1x64xf32>
    %1699 = vector.extract_strided_slice %1648 {offsets = [0, 12], sizes = [1, 1], strides = [1, 1]} : vector<1x16xf32> to vector<1x1xf32>
    %1700 = vector.broadcast %1699 : vector<1x1xf32> to vector<1x64xf32>
    %1701 = arith.mulf %1700, %29 : vector<1x64xf32>
    %1702 = arith.addf %1698, %1701 : vector<1x64xf32>
    %1703 = vector.extract_strided_slice %1648 {offsets = [0, 13], sizes = [1, 1], strides = [1, 1]} : vector<1x16xf32> to vector<1x1xf32>
    %1704 = vector.broadcast %1703 : vector<1x1xf32> to vector<1x64xf32>
    %1705 = arith.mulf %1704, %30 : vector<1x64xf32>
    %1706 = arith.addf %1702, %1705 : vector<1x64xf32>
    %1707 = vector.extract_strided_slice %1648 {offsets = [0, 14], sizes = [1, 1], strides = [1, 1]} : vector<1x16xf32> to vector<1x1xf32>
    %1708 = vector.broadcast %1707 : vector<1x1xf32> to vector<1x64xf32>
    %1709 = arith.mulf %1708, %31 : vector<1x64xf32>
    %1710 = arith.addf %1706, %1709 : vector<1x64xf32>
    %1711 = vector.extract_strided_slice %1648 {offsets = [0, 15], sizes = [1, 1], strides = [1, 1]} : vector<1x16xf32> to vector<1x1xf32>
    %1712 = vector.broadcast %1711 : vector<1x1xf32> to vector<1x64xf32>
    %1713 = arith.mulf %1712, %32 : vector<1x64xf32>
    %1714 = arith.addf %1710, %1713 : vector<1x64xf32>
    %1715 = vector.extract_strided_slice %1714 {offsets = [0, 0], sizes = [1, 48], strides = [1, 1]} : vector<1x64xf32> to vector<1x48xf32>
    %cst_168 = arith.constant 5.000000e-01 : f32
    %1716 = vector.broadcast %cst_168 : f32 to vector<1x48xf32>
    %1717 = arith.mulf %1716, %1715 : vector<1x48xf32>
    %1718 = math.tanh %1717 : vector<1x48xf32>
    %cst_169 = arith.constant 5.000000e-01 : f32
    %1719 = vector.broadcast %cst_169 : f32 to vector<1x48xf32>
    %1720 = arith.mulf %1719, %1718 : vector<1x48xf32>
    %cst_170 = arith.constant 5.000000e-01 : f32
    %1721 = vector.broadcast %cst_170 : f32 to vector<1x48xf32>
    %1722 = arith.addf %1720, %1721 : vector<1x48xf32>
    %1723 = vector.extract_strided_slice %1714 {offsets = [0, 48], sizes = [1, 16], strides = [1, 1]} : vector<1x64xf32> to vector<1x16xf32>
    %1724 = math.tanh %1723 : vector<1x16xf32>
    %1725 = vector.extract_strided_slice %1722 {offsets = [0, 0], sizes = [1, 16], strides = [1, 1]} : vector<1x48xf32> to vector<1x16xf32>
    %1726 = vector.extract_strided_slice %1722 {offsets = [0, 16], sizes = [1, 16], strides = [1, 1]} : vector<1x48xf32> to vector<1x16xf32>
    %1727 = vector.extract_strided_slice %1722 {offsets = [0, 32], sizes = [1, 16], strides = [1, 1]} : vector<1x48xf32> to vector<1x16xf32>
    %1728 = arith.mulf %1726, %1646 : vector<1x16xf32>
    %1729 = arith.mulf %1725, %1724 : vector<1x16xf32>
    %1730 = arith.addf %1728, %1729 : vector<1x16xf32>
    %1731 = math.tanh %1730 : vector<1x16xf32>
    %1732 = arith.mulf %1727, %1731 : vector<1x16xf32>
    %c20_171 = arith.constant 20 : index
    %c0_172 = arith.constant 0 : index
    %1733 = vector.load %arg13[%c20_171, %c0_172] : memref<32x16xf32, #tpu.memory_space<vmem>>, vector<1x16xf32>
    tpu.vector_store %arg13[%c20_171, %c0_172], %1732 {strides = array<i32>} : memref<32x16xf32, #tpu.memory_space<vmem>>, vector<1x16xf32>,
    %c21 = arith.constant 21 : index
    %c0_173 = arith.constant 0 : index
    %1734 = vector.load %arg12[%c21, %c0_173] : memref<32x64xf32, #tpu.memory_space<vmem>>, vector<1x64xf32>
    %1735 = vector.extract_strided_slice %1732 {offsets = [0, 0], sizes = [1, 1], strides = [1, 1]} : vector<1x16xf32> to vector<1x1xf32>
    %1736 = vector.broadcast %1735 : vector<1x1xf32> to vector<1x64xf32>
    %1737 = arith.mulf %1736, %17 : vector<1x64xf32>
    %1738 = arith.addf %1734, %1737 : vector<1x64xf32>
    %1739 = vector.extract_strided_slice %1732 {offsets = [0, 1], sizes = [1, 1], strides = [1, 1]} : vector<1x16xf32> to vector<1x1xf32>
    %1740 = vector.broadcast %1739 : vector<1x1xf32> to vector<1x64xf32>
    %1741 = arith.mulf %1740, %18 : vector<1x64xf32>
    %1742 = arith.addf %1738, %1741 : vector<1x64xf32>
    %1743 = vector.extract_strided_slice %1732 {offsets = [0, 2], sizes = [1, 1], strides = [1, 1]} : vector<1x16xf32> to vector<1x1xf32>
    %1744 = vector.broadcast %1743 : vector<1x1xf32> to vector<1x64xf32>
    %1745 = arith.mulf %1744, %19 : vector<1x64xf32>
    %1746 = arith.addf %1742, %1745 : vector<1x64xf32>
    %1747 = vector.extract_strided_slice %1732 {offsets = [0, 3], sizes = [1, 1], strides = [1, 1]} : vector<1x16xf32> to vector<1x1xf32>
    %1748 = vector.broadcast %1747 : vector<1x1xf32> to vector<1x64xf32>
    %1749 = arith.mulf %1748, %20 : vector<1x64xf32>
    %1750 = arith.addf %1746, %1749 : vector<1x64xf32>
    %1751 = vector.extract_strided_slice %1732 {offsets = [0, 4], sizes = [1, 1], strides = [1, 1]} : vector<1x16xf32> to vector<1x1xf32>
    %1752 = vector.broadcast %1751 : vector<1x1xf32> to vector<1x64xf32>
    %1753 = arith.mulf %1752, %21 : vector<1x64xf32>
    %1754 = arith.addf %1750, %1753 : vector<1x64xf32>
    %1755 = vector.extract_strided_slice %1732 {offsets = [0, 5], sizes = [1, 1], strides = [1, 1]} : vector<1x16xf32> to vector<1x1xf32>
    %1756 = vector.broadcast %1755 : vector<1x1xf32> to vector<1x64xf32>
    %1757 = arith.mulf %1756, %22 : vector<1x64xf32>
    %1758 = arith.addf %1754, %1757 : vector<1x64xf32>
    %1759 = vector.extract_strided_slice %1732 {offsets = [0, 6], sizes = [1, 1], strides = [1, 1]} : vector<1x16xf32> to vector<1x1xf32>
    %1760 = vector.broadcast %1759 : vector<1x1xf32> to vector<1x64xf32>
    %1761 = arith.mulf %1760, %23 : vector<1x64xf32>
    %1762 = arith.addf %1758, %1761 : vector<1x64xf32>
    %1763 = vector.extract_strided_slice %1732 {offsets = [0, 7], sizes = [1, 1], strides = [1, 1]} : vector<1x16xf32> to vector<1x1xf32>
    %1764 = vector.broadcast %1763 : vector<1x1xf32> to vector<1x64xf32>
    %1765 = arith.mulf %1764, %24 : vector<1x64xf32>
    %1766 = arith.addf %1762, %1765 : vector<1x64xf32>
    %1767 = vector.extract_strided_slice %1732 {offsets = [0, 8], sizes = [1, 1], strides = [1, 1]} : vector<1x16xf32> to vector<1x1xf32>
    %1768 = vector.broadcast %1767 : vector<1x1xf32> to vector<1x64xf32>
    %1769 = arith.mulf %1768, %25 : vector<1x64xf32>
    %1770 = arith.addf %1766, %1769 : vector<1x64xf32>
    %1771 = vector.extract_strided_slice %1732 {offsets = [0, 9], sizes = [1, 1], strides = [1, 1]} : vector<1x16xf32> to vector<1x1xf32>
    %1772 = vector.broadcast %1771 : vector<1x1xf32> to vector<1x64xf32>
    %1773 = arith.mulf %1772, %26 : vector<1x64xf32>
    %1774 = arith.addf %1770, %1773 : vector<1x64xf32>
    %1775 = vector.extract_strided_slice %1732 {offsets = [0, 10], sizes = [1, 1], strides = [1, 1]} : vector<1x16xf32> to vector<1x1xf32>
    %1776 = vector.broadcast %1775 : vector<1x1xf32> to vector<1x64xf32>
    %1777 = arith.mulf %1776, %27 : vector<1x64xf32>
    %1778 = arith.addf %1774, %1777 : vector<1x64xf32>
    %1779 = vector.extract_strided_slice %1732 {offsets = [0, 11], sizes = [1, 1], strides = [1, 1]} : vector<1x16xf32> to vector<1x1xf32>
    %1780 = vector.broadcast %1779 : vector<1x1xf32> to vector<1x64xf32>
    %1781 = arith.mulf %1780, %28 : vector<1x64xf32>
    %1782 = arith.addf %1778, %1781 : vector<1x64xf32>
    %1783 = vector.extract_strided_slice %1732 {offsets = [0, 12], sizes = [1, 1], strides = [1, 1]} : vector<1x16xf32> to vector<1x1xf32>
    %1784 = vector.broadcast %1783 : vector<1x1xf32> to vector<1x64xf32>
    %1785 = arith.mulf %1784, %29 : vector<1x64xf32>
    %1786 = arith.addf %1782, %1785 : vector<1x64xf32>
    %1787 = vector.extract_strided_slice %1732 {offsets = [0, 13], sizes = [1, 1], strides = [1, 1]} : vector<1x16xf32> to vector<1x1xf32>
    %1788 = vector.broadcast %1787 : vector<1x1xf32> to vector<1x64xf32>
    %1789 = arith.mulf %1788, %30 : vector<1x64xf32>
    %1790 = arith.addf %1786, %1789 : vector<1x64xf32>
    %1791 = vector.extract_strided_slice %1732 {offsets = [0, 14], sizes = [1, 1], strides = [1, 1]} : vector<1x16xf32> to vector<1x1xf32>
    %1792 = vector.broadcast %1791 : vector<1x1xf32> to vector<1x64xf32>
    %1793 = arith.mulf %1792, %31 : vector<1x64xf32>
    %1794 = arith.addf %1790, %1793 : vector<1x64xf32>
    %1795 = vector.extract_strided_slice %1732 {offsets = [0, 15], sizes = [1, 1], strides = [1, 1]} : vector<1x16xf32> to vector<1x1xf32>
    %1796 = vector.broadcast %1795 : vector<1x1xf32> to vector<1x64xf32>
    %1797 = arith.mulf %1796, %32 : vector<1x64xf32>
    %1798 = arith.addf %1794, %1797 : vector<1x64xf32>
    %1799 = vector.extract_strided_slice %1798 {offsets = [0, 0], sizes = [1, 48], strides = [1, 1]} : vector<1x64xf32> to vector<1x48xf32>
    %cst_174 = arith.constant 5.000000e-01 : f32
    %1800 = vector.broadcast %cst_174 : f32 to vector<1x48xf32>
    %1801 = arith.mulf %1800, %1799 : vector<1x48xf32>
    %1802 = math.tanh %1801 : vector<1x48xf32>
    %cst_175 = arith.constant 5.000000e-01 : f32
    %1803 = vector.broadcast %cst_175 : f32 to vector<1x48xf32>
    %1804 = arith.mulf %1803, %1802 : vector<1x48xf32>
    %cst_176 = arith.constant 5.000000e-01 : f32
    %1805 = vector.broadcast %cst_176 : f32 to vector<1x48xf32>
    %1806 = arith.addf %1804, %1805 : vector<1x48xf32>
    %1807 = vector.extract_strided_slice %1798 {offsets = [0, 48], sizes = [1, 16], strides = [1, 1]} : vector<1x64xf32> to vector<1x16xf32>
    %1808 = math.tanh %1807 : vector<1x16xf32>
    %1809 = vector.extract_strided_slice %1806 {offsets = [0, 0], sizes = [1, 16], strides = [1, 1]} : vector<1x48xf32> to vector<1x16xf32>
    %1810 = vector.extract_strided_slice %1806 {offsets = [0, 16], sizes = [1, 16], strides = [1, 1]} : vector<1x48xf32> to vector<1x16xf32>
    %1811 = vector.extract_strided_slice %1806 {offsets = [0, 32], sizes = [1, 16], strides = [1, 1]} : vector<1x48xf32> to vector<1x16xf32>
    %1812 = arith.mulf %1810, %1730 : vector<1x16xf32>
    %1813 = arith.mulf %1809, %1808 : vector<1x16xf32>
    %1814 = arith.addf %1812, %1813 : vector<1x16xf32>
    %1815 = math.tanh %1814 : vector<1x16xf32>
    %1816 = arith.mulf %1811, %1815 : vector<1x16xf32>
    %c21_177 = arith.constant 21 : index
    %c0_178 = arith.constant 0 : index
    %1817 = vector.load %arg13[%c21_177, %c0_178] : memref<32x16xf32, #tpu.memory_space<vmem>>, vector<1x16xf32>
    tpu.vector_store %arg13[%c21_177, %c0_178], %1816 {strides = array<i32>} : memref<32x16xf32, #tpu.memory_space<vmem>>, vector<1x16xf32>,
    %c22 = arith.constant 22 : index
    %c0_179 = arith.constant 0 : index
    %1818 = vector.load %arg12[%c22, %c0_179] : memref<32x64xf32, #tpu.memory_space<vmem>>, vector<1x64xf32>
    %1819 = vector.extract_strided_slice %1816 {offsets = [0, 0], sizes = [1, 1], strides = [1, 1]} : vector<1x16xf32> to vector<1x1xf32>
    %1820 = vector.broadcast %1819 : vector<1x1xf32> to vector<1x64xf32>
    %1821 = arith.mulf %1820, %17 : vector<1x64xf32>
    %1822 = arith.addf %1818, %1821 : vector<1x64xf32>
    %1823 = vector.extract_strided_slice %1816 {offsets = [0, 1], sizes = [1, 1], strides = [1, 1]} : vector<1x16xf32> to vector<1x1xf32>
    %1824 = vector.broadcast %1823 : vector<1x1xf32> to vector<1x64xf32>
    %1825 = arith.mulf %1824, %18 : vector<1x64xf32>
    %1826 = arith.addf %1822, %1825 : vector<1x64xf32>
    %1827 = vector.extract_strided_slice %1816 {offsets = [0, 2], sizes = [1, 1], strides = [1, 1]} : vector<1x16xf32> to vector<1x1xf32>
    %1828 = vector.broadcast %1827 : vector<1x1xf32> to vector<1x64xf32>
    %1829 = arith.mulf %1828, %19 : vector<1x64xf32>
    %1830 = arith.addf %1826, %1829 : vector<1x64xf32>
    %1831 = vector.extract_strided_slice %1816 {offsets = [0, 3], sizes = [1, 1], strides = [1, 1]} : vector<1x16xf32> to vector<1x1xf32>
    %1832 = vector.broadcast %1831 : vector<1x1xf32> to vector<1x64xf32>
    %1833 = arith.mulf %1832, %20 : vector<1x64xf32>
    %1834 = arith.addf %1830, %1833 : vector<1x64xf32>
    %1835 = vector.extract_strided_slice %1816 {offsets = [0, 4], sizes = [1, 1], strides = [1, 1]} : vector<1x16xf32> to vector<1x1xf32>
    %1836 = vector.broadcast %1835 : vector<1x1xf32> to vector<1x64xf32>
    %1837 = arith.mulf %1836, %21 : vector<1x64xf32>
    %1838 = arith.addf %1834, %1837 : vector<1x64xf32>
    %1839 = vector.extract_strided_slice %1816 {offsets = [0, 5], sizes = [1, 1], strides = [1, 1]} : vector<1x16xf32> to vector<1x1xf32>
    %1840 = vector.broadcast %1839 : vector<1x1xf32> to vector<1x64xf32>
    %1841 = arith.mulf %1840, %22 : vector<1x64xf32>
    %1842 = arith.addf %1838, %1841 : vector<1x64xf32>
    %1843 = vector.extract_strided_slice %1816 {offsets = [0, 6], sizes = [1, 1], strides = [1, 1]} : vector<1x16xf32> to vector<1x1xf32>
    %1844 = vector.broadcast %1843 : vector<1x1xf32> to vector<1x64xf32>
    %1845 = arith.mulf %1844, %23 : vector<1x64xf32>
    %1846 = arith.addf %1842, %1845 : vector<1x64xf32>
    %1847 = vector.extract_strided_slice %1816 {offsets = [0, 7], sizes = [1, 1], strides = [1, 1]} : vector<1x16xf32> to vector<1x1xf32>
    %1848 = vector.broadcast %1847 : vector<1x1xf32> to vector<1x64xf32>
    %1849 = arith.mulf %1848, %24 : vector<1x64xf32>
    %1850 = arith.addf %1846, %1849 : vector<1x64xf32>
    %1851 = vector.extract_strided_slice %1816 {offsets = [0, 8], sizes = [1, 1], strides = [1, 1]} : vector<1x16xf32> to vector<1x1xf32>
    %1852 = vector.broadcast %1851 : vector<1x1xf32> to vector<1x64xf32>
    %1853 = arith.mulf %1852, %25 : vector<1x64xf32>
    %1854 = arith.addf %1850, %1853 : vector<1x64xf32>
    %1855 = vector.extract_strided_slice %1816 {offsets = [0, 9], sizes = [1, 1], strides = [1, 1]} : vector<1x16xf32> to vector<1x1xf32>
    %1856 = vector.broadcast %1855 : vector<1x1xf32> to vector<1x64xf32>
    %1857 = arith.mulf %1856, %26 : vector<1x64xf32>
    %1858 = arith.addf %1854, %1857 : vector<1x64xf32>
    %1859 = vector.extract_strided_slice %1816 {offsets = [0, 10], sizes = [1, 1], strides = [1, 1]} : vector<1x16xf32> to vector<1x1xf32>
    %1860 = vector.broadcast %1859 : vector<1x1xf32> to vector<1x64xf32>
    %1861 = arith.mulf %1860, %27 : vector<1x64xf32>
    %1862 = arith.addf %1858, %1861 : vector<1x64xf32>
    %1863 = vector.extract_strided_slice %1816 {offsets = [0, 11], sizes = [1, 1], strides = [1, 1]} : vector<1x16xf32> to vector<1x1xf32>
    %1864 = vector.broadcast %1863 : vector<1x1xf32> to vector<1x64xf32>
    %1865 = arith.mulf %1864, %28 : vector<1x64xf32>
    %1866 = arith.addf %1862, %1865 : vector<1x64xf32>
    %1867 = vector.extract_strided_slice %1816 {offsets = [0, 12], sizes = [1, 1], strides = [1, 1]} : vector<1x16xf32> to vector<1x1xf32>
    %1868 = vector.broadcast %1867 : vector<1x1xf32> to vector<1x64xf32>
    %1869 = arith.mulf %1868, %29 : vector<1x64xf32>
    %1870 = arith.addf %1866, %1869 : vector<1x64xf32>
    %1871 = vector.extract_strided_slice %1816 {offsets = [0, 13], sizes = [1, 1], strides = [1, 1]} : vector<1x16xf32> to vector<1x1xf32>
    %1872 = vector.broadcast %1871 : vector<1x1xf32> to vector<1x64xf32>
    %1873 = arith.mulf %1872, %30 : vector<1x64xf32>
    %1874 = arith.addf %1870, %1873 : vector<1x64xf32>
    %1875 = vector.extract_strided_slice %1816 {offsets = [0, 14], sizes = [1, 1], strides = [1, 1]} : vector<1x16xf32> to vector<1x1xf32>
    %1876 = vector.broadcast %1875 : vector<1x1xf32> to vector<1x64xf32>
    %1877 = arith.mulf %1876, %31 : vector<1x64xf32>
    %1878 = arith.addf %1874, %1877 : vector<1x64xf32>
    %1879 = vector.extract_strided_slice %1816 {offsets = [0, 15], sizes = [1, 1], strides = [1, 1]} : vector<1x16xf32> to vector<1x1xf32>
    %1880 = vector.broadcast %1879 : vector<1x1xf32> to vector<1x64xf32>
    %1881 = arith.mulf %1880, %32 : vector<1x64xf32>
    %1882 = arith.addf %1878, %1881 : vector<1x64xf32>
    %1883 = vector.extract_strided_slice %1882 {offsets = [0, 0], sizes = [1, 48], strides = [1, 1]} : vector<1x64xf32> to vector<1x48xf32>
    %cst_180 = arith.constant 5.000000e-01 : f32
    %1884 = vector.broadcast %cst_180 : f32 to vector<1x48xf32>
    %1885 = arith.mulf %1884, %1883 : vector<1x48xf32>
    %1886 = math.tanh %1885 : vector<1x48xf32>
    %cst_181 = arith.constant 5.000000e-01 : f32
    %1887 = vector.broadcast %cst_181 : f32 to vector<1x48xf32>
    %1888 = arith.mulf %1887, %1886 : vector<1x48xf32>
    %cst_182 = arith.constant 5.000000e-01 : f32
    %1889 = vector.broadcast %cst_182 : f32 to vector<1x48xf32>
    %1890 = arith.addf %1888, %1889 : vector<1x48xf32>
    %1891 = vector.extract_strided_slice %1882 {offsets = [0, 48], sizes = [1, 16], strides = [1, 1]} : vector<1x64xf32> to vector<1x16xf32>
    %1892 = math.tanh %1891 : vector<1x16xf32>
    %1893 = vector.extract_strided_slice %1890 {offsets = [0, 0], sizes = [1, 16], strides = [1, 1]} : vector<1x48xf32> to vector<1x16xf32>
    %1894 = vector.extract_strided_slice %1890 {offsets = [0, 16], sizes = [1, 16], strides = [1, 1]} : vector<1x48xf32> to vector<1x16xf32>
    %1895 = vector.extract_strided_slice %1890 {offsets = [0, 32], sizes = [1, 16], strides = [1, 1]} : vector<1x48xf32> to vector<1x16xf32>
    %1896 = arith.mulf %1894, %1814 : vector<1x16xf32>
    %1897 = arith.mulf %1893, %1892 : vector<1x16xf32>
    %1898 = arith.addf %1896, %1897 : vector<1x16xf32>
    %1899 = math.tanh %1898 : vector<1x16xf32>
    %1900 = arith.mulf %1895, %1899 : vector<1x16xf32>
    %c22_183 = arith.constant 22 : index
    %c0_184 = arith.constant 0 : index
    %1901 = vector.load %arg13[%c22_183, %c0_184] : memref<32x16xf32, #tpu.memory_space<vmem>>, vector<1x16xf32>
    tpu.vector_store %arg13[%c22_183, %c0_184], %1900 {strides = array<i32>} : memref<32x16xf32, #tpu.memory_space<vmem>>, vector<1x16xf32>,
    %c23 = arith.constant 23 : index
    %c0_185 = arith.constant 0 : index
    %1902 = vector.load %arg12[%c23, %c0_185] : memref<32x64xf32, #tpu.memory_space<vmem>>, vector<1x64xf32>
    %1903 = vector.extract_strided_slice %1900 {offsets = [0, 0], sizes = [1, 1], strides = [1, 1]} : vector<1x16xf32> to vector<1x1xf32>
    %1904 = vector.broadcast %1903 : vector<1x1xf32> to vector<1x64xf32>
    %1905 = arith.mulf %1904, %17 : vector<1x64xf32>
    %1906 = arith.addf %1902, %1905 : vector<1x64xf32>
    %1907 = vector.extract_strided_slice %1900 {offsets = [0, 1], sizes = [1, 1], strides = [1, 1]} : vector<1x16xf32> to vector<1x1xf32>
    %1908 = vector.broadcast %1907 : vector<1x1xf32> to vector<1x64xf32>
    %1909 = arith.mulf %1908, %18 : vector<1x64xf32>
    %1910 = arith.addf %1906, %1909 : vector<1x64xf32>
    %1911 = vector.extract_strided_slice %1900 {offsets = [0, 2], sizes = [1, 1], strides = [1, 1]} : vector<1x16xf32> to vector<1x1xf32>
    %1912 = vector.broadcast %1911 : vector<1x1xf32> to vector<1x64xf32>
    %1913 = arith.mulf %1912, %19 : vector<1x64xf32>
    %1914 = arith.addf %1910, %1913 : vector<1x64xf32>
    %1915 = vector.extract_strided_slice %1900 {offsets = [0, 3], sizes = [1, 1], strides = [1, 1]} : vector<1x16xf32> to vector<1x1xf32>
    %1916 = vector.broadcast %1915 : vector<1x1xf32> to vector<1x64xf32>
    %1917 = arith.mulf %1916, %20 : vector<1x64xf32>
    %1918 = arith.addf %1914, %1917 : vector<1x64xf32>
    %1919 = vector.extract_strided_slice %1900 {offsets = [0, 4], sizes = [1, 1], strides = [1, 1]} : vector<1x16xf32> to vector<1x1xf32>
    %1920 = vector.broadcast %1919 : vector<1x1xf32> to vector<1x64xf32>
    %1921 = arith.mulf %1920, %21 : vector<1x64xf32>
    %1922 = arith.addf %1918, %1921 : vector<1x64xf32>
    %1923 = vector.extract_strided_slice %1900 {offsets = [0, 5], sizes = [1, 1], strides = [1, 1]} : vector<1x16xf32> to vector<1x1xf32>
    %1924 = vector.broadcast %1923 : vector<1x1xf32> to vector<1x64xf32>
    %1925 = arith.mulf %1924, %22 : vector<1x64xf32>
    %1926 = arith.addf %1922, %1925 : vector<1x64xf32>
    %1927 = vector.extract_strided_slice %1900 {offsets = [0, 6], sizes = [1, 1], strides = [1, 1]} : vector<1x16xf32> to vector<1x1xf32>
    %1928 = vector.broadcast %1927 : vector<1x1xf32> to vector<1x64xf32>
    %1929 = arith.mulf %1928, %23 : vector<1x64xf32>
    %1930 = arith.addf %1926, %1929 : vector<1x64xf32>
    %1931 = vector.extract_strided_slice %1900 {offsets = [0, 7], sizes = [1, 1], strides = [1, 1]} : vector<1x16xf32> to vector<1x1xf32>
    %1932 = vector.broadcast %1931 : vector<1x1xf32> to vector<1x64xf32>
    %1933 = arith.mulf %1932, %24 : vector<1x64xf32>
    %1934 = arith.addf %1930, %1933 : vector<1x64xf32>
    %1935 = vector.extract_strided_slice %1900 {offsets = [0, 8], sizes = [1, 1], strides = [1, 1]} : vector<1x16xf32> to vector<1x1xf32>
    %1936 = vector.broadcast %1935 : vector<1x1xf32> to vector<1x64xf32>
    %1937 = arith.mulf %1936, %25 : vector<1x64xf32>
    %1938 = arith.addf %1934, %1937 : vector<1x64xf32>
    %1939 = vector.extract_strided_slice %1900 {offsets = [0, 9], sizes = [1, 1], strides = [1, 1]} : vector<1x16xf32> to vector<1x1xf32>
    %1940 = vector.broadcast %1939 : vector<1x1xf32> to vector<1x64xf32>
    %1941 = arith.mulf %1940, %26 : vector<1x64xf32>
    %1942 = arith.addf %1938, %1941 : vector<1x64xf32>
    %1943 = vector.extract_strided_slice %1900 {offsets = [0, 10], sizes = [1, 1], strides = [1, 1]} : vector<1x16xf32> to vector<1x1xf32>
    %1944 = vector.broadcast %1943 : vector<1x1xf32> to vector<1x64xf32>
    %1945 = arith.mulf %1944, %27 : vector<1x64xf32>
    %1946 = arith.addf %1942, %1945 : vector<1x64xf32>
    %1947 = vector.extract_strided_slice %1900 {offsets = [0, 11], sizes = [1, 1], strides = [1, 1]} : vector<1x16xf32> to vector<1x1xf32>
    %1948 = vector.broadcast %1947 : vector<1x1xf32> to vector<1x64xf32>
    %1949 = arith.mulf %1948, %28 : vector<1x64xf32>
    %1950 = arith.addf %1946, %1949 : vector<1x64xf32>
    %1951 = vector.extract_strided_slice %1900 {offsets = [0, 12], sizes = [1, 1], strides = [1, 1]} : vector<1x16xf32> to vector<1x1xf32>
    %1952 = vector.broadcast %1951 : vector<1x1xf32> to vector<1x64xf32>
    %1953 = arith.mulf %1952, %29 : vector<1x64xf32>
    %1954 = arith.addf %1950, %1953 : vector<1x64xf32>
    %1955 = vector.extract_strided_slice %1900 {offsets = [0, 13], sizes = [1, 1], strides = [1, 1]} : vector<1x16xf32> to vector<1x1xf32>
    %1956 = vector.broadcast %1955 : vector<1x1xf32> to vector<1x64xf32>
    %1957 = arith.mulf %1956, %30 : vector<1x64xf32>
    %1958 = arith.addf %1954, %1957 : vector<1x64xf32>
    %1959 = vector.extract_strided_slice %1900 {offsets = [0, 14], sizes = [1, 1], strides = [1, 1]} : vector<1x16xf32> to vector<1x1xf32>
    %1960 = vector.broadcast %1959 : vector<1x1xf32> to vector<1x64xf32>
    %1961 = arith.mulf %1960, %31 : vector<1x64xf32>
    %1962 = arith.addf %1958, %1961 : vector<1x64xf32>
    %1963 = vector.extract_strided_slice %1900 {offsets = [0, 15], sizes = [1, 1], strides = [1, 1]} : vector<1x16xf32> to vector<1x1xf32>
    %1964 = vector.broadcast %1963 : vector<1x1xf32> to vector<1x64xf32>
    %1965 = arith.mulf %1964, %32 : vector<1x64xf32>
    %1966 = arith.addf %1962, %1965 : vector<1x64xf32>
    %1967 = vector.extract_strided_slice %1966 {offsets = [0, 0], sizes = [1, 48], strides = [1, 1]} : vector<1x64xf32> to vector<1x48xf32>
    %cst_186 = arith.constant 5.000000e-01 : f32
    %1968 = vector.broadcast %cst_186 : f32 to vector<1x48xf32>
    %1969 = arith.mulf %1968, %1967 : vector<1x48xf32>
    %1970 = math.tanh %1969 : vector<1x48xf32>
    %cst_187 = arith.constant 5.000000e-01 : f32
    %1971 = vector.broadcast %cst_187 : f32 to vector<1x48xf32>
    %1972 = arith.mulf %1971, %1970 : vector<1x48xf32>
    %cst_188 = arith.constant 5.000000e-01 : f32
    %1973 = vector.broadcast %cst_188 : f32 to vector<1x48xf32>
    %1974 = arith.addf %1972, %1973 : vector<1x48xf32>
    %1975 = vector.extract_strided_slice %1966 {offsets = [0, 48], sizes = [1, 16], strides = [1, 1]} : vector<1x64xf32> to vector<1x16xf32>
    %1976 = math.tanh %1975 : vector<1x16xf32>
    %1977 = vector.extract_strided_slice %1974 {offsets = [0, 0], sizes = [1, 16], strides = [1, 1]} : vector<1x48xf32> to vector<1x16xf32>
    %1978 = vector.extract_strided_slice %1974 {offsets = [0, 16], sizes = [1, 16], strides = [1, 1]} : vector<1x48xf32> to vector<1x16xf32>
    %1979 = vector.extract_strided_slice %1974 {offsets = [0, 32], sizes = [1, 16], strides = [1, 1]} : vector<1x48xf32> to vector<1x16xf32>
    %1980 = arith.mulf %1978, %1898 : vector<1x16xf32>
    %1981 = arith.mulf %1977, %1976 : vector<1x16xf32>
    %1982 = arith.addf %1980, %1981 : vector<1x16xf32>
    %1983 = math.tanh %1982 : vector<1x16xf32>
    %1984 = arith.mulf %1979, %1983 : vector<1x16xf32>
    %c23_189 = arith.constant 23 : index
    %c0_190 = arith.constant 0 : index
    %1985 = vector.load %arg13[%c23_189, %c0_190] : memref<32x16xf32, #tpu.memory_space<vmem>>, vector<1x16xf32>
    tpu.vector_store %arg13[%c23_189, %c0_190], %1984 {strides = array<i32>} : memref<32x16xf32, #tpu.memory_space<vmem>>, vector<1x16xf32>,
    %c24 = arith.constant 24 : index
    %c0_191 = arith.constant 0 : index
    %1986 = vector.load %arg12[%c24, %c0_191] : memref<32x64xf32, #tpu.memory_space<vmem>>, vector<1x64xf32>
    %1987 = vector.extract_strided_slice %1984 {offsets = [0, 0], sizes = [1, 1], strides = [1, 1]} : vector<1x16xf32> to vector<1x1xf32>
    %1988 = vector.broadcast %1987 : vector<1x1xf32> to vector<1x64xf32>
    %1989 = arith.mulf %1988, %17 : vector<1x64xf32>
    %1990 = arith.addf %1986, %1989 : vector<1x64xf32>
    %1991 = vector.extract_strided_slice %1984 {offsets = [0, 1], sizes = [1, 1], strides = [1, 1]} : vector<1x16xf32> to vector<1x1xf32>
    %1992 = vector.broadcast %1991 : vector<1x1xf32> to vector<1x64xf32>
    %1993 = arith.mulf %1992, %18 : vector<1x64xf32>
    %1994 = arith.addf %1990, %1993 : vector<1x64xf32>
    %1995 = vector.extract_strided_slice %1984 {offsets = [0, 2], sizes = [1, 1], strides = [1, 1]} : vector<1x16xf32> to vector<1x1xf32>
    %1996 = vector.broadcast %1995 : vector<1x1xf32> to vector<1x64xf32>
    %1997 = arith.mulf %1996, %19 : vector<1x64xf32>
    %1998 = arith.addf %1994, %1997 : vector<1x64xf32>
    %1999 = vector.extract_strided_slice %1984 {offsets = [0, 3], sizes = [1, 1], strides = [1, 1]} : vector<1x16xf32> to vector<1x1xf32>
    %2000 = vector.broadcast %1999 : vector<1x1xf32> to vector<1x64xf32>
    %2001 = arith.mulf %2000, %20 : vector<1x64xf32>
    %2002 = arith.addf %1998, %2001 : vector<1x64xf32>
    %2003 = vector.extract_strided_slice %1984 {offsets = [0, 4], sizes = [1, 1], strides = [1, 1]} : vector<1x16xf32> to vector<1x1xf32>
    %2004 = vector.broadcast %2003 : vector<1x1xf32> to vector<1x64xf32>
    %2005 = arith.mulf %2004, %21 : vector<1x64xf32>
    %2006 = arith.addf %2002, %2005 : vector<1x64xf32>
    %2007 = vector.extract_strided_slice %1984 {offsets = [0, 5], sizes = [1, 1], strides = [1, 1]} : vector<1x16xf32> to vector<1x1xf32>
    %2008 = vector.broadcast %2007 : vector<1x1xf32> to vector<1x64xf32>
    %2009 = arith.mulf %2008, %22 : vector<1x64xf32>
    %2010 = arith.addf %2006, %2009 : vector<1x64xf32>
    %2011 = vector.extract_strided_slice %1984 {offsets = [0, 6], sizes = [1, 1], strides = [1, 1]} : vector<1x16xf32> to vector<1x1xf32>
    %2012 = vector.broadcast %2011 : vector<1x1xf32> to vector<1x64xf32>
    %2013 = arith.mulf %2012, %23 : vector<1x64xf32>
    %2014 = arith.addf %2010, %2013 : vector<1x64xf32>
    %2015 = vector.extract_strided_slice %1984 {offsets = [0, 7], sizes = [1, 1], strides = [1, 1]} : vector<1x16xf32> to vector<1x1xf32>
    %2016 = vector.broadcast %2015 : vector<1x1xf32> to vector<1x64xf32>
    %2017 = arith.mulf %2016, %24 : vector<1x64xf32>
    %2018 = arith.addf %2014, %2017 : vector<1x64xf32>
    %2019 = vector.extract_strided_slice %1984 {offsets = [0, 8], sizes = [1, 1], strides = [1, 1]} : vector<1x16xf32> to vector<1x1xf32>
    %2020 = vector.broadcast %2019 : vector<1x1xf32> to vector<1x64xf32>
    %2021 = arith.mulf %2020, %25 : vector<1x64xf32>
    %2022 = arith.addf %2018, %2021 : vector<1x64xf32>
    %2023 = vector.extract_strided_slice %1984 {offsets = [0, 9], sizes = [1, 1], strides = [1, 1]} : vector<1x16xf32> to vector<1x1xf32>
    %2024 = vector.broadcast %2023 : vector<1x1xf32> to vector<1x64xf32>
    %2025 = arith.mulf %2024, %26 : vector<1x64xf32>
    %2026 = arith.addf %2022, %2025 : vector<1x64xf32>
    %2027 = vector.extract_strided_slice %1984 {offsets = [0, 10], sizes = [1, 1], strides = [1, 1]} : vector<1x16xf32> to vector<1x1xf32>
    %2028 = vector.broadcast %2027 : vector<1x1xf32> to vector<1x64xf32>
    %2029 = arith.mulf %2028, %27 : vector<1x64xf32>
    %2030 = arith.addf %2026, %2029 : vector<1x64xf32>
    %2031 = vector.extract_strided_slice %1984 {offsets = [0, 11], sizes = [1, 1], strides = [1, 1]} : vector<1x16xf32> to vector<1x1xf32>
    %2032 = vector.broadcast %2031 : vector<1x1xf32> to vector<1x64xf32>
    %2033 = arith.mulf %2032, %28 : vector<1x64xf32>
    %2034 = arith.addf %2030, %2033 : vector<1x64xf32>
    %2035 = vector.extract_strided_slice %1984 {offsets = [0, 12], sizes = [1, 1], strides = [1, 1]} : vector<1x16xf32> to vector<1x1xf32>
    %2036 = vector.broadcast %2035 : vector<1x1xf32> to vector<1x64xf32>
    %2037 = arith.mulf %2036, %29 : vector<1x64xf32>
    %2038 = arith.addf %2034, %2037 : vector<1x64xf32>
    %2039 = vector.extract_strided_slice %1984 {offsets = [0, 13], sizes = [1, 1], strides = [1, 1]} : vector<1x16xf32> to vector<1x1xf32>
    %2040 = vector.broadcast %2039 : vector<1x1xf32> to vector<1x64xf32>
    %2041 = arith.mulf %2040, %30 : vector<1x64xf32>
    %2042 = arith.addf %2038, %2041 : vector<1x64xf32>
    %2043 = vector.extract_strided_slice %1984 {offsets = [0, 14], sizes = [1, 1], strides = [1, 1]} : vector<1x16xf32> to vector<1x1xf32>
    %2044 = vector.broadcast %2043 : vector<1x1xf32> to vector<1x64xf32>
    %2045 = arith.mulf %2044, %31 : vector<1x64xf32>
    %2046 = arith.addf %2042, %2045 : vector<1x64xf32>
    %2047 = vector.extract_strided_slice %1984 {offsets = [0, 15], sizes = [1, 1], strides = [1, 1]} : vector<1x16xf32> to vector<1x1xf32>
    %2048 = vector.broadcast %2047 : vector<1x1xf32> to vector<1x64xf32>
    %2049 = arith.mulf %2048, %32 : vector<1x64xf32>
    %2050 = arith.addf %2046, %2049 : vector<1x64xf32>
    %2051 = vector.extract_strided_slice %2050 {offsets = [0, 0], sizes = [1, 48], strides = [1, 1]} : vector<1x64xf32> to vector<1x48xf32>
    %cst_192 = arith.constant 5.000000e-01 : f32
    %2052 = vector.broadcast %cst_192 : f32 to vector<1x48xf32>
    %2053 = arith.mulf %2052, %2051 : vector<1x48xf32>
    %2054 = math.tanh %2053 : vector<1x48xf32>
    %cst_193 = arith.constant 5.000000e-01 : f32
    %2055 = vector.broadcast %cst_193 : f32 to vector<1x48xf32>
    %2056 = arith.mulf %2055, %2054 : vector<1x48xf32>
    %cst_194 = arith.constant 5.000000e-01 : f32
    %2057 = vector.broadcast %cst_194 : f32 to vector<1x48xf32>
    %2058 = arith.addf %2056, %2057 : vector<1x48xf32>
    %2059 = vector.extract_strided_slice %2050 {offsets = [0, 48], sizes = [1, 16], strides = [1, 1]} : vector<1x64xf32> to vector<1x16xf32>
    %2060 = math.tanh %2059 : vector<1x16xf32>
    %2061 = vector.extract_strided_slice %2058 {offsets = [0, 0], sizes = [1, 16], strides = [1, 1]} : vector<1x48xf32> to vector<1x16xf32>
    %2062 = vector.extract_strided_slice %2058 {offsets = [0, 16], sizes = [1, 16], strides = [1, 1]} : vector<1x48xf32> to vector<1x16xf32>
    %2063 = vector.extract_strided_slice %2058 {offsets = [0, 32], sizes = [1, 16], strides = [1, 1]} : vector<1x48xf32> to vector<1x16xf32>
    %2064 = arith.mulf %2062, %1982 : vector<1x16xf32>
    %2065 = arith.mulf %2061, %2060 : vector<1x16xf32>
    %2066 = arith.addf %2064, %2065 : vector<1x16xf32>
    %2067 = math.tanh %2066 : vector<1x16xf32>
    %2068 = arith.mulf %2063, %2067 : vector<1x16xf32>
    %c24_195 = arith.constant 24 : index
    %c0_196 = arith.constant 0 : index
    %2069 = vector.load %arg13[%c24_195, %c0_196] : memref<32x16xf32, #tpu.memory_space<vmem>>, vector<1x16xf32>
    tpu.vector_store %arg13[%c24_195, %c0_196], %2068 {strides = array<i32>} : memref<32x16xf32, #tpu.memory_space<vmem>>, vector<1x16xf32>,
    %c25 = arith.constant 25 : index
    %c0_197 = arith.constant 0 : index
    %2070 = vector.load %arg12[%c25, %c0_197] : memref<32x64xf32, #tpu.memory_space<vmem>>, vector<1x64xf32>
    %2071 = vector.extract_strided_slice %2068 {offsets = [0, 0], sizes = [1, 1], strides = [1, 1]} : vector<1x16xf32> to vector<1x1xf32>
    %2072 = vector.broadcast %2071 : vector<1x1xf32> to vector<1x64xf32>
    %2073 = arith.mulf %2072, %17 : vector<1x64xf32>
    %2074 = arith.addf %2070, %2073 : vector<1x64xf32>
    %2075 = vector.extract_strided_slice %2068 {offsets = [0, 1], sizes = [1, 1], strides = [1, 1]} : vector<1x16xf32> to vector<1x1xf32>
    %2076 = vector.broadcast %2075 : vector<1x1xf32> to vector<1x64xf32>
    %2077 = arith.mulf %2076, %18 : vector<1x64xf32>
    %2078 = arith.addf %2074, %2077 : vector<1x64xf32>
    %2079 = vector.extract_strided_slice %2068 {offsets = [0, 2], sizes = [1, 1], strides = [1, 1]} : vector<1x16xf32> to vector<1x1xf32>
    %2080 = vector.broadcast %2079 : vector<1x1xf32> to vector<1x64xf32>
    %2081 = arith.mulf %2080, %19 : vector<1x64xf32>
    %2082 = arith.addf %2078, %2081 : vector<1x64xf32>
    %2083 = vector.extract_strided_slice %2068 {offsets = [0, 3], sizes = [1, 1], strides = [1, 1]} : vector<1x16xf32> to vector<1x1xf32>
    %2084 = vector.broadcast %2083 : vector<1x1xf32> to vector<1x64xf32>
    %2085 = arith.mulf %2084, %20 : vector<1x64xf32>
    %2086 = arith.addf %2082, %2085 : vector<1x64xf32>
    %2087 = vector.extract_strided_slice %2068 {offsets = [0, 4], sizes = [1, 1], strides = [1, 1]} : vector<1x16xf32> to vector<1x1xf32>
    %2088 = vector.broadcast %2087 : vector<1x1xf32> to vector<1x64xf32>
    %2089 = arith.mulf %2088, %21 : vector<1x64xf32>
    %2090 = arith.addf %2086, %2089 : vector<1x64xf32>
    %2091 = vector.extract_strided_slice %2068 {offsets = [0, 5], sizes = [1, 1], strides = [1, 1]} : vector<1x16xf32> to vector<1x1xf32>
    %2092 = vector.broadcast %2091 : vector<1x1xf32> to vector<1x64xf32>
    %2093 = arith.mulf %2092, %22 : vector<1x64xf32>
    %2094 = arith.addf %2090, %2093 : vector<1x64xf32>
    %2095 = vector.extract_strided_slice %2068 {offsets = [0, 6], sizes = [1, 1], strides = [1, 1]} : vector<1x16xf32> to vector<1x1xf32>
    %2096 = vector.broadcast %2095 : vector<1x1xf32> to vector<1x64xf32>
    %2097 = arith.mulf %2096, %23 : vector<1x64xf32>
    %2098 = arith.addf %2094, %2097 : vector<1x64xf32>
    %2099 = vector.extract_strided_slice %2068 {offsets = [0, 7], sizes = [1, 1], strides = [1, 1]} : vector<1x16xf32> to vector<1x1xf32>
    %2100 = vector.broadcast %2099 : vector<1x1xf32> to vector<1x64xf32>
    %2101 = arith.mulf %2100, %24 : vector<1x64xf32>
    %2102 = arith.addf %2098, %2101 : vector<1x64xf32>
    %2103 = vector.extract_strided_slice %2068 {offsets = [0, 8], sizes = [1, 1], strides = [1, 1]} : vector<1x16xf32> to vector<1x1xf32>
    %2104 = vector.broadcast %2103 : vector<1x1xf32> to vector<1x64xf32>
    %2105 = arith.mulf %2104, %25 : vector<1x64xf32>
    %2106 = arith.addf %2102, %2105 : vector<1x64xf32>
    %2107 = vector.extract_strided_slice %2068 {offsets = [0, 9], sizes = [1, 1], strides = [1, 1]} : vector<1x16xf32> to vector<1x1xf32>
    %2108 = vector.broadcast %2107 : vector<1x1xf32> to vector<1x64xf32>
    %2109 = arith.mulf %2108, %26 : vector<1x64xf32>
    %2110 = arith.addf %2106, %2109 : vector<1x64xf32>
    %2111 = vector.extract_strided_slice %2068 {offsets = [0, 10], sizes = [1, 1], strides = [1, 1]} : vector<1x16xf32> to vector<1x1xf32>
    %2112 = vector.broadcast %2111 : vector<1x1xf32> to vector<1x64xf32>
    %2113 = arith.mulf %2112, %27 : vector<1x64xf32>
    %2114 = arith.addf %2110, %2113 : vector<1x64xf32>
    %2115 = vector.extract_strided_slice %2068 {offsets = [0, 11], sizes = [1, 1], strides = [1, 1]} : vector<1x16xf32> to vector<1x1xf32>
    %2116 = vector.broadcast %2115 : vector<1x1xf32> to vector<1x64xf32>
    %2117 = arith.mulf %2116, %28 : vector<1x64xf32>
    %2118 = arith.addf %2114, %2117 : vector<1x64xf32>
    %2119 = vector.extract_strided_slice %2068 {offsets = [0, 12], sizes = [1, 1], strides = [1, 1]} : vector<1x16xf32> to vector<1x1xf32>
    %2120 = vector.broadcast %2119 : vector<1x1xf32> to vector<1x64xf32>
    %2121 = arith.mulf %2120, %29 : vector<1x64xf32>
    %2122 = arith.addf %2118, %2121 : vector<1x64xf32>
    %2123 = vector.extract_strided_slice %2068 {offsets = [0, 13], sizes = [1, 1], strides = [1, 1]} : vector<1x16xf32> to vector<1x1xf32>
    %2124 = vector.broadcast %2123 : vector<1x1xf32> to vector<1x64xf32>
    %2125 = arith.mulf %2124, %30 : vector<1x64xf32>
    %2126 = arith.addf %2122, %2125 : vector<1x64xf32>
    %2127 = vector.extract_strided_slice %2068 {offsets = [0, 14], sizes = [1, 1], strides = [1, 1]} : vector<1x16xf32> to vector<1x1xf32>
    %2128 = vector.broadcast %2127 : vector<1x1xf32> to vector<1x64xf32>
    %2129 = arith.mulf %2128, %31 : vector<1x64xf32>
    %2130 = arith.addf %2126, %2129 : vector<1x64xf32>
    %2131 = vector.extract_strided_slice %2068 {offsets = [0, 15], sizes = [1, 1], strides = [1, 1]} : vector<1x16xf32> to vector<1x1xf32>
    %2132 = vector.broadcast %2131 : vector<1x1xf32> to vector<1x64xf32>
    %2133 = arith.mulf %2132, %32 : vector<1x64xf32>
    %2134 = arith.addf %2130, %2133 : vector<1x64xf32>
    %2135 = vector.extract_strided_slice %2134 {offsets = [0, 0], sizes = [1, 48], strides = [1, 1]} : vector<1x64xf32> to vector<1x48xf32>
    %cst_198 = arith.constant 5.000000e-01 : f32
    %2136 = vector.broadcast %cst_198 : f32 to vector<1x48xf32>
    %2137 = arith.mulf %2136, %2135 : vector<1x48xf32>
    %2138 = math.tanh %2137 : vector<1x48xf32>
    %cst_199 = arith.constant 5.000000e-01 : f32
    %2139 = vector.broadcast %cst_199 : f32 to vector<1x48xf32>
    %2140 = arith.mulf %2139, %2138 : vector<1x48xf32>
    %cst_200 = arith.constant 5.000000e-01 : f32
    %2141 = vector.broadcast %cst_200 : f32 to vector<1x48xf32>
    %2142 = arith.addf %2140, %2141 : vector<1x48xf32>
    %2143 = vector.extract_strided_slice %2134 {offsets = [0, 48], sizes = [1, 16], strides = [1, 1]} : vector<1x64xf32> to vector<1x16xf32>
    %2144 = math.tanh %2143 : vector<1x16xf32>
    %2145 = vector.extract_strided_slice %2142 {offsets = [0, 0], sizes = [1, 16], strides = [1, 1]} : vector<1x48xf32> to vector<1x16xf32>
    %2146 = vector.extract_strided_slice %2142 {offsets = [0, 16], sizes = [1, 16], strides = [1, 1]} : vector<1x48xf32> to vector<1x16xf32>
    %2147 = vector.extract_strided_slice %2142 {offsets = [0, 32], sizes = [1, 16], strides = [1, 1]} : vector<1x48xf32> to vector<1x16xf32>
    %2148 = arith.mulf %2146, %2066 : vector<1x16xf32>
    %2149 = arith.mulf %2145, %2144 : vector<1x16xf32>
    %2150 = arith.addf %2148, %2149 : vector<1x16xf32>
    %2151 = math.tanh %2150 : vector<1x16xf32>
    %2152 = arith.mulf %2147, %2151 : vector<1x16xf32>
    %c25_201 = arith.constant 25 : index
    %c0_202 = arith.constant 0 : index
    %2153 = vector.load %arg13[%c25_201, %c0_202] : memref<32x16xf32, #tpu.memory_space<vmem>>, vector<1x16xf32>
    tpu.vector_store %arg13[%c25_201, %c0_202], %2152 {strides = array<i32>} : memref<32x16xf32, #tpu.memory_space<vmem>>, vector<1x16xf32>,
    %c26 = arith.constant 26 : index
    %c0_203 = arith.constant 0 : index
    %2154 = vector.load %arg12[%c26, %c0_203] : memref<32x64xf32, #tpu.memory_space<vmem>>, vector<1x64xf32>
    %2155 = vector.extract_strided_slice %2152 {offsets = [0, 0], sizes = [1, 1], strides = [1, 1]} : vector<1x16xf32> to vector<1x1xf32>
    %2156 = vector.broadcast %2155 : vector<1x1xf32> to vector<1x64xf32>
    %2157 = arith.mulf %2156, %17 : vector<1x64xf32>
    %2158 = arith.addf %2154, %2157 : vector<1x64xf32>
    %2159 = vector.extract_strided_slice %2152 {offsets = [0, 1], sizes = [1, 1], strides = [1, 1]} : vector<1x16xf32> to vector<1x1xf32>
    %2160 = vector.broadcast %2159 : vector<1x1xf32> to vector<1x64xf32>
    %2161 = arith.mulf %2160, %18 : vector<1x64xf32>
    %2162 = arith.addf %2158, %2161 : vector<1x64xf32>
    %2163 = vector.extract_strided_slice %2152 {offsets = [0, 2], sizes = [1, 1], strides = [1, 1]} : vector<1x16xf32> to vector<1x1xf32>
    %2164 = vector.broadcast %2163 : vector<1x1xf32> to vector<1x64xf32>
    %2165 = arith.mulf %2164, %19 : vector<1x64xf32>
    %2166 = arith.addf %2162, %2165 : vector<1x64xf32>
    %2167 = vector.extract_strided_slice %2152 {offsets = [0, 3], sizes = [1, 1], strides = [1, 1]} : vector<1x16xf32> to vector<1x1xf32>
    %2168 = vector.broadcast %2167 : vector<1x1xf32> to vector<1x64xf32>
    %2169 = arith.mulf %2168, %20 : vector<1x64xf32>
    %2170 = arith.addf %2166, %2169 : vector<1x64xf32>
    %2171 = vector.extract_strided_slice %2152 {offsets = [0, 4], sizes = [1, 1], strides = [1, 1]} : vector<1x16xf32> to vector<1x1xf32>
    %2172 = vector.broadcast %2171 : vector<1x1xf32> to vector<1x64xf32>
    %2173 = arith.mulf %2172, %21 : vector<1x64xf32>
    %2174 = arith.addf %2170, %2173 : vector<1x64xf32>
    %2175 = vector.extract_strided_slice %2152 {offsets = [0, 5], sizes = [1, 1], strides = [1, 1]} : vector<1x16xf32> to vector<1x1xf32>
    %2176 = vector.broadcast %2175 : vector<1x1xf32> to vector<1x64xf32>
    %2177 = arith.mulf %2176, %22 : vector<1x64xf32>
    %2178 = arith.addf %2174, %2177 : vector<1x64xf32>
    %2179 = vector.extract_strided_slice %2152 {offsets = [0, 6], sizes = [1, 1], strides = [1, 1]} : vector<1x16xf32> to vector<1x1xf32>
    %2180 = vector.broadcast %2179 : vector<1x1xf32> to vector<1x64xf32>
    %2181 = arith.mulf %2180, %23 : vector<1x64xf32>
    %2182 = arith.addf %2178, %2181 : vector<1x64xf32>
    %2183 = vector.extract_strided_slice %2152 {offsets = [0, 7], sizes = [1, 1], strides = [1, 1]} : vector<1x16xf32> to vector<1x1xf32>
    %2184 = vector.broadcast %2183 : vector<1x1xf32> to vector<1x64xf32>
    %2185 = arith.mulf %2184, %24 : vector<1x64xf32>
    %2186 = arith.addf %2182, %2185 : vector<1x64xf32>
    %2187 = vector.extract_strided_slice %2152 {offsets = [0, 8], sizes = [1, 1], strides = [1, 1]} : vector<1x16xf32> to vector<1x1xf32>
    %2188 = vector.broadcast %2187 : vector<1x1xf32> to vector<1x64xf32>
    %2189 = arith.mulf %2188, %25 : vector<1x64xf32>
    %2190 = arith.addf %2186, %2189 : vector<1x64xf32>
    %2191 = vector.extract_strided_slice %2152 {offsets = [0, 9], sizes = [1, 1], strides = [1, 1]} : vector<1x16xf32> to vector<1x1xf32>
    %2192 = vector.broadcast %2191 : vector<1x1xf32> to vector<1x64xf32>
    %2193 = arith.mulf %2192, %26 : vector<1x64xf32>
    %2194 = arith.addf %2190, %2193 : vector<1x64xf32>
    %2195 = vector.extract_strided_slice %2152 {offsets = [0, 10], sizes = [1, 1], strides = [1, 1]} : vector<1x16xf32> to vector<1x1xf32>
    %2196 = vector.broadcast %2195 : vector<1x1xf32> to vector<1x64xf32>
    %2197 = arith.mulf %2196, %27 : vector<1x64xf32>
    %2198 = arith.addf %2194, %2197 : vector<1x64xf32>
    %2199 = vector.extract_strided_slice %2152 {offsets = [0, 11], sizes = [1, 1], strides = [1, 1]} : vector<1x16xf32> to vector<1x1xf32>
    %2200 = vector.broadcast %2199 : vector<1x1xf32> to vector<1x64xf32>
    %2201 = arith.mulf %2200, %28 : vector<1x64xf32>
    %2202 = arith.addf %2198, %2201 : vector<1x64xf32>
    %2203 = vector.extract_strided_slice %2152 {offsets = [0, 12], sizes = [1, 1], strides = [1, 1]} : vector<1x16xf32> to vector<1x1xf32>
    %2204 = vector.broadcast %2203 : vector<1x1xf32> to vector<1x64xf32>
    %2205 = arith.mulf %2204, %29 : vector<1x64xf32>
    %2206 = arith.addf %2202, %2205 : vector<1x64xf32>
    %2207 = vector.extract_strided_slice %2152 {offsets = [0, 13], sizes = [1, 1], strides = [1, 1]} : vector<1x16xf32> to vector<1x1xf32>
    %2208 = vector.broadcast %2207 : vector<1x1xf32> to vector<1x64xf32>
    %2209 = arith.mulf %2208, %30 : vector<1x64xf32>
    %2210 = arith.addf %2206, %2209 : vector<1x64xf32>
    %2211 = vector.extract_strided_slice %2152 {offsets = [0, 14], sizes = [1, 1], strides = [1, 1]} : vector<1x16xf32> to vector<1x1xf32>
    %2212 = vector.broadcast %2211 : vector<1x1xf32> to vector<1x64xf32>
    %2213 = arith.mulf %2212, %31 : vector<1x64xf32>
    %2214 = arith.addf %2210, %2213 : vector<1x64xf32>
    %2215 = vector.extract_strided_slice %2152 {offsets = [0, 15], sizes = [1, 1], strides = [1, 1]} : vector<1x16xf32> to vector<1x1xf32>
    %2216 = vector.broadcast %2215 : vector<1x1xf32> to vector<1x64xf32>
    %2217 = arith.mulf %2216, %32 : vector<1x64xf32>
    %2218 = arith.addf %2214, %2217 : vector<1x64xf32>
    %2219 = vector.extract_strided_slice %2218 {offsets = [0, 0], sizes = [1, 48], strides = [1, 1]} : vector<1x64xf32> to vector<1x48xf32>
    %cst_204 = arith.constant 5.000000e-01 : f32
    %2220 = vector.broadcast %cst_204 : f32 to vector<1x48xf32>
    %2221 = arith.mulf %2220, %2219 : vector<1x48xf32>
    %2222 = math.tanh %2221 : vector<1x48xf32>
    %cst_205 = arith.constant 5.000000e-01 : f32
    %2223 = vector.broadcast %cst_205 : f32 to vector<1x48xf32>
    %2224 = arith.mulf %2223, %2222 : vector<1x48xf32>
    %cst_206 = arith.constant 5.000000e-01 : f32
    %2225 = vector.broadcast %cst_206 : f32 to vector<1x48xf32>
    %2226 = arith.addf %2224, %2225 : vector<1x48xf32>
    %2227 = vector.extract_strided_slice %2218 {offsets = [0, 48], sizes = [1, 16], strides = [1, 1]} : vector<1x64xf32> to vector<1x16xf32>
    %2228 = math.tanh %2227 : vector<1x16xf32>
    %2229 = vector.extract_strided_slice %2226 {offsets = [0, 0], sizes = [1, 16], strides = [1, 1]} : vector<1x48xf32> to vector<1x16xf32>
    %2230 = vector.extract_strided_slice %2226 {offsets = [0, 16], sizes = [1, 16], strides = [1, 1]} : vector<1x48xf32> to vector<1x16xf32>
    %2231 = vector.extract_strided_slice %2226 {offsets = [0, 32], sizes = [1, 16], strides = [1, 1]} : vector<1x48xf32> to vector<1x16xf32>
    %2232 = arith.mulf %2230, %2150 : vector<1x16xf32>
    %2233 = arith.mulf %2229, %2228 : vector<1x16xf32>
    %2234 = arith.addf %2232, %2233 : vector<1x16xf32>
    %2235 = math.tanh %2234 : vector<1x16xf32>
    %2236 = arith.mulf %2231, %2235 : vector<1x16xf32>
    %c26_207 = arith.constant 26 : index
    %c0_208 = arith.constant 0 : index
    %2237 = vector.load %arg13[%c26_207, %c0_208] : memref<32x16xf32, #tpu.memory_space<vmem>>, vector<1x16xf32>
    tpu.vector_store %arg13[%c26_207, %c0_208], %2236 {strides = array<i32>} : memref<32x16xf32, #tpu.memory_space<vmem>>, vector<1x16xf32>,
    %c27 = arith.constant 27 : index
    %c0_209 = arith.constant 0 : index
    %2238 = vector.load %arg12[%c27, %c0_209] : memref<32x64xf32, #tpu.memory_space<vmem>>, vector<1x64xf32>
    %2239 = vector.extract_strided_slice %2236 {offsets = [0, 0], sizes = [1, 1], strides = [1, 1]} : vector<1x16xf32> to vector<1x1xf32>
    %2240 = vector.broadcast %2239 : vector<1x1xf32> to vector<1x64xf32>
    %2241 = arith.mulf %2240, %17 : vector<1x64xf32>
    %2242 = arith.addf %2238, %2241 : vector<1x64xf32>
    %2243 = vector.extract_strided_slice %2236 {offsets = [0, 1], sizes = [1, 1], strides = [1, 1]} : vector<1x16xf32> to vector<1x1xf32>
    %2244 = vector.broadcast %2243 : vector<1x1xf32> to vector<1x64xf32>
    %2245 = arith.mulf %2244, %18 : vector<1x64xf32>
    %2246 = arith.addf %2242, %2245 : vector<1x64xf32>
    %2247 = vector.extract_strided_slice %2236 {offsets = [0, 2], sizes = [1, 1], strides = [1, 1]} : vector<1x16xf32> to vector<1x1xf32>
    %2248 = vector.broadcast %2247 : vector<1x1xf32> to vector<1x64xf32>
    %2249 = arith.mulf %2248, %19 : vector<1x64xf32>
    %2250 = arith.addf %2246, %2249 : vector<1x64xf32>
    %2251 = vector.extract_strided_slice %2236 {offsets = [0, 3], sizes = [1, 1], strides = [1, 1]} : vector<1x16xf32> to vector<1x1xf32>
    %2252 = vector.broadcast %2251 : vector<1x1xf32> to vector<1x64xf32>
    %2253 = arith.mulf %2252, %20 : vector<1x64xf32>
    %2254 = arith.addf %2250, %2253 : vector<1x64xf32>
    %2255 = vector.extract_strided_slice %2236 {offsets = [0, 4], sizes = [1, 1], strides = [1, 1]} : vector<1x16xf32> to vector<1x1xf32>
    %2256 = vector.broadcast %2255 : vector<1x1xf32> to vector<1x64xf32>
    %2257 = arith.mulf %2256, %21 : vector<1x64xf32>
    %2258 = arith.addf %2254, %2257 : vector<1x64xf32>
    %2259 = vector.extract_strided_slice %2236 {offsets = [0, 5], sizes = [1, 1], strides = [1, 1]} : vector<1x16xf32> to vector<1x1xf32>
    %2260 = vector.broadcast %2259 : vector<1x1xf32> to vector<1x64xf32>
    %2261 = arith.mulf %2260, %22 : vector<1x64xf32>
    %2262 = arith.addf %2258, %2261 : vector<1x64xf32>
    %2263 = vector.extract_strided_slice %2236 {offsets = [0, 6], sizes = [1, 1], strides = [1, 1]} : vector<1x16xf32> to vector<1x1xf32>
    %2264 = vector.broadcast %2263 : vector<1x1xf32> to vector<1x64xf32>
    %2265 = arith.mulf %2264, %23 : vector<1x64xf32>
    %2266 = arith.addf %2262, %2265 : vector<1x64xf32>
    %2267 = vector.extract_strided_slice %2236 {offsets = [0, 7], sizes = [1, 1], strides = [1, 1]} : vector<1x16xf32> to vector<1x1xf32>
    %2268 = vector.broadcast %2267 : vector<1x1xf32> to vector<1x64xf32>
    %2269 = arith.mulf %2268, %24 : vector<1x64xf32>
    %2270 = arith.addf %2266, %2269 : vector<1x64xf32>
    %2271 = vector.extract_strided_slice %2236 {offsets = [0, 8], sizes = [1, 1], strides = [1, 1]} : vector<1x16xf32> to vector<1x1xf32>
    %2272 = vector.broadcast %2271 : vector<1x1xf32> to vector<1x64xf32>
    %2273 = arith.mulf %2272, %25 : vector<1x64xf32>
    %2274 = arith.addf %2270, %2273 : vector<1x64xf32>
    %2275 = vector.extract_strided_slice %2236 {offsets = [0, 9], sizes = [1, 1], strides = [1, 1]} : vector<1x16xf32> to vector<1x1xf32>
    %2276 = vector.broadcast %2275 : vector<1x1xf32> to vector<1x64xf32>
    %2277 = arith.mulf %2276, %26 : vector<1x64xf32>
    %2278 = arith.addf %2274, %2277 : vector<1x64xf32>
    %2279 = vector.extract_strided_slice %2236 {offsets = [0, 10], sizes = [1, 1], strides = [1, 1]} : vector<1x16xf32> to vector<1x1xf32>
    %2280 = vector.broadcast %2279 : vector<1x1xf32> to vector<1x64xf32>
    %2281 = arith.mulf %2280, %27 : vector<1x64xf32>
    %2282 = arith.addf %2278, %2281 : vector<1x64xf32>
    %2283 = vector.extract_strided_slice %2236 {offsets = [0, 11], sizes = [1, 1], strides = [1, 1]} : vector<1x16xf32> to vector<1x1xf32>
    %2284 = vector.broadcast %2283 : vector<1x1xf32> to vector<1x64xf32>
    %2285 = arith.mulf %2284, %28 : vector<1x64xf32>
    %2286 = arith.addf %2282, %2285 : vector<1x64xf32>
    %2287 = vector.extract_strided_slice %2236 {offsets = [0, 12], sizes = [1, 1], strides = [1, 1]} : vector<1x16xf32> to vector<1x1xf32>
    %2288 = vector.broadcast %2287 : vector<1x1xf32> to vector<1x64xf32>
    %2289 = arith.mulf %2288, %29 : vector<1x64xf32>
    %2290 = arith.addf %2286, %2289 : vector<1x64xf32>
    %2291 = vector.extract_strided_slice %2236 {offsets = [0, 13], sizes = [1, 1], strides = [1, 1]} : vector<1x16xf32> to vector<1x1xf32>
    %2292 = vector.broadcast %2291 : vector<1x1xf32> to vector<1x64xf32>
    %2293 = arith.mulf %2292, %30 : vector<1x64xf32>
    %2294 = arith.addf %2290, %2293 : vector<1x64xf32>
    %2295 = vector.extract_strided_slice %2236 {offsets = [0, 14], sizes = [1, 1], strides = [1, 1]} : vector<1x16xf32> to vector<1x1xf32>
    %2296 = vector.broadcast %2295 : vector<1x1xf32> to vector<1x64xf32>
    %2297 = arith.mulf %2296, %31 : vector<1x64xf32>
    %2298 = arith.addf %2294, %2297 : vector<1x64xf32>
    %2299 = vector.extract_strided_slice %2236 {offsets = [0, 15], sizes = [1, 1], strides = [1, 1]} : vector<1x16xf32> to vector<1x1xf32>
    %2300 = vector.broadcast %2299 : vector<1x1xf32> to vector<1x64xf32>
    %2301 = arith.mulf %2300, %32 : vector<1x64xf32>
    %2302 = arith.addf %2298, %2301 : vector<1x64xf32>
    %2303 = vector.extract_strided_slice %2302 {offsets = [0, 0], sizes = [1, 48], strides = [1, 1]} : vector<1x64xf32> to vector<1x48xf32>
    %cst_210 = arith.constant 5.000000e-01 : f32
    %2304 = vector.broadcast %cst_210 : f32 to vector<1x48xf32>
    %2305 = arith.mulf %2304, %2303 : vector<1x48xf32>
    %2306 = math.tanh %2305 : vector<1x48xf32>
    %cst_211 = arith.constant 5.000000e-01 : f32
    %2307 = vector.broadcast %cst_211 : f32 to vector<1x48xf32>
    %2308 = arith.mulf %2307, %2306 : vector<1x48xf32>
    %cst_212 = arith.constant 5.000000e-01 : f32
    %2309 = vector.broadcast %cst_212 : f32 to vector<1x48xf32>
    %2310 = arith.addf %2308, %2309 : vector<1x48xf32>
    %2311 = vector.extract_strided_slice %2302 {offsets = [0, 48], sizes = [1, 16], strides = [1, 1]} : vector<1x64xf32> to vector<1x16xf32>
    %2312 = math.tanh %2311 : vector<1x16xf32>
    %2313 = vector.extract_strided_slice %2310 {offsets = [0, 0], sizes = [1, 16], strides = [1, 1]} : vector<1x48xf32> to vector<1x16xf32>
    %2314 = vector.extract_strided_slice %2310 {offsets = [0, 16], sizes = [1, 16], strides = [1, 1]} : vector<1x48xf32> to vector<1x16xf32>
    %2315 = vector.extract_strided_slice %2310 {offsets = [0, 32], sizes = [1, 16], strides = [1, 1]} : vector<1x48xf32> to vector<1x16xf32>
    %2316 = arith.mulf %2314, %2234 : vector<1x16xf32>
    %2317 = arith.mulf %2313, %2312 : vector<1x16xf32>
    %2318 = arith.addf %2316, %2317 : vector<1x16xf32>
    %2319 = math.tanh %2318 : vector<1x16xf32>
    %2320 = arith.mulf %2315, %2319 : vector<1x16xf32>
    %c27_213 = arith.constant 27 : index
    %c0_214 = arith.constant 0 : index
    %2321 = vector.load %arg13[%c27_213, %c0_214] : memref<32x16xf32, #tpu.memory_space<vmem>>, vector<1x16xf32>
    tpu.vector_store %arg13[%c27_213, %c0_214], %2320 {strides = array<i32>} : memref<32x16xf32, #tpu.memory_space<vmem>>, vector<1x16xf32>,
    %c28 = arith.constant 28 : index
    %c0_215 = arith.constant 0 : index
    %2322 = vector.load %arg12[%c28, %c0_215] : memref<32x64xf32, #tpu.memory_space<vmem>>, vector<1x64xf32>
    %2323 = vector.extract_strided_slice %2320 {offsets = [0, 0], sizes = [1, 1], strides = [1, 1]} : vector<1x16xf32> to vector<1x1xf32>
    %2324 = vector.broadcast %2323 : vector<1x1xf32> to vector<1x64xf32>
    %2325 = arith.mulf %2324, %17 : vector<1x64xf32>
    %2326 = arith.addf %2322, %2325 : vector<1x64xf32>
    %2327 = vector.extract_strided_slice %2320 {offsets = [0, 1], sizes = [1, 1], strides = [1, 1]} : vector<1x16xf32> to vector<1x1xf32>
    %2328 = vector.broadcast %2327 : vector<1x1xf32> to vector<1x64xf32>
    %2329 = arith.mulf %2328, %18 : vector<1x64xf32>
    %2330 = arith.addf %2326, %2329 : vector<1x64xf32>
    %2331 = vector.extract_strided_slice %2320 {offsets = [0, 2], sizes = [1, 1], strides = [1, 1]} : vector<1x16xf32> to vector<1x1xf32>
    %2332 = vector.broadcast %2331 : vector<1x1xf32> to vector<1x64xf32>
    %2333 = arith.mulf %2332, %19 : vector<1x64xf32>
    %2334 = arith.addf %2330, %2333 : vector<1x64xf32>
    %2335 = vector.extract_strided_slice %2320 {offsets = [0, 3], sizes = [1, 1], strides = [1, 1]} : vector<1x16xf32> to vector<1x1xf32>
    %2336 = vector.broadcast %2335 : vector<1x1xf32> to vector<1x64xf32>
    %2337 = arith.mulf %2336, %20 : vector<1x64xf32>
    %2338 = arith.addf %2334, %2337 : vector<1x64xf32>
    %2339 = vector.extract_strided_slice %2320 {offsets = [0, 4], sizes = [1, 1], strides = [1, 1]} : vector<1x16xf32> to vector<1x1xf32>
    %2340 = vector.broadcast %2339 : vector<1x1xf32> to vector<1x64xf32>
    %2341 = arith.mulf %2340, %21 : vector<1x64xf32>
    %2342 = arith.addf %2338, %2341 : vector<1x64xf32>
    %2343 = vector.extract_strided_slice %2320 {offsets = [0, 5], sizes = [1, 1], strides = [1, 1]} : vector<1x16xf32> to vector<1x1xf32>
    %2344 = vector.broadcast %2343 : vector<1x1xf32> to vector<1x64xf32>
    %2345 = arith.mulf %2344, %22 : vector<1x64xf32>
    %2346 = arith.addf %2342, %2345 : vector<1x64xf32>
    %2347 = vector.extract_strided_slice %2320 {offsets = [0, 6], sizes = [1, 1], strides = [1, 1]} : vector<1x16xf32> to vector<1x1xf32>
    %2348 = vector.broadcast %2347 : vector<1x1xf32> to vector<1x64xf32>
    %2349 = arith.mulf %2348, %23 : vector<1x64xf32>
    %2350 = arith.addf %2346, %2349 : vector<1x64xf32>
    %2351 = vector.extract_strided_slice %2320 {offsets = [0, 7], sizes = [1, 1], strides = [1, 1]} : vector<1x16xf32> to vector<1x1xf32>
    %2352 = vector.broadcast %2351 : vector<1x1xf32> to vector<1x64xf32>
    %2353 = arith.mulf %2352, %24 : vector<1x64xf32>
    %2354 = arith.addf %2350, %2353 : vector<1x64xf32>
    %2355 = vector.extract_strided_slice %2320 {offsets = [0, 8], sizes = [1, 1], strides = [1, 1]} : vector<1x16xf32> to vector<1x1xf32>
    %2356 = vector.broadcast %2355 : vector<1x1xf32> to vector<1x64xf32>
    %2357 = arith.mulf %2356, %25 : vector<1x64xf32>
    %2358 = arith.addf %2354, %2357 : vector<1x64xf32>
    %2359 = vector.extract_strided_slice %2320 {offsets = [0, 9], sizes = [1, 1], strides = [1, 1]} : vector<1x16xf32> to vector<1x1xf32>
    %2360 = vector.broadcast %2359 : vector<1x1xf32> to vector<1x64xf32>
    %2361 = arith.mulf %2360, %26 : vector<1x64xf32>
    %2362 = arith.addf %2358, %2361 : vector<1x64xf32>
    %2363 = vector.extract_strided_slice %2320 {offsets = [0, 10], sizes = [1, 1], strides = [1, 1]} : vector<1x16xf32> to vector<1x1xf32>
    %2364 = vector.broadcast %2363 : vector<1x1xf32> to vector<1x64xf32>
    %2365 = arith.mulf %2364, %27 : vector<1x64xf32>
    %2366 = arith.addf %2362, %2365 : vector<1x64xf32>
    %2367 = vector.extract_strided_slice %2320 {offsets = [0, 11], sizes = [1, 1], strides = [1, 1]} : vector<1x16xf32> to vector<1x1xf32>
    %2368 = vector.broadcast %2367 : vector<1x1xf32> to vector<1x64xf32>
    %2369 = arith.mulf %2368, %28 : vector<1x64xf32>
    %2370 = arith.addf %2366, %2369 : vector<1x64xf32>
    %2371 = vector.extract_strided_slice %2320 {offsets = [0, 12], sizes = [1, 1], strides = [1, 1]} : vector<1x16xf32> to vector<1x1xf32>
    %2372 = vector.broadcast %2371 : vector<1x1xf32> to vector<1x64xf32>
    %2373 = arith.mulf %2372, %29 : vector<1x64xf32>
    %2374 = arith.addf %2370, %2373 : vector<1x64xf32>
    %2375 = vector.extract_strided_slice %2320 {offsets = [0, 13], sizes = [1, 1], strides = [1, 1]} : vector<1x16xf32> to vector<1x1xf32>
    %2376 = vector.broadcast %2375 : vector<1x1xf32> to vector<1x64xf32>
    %2377 = arith.mulf %2376, %30 : vector<1x64xf32>
    %2378 = arith.addf %2374, %2377 : vector<1x64xf32>
    %2379 = vector.extract_strided_slice %2320 {offsets = [0, 14], sizes = [1, 1], strides = [1, 1]} : vector<1x16xf32> to vector<1x1xf32>
    %2380 = vector.broadcast %2379 : vector<1x1xf32> to vector<1x64xf32>
    %2381 = arith.mulf %2380, %31 : vector<1x64xf32>
    %2382 = arith.addf %2378, %2381 : vector<1x64xf32>
    %2383 = vector.extract_strided_slice %2320 {offsets = [0, 15], sizes = [1, 1], strides = [1, 1]} : vector<1x16xf32> to vector<1x1xf32>
    %2384 = vector.broadcast %2383 : vector<1x1xf32> to vector<1x64xf32>
    %2385 = arith.mulf %2384, %32 : vector<1x64xf32>
    %2386 = arith.addf %2382, %2385 : vector<1x64xf32>
    %2387 = vector.extract_strided_slice %2386 {offsets = [0, 0], sizes = [1, 48], strides = [1, 1]} : vector<1x64xf32> to vector<1x48xf32>
    %cst_216 = arith.constant 5.000000e-01 : f32
    %2388 = vector.broadcast %cst_216 : f32 to vector<1x48xf32>
    %2389 = arith.mulf %2388, %2387 : vector<1x48xf32>
    %2390 = math.tanh %2389 : vector<1x48xf32>
    %cst_217 = arith.constant 5.000000e-01 : f32
    %2391 = vector.broadcast %cst_217 : f32 to vector<1x48xf32>
    %2392 = arith.mulf %2391, %2390 : vector<1x48xf32>
    %cst_218 = arith.constant 5.000000e-01 : f32
    %2393 = vector.broadcast %cst_218 : f32 to vector<1x48xf32>
    %2394 = arith.addf %2392, %2393 : vector<1x48xf32>
    %2395 = vector.extract_strided_slice %2386 {offsets = [0, 48], sizes = [1, 16], strides = [1, 1]} : vector<1x64xf32> to vector<1x16xf32>
    %2396 = math.tanh %2395 : vector<1x16xf32>
    %2397 = vector.extract_strided_slice %2394 {offsets = [0, 0], sizes = [1, 16], strides = [1, 1]} : vector<1x48xf32> to vector<1x16xf32>
    %2398 = vector.extract_strided_slice %2394 {offsets = [0, 16], sizes = [1, 16], strides = [1, 1]} : vector<1x48xf32> to vector<1x16xf32>
    %2399 = vector.extract_strided_slice %2394 {offsets = [0, 32], sizes = [1, 16], strides = [1, 1]} : vector<1x48xf32> to vector<1x16xf32>
    %2400 = arith.mulf %2398, %2318 : vector<1x16xf32>
    %2401 = arith.mulf %2397, %2396 : vector<1x16xf32>
    %2402 = arith.addf %2400, %2401 : vector<1x16xf32>
    %2403 = math.tanh %2402 : vector<1x16xf32>
    %2404 = arith.mulf %2399, %2403 : vector<1x16xf32>
    %c28_219 = arith.constant 28 : index
    %c0_220 = arith.constant 0 : index
    %2405 = vector.load %arg13[%c28_219, %c0_220] : memref<32x16xf32, #tpu.memory_space<vmem>>, vector<1x16xf32>
    tpu.vector_store %arg13[%c28_219, %c0_220], %2404 {strides = array<i32>} : memref<32x16xf32, #tpu.memory_space<vmem>>, vector<1x16xf32>,
    %c29 = arith.constant 29 : index
    %c0_221 = arith.constant 0 : index
    %2406 = vector.load %arg12[%c29, %c0_221] : memref<32x64xf32, #tpu.memory_space<vmem>>, vector<1x64xf32>
    %2407 = vector.extract_strided_slice %2404 {offsets = [0, 0], sizes = [1, 1], strides = [1, 1]} : vector<1x16xf32> to vector<1x1xf32>
    %2408 = vector.broadcast %2407 : vector<1x1xf32> to vector<1x64xf32>
    %2409 = arith.mulf %2408, %17 : vector<1x64xf32>
    %2410 = arith.addf %2406, %2409 : vector<1x64xf32>
    %2411 = vector.extract_strided_slice %2404 {offsets = [0, 1], sizes = [1, 1], strides = [1, 1]} : vector<1x16xf32> to vector<1x1xf32>
    %2412 = vector.broadcast %2411 : vector<1x1xf32> to vector<1x64xf32>
    %2413 = arith.mulf %2412, %18 : vector<1x64xf32>
    %2414 = arith.addf %2410, %2413 : vector<1x64xf32>
    %2415 = vector.extract_strided_slice %2404 {offsets = [0, 2], sizes = [1, 1], strides = [1, 1]} : vector<1x16xf32> to vector<1x1xf32>
    %2416 = vector.broadcast %2415 : vector<1x1xf32> to vector<1x64xf32>
    %2417 = arith.mulf %2416, %19 : vector<1x64xf32>
    %2418 = arith.addf %2414, %2417 : vector<1x64xf32>
    %2419 = vector.extract_strided_slice %2404 {offsets = [0, 3], sizes = [1, 1], strides = [1, 1]} : vector<1x16xf32> to vector<1x1xf32>
    %2420 = vector.broadcast %2419 : vector<1x1xf32> to vector<1x64xf32>
    %2421 = arith.mulf %2420, %20 : vector<1x64xf32>
    %2422 = arith.addf %2418, %2421 : vector<1x64xf32>
    %2423 = vector.extract_strided_slice %2404 {offsets = [0, 4], sizes = [1, 1], strides = [1, 1]} : vector<1x16xf32> to vector<1x1xf32>
    %2424 = vector.broadcast %2423 : vector<1x1xf32> to vector<1x64xf32>
    %2425 = arith.mulf %2424, %21 : vector<1x64xf32>
    %2426 = arith.addf %2422, %2425 : vector<1x64xf32>
    %2427 = vector.extract_strided_slice %2404 {offsets = [0, 5], sizes = [1, 1], strides = [1, 1]} : vector<1x16xf32> to vector<1x1xf32>
    %2428 = vector.broadcast %2427 : vector<1x1xf32> to vector<1x64xf32>
    %2429 = arith.mulf %2428, %22 : vector<1x64xf32>
    %2430 = arith.addf %2426, %2429 : vector<1x64xf32>
    %2431 = vector.extract_strided_slice %2404 {offsets = [0, 6], sizes = [1, 1], strides = [1, 1]} : vector<1x16xf32> to vector<1x1xf32>
    %2432 = vector.broadcast %2431 : vector<1x1xf32> to vector<1x64xf32>
    %2433 = arith.mulf %2432, %23 : vector<1x64xf32>
    %2434 = arith.addf %2430, %2433 : vector<1x64xf32>
    %2435 = vector.extract_strided_slice %2404 {offsets = [0, 7], sizes = [1, 1], strides = [1, 1]} : vector<1x16xf32> to vector<1x1xf32>
    %2436 = vector.broadcast %2435 : vector<1x1xf32> to vector<1x64xf32>
    %2437 = arith.mulf %2436, %24 : vector<1x64xf32>
    %2438 = arith.addf %2434, %2437 : vector<1x64xf32>
    %2439 = vector.extract_strided_slice %2404 {offsets = [0, 8], sizes = [1, 1], strides = [1, 1]} : vector<1x16xf32> to vector<1x1xf32>
    %2440 = vector.broadcast %2439 : vector<1x1xf32> to vector<1x64xf32>
    %2441 = arith.mulf %2440, %25 : vector<1x64xf32>
    %2442 = arith.addf %2438, %2441 : vector<1x64xf32>
    %2443 = vector.extract_strided_slice %2404 {offsets = [0, 9], sizes = [1, 1], strides = [1, 1]} : vector<1x16xf32> to vector<1x1xf32>
    %2444 = vector.broadcast %2443 : vector<1x1xf32> to vector<1x64xf32>
    %2445 = arith.mulf %2444, %26 : vector<1x64xf32>
    %2446 = arith.addf %2442, %2445 : vector<1x64xf32>
    %2447 = vector.extract_strided_slice %2404 {offsets = [0, 10], sizes = [1, 1], strides = [1, 1]} : vector<1x16xf32> to vector<1x1xf32>
    %2448 = vector.broadcast %2447 : vector<1x1xf32> to vector<1x64xf32>
    %2449 = arith.mulf %2448, %27 : vector<1x64xf32>
    %2450 = arith.addf %2446, %2449 : vector<1x64xf32>
    %2451 = vector.extract_strided_slice %2404 {offsets = [0, 11], sizes = [1, 1], strides = [1, 1]} : vector<1x16xf32> to vector<1x1xf32>
    %2452 = vector.broadcast %2451 : vector<1x1xf32> to vector<1x64xf32>
    %2453 = arith.mulf %2452, %28 : vector<1x64xf32>
    %2454 = arith.addf %2450, %2453 : vector<1x64xf32>
    %2455 = vector.extract_strided_slice %2404 {offsets = [0, 12], sizes = [1, 1], strides = [1, 1]} : vector<1x16xf32> to vector<1x1xf32>
    %2456 = vector.broadcast %2455 : vector<1x1xf32> to vector<1x64xf32>
    %2457 = arith.mulf %2456, %29 : vector<1x64xf32>
    %2458 = arith.addf %2454, %2457 : vector<1x64xf32>
    %2459 = vector.extract_strided_slice %2404 {offsets = [0, 13], sizes = [1, 1], strides = [1, 1]} : vector<1x16xf32> to vector<1x1xf32>
    %2460 = vector.broadcast %2459 : vector<1x1xf32> to vector<1x64xf32>
    %2461 = arith.mulf %2460, %30 : vector<1x64xf32>
    %2462 = arith.addf %2458, %2461 : vector<1x64xf32>
    %2463 = vector.extract_strided_slice %2404 {offsets = [0, 14], sizes = [1, 1], strides = [1, 1]} : vector<1x16xf32> to vector<1x1xf32>
    %2464 = vector.broadcast %2463 : vector<1x1xf32> to vector<1x64xf32>
    %2465 = arith.mulf %2464, %31 : vector<1x64xf32>
    %2466 = arith.addf %2462, %2465 : vector<1x64xf32>
    %2467 = vector.extract_strided_slice %2404 {offsets = [0, 15], sizes = [1, 1], strides = [1, 1]} : vector<1x16xf32> to vector<1x1xf32>
    %2468 = vector.broadcast %2467 : vector<1x1xf32> to vector<1x64xf32>
    %2469 = arith.mulf %2468, %32 : vector<1x64xf32>
    %2470 = arith.addf %2466, %2469 : vector<1x64xf32>
    %2471 = vector.extract_strided_slice %2470 {offsets = [0, 0], sizes = [1, 48], strides = [1, 1]} : vector<1x64xf32> to vector<1x48xf32>
    %cst_222 = arith.constant 5.000000e-01 : f32
    %2472 = vector.broadcast %cst_222 : f32 to vector<1x48xf32>
    %2473 = arith.mulf %2472, %2471 : vector<1x48xf32>
    %2474 = math.tanh %2473 : vector<1x48xf32>
    %cst_223 = arith.constant 5.000000e-01 : f32
    %2475 = vector.broadcast %cst_223 : f32 to vector<1x48xf32>
    %2476 = arith.mulf %2475, %2474 : vector<1x48xf32>
    %cst_224 = arith.constant 5.000000e-01 : f32
    %2477 = vector.broadcast %cst_224 : f32 to vector<1x48xf32>
    %2478 = arith.addf %2476, %2477 : vector<1x48xf32>
    %2479 = vector.extract_strided_slice %2470 {offsets = [0, 48], sizes = [1, 16], strides = [1, 1]} : vector<1x64xf32> to vector<1x16xf32>
    %2480 = math.tanh %2479 : vector<1x16xf32>
    %2481 = vector.extract_strided_slice %2478 {offsets = [0, 0], sizes = [1, 16], strides = [1, 1]} : vector<1x48xf32> to vector<1x16xf32>
    %2482 = vector.extract_strided_slice %2478 {offsets = [0, 16], sizes = [1, 16], strides = [1, 1]} : vector<1x48xf32> to vector<1x16xf32>
    %2483 = vector.extract_strided_slice %2478 {offsets = [0, 32], sizes = [1, 16], strides = [1, 1]} : vector<1x48xf32> to vector<1x16xf32>
    %2484 = arith.mulf %2482, %2402 : vector<1x16xf32>
    %2485 = arith.mulf %2481, %2480 : vector<1x16xf32>
    %2486 = arith.addf %2484, %2485 : vector<1x16xf32>
    %2487 = math.tanh %2486 : vector<1x16xf32>
    %2488 = arith.mulf %2483, %2487 : vector<1x16xf32>
    %c29_225 = arith.constant 29 : index
    %c0_226 = arith.constant 0 : index
    %2489 = vector.load %arg13[%c29_225, %c0_226] : memref<32x16xf32, #tpu.memory_space<vmem>>, vector<1x16xf32>
    tpu.vector_store %arg13[%c29_225, %c0_226], %2488 {strides = array<i32>} : memref<32x16xf32, #tpu.memory_space<vmem>>, vector<1x16xf32>,
    %c30 = arith.constant 30 : index
    %c0_227 = arith.constant 0 : index
    %2490 = vector.load %arg12[%c30, %c0_227] : memref<32x64xf32, #tpu.memory_space<vmem>>, vector<1x64xf32>
    %2491 = vector.extract_strided_slice %2488 {offsets = [0, 0], sizes = [1, 1], strides = [1, 1]} : vector<1x16xf32> to vector<1x1xf32>
    %2492 = vector.broadcast %2491 : vector<1x1xf32> to vector<1x64xf32>
    %2493 = arith.mulf %2492, %17 : vector<1x64xf32>
    %2494 = arith.addf %2490, %2493 : vector<1x64xf32>
    %2495 = vector.extract_strided_slice %2488 {offsets = [0, 1], sizes = [1, 1], strides = [1, 1]} : vector<1x16xf32> to vector<1x1xf32>
    %2496 = vector.broadcast %2495 : vector<1x1xf32> to vector<1x64xf32>
    %2497 = arith.mulf %2496, %18 : vector<1x64xf32>
    %2498 = arith.addf %2494, %2497 : vector<1x64xf32>
    %2499 = vector.extract_strided_slice %2488 {offsets = [0, 2], sizes = [1, 1], strides = [1, 1]} : vector<1x16xf32> to vector<1x1xf32>
    %2500 = vector.broadcast %2499 : vector<1x1xf32> to vector<1x64xf32>
    %2501 = arith.mulf %2500, %19 : vector<1x64xf32>
    %2502 = arith.addf %2498, %2501 : vector<1x64xf32>
    %2503 = vector.extract_strided_slice %2488 {offsets = [0, 3], sizes = [1, 1], strides = [1, 1]} : vector<1x16xf32> to vector<1x1xf32>
    %2504 = vector.broadcast %2503 : vector<1x1xf32> to vector<1x64xf32>
    %2505 = arith.mulf %2504, %20 : vector<1x64xf32>
    %2506 = arith.addf %2502, %2505 : vector<1x64xf32>
    %2507 = vector.extract_strided_slice %2488 {offsets = [0, 4], sizes = [1, 1], strides = [1, 1]} : vector<1x16xf32> to vector<1x1xf32>
    %2508 = vector.broadcast %2507 : vector<1x1xf32> to vector<1x64xf32>
    %2509 = arith.mulf %2508, %21 : vector<1x64xf32>
    %2510 = arith.addf %2506, %2509 : vector<1x64xf32>
    %2511 = vector.extract_strided_slice %2488 {offsets = [0, 5], sizes = [1, 1], strides = [1, 1]} : vector<1x16xf32> to vector<1x1xf32>
    %2512 = vector.broadcast %2511 : vector<1x1xf32> to vector<1x64xf32>
    %2513 = arith.mulf %2512, %22 : vector<1x64xf32>
    %2514 = arith.addf %2510, %2513 : vector<1x64xf32>
    %2515 = vector.extract_strided_slice %2488 {offsets = [0, 6], sizes = [1, 1], strides = [1, 1]} : vector<1x16xf32> to vector<1x1xf32>
    %2516 = vector.broadcast %2515 : vector<1x1xf32> to vector<1x64xf32>
    %2517 = arith.mulf %2516, %23 : vector<1x64xf32>
    %2518 = arith.addf %2514, %2517 : vector<1x64xf32>
    %2519 = vector.extract_strided_slice %2488 {offsets = [0, 7], sizes = [1, 1], strides = [1, 1]} : vector<1x16xf32> to vector<1x1xf32>
    %2520 = vector.broadcast %2519 : vector<1x1xf32> to vector<1x64xf32>
    %2521 = arith.mulf %2520, %24 : vector<1x64xf32>
    %2522 = arith.addf %2518, %2521 : vector<1x64xf32>
    %2523 = vector.extract_strided_slice %2488 {offsets = [0, 8], sizes = [1, 1], strides = [1, 1]} : vector<1x16xf32> to vector<1x1xf32>
    %2524 = vector.broadcast %2523 : vector<1x1xf32> to vector<1x64xf32>
    %2525 = arith.mulf %2524, %25 : vector<1x64xf32>
    %2526 = arith.addf %2522, %2525 : vector<1x64xf32>
    %2527 = vector.extract_strided_slice %2488 {offsets = [0, 9], sizes = [1, 1], strides = [1, 1]} : vector<1x16xf32> to vector<1x1xf32>
    %2528 = vector.broadcast %2527 : vector<1x1xf32> to vector<1x64xf32>
    %2529 = arith.mulf %2528, %26 : vector<1x64xf32>
    %2530 = arith.addf %2526, %2529 : vector<1x64xf32>
    %2531 = vector.extract_strided_slice %2488 {offsets = [0, 10], sizes = [1, 1], strides = [1, 1]} : vector<1x16xf32> to vector<1x1xf32>
    %2532 = vector.broadcast %2531 : vector<1x1xf32> to vector<1x64xf32>
    %2533 = arith.mulf %2532, %27 : vector<1x64xf32>
    %2534 = arith.addf %2530, %2533 : vector<1x64xf32>
    %2535 = vector.extract_strided_slice %2488 {offsets = [0, 11], sizes = [1, 1], strides = [1, 1]} : vector<1x16xf32> to vector<1x1xf32>
    %2536 = vector.broadcast %2535 : vector<1x1xf32> to vector<1x64xf32>
    %2537 = arith.mulf %2536, %28 : vector<1x64xf32>
    %2538 = arith.addf %2534, %2537 : vector<1x64xf32>
    %2539 = vector.extract_strided_slice %2488 {offsets = [0, 12], sizes = [1, 1], strides = [1, 1]} : vector<1x16xf32> to vector<1x1xf32>
    %2540 = vector.broadcast %2539 : vector<1x1xf32> to vector<1x64xf32>
    %2541 = arith.mulf %2540, %29 : vector<1x64xf32>
    %2542 = arith.addf %2538, %2541 : vector<1x64xf32>
    %2543 = vector.extract_strided_slice %2488 {offsets = [0, 13], sizes = [1, 1], strides = [1, 1]} : vector<1x16xf32> to vector<1x1xf32>
    %2544 = vector.broadcast %2543 : vector<1x1xf32> to vector<1x64xf32>
    %2545 = arith.mulf %2544, %30 : vector<1x64xf32>
    %2546 = arith.addf %2542, %2545 : vector<1x64xf32>
    %2547 = vector.extract_strided_slice %2488 {offsets = [0, 14], sizes = [1, 1], strides = [1, 1]} : vector<1x16xf32> to vector<1x1xf32>
    %2548 = vector.broadcast %2547 : vector<1x1xf32> to vector<1x64xf32>
    %2549 = arith.mulf %2548, %31 : vector<1x64xf32>
    %2550 = arith.addf %2546, %2549 : vector<1x64xf32>
    %2551 = vector.extract_strided_slice %2488 {offsets = [0, 15], sizes = [1, 1], strides = [1, 1]} : vector<1x16xf32> to vector<1x1xf32>
    %2552 = vector.broadcast %2551 : vector<1x1xf32> to vector<1x64xf32>
    %2553 = arith.mulf %2552, %32 : vector<1x64xf32>
    %2554 = arith.addf %2550, %2553 : vector<1x64xf32>
    %2555 = vector.extract_strided_slice %2554 {offsets = [0, 0], sizes = [1, 48], strides = [1, 1]} : vector<1x64xf32> to vector<1x48xf32>
    %cst_228 = arith.constant 5.000000e-01 : f32
    %2556 = vector.broadcast %cst_228 : f32 to vector<1x48xf32>
    %2557 = arith.mulf %2556, %2555 : vector<1x48xf32>
    %2558 = math.tanh %2557 : vector<1x48xf32>
    %cst_229 = arith.constant 5.000000e-01 : f32
    %2559 = vector.broadcast %cst_229 : f32 to vector<1x48xf32>
    %2560 = arith.mulf %2559, %2558 : vector<1x48xf32>
    %cst_230 = arith.constant 5.000000e-01 : f32
    %2561 = vector.broadcast %cst_230 : f32 to vector<1x48xf32>
    %2562 = arith.addf %2560, %2561 : vector<1x48xf32>
    %2563 = vector.extract_strided_slice %2554 {offsets = [0, 48], sizes = [1, 16], strides = [1, 1]} : vector<1x64xf32> to vector<1x16xf32>
    %2564 = math.tanh %2563 : vector<1x16xf32>
    %2565 = vector.extract_strided_slice %2562 {offsets = [0, 0], sizes = [1, 16], strides = [1, 1]} : vector<1x48xf32> to vector<1x16xf32>
    %2566 = vector.extract_strided_slice %2562 {offsets = [0, 16], sizes = [1, 16], strides = [1, 1]} : vector<1x48xf32> to vector<1x16xf32>
    %2567 = vector.extract_strided_slice %2562 {offsets = [0, 32], sizes = [1, 16], strides = [1, 1]} : vector<1x48xf32> to vector<1x16xf32>
    %2568 = arith.mulf %2566, %2486 : vector<1x16xf32>
    %2569 = arith.mulf %2565, %2564 : vector<1x16xf32>
    %2570 = arith.addf %2568, %2569 : vector<1x16xf32>
    %2571 = math.tanh %2570 : vector<1x16xf32>
    %2572 = arith.mulf %2567, %2571 : vector<1x16xf32>
    %c30_231 = arith.constant 30 : index
    %c0_232 = arith.constant 0 : index
    %2573 = vector.load %arg13[%c30_231, %c0_232] : memref<32x16xf32, #tpu.memory_space<vmem>>, vector<1x16xf32>
    tpu.vector_store %arg13[%c30_231, %c0_232], %2572 {strides = array<i32>} : memref<32x16xf32, #tpu.memory_space<vmem>>, vector<1x16xf32>,
    %c31 = arith.constant 31 : index
    %c0_233 = arith.constant 0 : index
    %2574 = vector.load %arg12[%c31, %c0_233] : memref<32x64xf32, #tpu.memory_space<vmem>>, vector<1x64xf32>
    %2575 = vector.extract_strided_slice %2572 {offsets = [0, 0], sizes = [1, 1], strides = [1, 1]} : vector<1x16xf32> to vector<1x1xf32>
    %2576 = vector.broadcast %2575 : vector<1x1xf32> to vector<1x64xf32>
    %2577 = arith.mulf %2576, %17 : vector<1x64xf32>
    %2578 = arith.addf %2574, %2577 : vector<1x64xf32>
    %2579 = vector.extract_strided_slice %2572 {offsets = [0, 1], sizes = [1, 1], strides = [1, 1]} : vector<1x16xf32> to vector<1x1xf32>
    %2580 = vector.broadcast %2579 : vector<1x1xf32> to vector<1x64xf32>
    %2581 = arith.mulf %2580, %18 : vector<1x64xf32>
    %2582 = arith.addf %2578, %2581 : vector<1x64xf32>
    %2583 = vector.extract_strided_slice %2572 {offsets = [0, 2], sizes = [1, 1], strides = [1, 1]} : vector<1x16xf32> to vector<1x1xf32>
    %2584 = vector.broadcast %2583 : vector<1x1xf32> to vector<1x64xf32>
    %2585 = arith.mulf %2584, %19 : vector<1x64xf32>
    %2586 = arith.addf %2582, %2585 : vector<1x64xf32>
    %2587 = vector.extract_strided_slice %2572 {offsets = [0, 3], sizes = [1, 1], strides = [1, 1]} : vector<1x16xf32> to vector<1x1xf32>
    %2588 = vector.broadcast %2587 : vector<1x1xf32> to vector<1x64xf32>
    %2589 = arith.mulf %2588, %20 : vector<1x64xf32>
    %2590 = arith.addf %2586, %2589 : vector<1x64xf32>
    %2591 = vector.extract_strided_slice %2572 {offsets = [0, 4], sizes = [1, 1], strides = [1, 1]} : vector<1x16xf32> to vector<1x1xf32>
    %2592 = vector.broadcast %2591 : vector<1x1xf32> to vector<1x64xf32>
    %2593 = arith.mulf %2592, %21 : vector<1x64xf32>
    %2594 = arith.addf %2590, %2593 : vector<1x64xf32>
    %2595 = vector.extract_strided_slice %2572 {offsets = [0, 5], sizes = [1, 1], strides = [1, 1]} : vector<1x16xf32> to vector<1x1xf32>
    %2596 = vector.broadcast %2595 : vector<1x1xf32> to vector<1x64xf32>
    %2597 = arith.mulf %2596, %22 : vector<1x64xf32>
    %2598 = arith.addf %2594, %2597 : vector<1x64xf32>
    %2599 = vector.extract_strided_slice %2572 {offsets = [0, 6], sizes = [1, 1], strides = [1, 1]} : vector<1x16xf32> to vector<1x1xf32>
    %2600 = vector.broadcast %2599 : vector<1x1xf32> to vector<1x64xf32>
    %2601 = arith.mulf %2600, %23 : vector<1x64xf32>
    %2602 = arith.addf %2598, %2601 : vector<1x64xf32>
    %2603 = vector.extract_strided_slice %2572 {offsets = [0, 7], sizes = [1, 1], strides = [1, 1]} : vector<1x16xf32> to vector<1x1xf32>
    %2604 = vector.broadcast %2603 : vector<1x1xf32> to vector<1x64xf32>
    %2605 = arith.mulf %2604, %24 : vector<1x64xf32>
    %2606 = arith.addf %2602, %2605 : vector<1x64xf32>
    %2607 = vector.extract_strided_slice %2572 {offsets = [0, 8], sizes = [1, 1], strides = [1, 1]} : vector<1x16xf32> to vector<1x1xf32>
    %2608 = vector.broadcast %2607 : vector<1x1xf32> to vector<1x64xf32>
    %2609 = arith.mulf %2608, %25 : vector<1x64xf32>
    %2610 = arith.addf %2606, %2609 : vector<1x64xf32>
    %2611 = vector.extract_strided_slice %2572 {offsets = [0, 9], sizes = [1, 1], strides = [1, 1]} : vector<1x16xf32> to vector<1x1xf32>
    %2612 = vector.broadcast %2611 : vector<1x1xf32> to vector<1x64xf32>
    %2613 = arith.mulf %2612, %26 : vector<1x64xf32>
    %2614 = arith.addf %2610, %2613 : vector<1x64xf32>
    %2615 = vector.extract_strided_slice %2572 {offsets = [0, 10], sizes = [1, 1], strides = [1, 1]} : vector<1x16xf32> to vector<1x1xf32>
    %2616 = vector.broadcast %2615 : vector<1x1xf32> to vector<1x64xf32>
    %2617 = arith.mulf %2616, %27 : vector<1x64xf32>
    %2618 = arith.addf %2614, %2617 : vector<1x64xf32>
    %2619 = vector.extract_strided_slice %2572 {offsets = [0, 11], sizes = [1, 1], strides = [1, 1]} : vector<1x16xf32> to vector<1x1xf32>
    %2620 = vector.broadcast %2619 : vector<1x1xf32> to vector<1x64xf32>
    %2621 = arith.mulf %2620, %28 : vector<1x64xf32>
    %2622 = arith.addf %2618, %2621 : vector<1x64xf32>
    %2623 = vector.extract_strided_slice %2572 {offsets = [0, 12], sizes = [1, 1], strides = [1, 1]} : vector<1x16xf32> to vector<1x1xf32>
    %2624 = vector.broadcast %2623 : vector<1x1xf32> to vector<1x64xf32>
    %2625 = arith.mulf %2624, %29 : vector<1x64xf32>
    %2626 = arith.addf %2622, %2625 : vector<1x64xf32>
    %2627 = vector.extract_strided_slice %2572 {offsets = [0, 13], sizes = [1, 1], strides = [1, 1]} : vector<1x16xf32> to vector<1x1xf32>
    %2628 = vector.broadcast %2627 : vector<1x1xf32> to vector<1x64xf32>
    %2629 = arith.mulf %2628, %30 : vector<1x64xf32>
    %2630 = arith.addf %2626, %2629 : vector<1x64xf32>
    %2631 = vector.extract_strided_slice %2572 {offsets = [0, 14], sizes = [1, 1], strides = [1, 1]} : vector<1x16xf32> to vector<1x1xf32>
    %2632 = vector.broadcast %2631 : vector<1x1xf32> to vector<1x64xf32>
    %2633 = arith.mulf %2632, %31 : vector<1x64xf32>
    %2634 = arith.addf %2630, %2633 : vector<1x64xf32>
    %2635 = vector.extract_strided_slice %2572 {offsets = [0, 15], sizes = [1, 1], strides = [1, 1]} : vector<1x16xf32> to vector<1x1xf32>
    %2636 = vector.broadcast %2635 : vector<1x1xf32> to vector<1x64xf32>
    %2637 = arith.mulf %2636, %32 : vector<1x64xf32>
    %2638 = arith.addf %2634, %2637 : vector<1x64xf32>
    %2639 = vector.extract_strided_slice %2638 {offsets = [0, 0], sizes = [1, 48], strides = [1, 1]} : vector<1x64xf32> to vector<1x48xf32>
    %cst_234 = arith.constant 5.000000e-01 : f32
    %2640 = vector.broadcast %cst_234 : f32 to vector<1x48xf32>
    %2641 = arith.mulf %2640, %2639 : vector<1x48xf32>
    %2642 = math.tanh %2641 : vector<1x48xf32>
    %cst_235 = arith.constant 5.000000e-01 : f32
    %2643 = vector.broadcast %cst_235 : f32 to vector<1x48xf32>
    %2644 = arith.mulf %2643, %2642 : vector<1x48xf32>
    %cst_236 = arith.constant 5.000000e-01 : f32
    %2645 = vector.broadcast %cst_236 : f32 to vector<1x48xf32>
    %2646 = arith.addf %2644, %2645 : vector<1x48xf32>
    %2647 = vector.extract_strided_slice %2638 {offsets = [0, 48], sizes = [1, 16], strides = [1, 1]} : vector<1x64xf32> to vector<1x16xf32>
    %2648 = math.tanh %2647 : vector<1x16xf32>
    %2649 = vector.extract_strided_slice %2646 {offsets = [0, 0], sizes = [1, 16], strides = [1, 1]} : vector<1x48xf32> to vector<1x16xf32>
    %2650 = vector.extract_strided_slice %2646 {offsets = [0, 16], sizes = [1, 16], strides = [1, 1]} : vector<1x48xf32> to vector<1x16xf32>
    %2651 = vector.extract_strided_slice %2646 {offsets = [0, 32], sizes = [1, 16], strides = [1, 1]} : vector<1x48xf32> to vector<1x16xf32>
    %2652 = arith.mulf %2650, %2570 : vector<1x16xf32>
    %2653 = arith.mulf %2649, %2648 : vector<1x16xf32>
    %2654 = arith.addf %2652, %2653 : vector<1x16xf32>
    %2655 = math.tanh %2654 : vector<1x16xf32>
    %2656 = arith.mulf %2651, %2655 : vector<1x16xf32>
    %c31_237 = arith.constant 31 : index
    %c0_238 = arith.constant 0 : index
    %2657 = vector.load %arg13[%c31_237, %c0_238] : memref<32x16xf32, #tpu.memory_space<vmem>>, vector<1x16xf32>
    tpu.vector_store %arg13[%c31_237, %c0_238], %2656 {strides = array<i32>} : memref<32x16xf32, #tpu.memory_space<vmem>>, vector<1x16xf32>,
    %c0_239 = arith.constant 0 : index
    %c0_240 = arith.constant 0 : index
    %2658 = vector.load %arg13[%c0_239, %c0_240] : memref<32x16xf32, #tpu.memory_space<vmem>>, vector<32x16xf32>
    %2659 = vector.broadcast %2656 : vector<1x16xf32> to vector<32x16xf32>
    %2660 = arith.mulf %2658, %2659 : vector<32x16xf32>
    %c0_241 = arith.constant 0 : index
    %c0_242 = arith.constant 0 : index
    %2661 = vector.load %arg7[%c0_241, %c0_242] : memref<16x2xf32, #tpu.memory_space<vmem>>, vector<16x2xf32>
    %cst_243 = arith.constant dense<0.000000e+00> : vector<32x2xf32>
    %2662 = tpu.matmul %2660, %2661, %cst_243 {dimension_numbers = #tpu.dot_dimension_numbers<[1], [0], [0], [1], [0, 0, 1, 1], [], []>} : vector<32x16xf32>, vector<16x2xf32>, vector<32x2xf32> -> vector<32x2xf32>
    %cst_244 = arith.constant dense<0xFF800000> : vector<2xf32>
    %2663 = vector.multi_reduction <maximumf>, %2662, %cst_244 [0] : vector<32x2xf32> to vector<2xf32>
    %2664 = vector.shape_cast %2663 : vector<2xf32> to vector<1x2xf32>
    %2665 = vector.broadcast %2664 : vector<1x2xf32> to vector<32x2xf32>
    %2666 = arith.subf %2662, %2665 : vector<32x2xf32>
    %2667 = math.exp %2666 : vector<32x2xf32>
    %cst_245 = arith.constant dense<0.000000e+00> : vector<2xf32>
    %2668 = vector.multi_reduction <add>, %2667, %cst_245 [0] : vector<32x2xf32> to vector<2xf32>
    %2669 = vector.shape_cast %2668 : vector<2xf32> to vector<1x2xf32>
    %2670 = vector.broadcast %2669 : vector<1x2xf32> to vector<32x2xf32>
    %2671 = arith.divf %2667, %2670 : vector<32x2xf32>
    %c0_246 = arith.constant 0 : index
    %c0_247 = arith.constant 0 : index
    %2672 = vector.load %arg8[%c0_246, %c0_247] : memref<2x16xf32, #tpu.memory_space<vmem>>, vector<2x16xf32>
    %cst_248 = arith.constant dense<0.000000e+00> : vector<32x16xf32>
    %2673 = tpu.matmul %2671, %2672, %cst_248 {dimension_numbers = #tpu.dot_dimension_numbers<[1], [0], [0], [1], [0, 0, 1, 1], [], []>} : vector<32x2xf32>, vector<2x16xf32>, vector<32x16xf32> -> vector<32x16xf32>
    %2674 = arith.mulf %2658, %2673 : vector<32x16xf32>
    %cst_249 = arith.constant dense<0.000000e+00> : vector<16xf32>
    %2675 = vector.multi_reduction <add>, %2674, %cst_249 [0] : vector<32x16xf32> to vector<16xf32>
    %2676 = vector.shape_cast %2675 : vector<16xf32> to vector<1x16xf32>
    %c0_250 = arith.constant 0 : index
    %c0_251 = arith.constant 0 : index
    %2677 = vector.load %arg9[%c0_250, %c0_251] : memref<16x8xf32, #tpu.memory_space<vmem>>, vector<16x8xf32>
    %cst_252 = arith.constant dense<0.000000e+00> : vector<1x8xf32>
    %2678 = tpu.matmul %2676, %2677, %cst_252 {dimension_numbers = #tpu.dot_dimension_numbers<[1], [0], [0], [1], [0, 0, 1, 1], [], []>} : vector<1x16xf32>, vector<16x8xf32>, vector<1x8xf32> -> vector<1x8xf32>
    %c0_253 = arith.constant 0 : index
    %c0_254 = arith.constant 0 : index
    %2679 = vector.load %arg10[%c0_253, %c0_254] : memref<1x8xf32, #tpu.memory_space<vmem>>, vector<1x8xf32>
    %2680 = arith.addf %2678, %2679 : vector<1x8xf32>
    %c0_255 = arith.constant 0 : index
    %c0_256 = arith.constant 0 : index
    %2681 = vector.load %arg11[%c0_255, %c0_256] : memref<1x40xf32, #tpu.memory_space<vmem>>, vector<1x8xf32>
    tpu.vector_store %arg11[%c0_255, %c0_256], %2680 {strides = array<i32>} : memref<1x40xf32, #tpu.memory_space<vmem>>, vector<1x8xf32>,
    %c0_257 = arith.constant 0 : index
    %c8_258 = arith.constant 8 : index
    %2682 = vector.load %arg11[%c0_257, %c8_258] : memref<1x40xf32, #tpu.memory_space<vmem>>, vector<1x16xf32>
    tpu.vector_store %arg11[%c0_257, %c8_258], %2656 {strides = array<i32>} : memref<1x40xf32, #tpu.memory_space<vmem>>, vector<1x16xf32>,
    %c0_259 = arith.constant 0 : index
    %c24_260 = arith.constant 24 : index
    %2683 = vector.load %arg11[%c0_259, %c24_260] : memref<1x40xf32, #tpu.memory_space<vmem>>, vector<1x16xf32>
    tpu.vector_store %arg11[%c0_259, %c24_260], %2654 {strides = array<i32>} : memref<1x40xf32, #tpu.memory_space<vmem>>, vector<1x16xf32>,
    return
  }
  func.func @transform_0(%arg0: i32) -> (i32, i32) {
    %c0_i32 = arith.constant 0 : i32
    %c0_i32_0 = arith.constant 0 : i32
    %c0_i32_1 = arith.constant 0 : i32
    return %c0_i32, %c0_i32_0 : i32, i32
  }
  func.func @transform_1(%arg0: i32) -> (i32, i32) {
    %c0_i32 = arith.constant 0 : i32
    %c0_i32_0 = arith.constant 0 : i32
    %c0_i32_1 = arith.constant 0 : i32
    return %c0_i32, %c0_i32_0 : i32, i32
  }
  func.func @transform_2(%arg0: i32) -> (i32, i32) {
    %c0_i32 = arith.constant 0 : i32
    %c0_i32_0 = arith.constant 0 : i32
    %c0_i32_1 = arith.constant 0 : i32
    return %c0_i32, %c0_i32_0 : i32, i32
  }
  func.func @transform_3(%arg0: i32) -> (i32, i32) {
    %c0_i32 = arith.constant 0 : i32
    %c0_i32_0 = arith.constant 0 : i32
    %c0_i32_1 = arith.constant 0 : i32
    return %c0_i32, %c0_i32_0 : i32, i32
  }
  func.func @transform_4(%arg0: i32) -> (i32, i32) {
    %c0_i32 = arith.constant 0 : i32
    %c0_i32_0 = arith.constant 0 : i32
    %c0_i32_1 = arith.constant 0 : i32
    return %c0_i32, %c0_i32_0 : i32, i32
  }
  func.func @transform_5(%arg0: i32) -> (i32, i32) {
    %c0_i32 = arith.constant 0 : i32
    %c0_i32_0 = arith.constant 0 : i32
    %c0_i32_1 = arith.constant 0 : i32
    return %c0_i32, %c0_i32_0 : i32, i32
  }
  func.func @transform_6(%arg0: i32) -> (i32, i32) {
    %c0_i32 = arith.constant 0 : i32
    %c0_i32_0 = arith.constant 0 : i32
    %c0_i32_1 = arith.constant 0 : i32
    return %c0_i32, %c0_i32_0 : i32, i32
  }
  func.func @transform_7(%arg0: i32) -> (i32, i32) {
    %c0_i32 = arith.constant 0 : i32
    %c0_i32_0 = arith.constant 0 : i32
    %c0_i32_1 = arith.constant 0 : i32
    return %c0_i32, %c0_i32_0 : i32, i32
  }
  func.func @transform_8(%arg0: i32) -> (i32, i32) {
    %c0_i32 = arith.constant 0 : i32
    %c0_i32_0 = arith.constant 0 : i32
    %c0_i32_1 = arith.constant 0 : i32
    return %c0_i32, %c0_i32_0 : i32, i32
  }
  func.func @transform_9(%arg0: i32) -> (i32, i32) {
    %c0_i32 = arith.constant 0 : i32
    %c0_i32_0 = arith.constant 0 : i32
    %c0_i32_1 = arith.constant 0 : i32
    return %c0_i32, %c0_i32_0 : i32, i32
  }
  func.func @transform_10(%arg0: i32) -> (i32, i32) {
    %c0_i32 = arith.constant 0 : i32
    %c0_i32_0 = arith.constant 0 : i32
    %c0_i32_1 = arith.constant 0 : i32
    return %c0_i32, %c0_i32_0 : i32, i32
  }
}

</mosaic_0001>

<bundles_post_ra>
// kernel: tpu_custom_call.1
= control target key start
LH: loop header
LB: loop body
LE: loop exit
PB: predicated region body
PF: predicated region fallthrough
CT: control target
= control target key end

     0   :  { %vm67_vm0 = vcmask 146432   ;;  %vm80_vm1 = vcmask 1041408   ;;  %v5514_v6 = vmov 0   ;;  %s8090_s0 = inlined_call_operand.vmem [shape: f32[18,12], index: 0, kind: input, shape index: {}]   ;;  %s8091_s1 = inlined_call_operand.vmem [shape: f32[32,18], index: 1, kind: input, shape index: {}]   ;;  %s8092_s2 = inlined_call_operand.vmem [shape: f32[32,1], index: 2, kind: input, shape index: {}]   ;;  %s8093_s3 = inlined_call_operand.vmem [shape: f32[6,64], index: 3, kind: input, shape index: {}]   ;;  %s8094_s4 = inlined_call_operand.vmem [shape: f32[16,64], index: 4, kind: input, shape index: {}]   ;;  %s8095_s5 = inlined_call_operand.vmem [shape: f32[1,64], index: 5, kind: input, shape index: {}]   ;;  %s8096_s6 = inlined_call_operand.vmem [shape: f32[16,2], index: 6, kind: input, shape index: {}]   ;;  %s8097_s7 = inlined_call_operand.vmem [shape: f32[2,16], index: 7, kind: input, shape index: {}]   ;;  %s8098_s8 = inlined_call_operand.vmem [shape: f32[16,8], index: 8, kind: input, shape index: {}]   ;;  %s8099_s9 = inlined_call_operand.vmem [shape: f32[1,8], index: 9, kind: input, shape index: {}]   ;;  %s8100_s10 = inlined_call_operand.hbm [shape: f32[1,40], index: 10, kind: output, shape index: {}]  }
   0x1   :  { %v40_v0 = vld [vmem:[%s8090_s0] sm:$0xff]  ;;  %v41_v1 = vld [vmem:[%s8090_s0 + $0x8] sm:$0xff]  ;;  %v42_v5 = vld [vmem:[%s8090_s0 + $0x10] sm:$0x3]  ;;  %4708 = vset.pattern.permute.xlu0 %v5514_v6 }
   0x2   :  { %v4670_v2 = vpack.c.bf16 %v41_v1, %v40_v0  ;;  %v36_v3 = vld [vmem:[%s8091_s1] sm:$0xff] }
   0x3   :  { %v43_v4 = vld [vmem:[%s8092_s2] sm:$0xff]  ;;  %4631 = vmatprep.mubr.msk.f32.mxu0 %vm67_vm0, %v36_v3 }
   0x4   :  { %15 = vsyncpa [#allocation5], 0  ;;  %4671 = vmatprep.subr.bf16.mxu0 %v4670_v2  ;;  %49 = vperm.xlu0 %4708, %v43_v4   ;;  %v44_v7 = vld [vmem:[%s8092_s2 + $0x8] sm:$0xff]  ;;  %v193_v10 = vld [vmem:[%s8093_s3] sm:$0x3f]  ;;  %vm214_vm2 = vcmask 1045504  }
   0x5   :  { %4673 = vmatpush3.bf16.msra.mxu0 %v4670_v2  ;;  %v37_v8 = vld [vmem:[%s8091_s1 + $0x8] sm:$0xff]  ;;  %4637 = vmatprep.subr.msk.mxu1 %vm214_vm2, %v193_v10  ;;  %s5515_s28 = smov 122   ;;  %vm201_vm3 = vcmask 48128   ;;  %v4583_v22 = vld [vmem:[%s8095_s5] ss:$0 sm:$0xff]  ;;  %vm303_vm4 = vcmask 523264  }
   0x6   :  { %4629 = vmatprep.subr.msk.mxu0 %vm80_vm1, %v42_v5  ;;  %4638 = vmatpush3.msk.msra.mxu1 %vm214_vm2, %v193_v10  ;;  %s5516_s30 = smov 80   ;;  %s5517_s11 = smov 16   ;;  %v8103_v38 = vmov 32   ;;  %v8101_v39 = vmov 33   ;;  %v8131_v43 = vmov 36   ;;  %v8129_v44 = vmov 34  }
   0x7   :  { %4709 = vset.pattern.permute.xlu1 %v8103_v38  ;;  %v8127_v45 = vmov 39   ;;  %v8125_v46 = vmov 35   ;;  %v8111_v47 = vmov 42   ;;  %v8123_v48 = vmov 37   ;;  %v5679_v57 = vld [vmem:[%s8094_s4] sm:$0x1] }
   0x8   :  { %54 = vperm.xlu0 %4708, %v44_v7   ;;  %v8107_v49 = vmov 45   ;;  %v8121_v50 = vmov 38   ;;  %v8119_v51 = vmov 40   ;;  %v8117_v52 = vmov 41   ;;  %v5685_v60 = vld [vmem:[%s8094_s4 + $0x1] sm:$0x1] }
   0x9   :  { %4630 = vmatpush3.msk.msra.mxu0 %vm80_vm1, %v42_v5  ;;  %v8109_v53 = vmov 43   ;;  %v8115_v54 = vmov 44   ;;  %v8105_v55 = vmov 46   ;;  %v8113_v56 = vmov 47   ;;  %v5690_v0 = vld [vmem:[%s8094_s4 + $0x2] sm:$0x1] }
   0xa   :  { %4632 = vmatmul.mubr.msk.f32.vlgmr.msra.gmra.mrb[0].mxu0 %vm67_vm0, %v37_v8  ;;  %v5697_v5 = vld [vmem:[%s8094_s4 + $0x3] sm:$0x1]  ;;  %v5703_v10 = vld [vmem:[%s8094_s4 + $0x4] sm:$0x1]  ;;  %vm351_vm5 = vcmask 122880   ;;  %s5536_s25 = smov 8  }
   0xb   :  { %vm4215_vm6 = vcmask 130048   ;;  %vm4313_vm7 = vcmask 15360   ;;  %vm5538_vm8 = vmmov 0   ;;  %vm4551_vm9 = vcmask 57344   ;;  %s5540_s13 = smov [#allocation4]  }
   0xc   :  { %4710 = vset.pattern.permute.xlu0 %v8101_v39  ;;  %s4570_s14 = sshll.u32 %s5540_s13, 4  ;;  %vm4556_vm10 = vcmask 188480   ;;  %vm4562_vm11 = vcmask 319680   ;;  %s4571_s14 = int_to_ptr.vmem [resolvable:$true] %s4570_s14 }
   0xd   :  { %s5490_s15 = scalar_lea.vmem %s4571_s14, 16  ;;  %s5494_s16 = scalar_lea.vmem %s4571_s14, 32 }
   0xe   :  { %p5491_p0 = scmp.ne.s32.totalorder %s4571_s14, %s5490_s15  ;;  %p5495_p1 = scmp.lt.s32.totalorder %s4571_s14, %s4571_s14 }
   0xf   :  { %p5496_p2 = scmp.lt.s32.totalorder %s5494_s16, %s5490_s15 }
  0x11   :  { %p5497_p3 = por %p5496_p2, %p5495_p1 }
  0x13   :  { %p5498_p4 = pnand %p5497_p3, %p5491_p0 }
  0x83   :  { %v50_v9 = vpop.permute.xlu0 %49 }
  0x87   :  { %v55_v12 = vpop.permute.xlu0 %54 }
  0xdd   :  { %v4633_v11 = vpop.f32.mrb[0].mxu0 }
  0xde   :  { %v150_v13 = vpop.f32.mrb[1].mxu0  ;;  %v156_v15 = vadd.f32 %v4633_v11, %v55_v12 }
  0xdf   :  { %v151_v14 = vadd.f32 %v150_v13, %v50_v9  ;;  %v5708_v13 = vld [vmem:[%s8094_s4 + $0x5] sm:$0x1] }
  0xe0   :  { %v170_v17 = vmax.f32 %v156_v15, 0.0 }
  0xe1   :  { %v169_v16 = vmax.f32 %v151_v14, 0.0 }
  0xe3   :  { %177 = vrot.lane.b32.xlu1 %v169_v16, %s5515_s28 }
  0xe7   :  { %179 = vrot.lane.b32.xlu1 %v170_v17, %s5515_s28 }
 0x155   :  { %v178_v18 = vpop.permute.xlu1 %177 }
 0x156   :  { %v189_v19 = vmax.f32 %v169_v16, %v178_v18  ;;  %v5715_v18 = vld [vmem:[%s8094_s4 + $0x6] sm:$0x1] }
 0x158   :  { %4639 = vmatprep.mubr.msk.f32.mxu1 %vm201_vm3, %v189_v19 }
 0x159   :  { %v180_v20 = vpop.permute.xlu1 %179 }
 0x15a   :  { %v190_v21 = vmax.f32 %v170_v17, %v180_v20 }
 0x15c   :  { %4640 = vmatmul.mubr.msk.f32.vlgmr.msra.gmra.mrb[0].mxu1 %vm201_vm3, %v190_v21 }
 0x22f   :  { %v4641_v23 = vpop.f32.mrb[0].mxu1 }
 0x230   :  { %v290_v24 = vadd.f32 %v4641_v23, %v4583_v22  ;;  %v284_v25 = vpop.f32.mrb[1].mxu1 }
 0x231   :  { %v285_v26 = vadd.f32 %v4583_v22, %v284_v25  ;;  %v5721_v22 = vld [vmem:[%s8094_s4 + $0x7] sm:$0x1]  ;;  %v5726_v25 = vld [vmem:[%s8094_s4 + $0x8] sm:$0x1] }
 0x232   :  { %305 = vst.msk [vmem:[#allocation2 + $0x8] sm:$0xff] %vm303_vm4, %v290_v24 }
 0x233   :  { %304 = vst.msk [vmem:[#allocation2] sm:$0xff] %vm303_vm4, %v285_v26 }
 0x23a   :  { %v324_v27 = vld [vmem:[#allocation2] sm:$0x1]  ;;  %v353_v62 = vld [vmem:[#allocation2 + $0x1] sm:$0x1] }
 0x23b   :  { %5207 = vtanh.f32 %v324_v27  ;;  %v325_v29 = vmul.f32 0.5, %v324_v27 }
 0x23d   :  { %5209 = vtanh.f32 %v325_v29 }
 0x245   :  { %v5208_v28 = vpop.eup %5207 }
 0x246   :  { %332 = vrot.lane.b32.xlu0 %v5208_v28, %s5516_s30 }
 0x247   :  { %v5210_v30 = vpop.eup %5209 }
 0x248   :  { %v327_v31 = vmul.f32 0.5, %v5210_v30  ;;  %v5733_v30 = vld [vmem:[%s8094_s4 + $0x9] sm:$0x1] }
 0x24a   :  { %v328_v32 = vadd.f32 0.5, %v327_v31 }
 0x24c   :  { %v330_v35 = vmul.f32 0.0, %v328_v32 }
 0x2b8   :  { %v333_v33 = vpop.permute.xlu0 %332 }
 0x2b9   :  { %v335_v34 = vmul.f32 %v333_v33, %v328_v32 }
 0x2bb   :  { %337 = vrot.lane.b32.xlu1 %v335_v34, %s5517_s11  ;;  %v5739_v34 = vld [vmem:[%s8094_s4 + $0xa] sm:$0x1] }
 0x32d   :  { %v338_v36 = vpop.permute.xlu1 %337 }
 0x32e   :  { %v5636_v37 = vadd.f32 %v338_v36, %v330_v35 }
 0x330   :  { %5211 = vtanh.f32 %v5636_v37 }
 0x33a   :  { %v5212_v40 = vpop.eup %5211 }
 0x33b   :  { %343 = vrot.lane.b32.xlu0 %v5212_v40, %s5517_s11  ;;  %v5744_v40 = vld [vmem:[%s8094_s4 + $0xb] sm:$0x1] }
 0x3ad   :  { %v344_v41 = vpop.permute.xlu0 %343 }
 0x3ae   :  { %v5642_v42 = vmul.f32 %v344_v41, %v328_v32 }
 0x3b0   :  { %361 = vperm.xlu0 %4710, %v5642_v42   ;;  %355 = vperm.xlu1 %4709, %v5642_v42  }
 0x3b4   :  { %4713 = vset.pattern.permute.xlu0 %v8131_v43  ;;  %4711 = vset.pattern.permute.xlu1 %v8129_v44 }
 0x3b5   :  { %379 = vperm.xlu0 %4713, %v5642_v42   ;;  %367 = vperm.xlu1 %4711, %v5642_v42  }
 0x3b9   :  { %4716 = vset.pattern.permute.xlu0 %v8127_v45  ;;  %4712 = vset.pattern.permute.xlu1 %v8125_v46 }
 0x3ba   :  { %397 = vperm.xlu0 %4716, %v5642_v42   ;;  %373 = vperm.xlu1 %4712, %v5642_v42  }
 0x3be   :  { %4719 = vset.pattern.permute.xlu0 %v8111_v47  ;;  %4714 = vset.pattern.permute.xlu1 %v8123_v48 }
 0x3bf   :  { %415 = vperm.xlu0 %4719, %v5642_v42   ;;  %385 = vperm.xlu1 %4714, %v5642_v42  }
 0x3c3   :  { %4722 = vset.pattern.permute.xlu0 %v8107_v49  ;;  %4715 = vset.pattern.permute.xlu1 %v8121_v50 }
 0x3c4   :  { %433 = vperm.xlu0 %4722, %v5642_v42   ;;  %391 = vperm.xlu1 %4715, %v5642_v42  }
 0x3c8   :  { %4717 = vset.pattern.permute.xlu1 %v8119_v51  ;;  %4726 = vset.pattern.permute.xlu0 %v8101_v39 }
 0x3c9   :  { %403 = vperm.xlu1 %4717, %v5642_v42  }
 0x3cd   :  { %4718 = vset.pattern.permute.xlu1 %v8117_v52 }
 0x3ce   :  { %409 = vperm.xlu1 %4718, %v5642_v42  }
 0x3d2   :  { %4720 = vset.pattern.permute.xlu1 %v8109_v53 }
 0x3d3   :  { %421 = vperm.xlu1 %4720, %v5642_v42  }
 0x3d7   :  { %4721 = vset.pattern.permute.xlu1 %v8115_v54 }
 0x3d8   :  { %427 = vperm.xlu1 %4721, %v5642_v42  }
 0x3dc   :  { %4723 = vset.pattern.permute.xlu1 %v8105_v55 }
 0x3dd   :  { %439 = vperm.xlu1 %4723, %v5642_v42  }
 0x3e1   :  { %4724 = vset.pattern.permute.xlu1 %v8113_v56 }
 0x3e2   :  { %445 = vperm.xlu1 %4724, %v5642_v42  }
 0x3e6   :  { %4725 = vset.pattern.permute.xlu1 %v8103_v38 }
 0x42f   :  { %v356_v58 = vpop.permute.xlu1 %355  ;;  %v362_v61 = vpop.permute.xlu0 %361 }
 0x430   :  { %v358_v59 = vmul.f32 %v356_v58, %v5679_v57  ;;  %v364_v1 = vmul.f32 %v362_v61, %v5685_v60 }
 0x432   :  { %v359_v63 = vadd.f32 %v358_v59, %v353_v62  ;;  %v5751_v62 = vld [vmem:[%s8094_s4 + $0xc] sm:$0x1] }
 0x434   :  { %v368_v2 = vpop.permute.xlu1 %367  ;;  %v365_v3 = vadd.f32 %v364_v1, %v359_v63  ;;  %v380_v11 = vpop.permute.xlu0 %379 }
 0x435   :  { %v370_v4 = vmul.f32 %v368_v2, %v5690_v0  ;;  %v382_v14 = vmul.f32 %v380_v11, %v5703_v10 }
 0x437   :  { %v371_v8 = vadd.f32 %v370_v4, %v365_v3  ;;  %v5757_v3 = vld [vmem:[%s8094_s4 + $0xd] sm:$0x1] }
 0x439   :  { %v374_v7 = vpop.permute.xlu1 %373  ;;  %v398_v23 = vpop.permute.xlu0 %397 }
 0x43a   :  { %v376_v9 = vmul.f32 %v374_v7, %v5697_v5  ;;  %v400_v26 = vmul.f32 %v398_v23, %v5721_v22 }
 0x43c   :  { %v377_v12 = vadd.f32 %v376_v9, %v371_v8  ;;  %v5762_v8 = vld [vmem:[%s8094_s4 + $0xe] sm:$0x1] }
 0x43e   :  { %v386_v15 = vpop.permute.xlu1 %385  ;;  %v383_v16 = vadd.f32 %v382_v14, %v377_v12  ;;  %v416_v35 = vpop.permute.xlu0 %415 }
 0x43f   :  { %v388_v17 = vmul.f32 %v386_v15, %v5708_v13  ;;  %v418_v41 = vmul.f32 %v416_v35, %v5739_v34  ;;  %v5769_v15 = vld [vmem:[%s8094_s4 + $0xf] sm:$0x1] }
 0x441   :  { %v389_v20 = vadd.f32 %v388_v17, %v383_v16 }
 0x443   :  { %v392_v19 = vpop.permute.xlu1 %391  ;;  %v434_v4 = vpop.permute.xlu0 %433 }
 0x444   :  { %v394_v21 = vmul.f32 %v392_v19, %v5715_v18  ;;  %v436_v9 = vmul.f32 %v434_v4, %v5757_v3 }
 0x446   :  { %v395_v24 = vadd.f32 %v394_v21, %v389_v20 }
 0x448   :  { %v404_v27 = vpop.permute.xlu1 %403  ;;  %v401_v28 = vadd.f32 %v400_v26, %v395_v24 }
 0x449   :  { %v406_v29 = vmul.f32 %v404_v27, %v5726_v25 }
 0x44b   :  { %v407_v32 = vadd.f32 %v406_v29, %v401_v28 }
 0x44d   :  { %v410_v31 = vpop.permute.xlu1 %409 }
 0x44e   :  { %v412_v33 = vmul.f32 %v410_v31, %v5733_v30 }
 0x450   :  { %v413_v36 = vadd.f32 %v412_v33, %v407_v32 }
 0x452   :  { %v422_v58 = vpop.permute.xlu1 %421  ;;  %v419_v59 = vadd.f32 %v418_v41, %v413_v36 }
 0x453   :  { %v424_v61 = vmul.f32 %v422_v58, %v5744_v40 }
 0x455   :  { %v425_v1 = vadd.f32 %v424_v61, %v419_v59  ;;  %v477_v61 = vld [vmem:[#allocation2 + $0x2] sm:$0x1] }
 0x457   :  { %v428_v63 = vpop.permute.xlu1 %427 }
 0x458   :  { %v430_v2 = vmul.f32 %v428_v63, %v5751_v62 }
 0x45a   :  { %v431_v7 = vadd.f32 %v430_v2, %v425_v1 }
 0x45c   :  { %v440_v11 = vpop.permute.xlu1 %439  ;;  %v437_v12 = vadd.f32 %v436_v9, %v431_v7 }
 0x45d   :  { %v442_v14 = vmul.f32 %v440_v11, %v5762_v8 }
 0x45f   :  { %v443_v17 = vadd.f32 %v442_v14, %v437_v12 }
 0x461   :  { %v446_v16 = vpop.permute.xlu1 %445 }
 0x462   :  { %v448_v19 = vmul.f32 %v446_v16, %v5769_v15 }
 0x464   :  { %v449_v20 = vadd.f32 %v448_v19, %v443_v17 }
 0x466   :  { %5213 = vtanh.f32 %v449_v20  ;;  %v450_v23 = vmul.f32 0.5, %v449_v20 }
 0x468   :  { %5215 = vtanh.f32 %v450_v23 }
 0x470   :  { %v5214_v21 = vpop.eup %5213 }
 0x471   :  { %457 = vrot.lane.b32.xlu0 %v5214_v21, %s5516_s30 }
 0x472   :  { %v5216_v24 = vpop.eup %5215 }
 0x473   :  { %v452_v26 = vmul.f32 0.5, %v5216_v24 }
 0x475   :  { %v453_v27 = vadd.f32 0.5, %v452_v26 }
 0x477   :  { %v455_v31 = vmul.f32 %v453_v27, %v5636_v37 }
 0x4e3   :  { %v458_v28 = vpop.permute.xlu0 %457 }
 0x4e4   :  { %v460_v29 = vmul.f32 %v458_v28, %v453_v27 }
 0x4e6   :  { %462 = vrot.lane.b32.xlu1 %v460_v29, %s5517_s11 }
 0x558   :  { %v463_v32 = vpop.permute.xlu1 %462 }
 0x559   :  { %v5775_v33 = vadd.f32 %v463_v32, %v455_v31 }
 0x55b   :  { %5217 = vtanh.f32 %v5775_v33 }
 0x565   :  { %v5218_v35 = vpop.eup %5217 }
 0x566   :  { %468 = vrot.lane.b32.xlu0 %v5218_v35, %s5517_s11 }
 0x5d8   :  { %v469_v36 = vpop.permute.xlu0 %468 }
 0x5d9   :  { %v5779_v41 = vmul.f32 %v469_v36, %v453_v27 }
 0x5db   :  { %485 = vperm.xlu0 %4726, %v5779_v41   ;;  %479 = vperm.xlu1 %4725, %v5779_v41  }
 0x5df   :  { %4729 = vset.pattern.permute.xlu0 %v8131_v43  ;;  %4727 = vset.pattern.permute.xlu1 %v8129_v44 }
 0x5e0   :  { %503 = vperm.xlu0 %4729, %v5779_v41   ;;  %491 = vperm.xlu1 %4727, %v5779_v41  }
 0x5e4   :  { %4732 = vset.pattern.permute.xlu0 %v8127_v45  ;;  %4728 = vset.pattern.permute.xlu1 %v8125_v46 }
 0x5e5   :  { %521 = vperm.xlu0 %4732, %v5779_v41   ;;  %497 = vperm.xlu1 %4728, %v5779_v41  }
 0x5e9   :  { %4735 = vset.pattern.permute.xlu0 %v8111_v47  ;;  %4730 = vset.pattern.permute.xlu1 %v8123_v48 }
 0x5ea   :  { %539 = vperm.xlu0 %4735, %v5779_v41   ;;  %509 = vperm.xlu1 %4730, %v5779_v41  }
 0x5ee   :  { %4738 = vset.pattern.permute.xlu0 %v8107_v49  ;;  %4731 = vset.pattern.permute.xlu1 %v8121_v50 }
 0x5ef   :  { %557 = vperm.xlu0 %4738, %v5779_v41   ;;  %515 = vperm.xlu1 %4731, %v5779_v41  }
 0x5f3   :  { %4733 = vset.pattern.permute.xlu1 %v8119_v51  ;;  %4742 = vset.pattern.permute.xlu0 %v8101_v39 }
 0x5f4   :  { %527 = vperm.xlu1 %4733, %v5779_v41  }
 0x5f8   :  { %4734 = vset.pattern.permute.xlu1 %v8117_v52 }
 0x5f9   :  { %533 = vperm.xlu1 %4734, %v5779_v41  }
 0x5fd   :  { %4736 = vset.pattern.permute.xlu1 %v8109_v53 }
 0x5fe   :  { %545 = vperm.xlu1 %4736, %v5779_v41  }
 0x602   :  { %4737 = vset.pattern.permute.xlu1 %v8115_v54 }
 0x603   :  { %551 = vperm.xlu1 %4737, %v5779_v41  }
 0x607   :  { %4739 = vset.pattern.permute.xlu1 %v8105_v55 }
 0x608   :  { %563 = vperm.xlu1 %4739, %v5779_v41  }
 0x60c   :  { %4740 = vset.pattern.permute.xlu1 %v8113_v56 }
 0x60d   :  { %569 = vperm.xlu1 %4740, %v5779_v41  }
 0x611   :  { %4741 = vset.pattern.permute.xlu1 %v8103_v38 }
 0x65a   :  { %v480_v37 = vpop.permute.xlu1 %479  ;;  %v486_v59 = vpop.permute.xlu0 %485 }
 0x65b   :  { %v482_v58 = vmul.f32 %v480_v37, %v5679_v57  ;;  %v488_v1 = vmul.f32 %v486_v59, %v5685_v60 }
 0x65d   :  { %v483_v63 = vadd.f32 %v482_v58, %v477_v61 }
 0x65f   :  { %v492_v2 = vpop.permute.xlu1 %491  ;;  %v489_v4 = vadd.f32 %v488_v1, %v483_v63  ;;  %v504_v14 = vpop.permute.xlu0 %503 }
 0x660   :  { %v494_v7 = vmul.f32 %v492_v2, %v5690_v0  ;;  %v506_v17 = vmul.f32 %v504_v14, %v5703_v10 }
 0x662   :  { %v495_v11 = vadd.f32 %v494_v7, %v489_v4 }
 0x664   :  { %v498_v9 = vpop.permute.xlu1 %497  ;;  %v522_v27 = vpop.permute.xlu0 %521 }
 0x665   :  { %v500_v12 = vmul.f32 %v498_v9, %v5697_v5  ;;  %v524_v29 = vmul.f32 %v522_v27, %v5721_v22 }
 0x667   :  { %v501_v16 = vadd.f32 %v500_v12, %v495_v11 }
 0x669   :  { %v510_v19 = vpop.permute.xlu1 %509  ;;  %v507_v20 = vadd.f32 %v506_v17, %v501_v16  ;;  %v540_v59 = vpop.permute.xlu0 %539 }
 0x66a   :  { %v512_v21 = vmul.f32 %v510_v19, %v5708_v13  ;;  %v542_v63 = vmul.f32 %v540_v59, %v5739_v34 }
 0x66c   :  { %v513_v24 = vadd.f32 %v512_v21, %v507_v20 }
 0x66e   :  { %v516_v23 = vpop.permute.xlu1 %515  ;;  %v558_v12 = vpop.permute.xlu0 %557 }
 0x66f   :  { %v518_v26 = vmul.f32 %v516_v23, %v5715_v18  ;;  %v560_v16 = vmul.f32 %v558_v12, %v5757_v3 }
 0x671   :  { %v519_v28 = vadd.f32 %v518_v26, %v513_v24 }
 0x673   :  { %v528_v31 = vpop.permute.xlu1 %527  ;;  %v525_v32 = vadd.f32 %v524_v29, %v519_v28 }
 0x674   :  { %v530_v35 = vmul.f32 %v528_v31, %v5726_v25 }
 0x676   :  { %v531_v37 = vadd.f32 %v530_v35, %v525_v32 }
 0x678   :  { %v534_v36 = vpop.permute.xlu1 %533 }
 0x679   :  { %v536_v58 = vmul.f32 %v534_v36, %v5733_v30 }
 0x67b   :  { %v537_v61 = vadd.f32 %v536_v58, %v531_v37 }
 0x67d   :  { %v546_v1 = vpop.permute.xlu1 %545  ;;  %v543_v2 = vadd.f32 %v542_v63, %v537_v61 }
 0x67e   :  { %v548_v4 = vmul.f32 %v546_v1, %v5744_v40 }
 0x680   :  { %v549_v9 = vadd.f32 %v548_v4, %v543_v2 }
 0x682   :  { %v552_v7 = vpop.permute.xlu1 %551 }
 0x683   :  { %v554_v11 = vmul.f32 %v552_v7, %v5751_v62  ;;  %v601_v7 = vld [vmem:[#allocation2 + $0x3] sm:$0x1] }
 0x685   :  { %v555_v14 = vadd.f32 %v554_v11, %v549_v9 }
 0x687   :  { %v564_v17 = vpop.permute.xlu1 %563  ;;  %v561_v19 = vadd.f32 %v560_v16, %v555_v14 }
 0x688   :  { %v566_v20 = vmul.f32 %v564_v17, %v5762_v8 }
 0x68a   :  { %v567_v23 = vadd.f32 %v566_v20, %v561_v19 }
 0x68c   :  { %v570_v21 = vpop.permute.xlu1 %569 }
 0x68d   :  { %v572_v24 = vmul.f32 %v570_v21, %v5769_v15 }
 0x68f   :  { %v573_v26 = vadd.f32 %v572_v24, %v567_v23 }
 0x691   :  { %5219 = vtanh.f32 %v573_v26  ;;  %v574_v28 = vmul.f32 0.5, %v573_v26 }
 0x693   :  { %5221 = vtanh.f32 %v574_v28 }
 0x69b   :  { %v5220_v27 = vpop.eup %5219 }
 0x69c   :  { %581 = vrot.lane.b32.xlu0 %v5220_v27, %s5516_s30 }
 0x69d   :  { %v5222_v29 = vpop.eup %5221 }
 0x69e   :  { %v576_v31 = vmul.f32 0.5, %v5222_v29 }
 0x6a0   :  { %v577_v32 = vadd.f32 0.5, %v576_v31 }
 0x6a2   :  { %v579_v37 = vmul.f32 %v577_v32, %v5775_v33 }
 0x70e   :  { %v582_v35 = vpop.permute.xlu0 %581 }
 0x70f   :  { %v584_v36 = vmul.f32 %v582_v35, %v577_v32 }
 0x711   :  { %586 = vrot.lane.b32.xlu1 %v584_v36, %s5517_s11 }
 0x783   :  { %v587_v58 = vpop.permute.xlu1 %586 }
 0x784   :  { %v5832_v59 = vadd.f32 %v587_v58, %v579_v37 }
 0x786   :  { %5223 = vtanh.f32 %v5832_v59 }
 0x790   :  { %v5224_v61 = vpop.eup %5223 }
 0x791   :  { %592 = vrot.lane.b32.xlu0 %v5224_v61, %s5517_s11 }
 0x803   :  { %v593_v63 = vpop.permute.xlu0 %592 }
 0x804   :  { %v5836_v1 = vmul.f32 %v593_v63, %v577_v32 }
 0x806   :  { %609 = vperm.xlu0 %4742, %v5836_v1   ;;  %603 = vperm.xlu1 %4741, %v5836_v1  }
 0x80a   :  { %4745 = vset.pattern.permute.xlu0 %v8131_v43  ;;  %4743 = vset.pattern.permute.xlu1 %v8129_v44 }
 0x80b   :  { %627 = vperm.xlu0 %4745, %v5836_v1   ;;  %615 = vperm.xlu1 %4743, %v5836_v1  }
 0x80f   :  { %4748 = vset.pattern.permute.xlu0 %v8127_v45  ;;  %4744 = vset.pattern.permute.xlu1 %v8125_v46 }
 0x810   :  { %645 = vperm.xlu0 %4748, %v5836_v1   ;;  %621 = vperm.xlu1 %4744, %v5836_v1  }
 0x814   :  { %4751 = vset.pattern.permute.xlu0 %v8111_v47  ;;  %4746 = vset.pattern.permute.xlu1 %v8123_v48 }
 0x815   :  { %663 = vperm.xlu0 %4751, %v5836_v1   ;;  %633 = vperm.xlu1 %4746, %v5836_v1  }
 0x819   :  { %4754 = vset.pattern.permute.xlu0 %v8107_v49  ;;  %4747 = vset.pattern.permute.xlu1 %v8121_v50 }
 0x81a   :  { %681 = vperm.xlu0 %4754, %v5836_v1   ;;  %639 = vperm.xlu1 %4747, %v5836_v1  }
 0x81e   :  { %4749 = vset.pattern.permute.xlu1 %v8119_v51  ;;  %4758 = vset.pattern.permute.xlu0 %v8101_v39 }
 0x81f   :  { %651 = vperm.xlu1 %4749, %v5836_v1  }
 0x823   :  { %4750 = vset.pattern.permute.xlu1 %v8117_v52 }
 0x824   :  { %657 = vperm.xlu1 %4750, %v5836_v1  }
 0x828   :  { %4752 = vset.pattern.permute.xlu1 %v8109_v53 }
 0x829   :  { %669 = vperm.xlu1 %4752, %v5836_v1  }
 0x82d   :  { %4753 = vset.pattern.permute.xlu1 %v8115_v54 }
 0x82e   :  { %675 = vperm.xlu1 %4753, %v5836_v1  }
 0x832   :  { %4755 = vset.pattern.permute.xlu1 %v8105_v55 }
 0x833   :  { %687 = vperm.xlu1 %4755, %v5836_v1  }
 0x837   :  { %4756 = vset.pattern.permute.xlu1 %v8113_v56 }
 0x838   :  { %693 = vperm.xlu1 %4756, %v5836_v1  }
 0x83c   :  { %4757 = vset.pattern.permute.xlu1 %v8103_v38 }
 0x885   :  { %v604_v33 = vpop.permute.xlu1 %603  ;;  %v610_v4 = vpop.permute.xlu0 %609 }
 0x886   :  { %v606_v2 = vmul.f32 %v604_v33, %v5679_v57  ;;  %v612_v11 = vmul.f32 %v610_v4, %v5685_v60 }
 0x888   :  { %v607_v9 = vadd.f32 %v606_v2, %v601_v7 }
 0x88a   :  { %v616_v12 = vpop.permute.xlu1 %615  ;;  %v613_v14 = vadd.f32 %v612_v11, %v607_v9  ;;  %v628_v21 = vpop.permute.xlu0 %627 }
 0x88b   :  { %v618_v16 = vmul.f32 %v616_v12, %v5690_v0  ;;  %v630_v24 = vmul.f32 %v628_v21, %v5703_v10 }
 0x88d   :  { %v619_v19 = vadd.f32 %v618_v16, %v613_v14 }
 0x88f   :  { %v622_v17 = vpop.permute.xlu1 %621  ;;  %v646_v35 = vpop.permute.xlu0 %645 }
 0x890   :  { %v624_v20 = vmul.f32 %v622_v17, %v5697_v5  ;;  %v648_v37 = vmul.f32 %v646_v35, %v5721_v22 }
 0x892   :  { %v625_v23 = vadd.f32 %v624_v20, %v619_v19 }
 0x894   :  { %v634_v26 = vpop.permute.xlu1 %633  ;;  %v631_v27 = vadd.f32 %v630_v24, %v625_v23  ;;  %v664_v7 = vpop.permute.xlu0 %663 }
 0x895   :  { %v636_v28 = vmul.f32 %v634_v26, %v5708_v13  ;;  %v666_v11 = vmul.f32 %v664_v7, %v5739_v34 }
 0x897   :  { %v637_v31 = vadd.f32 %v636_v28, %v631_v27 }
 0x899   :  { %v640_v29 = vpop.permute.xlu1 %639  ;;  %v682_v21 = vpop.permute.xlu0 %681 }
 0x89a   :  { %v642_v32 = vmul.f32 %v640_v29, %v5715_v18  ;;  %v684_v24 = vmul.f32 %v682_v21, %v5757_v3 }
 0x89c   :  { %v643_v36 = vadd.f32 %v642_v32, %v637_v31 }
 0x89e   :  { %v652_v58 = vpop.permute.xlu1 %651  ;;  %v649_v61 = vadd.f32 %v648_v37, %v643_v36 }
 0x89f   :  { %v654_v63 = vmul.f32 %v652_v58, %v5726_v25 }
 0x8a1   :  { %v655_v2 = vadd.f32 %v654_v63, %v649_v61 }
 0x8a3   :  { %v658_v33 = vpop.permute.xlu1 %657 }
 0x8a4   :  { %v660_v4 = vmul.f32 %v658_v33, %v5733_v30 }
 0x8a6   :  { %v661_v9 = vadd.f32 %v660_v4, %v655_v2 }
 0x8a8   :  { %v670_v12 = vpop.permute.xlu1 %669  ;;  %v667_v14 = vadd.f32 %v666_v11, %v661_v9 }
 0x8a9   :  { %v672_v16 = vmul.f32 %v670_v12, %v5744_v40 }
 0x8ab   :  { %v673_v19 = vadd.f32 %v672_v16, %v667_v14 }
 0x8ad   :  { %v676_v17 = vpop.permute.xlu1 %675 }
 0x8ae   :  { %v678_v20 = vmul.f32 %v676_v17, %v5751_v62 }
 0x8b0   :  { %v679_v23 = vadd.f32 %v678_v20, %v673_v19  ;;  %v725_v19 = vld [vmem:[#allocation2 + $0x4] sm:$0x1] }
 0x8b2   :  { %v688_v26 = vpop.permute.xlu1 %687  ;;  %v685_v27 = vadd.f32 %v684_v24, %v679_v23 }
 0x8b3   :  { %v690_v28 = vmul.f32 %v688_v26, %v5762_v8 }
 0x8b5   :  { %v691_v31 = vadd.f32 %v690_v28, %v685_v27 }
 0x8b7   :  { %v694_v29 = vpop.permute.xlu1 %693 }
 0x8b8   :  { %v696_v32 = vmul.f32 %v694_v29, %v5769_v15 }
 0x8ba   :  { %v697_v35 = vadd.f32 %v696_v32, %v691_v31 }
 0x8bc   :  { %5225 = vtanh.f32 %v697_v35  ;;  %v698_v37 = vmul.f32 0.5, %v697_v35 }
 0x8be   :  { %5227 = vtanh.f32 %v698_v37 }
 0x8c6   :  { %v5226_v36 = vpop.eup %5225 }
 0x8c7   :  { %705 = vrot.lane.b32.xlu0 %v5226_v36, %s5516_s30 }
 0x8c8   :  { %v5228_v58 = vpop.eup %5227 }
 0x8c9   :  { %v700_v61 = vmul.f32 0.5, %v5228_v58 }
 0x8cb   :  { %v701_v63 = vadd.f32 0.5, %v700_v61 }
 0x8cd   :  { %v703_v4 = vmul.f32 %v701_v63, %v5832_v59 }
 0x939   :  { %v706_v33 = vpop.permute.xlu0 %705 }
 0x93a   :  { %v708_v2 = vmul.f32 %v706_v33, %v701_v63 }
 0x93c   :  { %710 = vrot.lane.b32.xlu1 %v708_v2, %s5517_s11 }
 0x9ae   :  { %v711_v7 = vpop.permute.xlu1 %710 }
 0x9af   :  { %v5889_v9 = vadd.f32 %v711_v7, %v703_v4 }
 0x9b1   :  { %5229 = vtanh.f32 %v5889_v9 }
 0x9bb   :  { %v5230_v11 = vpop.eup %5229 }
 0x9bc   :  { %716 = vrot.lane.b32.xlu0 %v5230_v11, %s5517_s11 }
 0xa2e   :  { %v717_v12 = vpop.permute.xlu0 %716 }
 0xa2f   :  { %v5893_v14 = vmul.f32 %v717_v12, %v701_v63 }
 0xa31   :  { %8149 = vst [vmem:[#allocation7_spill] sm:$0xff] %v5893_v14  ;;  %733 = vperm.xlu0 %4758, %v5893_v14   ;;  %727 = vperm.xlu1 %4757, %v5893_v14  }
 0xa35   :  { %4761 = vset.pattern.permute.xlu0 %v8131_v43  ;;  %4759 = vset.pattern.permute.xlu1 %v8129_v44 }
 0xa36   :  { %751 = vperm.xlu0 %4761, %v5893_v14   ;;  %739 = vperm.xlu1 %4759, %v5893_v14  }
 0xa3a   :  { %4764 = vset.pattern.permute.xlu0 %v8127_v45  ;;  %4760 = vset.pattern.permute.xlu1 %v8125_v46 }
 0xa3b   :  { %769 = vperm.xlu0 %4764, %v5893_v14   ;;  %745 = vperm.xlu1 %4760, %v5893_v14  }
 0xa3f   :  { %4767 = vset.pattern.permute.xlu0 %v8111_v47  ;;  %4762 = vset.pattern.permute.xlu1 %v8123_v48 }
 0xa40   :  { %787 = vperm.xlu0 %4767, %v5893_v14   ;;  %757 = vperm.xlu1 %4762, %v5893_v14  }
 0xa44   :  { %4770 = vset.pattern.permute.xlu0 %v8107_v49  ;;  %4763 = vset.pattern.permute.xlu1 %v8121_v50 }
 0xa45   :  { %805 = vperm.xlu0 %4770, %v5893_v14   ;;  %763 = vperm.xlu1 %4763, %v5893_v14  }
 0xa49   :  { %4765 = vset.pattern.permute.xlu1 %v8119_v51  ;;  %4774 = vset.pattern.permute.xlu0 %v8101_v39 }
 0xa4a   :  { %775 = vperm.xlu1 %4765, %v5893_v14  }
 0xa4e   :  { %4766 = vset.pattern.permute.xlu1 %v8117_v52 }
 0xa4f   :  { %781 = vperm.xlu1 %4766, %v5893_v14  }
 0xa53   :  { %4768 = vset.pattern.permute.xlu1 %v8109_v53 }
 0xa54   :  { %793 = vperm.xlu1 %4768, %v5893_v14  }
 0xa58   :  { %4769 = vset.pattern.permute.xlu1 %v8115_v54 }
 0xa59   :  { %799 = vperm.xlu1 %4769, %v5893_v14  }
 0xa5d   :  { %4771 = vset.pattern.permute.xlu1 %v8105_v55 }
 0xa5e   :  { %811 = vperm.xlu1 %4771, %v5893_v14  }
 0xa62   :  { %4772 = vset.pattern.permute.xlu1 %v8113_v56 }
 0xa63   :  { %817 = vperm.xlu1 %4772, %v5893_v14  }
 0xa67   :  { %4773 = vset.pattern.permute.xlu1 %v8103_v38 }
 0xab0   :  { %v728_v59 = vpop.permute.xlu1 %727  ;;  %v734_v17 = vpop.permute.xlu0 %733 }
 0xab1   :  { %v730_v16 = vmul.f32 %v728_v59, %v5679_v57  ;;  %v736_v21 = vmul.f32 %v734_v17, %v5685_v60 }
 0xab3   :  { %v731_v20 = vadd.f32 %v730_v16, %v725_v19 }
 0xab5   :  { %v740_v23 = vpop.permute.xlu1 %739  ;;  %v737_v24 = vadd.f32 %v736_v21, %v731_v20  ;;  %v752_v31 = vpop.permute.xlu0 %751 }
 0xab6   :  { %v742_v26 = vmul.f32 %v740_v23, %v5690_v0  ;;  %v754_v35 = vmul.f32 %v752_v31, %v5703_v10 }
 0xab8   :  { %v743_v28 = vadd.f32 %v742_v26, %v737_v24 }
 0xaba   :  { %v746_v27 = vpop.permute.xlu1 %745  ;;  %v770_v2 = vpop.permute.xlu0 %769 }
 0xabb   :  { %v748_v29 = vmul.f32 %v746_v27, %v5697_v5  ;;  %v772_v7 = vmul.f32 %v770_v2, %v5721_v22 }
 0xabd   :  { %v749_v32 = vadd.f32 %v748_v29, %v743_v28 }
 0xabf   :  { %v758_v36 = vpop.permute.xlu1 %757  ;;  %v755_v37 = vadd.f32 %v754_v35, %v749_v32  ;;  %v788_v20 = vpop.permute.xlu0 %787 }
 0xac0   :  { %v760_v58 = vmul.f32 %v758_v36, %v5708_v13  ;;  %v790_v23 = vmul.f32 %v788_v20, %v5739_v34 }
 0xac2   :  { %v761_v63 = vadd.f32 %v760_v58, %v755_v37 }
 0xac4   :  { %v764_v61 = vpop.permute.xlu1 %763  ;;  %v806_v32 = vpop.permute.xlu0 %805 }
 0xac5   :  { %v766_v33 = vmul.f32 %v764_v61, %v5715_v18  ;;  %v808_v36 = vmul.f32 %v806_v32, %v5757_v3 }
 0xac7   :  { %v767_v4 = vadd.f32 %v766_v33, %v761_v63 }
 0xac9   :  { %v776_v11 = vpop.permute.xlu1 %775  ;;  %v773_v12 = vadd.f32 %v772_v7, %v767_v4 }
 0xaca   :  { %v778_v59 = vmul.f32 %v776_v11, %v5726_v25 }
 0xacc   :  { %v779_v17 = vadd.f32 %v778_v59, %v773_v12 }
 0xace   :  { %v782_v16 = vpop.permute.xlu1 %781 }
 0xacf   :  { %v784_v19 = vmul.f32 %v782_v16, %v5733_v30 }
 0xad1   :  { %v785_v21 = vadd.f32 %v784_v19, %v779_v17 }
 0xad3   :  { %v794_v24 = vpop.permute.xlu1 %793  ;;  %v791_v26 = vadd.f32 %v790_v23, %v785_v21 }
 0xad4   :  { %v796_v27 = vmul.f32 %v794_v24, %v5744_v40 }
 0xad6   :  { %v797_v29 = vadd.f32 %v796_v27, %v791_v26 }
 0xad8   :  { %v800_v28 = vpop.permute.xlu1 %799 }
 0xad9   :  { %v802_v31 = vmul.f32 %v800_v28, %v5751_v62 }
 0xadb   :  { %v803_v35 = vadd.f32 %v802_v31, %v797_v29  ;;  %v849_v31 = vld [vmem:[#allocation2 + $0x5] sm:$0x1] }
 0xadd   :  { %v812_v37 = vpop.permute.xlu1 %811  ;;  %v809_v58 = vadd.f32 %v808_v36, %v803_v35 }
 0xade   :  { %v814_v61 = vmul.f32 %v812_v37, %v5762_v8 }
 0xae0   :  { %v815_v33 = vadd.f32 %v814_v61, %v809_v58 }
 0xae2   :  { %v818_v63 = vpop.permute.xlu1 %817 }
 0xae3   :  { %v820_v2 = vmul.f32 %v818_v63, %v5769_v15 }
 0xae5   :  { %v821_v4 = vadd.f32 %v820_v2, %v815_v33 }
 0xae7   :  { %5231 = vtanh.f32 %v821_v4  ;;  %v822_v11 = vmul.f32 0.5, %v821_v4 }
 0xae9   :  { %5233 = vtanh.f32 %v822_v11 }
 0xaf1   :  { %v5232_v7 = vpop.eup %5231 }
 0xaf2   :  { %829 = vrot.lane.b32.xlu0 %v5232_v7, %s5516_s30 }
 0xaf3   :  { %v5234_v12 = vpop.eup %5233 }
 0xaf4   :  { %v824_v59 = vmul.f32 0.5, %v5234_v12 }
 0xaf6   :  { %v825_v16 = vadd.f32 0.5, %v824_v59 }
 0xaf8   :  { %v827_v20 = vmul.f32 %v825_v16, %v5889_v9 }
 0xb64   :  { %v830_v17 = vpop.permute.xlu0 %829 }
 0xb65   :  { %v832_v19 = vmul.f32 %v830_v17, %v825_v16 }
 0xb67   :  { %834 = vrot.lane.b32.xlu1 %v832_v19, %s5517_s11 }
 0xbd9   :  { %v835_v21 = vpop.permute.xlu1 %834 }
 0xbda   :  { %v5946_v23 = vadd.f32 %v835_v21, %v827_v20 }
 0xbdc   :  { %5235 = vtanh.f32 %v5946_v23 }
 0xbe6   :  { %v5236_v24 = vpop.eup %5235 }
 0xbe7   :  { %840 = vrot.lane.b32.xlu0 %v5236_v24, %s5517_s11 }
 0xc59   :  { %v841_v26 = vpop.permute.xlu0 %840 }
 0xc5a   :  { %v5950_v27 = vmul.f32 %v841_v26, %v825_v16 }
 0xc5c   :  { %857 = vperm.xlu0 %4774, %v5950_v27   ;;  %851 = vperm.xlu1 %4773, %v5950_v27  }
 0xc60   :  { %4777 = vset.pattern.permute.xlu0 %v8131_v43  ;;  %4775 = vset.pattern.permute.xlu1 %v8129_v44 }
 0xc61   :  { %875 = vperm.xlu0 %4777, %v5950_v27   ;;  %863 = vperm.xlu1 %4775, %v5950_v27  }
 0xc65   :  { %4780 = vset.pattern.permute.xlu0 %v8127_v45  ;;  %4776 = vset.pattern.permute.xlu1 %v8125_v46 }
 0xc66   :  { %893 = vperm.xlu0 %4780, %v5950_v27   ;;  %869 = vperm.xlu1 %4776, %v5950_v27  }
 0xc6a   :  { %4783 = vset.pattern.permute.xlu0 %v8111_v47  ;;  %4778 = vset.pattern.permute.xlu1 %v8123_v48 }
 0xc6b   :  { %911 = vperm.xlu0 %4783, %v5950_v27   ;;  %881 = vperm.xlu1 %4778, %v5950_v27  }
 0xc6f   :  { %4786 = vset.pattern.permute.xlu0 %v8107_v49  ;;  %4779 = vset.pattern.permute.xlu1 %v8121_v50 }
 0xc70   :  { %929 = vperm.xlu0 %4786, %v5950_v27   ;;  %887 = vperm.xlu1 %4779, %v5950_v27  }
 0xc74   :  { %4781 = vset.pattern.permute.xlu1 %v8119_v51  ;;  %4790 = vset.pattern.permute.xlu0 %v8101_v39 }
 0xc75   :  { %899 = vperm.xlu1 %4781, %v5950_v27  }
 0xc79   :  { %4782 = vset.pattern.permute.xlu1 %v8117_v52 }
 0xc7a   :  { %905 = vperm.xlu1 %4782, %v5950_v27  }
 0xc7e   :  { %4784 = vset.pattern.permute.xlu1 %v8109_v53 }
 0xc7f   :  { %917 = vperm.xlu1 %4784, %v5950_v27  }
 0xc83   :  { %4785 = vset.pattern.permute.xlu1 %v8115_v54 }
 0xc84   :  { %923 = vperm.xlu1 %4785, %v5950_v27  }
 0xc88   :  { %4787 = vset.pattern.permute.xlu1 %v8105_v55 }
 0xc89   :  { %935 = vperm.xlu1 %4787, %v5950_v27  }
 0xc8d   :  { %4788 = vset.pattern.permute.xlu1 %v8113_v56 }
 0xc8e   :  { %941 = vperm.xlu1 %4788, %v5950_v27  }
 0xc92   :  { %4789 = vset.pattern.permute.xlu1 %v8103_v38 }
 0xcdb   :  { %v852_v9 = vpop.permute.xlu1 %851  ;;  %v858_v29 = vpop.permute.xlu0 %857 }
 0xcdc   :  { %v854_v28 = vmul.f32 %v852_v9, %v5679_v57  ;;  %v860_v35 = vmul.f32 %v858_v29, %v5685_v60 }
 0xcde   :  { %v855_v32 = vadd.f32 %v854_v28, %v849_v31 }
 0xce0   :  { %v864_v36 = vpop.permute.xlu1 %863  ;;  %v861_v37 = vadd.f32 %v860_v35, %v855_v32  ;;  %v876_v2 = vpop.permute.xlu0 %875 }
 0xce1   :  { %v866_v58 = vmul.f32 %v864_v36, %v5690_v0  ;;  %v878_v7 = vmul.f32 %v876_v2, %v5703_v10 }
 0xce3   :  { %v867_v63 = vadd.f32 %v866_v58, %v861_v37 }
 0xce5   :  { %v870_v61 = vpop.permute.xlu1 %869  ;;  %v894_v17 = vpop.permute.xlu0 %893 }
 0xce6   :  { %v872_v33 = vmul.f32 %v870_v61, %v5697_v5  ;;  %v896_v0 = vmul.f32 %v894_v17, %v5721_v22 }
 0xce8   :  { %v873_v4 = vadd.f32 %v872_v33, %v867_v63 }
 0xcea   :  { %v882_v11 = vpop.permute.xlu1 %881  ;;  %v879_v12 = vadd.f32 %v878_v7, %v873_v4  ;;  %v912_v9 = vpop.permute.xlu0 %911 }
 0xceb   :  { %v884_v57 = vmul.f32 %v882_v11, %v5708_v13  ;;  %v914_v13 = vmul.f32 %v912_v9, %v5739_v34  ;;  %v6044_v9 = vld [vmem:[%s8094_s4] sm:$0x1] }
 0xced   :  { %v885_v16 = vadd.f32 %v884_v57, %v879_v12 }
 0xcef   :  { %v888_v59 = vpop.permute.xlu1 %887  ;;  %v930_v37 = vpop.permute.xlu0 %929 }
 0xcf0   :  { %v890_v60 = vmul.f32 %v888_v59, %v5715_v18  ;;  %v932_v61 = vmul.f32 %v930_v37, %v5757_v3  ;;  %v6056_v37 = vld [vmem:[%s8094_s4 + $0x2] sm:$0x1] }
 0xcf2   :  { %v891_v19 = vadd.f32 %v890_v60, %v885_v16 }
 0xcf4   :  { %v900_v20 = vpop.permute.xlu1 %899  ;;  %v897_v21 = vadd.f32 %v896_v0, %v891_v19 }
 0xcf5   :  { %v902_v5 = vmul.f32 %v900_v20, %v5726_v25 }
 0xcf7   :  { %v903_v26 = vadd.f32 %v902_v5, %v897_v21 }
 0xcf9   :  { %v906_v24 = vpop.permute.xlu1 %905 }
 0xcfa   :  { %v908_v10 = vmul.f32 %v906_v24, %v5733_v30 }
 0xcfc   :  { %v909_v28 = vadd.f32 %v908_v10, %v903_v26 }
 0xcfe   :  { %v918_v29 = vpop.permute.xlu1 %917  ;;  %v915_v31 = vadd.f32 %v914_v13, %v909_v28 }
 0xcff   :  { %v920_v18 = vmul.f32 %v918_v29, %v5744_v40  ;;  %v973_v29 = vld [vmem:[#allocation2 + $0x6] sm:$0x1] }
 0xd01   :  { %v921_v35 = vadd.f32 %v920_v18, %v915_v31  ;;  %v6050_v18 = vld [vmem:[%s8094_s4 + $0x1] sm:$0x1] }
 0xd03   :  { %v924_v32 = vpop.permute.xlu1 %923 }
 0xd04   :  { %v926_v36 = vmul.f32 %v924_v32, %v5751_v62 }
 0xd06   :  { %v927_v58 = vadd.f32 %v926_v36, %v921_v35 }
 0xd08   :  { %v936_v63 = vpop.permute.xlu1 %935  ;;  %v933_v33 = vadd.f32 %v932_v61, %v927_v58 }
 0xd09   :  { %v938_v2 = vmul.f32 %v936_v63, %v5762_v8 }
 0xd0b   :  { %v939_v7 = vadd.f32 %v938_v2, %v933_v33  ;;  %v6062_v33 = vld [vmem:[%s8094_s4 + $0x3] sm:$0x1] }
 0xd0d   :  { %v942_v4 = vpop.permute.xlu1 %941 }
 0xd0e   :  { %v944_v11 = vmul.f32 %v942_v4, %v5769_v15 }
 0xd10   :  { %v945_v12 = vadd.f32 %v944_v11, %v939_v7  ;;  %v6068_v11 = vld [vmem:[%s8094_s4 + $0x4] sm:$0x1] }
 0xd12   :  { %5237 = vtanh.f32 %v945_v12  ;;  %v946_v59 = vmul.f32 0.5, %v945_v12 }
 0xd14   :  { %5239 = vtanh.f32 %v946_v59 }
 0xd1c   :  { %v5238_v57 = vpop.eup %5237 }
 0xd1d   :  { %953 = vrot.lane.b32.xlu0 %v5238_v57, %s5516_s30 }
 0xd1e   :  { %v5240_v16 = vpop.eup %5239 }
 0xd1f   :  { %v948_v60 = vmul.f32 0.5, %v5240_v16  ;;  %v6074_v16 = vld [vmem:[%s8094_s4 + $0x5] sm:$0x1] }
 0xd21   :  { %v949_v17 = vadd.f32 0.5, %v948_v60 }
 0xd23   :  { %v951_v20 = vmul.f32 %v949_v17, %v5946_v23 }
 0xd8f   :  { %v954_v19 = vpop.permute.xlu0 %953 }
 0xd90   :  { %v956_v0 = vmul.f32 %v954_v19, %v949_v17 }
 0xd92   :  { %958 = vrot.lane.b32.xlu1 %v956_v0, %s5517_s11  ;;  %v6080_v0 = vld [vmem:[%s8094_s4 + $0x6] sm:$0x1] }
 0xe04   :  { %v959_v21 = vpop.permute.xlu1 %958 }
 0xe05   :  { %v6003_v5 = vadd.f32 %v959_v21, %v951_v20 }
 0xe07   :  { %5241 = vtanh.f32 %v6003_v5 }
 0xe11   :  { %v5242_v24 = vpop.eup %5241 }
 0xe12   :  { %964 = vrot.lane.b32.xlu0 %v5242_v24, %s5517_s11 }
 0xe84   :  { %v965_v26 = vpop.permute.xlu0 %964 }
 0xe85   :  { %v6007_v10 = vmul.f32 %v965_v26, %v949_v17 }
 0xe87   :  { %8150 = vst [vmem:[#allocation8_spill] sm:$0xff] %v6007_v10  ;;  %981 = vperm.xlu0 %4790, %v6007_v10   ;;  %975 = vperm.xlu1 %4789, %v6007_v10  }
 0xe8b   :  { %4793 = vset.pattern.permute.xlu0 %v8131_v43  ;;  %4791 = vset.pattern.permute.xlu1 %v8129_v44 }
 0xe8c   :  { %999 = vperm.xlu0 %4793, %v6007_v10   ;;  %987 = vperm.xlu1 %4791, %v6007_v10  }
 0xe90   :  { %4796 = vset.pattern.permute.xlu0 %v8127_v45  ;;  %4792 = vset.pattern.permute.xlu1 %v8125_v46 }
 0xe91   :  { %1017 = vperm.xlu0 %4796, %v6007_v10   ;;  %993 = vperm.xlu1 %4792, %v6007_v10  }
 0xe95   :  { %4799 = vset.pattern.permute.xlu0 %v8111_v47  ;;  %4794 = vset.pattern.permute.xlu1 %v8123_v48 }
 0xe96   :  { %1035 = vperm.xlu0 %4799, %v6007_v10   ;;  %1005 = vperm.xlu1 %4794, %v6007_v10  }
 0xe9a   :  { %4802 = vset.pattern.permute.xlu0 %v8107_v49  ;;  %4795 = vset.pattern.permute.xlu1 %v8121_v50 }
 0xe9b   :  { %1053 = vperm.xlu0 %4802, %v6007_v10   ;;  %1011 = vperm.xlu1 %4795, %v6007_v10  }
 0xe9f   :  { %4797 = vset.pattern.permute.xlu1 %v8119_v51  ;;  %4806 = vset.pattern.permute.xlu0 %v8101_v39 }
 0xea0   :  { %1023 = vperm.xlu1 %4797, %v6007_v10  }
 0xea4   :  { %4798 = vset.pattern.permute.xlu1 %v8117_v52 }
 0xea5   :  { %1029 = vperm.xlu1 %4798, %v6007_v10  }
 0xea9   :  { %4800 = vset.pattern.permute.xlu1 %v8109_v53 }
 0xeaa   :  { %1041 = vperm.xlu1 %4800, %v6007_v10  }
 0xeae   :  { %4801 = vset.pattern.permute.xlu1 %v8115_v54 }
 0xeaf   :  { %1047 = vperm.xlu1 %4801, %v6007_v10  }
 0xeb3   :  { %4803 = vset.pattern.permute.xlu1 %v8105_v55 }
 0xeb4   :  { %1059 = vperm.xlu1 %4803, %v6007_v10  }
 0xeb8   :  { %4804 = vset.pattern.permute.xlu1 %v8113_v56 }
 0xeb9   :  { %1065 = vperm.xlu1 %4804, %v6007_v10  }
 0xebd   :  { %4805 = vset.pattern.permute.xlu1 %v8103_v38 }
 0xf06   :  { %v976_v23 = vpop.permute.xlu1 %975  ;;  %v982_v13 = vpop.permute.xlu0 %981 }
 0xf07   :  { %v978_v28 = vmul.f32 %v6044_v9, %v976_v23  ;;  %v984_v32 = vmul.f32 %v6050_v18, %v982_v13 }
 0xf09   :  { %v979_v31 = vadd.f32 %v978_v28, %v973_v29 }
 0xf0b   :  { %v988_v35 = vpop.permute.xlu1 %987  ;;  %v985_v36 = vadd.f32 %v984_v32, %v979_v31  ;;  %v1000_v4 = vpop.permute.xlu0 %999 }
 0xf0c   :  { %v990_v58 = vmul.f32 %v6056_v37, %v988_v35  ;;  %v1002_v12 = vmul.f32 %v6068_v11, %v1000_v4 }
 0xf0e   :  { %v991_v63 = vadd.f32 %v990_v58, %v985_v36 }
 0xf10   :  { %v994_v61 = vpop.permute.xlu1 %993  ;;  %v1018_v21 = vpop.permute.xlu0 %1017 }
 0xf11   :  { %v996_v2 = vmul.f32 %v6062_v33, %v994_v61  ;;  %v1020_v26 = vmul.f32 %v1018_v21, %v5721_v22 }
 0xf13   :  { %v997_v7 = vadd.f32 %v996_v2, %v991_v63 }
 0xf15   :  { %v1006_v57 = vpop.permute.xlu1 %1005  ;;  %v1003_v59 = vadd.f32 %v1002_v12, %v997_v7  ;;  %v1036_v35 = vpop.permute.xlu0 %1035 }
 0xf16   :  { %v1008_v60 = vmul.f32 %v6074_v16, %v1006_v57  ;;  %v1038_v58 = vmul.f32 %v1036_v35, %v5739_v34 }
 0xf18   :  { %v1009_v19 = vadd.f32 %v1008_v60, %v1003_v59 }
 0xf1a   :  { %v1012_v17 = vpop.permute.xlu1 %1011  ;;  %v1054_v12 = vpop.permute.xlu0 %1053 }
 0xf1b   :  { %v1014_v20 = vmul.f32 %v6080_v0, %v1012_v17 }
 0xf1d   :  { %v1015_v24 = vadd.f32 %v1014_v20, %v1009_v19 }
 0xf1f   :  { %v1024_v23 = vpop.permute.xlu1 %1023  ;;  %v1021_v28 = vadd.f32 %v1020_v26, %v1015_v24 }
 0xf20   :  { %v1026_v13 = vmul.f32 %v1024_v23, %v5726_v25  ;;  %v1056_v25 = vmul.f32 %v1054_v12, %v5757_v3 }
 0xf22   :  { %v1027_v31 = vadd.f32 %v1026_v13, %v1021_v28 }
 0xf24   :  { %v1030_v29 = vpop.permute.xlu1 %1029 }
 0xf25   :  { %v1032_v32 = vmul.f32 %v1030_v29, %v5733_v30 }
 0xf27   :  { %v1033_v36 = vadd.f32 %v1032_v32, %v1027_v31 }
 0xf29   :  { %v1042_v61 = vpop.permute.xlu1 %1041  ;;  %v1039_v63 = vadd.f32 %v1038_v58, %v1033_v36  ;;  %v1097_v36 = vld [vmem:[#allocation2 + $0x7] sm:$0x1] }
 0xf2a   :  { %v1044_v2 = vmul.f32 %v1042_v61, %v5744_v40 }
 0xf2c   :  { %v1045_v7 = vadd.f32 %v1044_v2, %v1039_v63 }
 0xf2e   :  { %v1048_v4 = vpop.permute.xlu1 %1047 }
 0xf2f   :  { %v1050_v22 = vmul.f32 %v1048_v4, %v5751_v62 }
 0xf31   :  { %v1051_v57 = vadd.f32 %v1050_v22, %v1045_v7 }
 0xf33   :  { %v1060_v59 = vpop.permute.xlu1 %1059  ;;  %v1057_v60 = vadd.f32 %v1056_v25, %v1051_v57 }
 0xf34   :  { %v1062_v30 = vmul.f32 %v1060_v59, %v5762_v8 }
 0xf36   :  { %v1063_v19 = vadd.f32 %v1062_v30, %v1057_v60 }
 0xf38   :  { %v1066_v17 = vpop.permute.xlu1 %1065 }
 0xf39   :  { %v1068_v34 = vmul.f32 %v1066_v17, %v5769_v15 }
 0xf3b   :  { %v1069_v20 = vadd.f32 %v1068_v34, %v1063_v19 }
 0xf3d   :  { %5243 = vtanh.f32 %v1069_v20  ;;  %v1070_v40 = vmul.f32 0.5, %v1069_v20 }
 0xf3f   :  { %5245 = vtanh.f32 %v1070_v40 }
 0xf47   :  { %v5244_v21 = vpop.eup %5243 }
 0xf48   :  { %1077 = vrot.lane.b32.xlu0 %v5244_v21, %s5516_s30 }
 0xf49   :  { %v5246_v62 = vpop.eup %5245 }
 0xf4a   :  { %v1072_v24 = vmul.f32 0.5, %v5246_v62  ;;  %v6143_v62 = vld [vmem:[%s8094_s4 + $0x7] sm:$0x1] }
 0xf4c   :  { %v1073_v26 = vadd.f32 0.5, %v1072_v24 }
 0xf4e   :  { %v1075_v8 = vmul.f32 %v1073_v26, %v6003_v5 }
 0xfba   :  { %v1078_v23 = vpop.permute.xlu0 %1077 }
 0xfbb   :  { %v1080_v3 = vmul.f32 %v1078_v23, %v1073_v26 }
 0xfbd   :  { %1082 = vrot.lane.b32.xlu1 %v1080_v3, %s5517_s11  ;;  %v6149_v3 = vld [vmem:[%s8094_s4 + $0x8] sm:$0x1] }
0x102f   :  { %v1083_v28 = vpop.permute.xlu1 %1082 }
0x1030   :  { %v6095_v13 = vadd.f32 %v1083_v28, %v1075_v8 }
0x1032   :  { %5247 = vtanh.f32 %v6095_v13 }
0x103c   :  { %v5248_v15 = vpop.eup %5247 }
0x103d   :  { %1088 = vrot.lane.b32.xlu0 %v5248_v15, %s5517_s11 }
0x10af   :  { %v1089_v29 = vpop.permute.xlu0 %1088 }
0x10b0   :  { %v6099_v31 = vmul.f32 %v1089_v29, %v1073_v26  ;;  %v6155_v29 = vld [vmem:[%s8094_s4 + $0x9] sm:$0x1] }
0x10b2   :  { %1105 = vperm.xlu0 %4806, %v6099_v31   ;;  %1099 = vperm.xlu1 %4805, %v6099_v31  }
0x10b6   :  { %4809 = vset.pattern.permute.xlu0 %v8131_v43  ;;  %4807 = vset.pattern.permute.xlu1 %v8129_v44 }
0x10b7   :  { %1123 = vperm.xlu0 %4809, %v6099_v31   ;;  %1111 = vperm.xlu1 %4807, %v6099_v31  }
0x10bb   :  { %4812 = vset.pattern.permute.xlu0 %v8127_v45  ;;  %4808 = vset.pattern.permute.xlu1 %v8125_v46 }
0x10bc   :  { %1141 = vperm.xlu0 %4812, %v6099_v31   ;;  %1117 = vperm.xlu1 %4808, %v6099_v31  }
0x10c0   :  { %4815 = vset.pattern.permute.xlu0 %v8111_v47  ;;  %4810 = vset.pattern.permute.xlu1 %v8123_v48 }
0x10c1   :  { %1159 = vperm.xlu0 %4815, %v6099_v31   ;;  %1129 = vperm.xlu1 %4810, %v6099_v31  }
0x10c5   :  { %4818 = vset.pattern.permute.xlu0 %v8107_v49  ;;  %4811 = vset.pattern.permute.xlu1 %v8121_v50 }
0x10c6   :  { %1177 = vperm.xlu0 %4818, %v6099_v31   ;;  %1135 = vperm.xlu1 %4811, %v6099_v31  }
0x10ca   :  { %4813 = vset.pattern.permute.xlu1 %v8119_v51  ;;  %4822 = vset.pattern.permute.xlu0 %v8101_v39 }
0x10cb   :  { %1147 = vperm.xlu1 %4813, %v6099_v31  }
0x10cf   :  { %4814 = vset.pattern.permute.xlu1 %v8117_v52 }
0x10d0   :  { %1153 = vperm.xlu1 %4814, %v6099_v31  }
0x10d4   :  { %4816 = vset.pattern.permute.xlu1 %v8109_v53 }
0x10d5   :  { %1165 = vperm.xlu1 %4816, %v6099_v31  }
0x10d9   :  { %4817 = vset.pattern.permute.xlu1 %v8115_v54 }
0x10da   :  { %1171 = vperm.xlu1 %4817, %v6099_v31  }
0x10de   :  { %4819 = vset.pattern.permute.xlu1 %v8105_v55 }
0x10df   :  { %1183 = vperm.xlu1 %4819, %v6099_v31  }
0x10e3   :  { %4820 = vset.pattern.permute.xlu1 %v8113_v56 }
0x10e4   :  { %1189 = vperm.xlu1 %4820, %v6099_v31  }
0x10e8   :  { %4821 = vset.pattern.permute.xlu1 %v8103_v38 }
0x1131   :  { %v1100_v5 = vpop.permute.xlu1 %1099  ;;  %v1106_v35 = vpop.permute.xlu0 %1105 }
0x1132   :  { %v1102_v32 = vmul.f32 %v6044_v9, %v1100_v5  ;;  %v1108_v61 = vmul.f32 %v6050_v18, %v1106_v35 }
0x1134   :  { %v1103_v58 = vadd.f32 %v1102_v32, %v1097_v36  ;;  %v6161_v36 = vld [vmem:[%s8094_s4 + $0xa] sm:$0x1] }
0x1136   :  { %v1112_v63 = vpop.permute.xlu1 %1111  ;;  %v1109_v2 = vadd.f32 %v1108_v61, %v1103_v58  ;;  %v1124_v57 = vpop.permute.xlu0 %1123 }
0x1137   :  { %v1114_v4 = vmul.f32 %v6056_v37, %v1112_v63  ;;  %v1126_v59 = vmul.f32 %v6068_v11, %v1124_v57 }
0x1139   :  { %v1115_v22 = vadd.f32 %v1114_v4, %v1109_v2  ;;  %v6167_v2 = vld [vmem:[%s8094_s4 + $0xb] sm:$0x1] }
0x113b   :  { %v1118_v7 = vpop.permute.xlu1 %1117  ;;  %v1142_v21 = vpop.permute.xlu0 %1141 }
0x113c   :  { %v1120_v12 = vmul.f32 %v6062_v33, %v1118_v7  ;;  %v1144_v24 = vmul.f32 %v6143_v62, %v1142_v21 }
0x113e   :  { %v1121_v25 = vadd.f32 %v1120_v12, %v1115_v22  ;;  %v6173_v12 = vld [vmem:[%s8094_s4 + $0xc] sm:$0x1] }
0x1140   :  { %v1130_v60 = vpop.permute.xlu1 %1129  ;;  %v1127_v30 = vadd.f32 %v1126_v59, %v1121_v25  ;;  %v1160_v32 = vpop.permute.xlu0 %1159 }
0x1141   :  { %v1132_v17 = vmul.f32 %v6074_v16, %v1130_v60  ;;  %v1162_v58 = vmul.f32 %v6161_v36, %v1160_v32  ;;  %v6179_v60 = vld [vmem:[%s8094_s4 + $0xd] sm:$0x1] }
0x1143   :  { %v1133_v34 = vadd.f32 %v1132_v17, %v1127_v30 }
0x1145   :  { %v1136_v19 = vpop.permute.xlu1 %1135  ;;  %v1178_v25 = vpop.permute.xlu0 %1177 }
0x1146   :  { %v1138_v20 = vmul.f32 %v6080_v0, %v1136_v19  ;;  %v1180_v30 = vmul.f32 %v6179_v60, %v1178_v25 }
0x1148   :  { %v1139_v40 = vadd.f32 %v1138_v20, %v1133_v34  ;;  %v6185_v34 = vld [vmem:[%s8094_s4 + $0xe] sm:$0x1] }
0x114a   :  { %v1148_v26 = vpop.permute.xlu1 %1147  ;;  %v1145_v23 = vadd.f32 %v1144_v24, %v1139_v40  ;;  %v6191_v24 = vld [vmem:[%s8094_s4 + $0xf] sm:$0x1] }
0x114b   :  { %v1150_v8 = vmul.f32 %v6149_v3, %v1148_v26 }
0x114d   :  { %v1151_v15 = vadd.f32 %v1150_v8, %v1145_v23 }
0x114f   :  { %v1154_v28 = vpop.permute.xlu1 %1153 }
0x1150   :  { %v1156_v5 = vmul.f32 %v6155_v29, %v1154_v28 }
0x1152   :  { %v1157_v35 = vadd.f32 %v1156_v5, %v1151_v15 }
0x1154   :  { %v1166_v61 = vpop.permute.xlu1 %1165  ;;  %v1163_v63 = vadd.f32 %v1162_v58, %v1157_v35 }
0x1155   :  { %v1168_v4 = vmul.f32 %v6167_v2, %v1166_v61 }
0x1157   :  { %v1169_v22 = vadd.f32 %v1168_v4, %v1163_v63 }
0x1159   :  { %v1172_v7 = vpop.permute.xlu1 %1171 }
0x115a   :  { %v1174_v57 = vmul.f32 %v6173_v12, %v1172_v7 }
0x115c   :  { %v1175_v59 = vadd.f32 %v1174_v57, %v1169_v22 }
0x115e   :  { %v1184_v17 = vpop.permute.xlu1 %1183  ;;  %v1181_v19 = vadd.f32 %v1180_v30, %v1175_v59  ;;  %v1221_v30 = vld [vmem:[#allocation2 + $0x8] sm:$0x1] }
0x115f   :  { %v1186_v20 = vmul.f32 %v6185_v34, %v1184_v17 }
0x1161   :  { %v1187_v40 = vadd.f32 %v1186_v20, %v1181_v19 }
0x1163   :  { %v1190_v21 = vpop.permute.xlu1 %1189 }
0x1164   :  { %v1192_v26 = vmul.f32 %v6191_v24, %v1190_v21 }
0x1166   :  { %v1193_v23 = vadd.f32 %v1192_v26, %v1187_v40 }
0x1168   :  { %5249 = vtanh.f32 %v1193_v23  ;;  %v1194_v28 = vmul.f32 0.5, %v1193_v23 }
0x116a   :  { %5251 = vtanh.f32 %v1194_v28 }
0x1172   :  { %v5250_v8 = vpop.eup %5249 }
0x1173   :  { %1201 = vrot.lane.b32.xlu0 %v5250_v8, %s5516_s30 }
0x1174   :  { %v5252_v15 = vpop.eup %5251 }
0x1175   :  { %v1196_v5 = vmul.f32 0.5, %v5252_v15 }
0x1177   :  { %v1197_v32 = vadd.f32 0.5, %v1196_v5 }
0x1179   :  { %v1199_v61 = vmul.f32 %v1197_v32, %v6095_v13 }
0x11e5   :  { %v1202_v35 = vpop.permute.xlu0 %1201 }
0x11e6   :  { %v1204_v58 = vmul.f32 %v1202_v35, %v1197_v32 }
0x11e8   :  { %1206 = vrot.lane.b32.xlu1 %v1204_v58, %s5517_s11 }
0x125a   :  { %v1207_v63 = vpop.permute.xlu1 %1206 }
0x125b   :  { %v6197_v4 = vadd.f32 %v1207_v63, %v1199_v61 }
0x125d   :  { %5253 = vtanh.f32 %v6197_v4 }
0x1267   :  { %v5254_v7 = vpop.eup %5253 }
0x1268   :  { %1212 = vrot.lane.b32.xlu0 %v5254_v7, %s5517_s11 }
0x12da   :  { %v1213_v22 = vpop.permute.xlu0 %1212 }
0x12db   :  { %v6201_v57 = vmul.f32 %v1213_v22, %v1197_v32 }
0x12dd   :  { %8151 = vst [vmem:[#allocation9_spill] sm:$0xff] %v6201_v57  ;;  %1229 = vperm.xlu0 %4822, %v6201_v57   ;;  %1223 = vperm.xlu1 %4821, %v6201_v57  }
0x12e1   :  { %4825 = vset.pattern.permute.xlu0 %v8131_v43  ;;  %4823 = vset.pattern.permute.xlu1 %v8129_v44 }
0x12e2   :  { %1247 = vperm.xlu0 %4825, %v6201_v57   ;;  %1235 = vperm.xlu1 %4823, %v6201_v57  }
0x12e6   :  { %4828 = vset.pattern.permute.xlu0 %v8127_v45  ;;  %4824 = vset.pattern.permute.xlu1 %v8125_v46 }
0x12e7   :  { %1265 = vperm.xlu0 %4828, %v6201_v57   ;;  %1241 = vperm.xlu1 %4824, %v6201_v57  }
0x12eb   :  { %4831 = vset.pattern.permute.xlu0 %v8111_v47  ;;  %4826 = vset.pattern.permute.xlu1 %v8123_v48 }
0x12ec   :  { %1283 = vperm.xlu0 %4831, %v6201_v57   ;;  %1253 = vperm.xlu1 %4826, %v6201_v57  }
0x12f0   :  { %4834 = vset.pattern.permute.xlu0 %v8107_v49  ;;  %4827 = vset.pattern.permute.xlu1 %v8121_v50 }
0x12f1   :  { %1301 = vperm.xlu0 %4834, %v6201_v57   ;;  %1259 = vperm.xlu1 %4827, %v6201_v57  }
0x12f5   :  { %4829 = vset.pattern.permute.xlu1 %v8119_v51  ;;  %4838 = vset.pattern.permute.xlu0 %v8101_v39 }
0x12f6   :  { %1271 = vperm.xlu1 %4829, %v6201_v57  }
0x12fa   :  { %4830 = vset.pattern.permute.xlu1 %v8117_v52 }
0x12fb   :  { %1277 = vperm.xlu1 %4830, %v6201_v57  }
0x12ff   :  { %4832 = vset.pattern.permute.xlu1 %v8109_v53 }
0x1300   :  { %1289 = vperm.xlu1 %4832, %v6201_v57  }
0x1304   :  { %4833 = vset.pattern.permute.xlu1 %v8115_v54 }
0x1305   :  { %1295 = vperm.xlu1 %4833, %v6201_v57  }
0x1309   :  { %4835 = vset.pattern.permute.xlu1 %v8105_v55 }
0x130a   :  { %1307 = vperm.xlu1 %4835, %v6201_v57  }
0x130e   :  { %4836 = vset.pattern.permute.xlu1 %v8113_v56 }
0x130f   :  { %1313 = vperm.xlu1 %4836, %v6201_v57  }
0x1313   :  { %4837 = vset.pattern.permute.xlu1 %v8103_v38 }
0x135c   :  { %v1224_v13 = vpop.permute.xlu1 %1223  ;;  %v1230_v59 = vpop.permute.xlu0 %1229 }
0x135d   :  { %v1226_v25 = vmul.f32 %v6044_v9, %v1224_v13  ;;  %v1232_v19 = vmul.f32 %v6050_v18, %v1230_v59 }
0x135f   :  { %v1227_v17 = vadd.f32 %v1226_v25, %v1221_v30 }
0x1361   :  { %v1236_v20 = vpop.permute.xlu1 %1235  ;;  %v1233_v21 = vadd.f32 %v1232_v19, %v1227_v17  ;;  %v1248_v28 = vpop.permute.xlu0 %1247 }
0x1362   :  { %v1238_v40 = vmul.f32 %v6056_v37, %v1236_v20  ;;  %v1250_v5 = vmul.f32 %v6068_v11, %v1248_v28 }
0x1364   :  { %v1239_v23 = vadd.f32 %v1238_v40, %v1233_v21 }
0x1366   :  { %v1242_v26 = vpop.permute.xlu1 %1241  ;;  %v1266_v22 = vpop.permute.xlu0 %1265 }
0x1367   :  { %v1244_v8 = vmul.f32 %v6062_v33, %v1242_v26  ;;  %v1268_v25 = vmul.f32 %v6143_v62, %v1266_v22 }
0x1369   :  { %v1245_v15 = vadd.f32 %v1244_v8, %v1239_v23 }
0x136b   :  { %v1254_v32 = vpop.permute.xlu1 %1253  ;;  %v1251_v35 = vadd.f32 %v1250_v5, %v1245_v15  ;;  %v1284_v40 = vpop.permute.xlu0 %1283 }
0x136c   :  { %v1256_v58 = vmul.f32 %v6074_v16, %v1254_v32  ;;  %v1286_v23 = vmul.f32 %v6161_v36, %v1284_v40 }
0x136e   :  { %v1257_v63 = vadd.f32 %v1256_v58, %v1251_v35 }
0x1370   :  { %v1260_v61 = vpop.permute.xlu1 %1259  ;;  %v1302_v58 = vpop.permute.xlu0 %1301 }
0x1371   :  { %v1262_v7 = vmul.f32 %v6080_v0, %v1260_v61 }
0x1373   :  { %v1263_v13 = vadd.f32 %v1262_v7, %v1257_v63  ;;  %v1304_v63 = vmul.f32 %v6179_v60, %v1302_v58 }
0x1375   :  { %v1272_v59 = vpop.permute.xlu1 %1271  ;;  %v1269_v30 = vadd.f32 %v1268_v25, %v1263_v13 }
0x1376   :  { %v1274_v17 = vmul.f32 %v6149_v3, %v1272_v59 }
0x1378   :  { %v1275_v20 = vadd.f32 %v1274_v17, %v1269_v30 }
0x137a   :  { %v1278_v19 = vpop.permute.xlu1 %1277 }
0x137b   :  { %v1280_v21 = vmul.f32 %v6155_v29, %v1278_v19 }
0x137d   :  { %v1281_v26 = vadd.f32 %v1280_v21, %v1275_v20 }
0x137f   :  { %v1290_v8 = vpop.permute.xlu1 %1289  ;;  %v1287_v28 = vadd.f32 %v1286_v23, %v1281_v26 }
0x1380   :  { %v1292_v15 = vmul.f32 %v6167_v2, %v1290_v8 }
0x1382   :  { %v1293_v32 = vadd.f32 %v1292_v15, %v1287_v28 }
0x1384   :  { %v1296_v5 = vpop.permute.xlu1 %1295 }
0x1385   :  { %v1298_v35 = vmul.f32 %v6173_v12, %v1296_v5 }
0x1387   :  { %v1299_v61 = vadd.f32 %v1298_v35, %v1293_v32 }
0x1389   :  { %v1308_v7 = vpop.permute.xlu1 %1307  ;;  %v1305_v22 = vadd.f32 %v1304_v63, %v1299_v61 }
0x138a   :  { %v1310_v13 = vmul.f32 %v6185_v34, %v1308_v7  ;;  %v1345_v7 = vld [vmem:[#allocation2 + $0x9] sm:$0x1] }
0x138c   :  { %v1311_v59 = vadd.f32 %v1310_v13, %v1305_v22 }
0x138e   :  { %v1314_v25 = vpop.permute.xlu1 %1313 }
0x138f   :  { %v1316_v30 = vmul.f32 %v6191_v24, %v1314_v25 }
0x1391   :  { %v1317_v17 = vadd.f32 %v1316_v30, %v1311_v59 }
0x1393   :  { %5255 = vtanh.f32 %v1317_v17  ;;  %v1318_v20 = vmul.f32 0.5, %v1317_v17 }
0x1395   :  { %5257 = vtanh.f32 %v1318_v20 }
0x139d   :  { %v5256_v19 = vpop.eup %5255 }
0x139e   :  { %1325 = vrot.lane.b32.xlu0 %v5256_v19, %s5516_s30 }
0x139f   :  { %v5258_v21 = vpop.eup %5257 }
0x13a0   :  { %v1320_v40 = vmul.f32 0.5, %v5258_v21 }
0x13a2   :  { %v1321_v26 = vadd.f32 0.5, %v1320_v40 }
0x13a4   :  { %v1323_v28 = vmul.f32 %v1321_v26, %v6197_v4 }
0x1410   :  { %v1326_v23 = vpop.permute.xlu0 %1325 }
0x1411   :  { %v1328_v8 = vmul.f32 %v1326_v23, %v1321_v26 }
0x1413   :  { %1330 = vrot.lane.b32.xlu1 %v1328_v8, %s5517_s11 }
0x1485   :  { %v1331_v15 = vpop.permute.xlu1 %1330 }
0x1486   :  { %v6254_v5 = vadd.f32 %v1331_v15, %v1323_v28 }
0x1488   :  { %5259 = vtanh.f32 %v6254_v5 }
0x1492   :  { %v5260_v32 = vpop.eup %5259 }
0x1493   :  { %1336 = vrot.lane.b32.xlu0 %v5260_v32, %s5517_s11 }
0x1505   :  { %v1337_v35 = vpop.permute.xlu0 %1336 }
0x1506   :  { %v6258_v58 = vmul.f32 %v1337_v35, %v1321_v26 }
0x1508   :  { %1353 = vperm.xlu0 %4838, %v6258_v58   ;;  %1347 = vperm.xlu1 %4837, %v6258_v58  }
0x150c   :  { %4841 = vset.pattern.permute.xlu0 %v8131_v43  ;;  %4839 = vset.pattern.permute.xlu1 %v8129_v44 }
0x150d   :  { %1371 = vperm.xlu0 %4841, %v6258_v58   ;;  %1359 = vperm.xlu1 %4839, %v6258_v58  }
0x1511   :  { %4844 = vset.pattern.permute.xlu0 %v8127_v45  ;;  %4840 = vset.pattern.permute.xlu1 %v8125_v46 }
0x1512   :  { %1389 = vperm.xlu0 %4844, %v6258_v58   ;;  %1365 = vperm.xlu1 %4840, %v6258_v58  }
0x1516   :  { %4847 = vset.pattern.permute.xlu0 %v8111_v47  ;;  %4842 = vset.pattern.permute.xlu1 %v8123_v48 }
0x1517   :  { %1407 = vperm.xlu0 %4847, %v6258_v58   ;;  %1377 = vperm.xlu1 %4842, %v6258_v58  }
0x151b   :  { %4850 = vset.pattern.permute.xlu0 %v8107_v49  ;;  %4843 = vset.pattern.permute.xlu1 %v8121_v50 }
0x151c   :  { %1425 = vperm.xlu0 %4850, %v6258_v58   ;;  %1383 = vperm.xlu1 %4843, %v6258_v58  }
0x1520   :  { %4845 = vset.pattern.permute.xlu1 %v8119_v51  ;;  %4854 = vset.pattern.permute.xlu0 %v8101_v39 }
0x1521   :  { %1395 = vperm.xlu1 %4845, %v6258_v58  }
0x1525   :  { %4846 = vset.pattern.permute.xlu1 %v8117_v52 }
0x1526   :  { %1401 = vperm.xlu1 %4846, %v6258_v58  }
0x152a   :  { %4848 = vset.pattern.permute.xlu1 %v8109_v53 }
0x152b   :  { %1413 = vperm.xlu1 %4848, %v6258_v58  }
0x152f   :  { %4849 = vset.pattern.permute.xlu1 %v8115_v54 }
0x1530   :  { %1419 = vperm.xlu1 %4849, %v6258_v58  }
0x1534   :  { %4851 = vset.pattern.permute.xlu1 %v8105_v55 }
0x1535   :  { %1431 = vperm.xlu1 %4851, %v6258_v58  }
0x1539   :  { %4852 = vset.pattern.permute.xlu1 %v8113_v56 }
0x153a   :  { %1437 = vperm.xlu1 %4852, %v6258_v58  }
0x153e   :  { %4853 = vset.pattern.permute.xlu1 %v8103_v38 }
0x1587   :  { %v1348_v4 = vpop.permute.xlu1 %1347  ;;  %v1354_v63 = vpop.permute.xlu0 %1353 }
0x1588   :  { %v1350_v61 = vmul.f32 %v6044_v9, %v1348_v4  ;;  %v1356_v13 = vmul.f32 %v6050_v18, %v1354_v63 }
0x158a   :  { %v1351_v22 = vadd.f32 %v1350_v61, %v1345_v7 }
0x158c   :  { %v1360_v25 = vpop.permute.xlu1 %1359  ;;  %v1357_v59 = vadd.f32 %v1356_v13, %v1351_v22  ;;  %v1372_v21 = vpop.permute.xlu0 %1371 }
0x158d   :  { %v1362_v30 = vmul.f32 %v6056_v37, %v1360_v25  ;;  %v1374_v26 = vmul.f32 %v6068_v11, %v1372_v21 }
0x158f   :  { %v1363_v19 = vadd.f32 %v1362_v30, %v1357_v59 }
0x1591   :  { %v1366_v17 = vpop.permute.xlu1 %1365  ;;  %v1390_v4 = vpop.permute.xlu0 %1389 }
0x1592   :  { %v1368_v20 = vmul.f32 %v6062_v33, %v1366_v17  ;;  %v1392_v63 = vmul.f32 %v6143_v62, %v1390_v4 }
0x1594   :  { %v1369_v40 = vadd.f32 %v1368_v20, %v1363_v19 }
0x1596   :  { %v1378_v23 = vpop.permute.xlu1 %1377  ;;  %v1375_v8 = vadd.f32 %v1374_v26, %v1369_v40  ;;  %v1408_v17 = vpop.permute.xlu0 %1407 }
0x1597   :  { %v1380_v28 = vmul.f32 %v6074_v16, %v1378_v23  ;;  %v1410_v20 = vmul.f32 %v6161_v36, %v1408_v17 }
0x1599   :  { %v1381_v32 = vadd.f32 %v1380_v28, %v1375_v8 }
0x159b   :  { %v1384_v15 = vpop.permute.xlu1 %1383 }
0x159c   :  { %v1386_v35 = vmul.f32 %v6080_v0, %v1384_v15  ;;  %v1426_v15 = vpop.permute.xlu0 %1425 }
0x159e   :  { %v1387_v61 = vadd.f32 %v1386_v35, %v1381_v32  ;;  %v1428_v35 = vmul.f32 %v6179_v60, %v1426_v15 }
0x15a0   :  { %v1396_v7 = vpop.permute.xlu1 %1395  ;;  %v1393_v22 = vadd.f32 %v1392_v63, %v1387_v61 }
0x15a1   :  { %v1398_v13 = vmul.f32 %v6149_v3, %v1396_v7 }
0x15a3   :  { %v1399_v59 = vadd.f32 %v1398_v13, %v1393_v22 }
0x15a5   :  { %v1402_v25 = vpop.permute.xlu1 %1401 }
0x15a6   :  { %v1404_v30 = vmul.f32 %v6155_v29, %v1402_v25 }
0x15a8   :  { %v1405_v19 = vadd.f32 %v1404_v30, %v1399_v59 }
0x15aa   :  { %v1414_v21 = vpop.permute.xlu1 %1413  ;;  %v1411_v40 = vadd.f32 %v1410_v20, %v1405_v19 }
0x15ab   :  { %v1416_v26 = vmul.f32 %v6167_v2, %v1414_v21 }
0x15ad   :  { %v1417_v8 = vadd.f32 %v1416_v26, %v1411_v40 }
0x15af   :  { %v1420_v23 = vpop.permute.xlu1 %1419 }
0x15b0   :  { %v1422_v28 = vmul.f32 %v6173_v12, %v1420_v23 }
0x15b2   :  { %v1423_v32 = vadd.f32 %v1422_v28, %v1417_v8 }
0x15b4   :  { %v1432_v4 = vpop.permute.xlu1 %1431  ;;  %v1429_v61 = vadd.f32 %v1428_v35, %v1423_v32 }
0x15b5   :  { %v1434_v63 = vmul.f32 %v6185_v34, %v1432_v4 }
0x15b7   :  { %v1435_v22 = vadd.f32 %v1434_v63, %v1429_v61  ;;  %v1469_v61 = vld [vmem:[#allocation2 + $0xa] sm:$0x1] }
0x15b9   :  { %v1438_v7 = vpop.permute.xlu1 %1437 }
0x15ba   :  { %v1440_v13 = vmul.f32 %v6191_v24, %v1438_v7 }
0x15bc   :  { %v1441_v25 = vadd.f32 %v1440_v13, %v1435_v22 }
0x15be   :  { %5261 = vtanh.f32 %v1441_v25  ;;  %v1442_v30 = vmul.f32 0.5, %v1441_v25 }
0x15c0   :  { %5263 = vtanh.f32 %v1442_v30 }
0x15c8   :  { %v5262_v59 = vpop.eup %5261 }
0x15c9   :  { %1449 = vrot.lane.b32.xlu0 %v5262_v59, %s5516_s30 }
0x15ca   :  { %v5264_v17 = vpop.eup %5263 }
0x15cb   :  { %v1444_v19 = vmul.f32 0.5, %v5264_v17 }
0x15cd   :  { %v1445_v20 = vadd.f32 0.5, %v1444_v19 }
0x15cf   :  { %v1447_v26 = vmul.f32 %v1445_v20, %v6254_v5 }
0x163b   :  { %v1450_v21 = vpop.permute.xlu0 %1449 }
0x163c   :  { %v1452_v40 = vmul.f32 %v1450_v21, %v1445_v20 }
0x163e   :  { %1454 = vrot.lane.b32.xlu1 %v1452_v40, %s5517_s11 }
0x16b0   :  { %v1455_v23 = vpop.permute.xlu1 %1454 }
0x16b1   :  { %v6311_v8 = vadd.f32 %v1455_v23, %v1447_v26 }
0x16b3   :  { %5265 = vtanh.f32 %v6311_v8 }
0x16bd   :  { %v5266_v28 = vpop.eup %5265 }
0x16be   :  { %1460 = vrot.lane.b32.xlu0 %v5266_v28, %s5517_s11 }
0x1730   :  { %v1461_v15 = vpop.permute.xlu0 %1460 }
0x1731   :  { %v6315_v32 = vmul.f32 %v1461_v15, %v1445_v20 }
0x1733   :  { %8152 = vst [vmem:[#allocation10_spill] sm:$0xff] %v6315_v32  ;;  %1477 = vperm.xlu0 %4854, %v6315_v32   ;;  %1471 = vperm.xlu1 %4853, %v6315_v32  }
0x1737   :  { %4857 = vset.pattern.permute.xlu0 %v8131_v43  ;;  %4855 = vset.pattern.permute.xlu1 %v8129_v44 }
0x1738   :  { %1495 = vperm.xlu0 %4857, %v6315_v32   ;;  %1483 = vperm.xlu1 %4855, %v6315_v32  }
0x173c   :  { %4860 = vset.pattern.permute.xlu0 %v8127_v45  ;;  %4856 = vset.pattern.permute.xlu1 %v8125_v46 }
0x173d   :  { %1513 = vperm.xlu0 %4860, %v6315_v32   ;;  %1489 = vperm.xlu1 %4856, %v6315_v32  }
0x1741   :  { %4863 = vset.pattern.permute.xlu0 %v8111_v47  ;;  %4858 = vset.pattern.permute.xlu1 %v8123_v48 }
0x1742   :  { %1531 = vperm.xlu0 %4863, %v6315_v32   ;;  %1501 = vperm.xlu1 %4858, %v6315_v32  }
0x1746   :  { %4866 = vset.pattern.permute.xlu0 %v8107_v49  ;;  %4859 = vset.pattern.permute.xlu1 %v8121_v50 }
0x1747   :  { %1549 = vperm.xlu0 %4866, %v6315_v32   ;;  %1507 = vperm.xlu1 %4859, %v6315_v32  }
0x174b   :  { %4861 = vset.pattern.permute.xlu1 %v8119_v51  ;;  %4870 = vset.pattern.permute.xlu0 %v8101_v39 }
0x174c   :  { %1519 = vperm.xlu1 %4861, %v6315_v32  }
0x1750   :  { %4862 = vset.pattern.permute.xlu1 %v8117_v52 }
0x1751   :  { %1525 = vperm.xlu1 %4862, %v6315_v32  }
0x1755   :  { %4864 = vset.pattern.permute.xlu1 %v8109_v53 }
0x1756   :  { %1537 = vperm.xlu1 %4864, %v6315_v32  }
0x175a   :  { %4865 = vset.pattern.permute.xlu1 %v8115_v54 }
0x175b   :  { %1543 = vperm.xlu1 %4865, %v6315_v32  }
0x175f   :  { %4867 = vset.pattern.permute.xlu1 %v8105_v55 }
0x1760   :  { %1555 = vperm.xlu1 %4867, %v6315_v32  }
0x1764   :  { %4868 = vset.pattern.permute.xlu1 %v8113_v56 }
0x1765   :  { %1561 = vperm.xlu1 %4868, %v6315_v32  }
0x1769   :  { %4869 = vset.pattern.permute.xlu1 %v8103_v38 }
0x17b2   :  { %v1472_v5 = vpop.permute.xlu1 %1471  ;;  %v1478_v4 = vpop.permute.xlu0 %1477 }
0x17b3   :  { %v1474_v35 = vmul.f32 %v6044_v9, %v1472_v5  ;;  %v1480_v7 = vmul.f32 %v6050_v18, %v1478_v4 }
0x17b5   :  { %v1475_v63 = vadd.f32 %v1474_v35, %v1469_v61 }
0x17b7   :  { %v1484_v22 = vpop.permute.xlu1 %1483  ;;  %v1481_v13 = vadd.f32 %v1480_v7, %v1475_v63  ;;  %v1496_v19 = vpop.permute.xlu0 %1495 }
0x17b8   :  { %v1486_v25 = vmul.f32 %v6056_v37, %v1484_v22  ;;  %v1498_v21 = vmul.f32 %v6068_v11, %v1496_v19 }
0x17ba   :  { %v1487_v30 = vadd.f32 %v1486_v25, %v1481_v13 }
0x17bc   :  { %v1490_v59 = vpop.permute.xlu1 %1489  ;;  %v1514_v35 = vpop.permute.xlu0 %1513 }
0x17bd   :  { %v1492_v17 = vmul.f32 %v6062_v33, %v1490_v59  ;;  %v1516_v61 = vmul.f32 %v6143_v62, %v1514_v35 }
0x17bf   :  { %v1493_v20 = vadd.f32 %v1492_v17, %v1487_v30 }
0x17c1   :  { %v1502_v40 = vpop.permute.xlu1 %1501  ;;  %v1499_v26 = vadd.f32 %v1498_v21, %v1493_v20  ;;  %v1532_v30 = vpop.permute.xlu0 %1531 }
0x17c2   :  { %v1504_v23 = vmul.f32 %v6074_v16, %v1502_v40  ;;  %v1534_v19 = vmul.f32 %v6161_v36, %v1532_v30 }
0x17c4   :  { %v1505_v15 = vadd.f32 %v1504_v23, %v1499_v26 }
0x17c6   :  { %v1508_v28 = vpop.permute.xlu1 %1507 }
0x17c7   :  { %v1510_v5 = vmul.f32 %v6080_v0, %v1508_v28 }
0x17c9   :  { %v1511_v4 = vadd.f32 %v1510_v5, %v1505_v15  ;;  %v1550_v15 = vpop.permute.xlu0 %1549 }
0x17ca   :  { %v1552_v35 = vmul.f32 %v6179_v60, %v1550_v15 }
0x17cb   :  { %v1520_v63 = vpop.permute.xlu1 %1519  ;;  %v1517_v7 = vadd.f32 %v1516_v61, %v1511_v4 }
0x17cc   :  { %v1522_v22 = vmul.f32 %v6149_v3, %v1520_v63 }
0x17ce   :  { %v1523_v25 = vadd.f32 %v1522_v22, %v1517_v7 }
0x17d0   :  { %v1526_v13 = vpop.permute.xlu1 %1525 }
0x17d1   :  { %v1528_v59 = vmul.f32 %v6155_v29, %v1526_v13 }
0x17d3   :  { %v1529_v17 = vadd.f32 %v1528_v59, %v1523_v25 }
0x17d5   :  { %v1538_v20 = vpop.permute.xlu1 %1537  ;;  %v1535_v21 = vadd.f32 %v1534_v19, %v1529_v17 }
0x17d6   :  { %v1540_v40 = vmul.f32 %v6167_v2, %v1538_v20 }
0x17d8   :  { %v1541_v23 = vadd.f32 %v1540_v40, %v1535_v21 }
0x17da   :  { %v1544_v26 = vpop.permute.xlu1 %1543 }
0x17db   :  { %v1546_v28 = vmul.f32 %v6173_v12, %v1544_v26 }
0x17dd   :  { %v1547_v5 = vadd.f32 %v1546_v28, %v1541_v23 }
0x17df   :  { %v1556_v4 = vpop.permute.xlu1 %1555  ;;  %v1553_v61 = vadd.f32 %v1552_v35, %v1547_v5 }
0x17e0   :  { %v1558_v63 = vmul.f32 %v6185_v34, %v1556_v4 }
0x17e2   :  { %v1559_v22 = vadd.f32 %v1558_v63, %v1553_v61  ;;  %v1593_v63 = vld [vmem:[#allocation2 + $0xb] sm:$0x1] }
0x17e4   :  { %v1562_v7 = vpop.permute.xlu1 %1561 }
0x17e5   :  { %v1564_v13 = vmul.f32 %v6191_v24, %v1562_v7 }
0x17e7   :  { %v1565_v25 = vadd.f32 %v1564_v13, %v1559_v22 }
0x17e9   :  { %5267 = vtanh.f32 %v1565_v25  ;;  %v1566_v30 = vmul.f32 0.5, %v1565_v25 }
0x17eb   :  { %5269 = vtanh.f32 %v1566_v30 }
0x17f3   :  { %v5268_v59 = vpop.eup %5267 }
0x17f4   :  { %1573 = vrot.lane.b32.xlu0 %v5268_v59, %s5516_s30 }
0x17f5   :  { %v5270_v17 = vpop.eup %5269 }
0x17f6   :  { %v1568_v19 = vmul.f32 0.5, %v5270_v17 }
0x17f8   :  { %v1569_v20 = vadd.f32 0.5, %v1568_v19 }
0x17fa   :  { %v1571_v26 = vmul.f32 %v1569_v20, %v6311_v8 }
0x1866   :  { %v1574_v21 = vpop.permute.xlu0 %1573 }
0x1867   :  { %v1576_v40 = vmul.f32 %v1574_v21, %v1569_v20 }
0x1869   :  { %1578 = vrot.lane.b32.xlu1 %v1576_v40, %s5517_s11 }
0x18db   :  { %v1579_v23 = vpop.permute.xlu1 %1578 }
0x18dc   :  { %v6368_v28 = vadd.f32 %v1579_v23, %v1571_v26 }
0x18de   :  { %5271 = vtanh.f32 %v6368_v28 }
0x18e8   :  { %v5272_v15 = vpop.eup %5271 }
0x18e9   :  { %1584 = vrot.lane.b32.xlu0 %v5272_v15, %s5517_s11 }
0x195b   :  { %v1585_v5 = vpop.permute.xlu0 %1584 }
0x195c   :  { %v6372_v35 = vmul.f32 %v1585_v5, %v1569_v20 }
0x195e   :  { %1601 = vperm.xlu0 %4870, %v6372_v35   ;;  %1595 = vperm.xlu1 %4869, %v6372_v35  }
0x1962   :  { %4873 = vset.pattern.permute.xlu0 %v8131_v43  ;;  %4871 = vset.pattern.permute.xlu1 %v8129_v44 }
0x1963   :  { %1619 = vperm.xlu0 %4873, %v6372_v35   ;;  %1607 = vperm.xlu1 %4871, %v6372_v35  }
0x1967   :  { %4876 = vset.pattern.permute.xlu0 %v8127_v45  ;;  %4872 = vset.pattern.permute.xlu1 %v8125_v46 }
0x1968   :  { %1637 = vperm.xlu0 %4876, %v6372_v35   ;;  %1613 = vperm.xlu1 %4872, %v6372_v35  }
0x196c   :  { %4879 = vset.pattern.permute.xlu0 %v8111_v47  ;;  %4874 = vset.pattern.permute.xlu1 %v8123_v48 }
0x196d   :  { %1655 = vperm.xlu0 %4879, %v6372_v35   ;;  %1625 = vperm.xlu1 %4874, %v6372_v35  }
0x1971   :  { %4882 = vset.pattern.permute.xlu0 %v8107_v49  ;;  %4875 = vset.pattern.permute.xlu1 %v8121_v50 }
0x1972   :  { %1673 = vperm.xlu0 %4882, %v6372_v35   ;;  %1631 = vperm.xlu1 %4875, %v6372_v35  }
0x1976   :  { %4877 = vset.pattern.permute.xlu1 %v8119_v51  ;;  %4886 = vset.pattern.permute.xlu0 %v8101_v39 }
0x1977   :  { %1643 = vperm.xlu1 %4877, %v6372_v35  }
0x197b   :  { %4878 = vset.pattern.permute.xlu1 %v8117_v52 }
0x197c   :  { %1649 = vperm.xlu1 %4878, %v6372_v35  }
0x1980   :  { %4880 = vset.pattern.permute.xlu1 %v8109_v53 }
0x1981   :  { %1661 = vperm.xlu1 %4880, %v6372_v35  }
0x1985   :  { %4881 = vset.pattern.permute.xlu1 %v8115_v54 }
0x1986   :  { %1667 = vperm.xlu1 %4881, %v6372_v35  }
0x198a   :  { %4883 = vset.pattern.permute.xlu1 %v8105_v55 }
0x198b   :  { %1679 = vperm.xlu1 %4883, %v6372_v35  }
0x198f   :  { %4884 = vset.pattern.permute.xlu1 %v8113_v56 }
0x1990   :  { %1685 = vperm.xlu1 %4884, %v6372_v35  }
0x1994   :  { %4885 = vset.pattern.permute.xlu1 %v8103_v38 }
0x19dd   :  { %v1596_v8 = vpop.permute.xlu1 %1595  ;;  %v1602_v61 = vpop.permute.xlu0 %1601 }
0x19de   :  { %v1598_v4 = vmul.f32 %v6044_v9, %v1596_v8  ;;  %v1604_v22 = vmul.f32 %v6050_v18, %v1602_v61 }
0x19e0   :  { %v1599_v7 = vadd.f32 %v1598_v4, %v1593_v63 }
0x19e2   :  { %v1608_v13 = vpop.permute.xlu1 %1607  ;;  %v1605_v25 = vadd.f32 %v1604_v22, %v1599_v7  ;;  %v1620_v20 = vpop.permute.xlu0 %1619 }
0x19e3   :  { %v1610_v59 = vmul.f32 %v6056_v37, %v1608_v13  ;;  %v1622_v40 = vmul.f32 %v6068_v11, %v1620_v20 }
0x19e5   :  { %v1611_v17 = vadd.f32 %v1610_v59, %v1605_v25 }
0x19e7   :  { %v1614_v30 = vpop.permute.xlu1 %1613  ;;  %v1638_v8 = vpop.permute.xlu0 %1637 }
0x19e8   :  { %v1616_v19 = vmul.f32 %v6062_v33, %v1614_v30  ;;  %v1640_v37 = vmul.f32 %v6143_v62, %v1638_v8 }
0x19ea   :  { %v1617_v21 = vadd.f32 %v1616_v19, %v1611_v17 }
0x19ec   :  { %v1626_v26 = vpop.permute.xlu1 %1625  ;;  %v1623_v23 = vadd.f32 %v1622_v40, %v1617_v21  ;;  %v1656_v13 = vpop.permute.xlu0 %1655 }
0x19ed   :  { %v1628_v9 = vmul.f32 %v6074_v16, %v1626_v26  ;;  %v1658_v16 = vmul.f32 %v6161_v36, %v1656_v13 }
0x19ef   :  { %v1629_v5 = vadd.f32 %v1628_v9, %v1623_v23 }
0x19f1   :  { %v1632_v15 = vpop.permute.xlu1 %1631  ;;  %v1674_v21 = vpop.permute.xlu0 %1673 }
0x19f2   :  { %v1634_v18 = vmul.f32 %v6080_v0, %v1632_v15  ;;  %v1676_v26 = vmul.f32 %v6179_v60, %v1674_v21  ;;  %v1717_v21 = vld [vmem:[#allocation2 + $0xc] sm:$0x1] }
0x19f4   :  { %v1635_v4 = vadd.f32 %v1634_v18, %v1629_v5 }
0x19f6   :  { %v1644_v61 = vpop.permute.xlu1 %1643  ;;  %v1641_v63 = vadd.f32 %v1640_v37, %v1635_v4 }
0x19f7   :  { %v1646_v33 = vmul.f32 %v6149_v3, %v1644_v61 }
0x19f9   :  { %v1647_v22 = vadd.f32 %v1646_v33, %v1641_v63 }
0x19fb   :  { %v1650_v7 = vpop.permute.xlu1 %1649 }
0x19fc   :  { %v1652_v11 = vmul.f32 %v6155_v29, %v1650_v7 }
0x19fe   :  { %v1653_v25 = vadd.f32 %v1652_v11, %v1647_v22 }
0x1a00   :  { %v1662_v59 = vpop.permute.xlu1 %1661  ;;  %v1659_v30 = vadd.f32 %v1658_v16, %v1653_v25 }
0x1a01   :  { %v1664_v0 = vmul.f32 %v6167_v2, %v1662_v59 }
0x1a03   :  { %v1665_v19 = vadd.f32 %v1664_v0, %v1659_v30 }
0x1a05   :  { %v1668_v17 = vpop.permute.xlu1 %1667 }
0x1a06   :  { %v1670_v20 = vmul.f32 %v6173_v12, %v1668_v17  ;;  %v6466_v17 = vld [vmem:[%s8094_s4] sm:$0x1] }
0x1a08   :  { %v1671_v40 = vadd.f32 %v1670_v20, %v1665_v19 }
0x1a0a   :  { %v1680_v23 = vpop.permute.xlu1 %1679  ;;  %v1677_v9 = vadd.f32 %v1676_v26, %v1671_v40  ;;  %v6472_v26 = vld [vmem:[%s8094_s4 + $0x1] sm:$0x1] }
0x1a0b   :  { %v1682_v15 = vmul.f32 %v6185_v34, %v1680_v23 }
0x1a0d   :  { %v1683_v18 = vadd.f32 %v1682_v15, %v1677_v9 }
0x1a0f   :  { %v1686_v5 = vpop.permute.xlu1 %1685 }
0x1a10   :  { %v1688_v8 = vmul.f32 %v6191_v24, %v1686_v5  ;;  %v6478_v5 = vld [vmem:[%s8094_s4 + $0x2] sm:$0x1] }
0x1a12   :  { %v1689_v4 = vadd.f32 %v1688_v8, %v1683_v18 }
0x1a14   :  { %5273 = vtanh.f32 %v1689_v4  ;;  %v1690_v61 = vmul.f32 0.5, %v1689_v4 }
0x1a16   :  { %5275 = vtanh.f32 %v1690_v61 }
0x1a1e   :  { %v5274_v37 = vpop.eup %5273 }
0x1a1f   :  { %1697 = vrot.lane.b32.xlu0 %v5274_v37, %s5516_s30  ;;  %v6484_v37 = vld [vmem:[%s8094_s4 + $0x3] sm:$0x1] }
0x1a20   :  { %v5276_v63 = vpop.eup %5275 }
0x1a21   :  { %v1692_v33 = vmul.f32 0.5, %v5276_v63 }
0x1a23   :  { %v1693_v7 = vadd.f32 0.5, %v1692_v33 }
0x1a25   :  { %v1695_v13 = vmul.f32 %v1693_v7, %v6368_v28 }
0x1a91   :  { %v1698_v22 = vpop.permute.xlu0 %1697 }
0x1a92   :  { %v1700_v11 = vmul.f32 %v1698_v22, %v1693_v7 }
0x1a94   :  { %1702 = vrot.lane.b32.xlu1 %v1700_v11, %s5517_s11 }
0x1b06   :  { %v1703_v25 = vpop.permute.xlu1 %1702 }
0x1b07   :  { %v6425_v16 = vadd.f32 %v1703_v25, %v1695_v13  ;;  %v6496_v25 = vld [vmem:[%s8094_s4 + $0x5] sm:$0x1] }
0x1b09   :  { %5277 = vtanh.f32 %v6425_v16 }
0x1b13   :  { %v5278_v59 = vpop.eup %5277 }
0x1b14   :  { %1708 = vrot.lane.b32.xlu0 %v5278_v59, %s5517_s11 }
0x1b86   :  { %v1709_v30 = vpop.permute.xlu0 %1708 }
0x1b87   :  { %v6429_v0 = vmul.f32 %v1709_v30, %v1693_v7  ;;  %v6490_v7 = vld [vmem:[%s8094_s4 + $0x4] sm:$0x1] }
0x1b89   :  { %8153 = vst [vmem:[#allocation11_spill] sm:$0xff] %v6429_v0  ;;  %1725 = vperm.xlu0 %4886, %v6429_v0   ;;  %1719 = vperm.xlu1 %4885, %v6429_v0  }
0x1b8d   :  { %4889 = vset.pattern.permute.xlu0 %v8131_v43  ;;  %4887 = vset.pattern.permute.xlu1 %v8129_v44 }
0x1b8e   :  { %1743 = vperm.xlu0 %4889, %v6429_v0   ;;  %1731 = vperm.xlu1 %4887, %v6429_v0  }
0x1b92   :  { %4892 = vset.pattern.permute.xlu0 %v8127_v45  ;;  %4888 = vset.pattern.permute.xlu1 %v8125_v46 }
0x1b93   :  { %1761 = vperm.xlu0 %4892, %v6429_v0   ;;  %1737 = vperm.xlu1 %4888, %v6429_v0  }
0x1b97   :  { %4895 = vset.pattern.permute.xlu0 %v8111_v47  ;;  %4890 = vset.pattern.permute.xlu1 %v8123_v48 }
0x1b98   :  { %1779 = vperm.xlu0 %4895, %v6429_v0   ;;  %1749 = vperm.xlu1 %4890, %v6429_v0  }
0x1b9c   :  { %4898 = vset.pattern.permute.xlu0 %v8107_v49  ;;  %4891 = vset.pattern.permute.xlu1 %v8121_v50 }
0x1b9d   :  { %1797 = vperm.xlu0 %4898, %v6429_v0   ;;  %1755 = vperm.xlu1 %4891, %v6429_v0  }
0x1ba1   :  { %4893 = vset.pattern.permute.xlu1 %v8119_v51  ;;  %4902 = vset.pattern.permute.xlu0 %v8101_v39 }
0x1ba2   :  { %1767 = vperm.xlu1 %4893, %v6429_v0  }
0x1ba6   :  { %4894 = vset.pattern.permute.xlu1 %v8117_v52 }
0x1ba7   :  { %1773 = vperm.xlu1 %4894, %v6429_v0  }
0x1bab   :  { %4896 = vset.pattern.permute.xlu1 %v8109_v53 }
0x1bac   :  { %1785 = vperm.xlu1 %4896, %v6429_v0  }
0x1bb0   :  { %4897 = vset.pattern.permute.xlu1 %v8115_v54 }
0x1bb1   :  { %1791 = vperm.xlu1 %4897, %v6429_v0  }
0x1bb5   :  { %4899 = vset.pattern.permute.xlu1 %v8105_v55 }
0x1bb6   :  { %1803 = vperm.xlu1 %4899, %v6429_v0  }
0x1bba   :  { %4900 = vset.pattern.permute.xlu1 %v8113_v56 }
0x1bbb   :  { %1809 = vperm.xlu1 %4900, %v6429_v0  }
0x1bbf   :  { %4901 = vset.pattern.permute.xlu1 %v8103_v38 }
0x1c08   :  { %v1720_v28 = vpop.permute.xlu1 %1719  ;;  %v1726_v20 = vpop.permute.xlu0 %1725 }
0x1c09   :  { %v1722_v19 = vmul.f32 %v6466_v17, %v1720_v28  ;;  %v1728_v23 = vmul.f32 %v6472_v26, %v1726_v20 }
0x1c0b   :  { %v1723_v40 = vadd.f32 %v1722_v19, %v1717_v21  ;;  %v6502_v19 = vld [vmem:[%s8094_s4 + $0x6] sm:$0x1] }
0x1c0d   :  { %v1732_v9 = vpop.permute.xlu1 %1731  ;;  %v1729_v15 = vadd.f32 %v1728_v23, %v1723_v40  ;;  %v1744_v63 = vpop.permute.xlu0 %1743 }
0x1c0e   :  { %v1734_v18 = vmul.f32 %v6478_v5, %v1732_v9  ;;  %v1746_v22 = vmul.f32 %v6490_v7, %v1744_v63 }
0x1c10   :  { %v1735_v4 = vadd.f32 %v1734_v18, %v1729_v15 }
0x1c12   :  { %v1738_v8 = vpop.permute.xlu1 %1737  ;;  %v1762_v21 = vpop.permute.xlu0 %1761 }
0x1c13   :  { %v1740_v61 = vmul.f32 %v6484_v37, %v1738_v8  ;;  %v1764_v23 = vmul.f32 %v6143_v62, %v1762_v21 }
0x1c15   :  { %v1741_v33 = vadd.f32 %v1740_v61, %v1735_v4 }
0x1c17   :  { %v1750_v11 = vpop.permute.xlu1 %1749  ;;  %v1747_v13 = vadd.f32 %v1746_v22, %v1741_v33  ;;  %v1780_v63 = vpop.permute.xlu0 %1779 }
0x1c18   :  { %v1752_v59 = vmul.f32 %v6496_v25, %v1750_v11  ;;  %v1782_v22 = vmul.f32 %v6161_v36, %v1780_v63 }
0x1c1a   :  { %v1753_v28 = vadd.f32 %v1752_v59, %v1747_v13 }
0x1c1c   :  { %v1756_v30 = vpop.permute.xlu1 %1755 }
0x1c1d   :  { %v1758_v20 = vmul.f32 %v6502_v19, %v1756_v30 }
0x1c1f   :  { %v1759_v40 = vadd.f32 %v1758_v20, %v1753_v28  ;;  %v1798_v20 = vpop.permute.xlu0 %1797 }
0x1c21   :  { %v1768_v9 = vpop.permute.xlu1 %1767  ;;  %v1765_v15 = vadd.f32 %v1764_v23, %v1759_v40 }
0x1c22   :  { %v1770_v18 = vmul.f32 %v6149_v3, %v1768_v9  ;;  %v1800_v3 = vmul.f32 %v6179_v60, %v1798_v20 }
0x1c24   :  { %v1771_v4 = vadd.f32 %v1770_v18, %v1765_v15 }
0x1c26   :  { %v1774_v8 = vpop.permute.xlu1 %1773 }
0x1c27   :  { %v1776_v61 = vmul.f32 %v6155_v29, %v1774_v8 }
0x1c29   :  { %v1777_v33 = vadd.f32 %v1776_v61, %v1771_v4 }
0x1c2b   :  { %v1786_v11 = vpop.permute.xlu1 %1785  ;;  %v1783_v13 = vadd.f32 %v1782_v22, %v1777_v33 }
0x1c2c   :  { %v1788_v59 = vmul.f32 %v6167_v2, %v1786_v11 }
0x1c2e   :  { %v1789_v28 = vadd.f32 %v1788_v59, %v1783_v13 }
0x1c30   :  { %v1792_v30 = vpop.permute.xlu1 %1791 }
0x1c31   :  { %v1794_v62 = vmul.f32 %v6173_v12, %v1792_v30 }
0x1c33   :  { %v1795_v21 = vadd.f32 %v1794_v62, %v1789_v28  ;;  %v1841_v28 = vld [vmem:[#allocation2 + $0xd] sm:$0x1] }
0x1c35   :  { %v1804_v40 = vpop.permute.xlu1 %1803  ;;  %v1801_v23 = vadd.f32 %v1800_v3, %v1795_v21 }
0x1c36   :  { %v1806_v29 = vmul.f32 %v6185_v34, %v1804_v40 }
0x1c38   :  { %v1807_v15 = vadd.f32 %v1806_v29, %v1801_v23 }
0x1c3a   :  { %v1810_v9 = vpop.permute.xlu1 %1809 }
0x1c3b   :  { %v1812_v36 = vmul.f32 %v6191_v24, %v1810_v9 }
0x1c3d   :  { %v1813_v18 = vadd.f32 %v1812_v36, %v1807_v15 }
0x1c3f   :  { %5279 = vtanh.f32 %v1813_v18  ;;  %v1814_v2 = vmul.f32 0.5, %v1813_v18 }
0x1c41   :  { %5281 = vtanh.f32 %v1814_v2 }
0x1c49   :  { %v5280_v8 = vpop.eup %5279 }
0x1c4a   :  { %1821 = vrot.lane.b32.xlu0 %v5280_v8, %s5516_s30 }
0x1c4b   :  { %v5282_v12 = vpop.eup %5281 }
0x1c4c   :  { %v1816_v4 = vmul.f32 0.5, %v5282_v12 }
0x1c4e   :  { %v1817_v61 = vadd.f32 0.5, %v1816_v4 }
0x1c50   :  { %v1819_v34 = vmul.f32 %v1817_v61, %v6425_v16 }
0x1cbc   :  { %v1822_v63 = vpop.permute.xlu0 %1821 }
0x1cbd   :  { %v1824_v60 = vmul.f32 %v1822_v63, %v1817_v61 }
0x1cbf   :  { %1826 = vrot.lane.b32.xlu1 %v1824_v60, %s5517_s11 }
0x1d31   :  { %v1827_v33 = vpop.permute.xlu1 %1826 }
0x1d32   :  { %v6517_v22 = vadd.f32 %v1827_v33, %v1819_v34  ;;  %v6565_v33 = vld [vmem:[%s8094_s4 + $0x7] sm:$0x1] }
0x1d34   :  { %5283 = vtanh.f32 %v6517_v22 }
0x1d3e   :  { %v5284_v24 = vpop.eup %5283 }
0x1d3f   :  { %1832 = vrot.lane.b32.xlu0 %v5284_v24, %s5517_s11 }
0x1db1   :  { %v1833_v11 = vpop.permute.xlu0 %1832 }
0x1db2   :  { %v6521_v13 = vmul.f32 %v1833_v11, %v1817_v61 }
0x1db4   :  { %1849 = vperm.xlu0 %4902, %v6521_v13   ;;  %1843 = vperm.xlu1 %4901, %v6521_v13  }
0x1db8   :  { %4905 = vset.pattern.permute.xlu0 %v8131_v43  ;;  %4903 = vset.pattern.permute.xlu1 %v8129_v44 }
0x1db9   :  { %1867 = vperm.xlu0 %4905, %v6521_v13   ;;  %1855 = vperm.xlu1 %4903, %v6521_v13  }
0x1dbd   :  { %4908 = vset.pattern.permute.xlu0 %v8127_v45  ;;  %4904 = vset.pattern.permute.xlu1 %v8125_v46 }
0x1dbe   :  { %1885 = vperm.xlu0 %4908, %v6521_v13   ;;  %1861 = vperm.xlu1 %4904, %v6521_v13  }
0x1dc2   :  { %4911 = vset.pattern.permute.xlu0 %v8111_v47  ;;  %4906 = vset.pattern.permute.xlu1 %v8123_v48 }
0x1dc3   :  { %1903 = vperm.xlu0 %4911, %v6521_v13   ;;  %1873 = vperm.xlu1 %4906, %v6521_v13  }
0x1dc7   :  { %4914 = vset.pattern.permute.xlu0 %v8107_v49  ;;  %4907 = vset.pattern.permute.xlu1 %v8121_v50 }
0x1dc8   :  { %1921 = vperm.xlu0 %4914, %v6521_v13   ;;  %1879 = vperm.xlu1 %4907, %v6521_v13  }
0x1dcc   :  { %4909 = vset.pattern.permute.xlu1 %v8119_v51  ;;  %4918 = vset.pattern.permute.xlu0 %v8101_v39 }
0x1dcd   :  { %1891 = vperm.xlu1 %4909, %v6521_v13  }
0x1dd1   :  { %4910 = vset.pattern.permute.xlu1 %v8117_v52 }
0x1dd2   :  { %1897 = vperm.xlu1 %4910, %v6521_v13  }
0x1dd6   :  { %4912 = vset.pattern.permute.xlu1 %v8109_v53 }
0x1dd7   :  { %1909 = vperm.xlu1 %4912, %v6521_v13  }
0x1ddb   :  { %4913 = vset.pattern.permute.xlu1 %v8115_v54 }
0x1ddc   :  { %1915 = vperm.xlu1 %4913, %v6521_v13  }
0x1de0   :  { %4915 = vset.pattern.permute.xlu1 %v8105_v55 }
0x1de1   :  { %1927 = vperm.xlu1 %4915, %v6521_v13  }
0x1de5   :  { %4916 = vset.pattern.permute.xlu1 %v8113_v56 }
0x1de6   :  { %1933 = vperm.xlu1 %4916, %v6521_v13  }
0x1dea   :  { %4917 = vset.pattern.permute.xlu1 %v8103_v38 }
0x1e33   :  { %v1844_v16 = vpop.permute.xlu1 %1843  ;;  %v1850_v30 = vpop.permute.xlu0 %1849 }
0x1e34   :  { %v1846_v59 = vmul.f32 %v6466_v17, %v1844_v16  ;;  %v1852_v20 = vmul.f32 %v6472_v26, %v1850_v30 }
0x1e36   :  { %v1847_v62 = vadd.f32 %v1846_v59, %v1841_v28  ;;  %v6571_v59 = vld [vmem:[%s8094_s4 + $0x8] sm:$0x1] }
0x1e38   :  { %v1856_v21 = vpop.permute.xlu1 %1855  ;;  %v1853_v3 = vadd.f32 %v1852_v20, %v1847_v62  ;;  %v1868_v15 = vpop.permute.xlu0 %1867  ;;  %v6577_v20 = vld [vmem:[%s8094_s4 + $0x9] sm:$0x1] }
0x1e39   :  { %v1858_v40 = vmul.f32 %v6478_v5, %v1856_v21  ;;  %v1870_v18 = vmul.f32 %v6490_v7, %v1868_v15 }
0x1e3b   :  { %v1859_v29 = vadd.f32 %v1858_v40, %v1853_v3 }
0x1e3d   :  { %v1862_v23 = vpop.permute.xlu1 %1861  ;;  %v1886_v60 = vpop.permute.xlu0 %1885 }
0x1e3e   :  { %v1864_v9 = vmul.f32 %v6484_v37, %v1862_v23  ;;  %v1888_v24 = vmul.f32 %v6565_v33, %v1886_v60  ;;  %v6583_v23 = vld [vmem:[%s8094_s4 + $0xa] sm:$0x1]  ;;  %v6601_v60 = vld [vmem:[%s8094_s4 + $0xd] sm:$0x1] }
0x1e40   :  { %v1865_v36 = vadd.f32 %v1864_v9, %v1859_v29 }
0x1e42   :  { %v1874_v8 = vpop.permute.xlu1 %1873  ;;  %v1871_v2 = vadd.f32 %v1870_v18, %v1865_v36  ;;  %v1904_v3 = vpop.permute.xlu0 %1903  ;;  %v6589_v36 = vld [vmem:[%s8094_s4 + $0xb] sm:$0x1] }
0x1e43   :  { %v1876_v12 = vmul.f32 %v6496_v25, %v1874_v8  ;;  %v1906_v29 = vmul.f32 %v6583_v23, %v1904_v3 }
0x1e45   :  { %v1877_v61 = vadd.f32 %v1876_v12, %v1871_v2  ;;  %v6595_v12 = vld [vmem:[%s8094_s4 + $0xc] sm:$0x1] }
0x1e47   :  { %v1880_v4 = vpop.permute.xlu1 %1879 }
0x1e48   :  { %v1882_v63 = vmul.f32 %v6502_v19, %v1880_v4 }
0x1e4a   :  { %v1883_v34 = vadd.f32 %v1882_v63, %v1877_v61  ;;  %v1922_v61 = vpop.permute.xlu0 %1921 }
0x1e4c   :  { %v1892_v11 = vpop.permute.xlu1 %1891  ;;  %v1889_v16 = vadd.f32 %v1888_v24, %v1883_v34  ;;  %v1924_v34 = vmul.f32 %v6601_v60, %v1922_v61 }
0x1e4d   :  { %v1894_v30 = vmul.f32 %v6571_v59, %v1892_v11 }
0x1e4f   :  { %v1895_v62 = vadd.f32 %v1894_v30, %v1889_v16  ;;  %v6607_v16 = vld [vmem:[%s8094_s4 + $0xe] sm:$0x1] }
0x1e51   :  { %v1898_v28 = vpop.permute.xlu1 %1897 }
0x1e52   :  { %v1900_v21 = vmul.f32 %v6577_v20, %v1898_v28 }
0x1e54   :  { %v1901_v40 = vadd.f32 %v1900_v21, %v1895_v62  ;;  %v6613_v21 = vld [vmem:[%s8094_s4 + $0xf] sm:$0x1] }
0x1e56   :  { %v1910_v9 = vpop.permute.xlu1 %1909  ;;  %v1907_v15 = vadd.f32 %v1906_v29, %v1901_v40 }
0x1e57   :  { %v1912_v18 = vmul.f32 %v6589_v36, %v1910_v9 }
0x1e59   :  { %v1913_v2 = vadd.f32 %v1912_v18, %v1907_v15 }
0x1e5b   :  { %v1916_v8 = vpop.permute.xlu1 %1915 }
0x1e5c   :  { %v1918_v4 = vmul.f32 %v6595_v12, %v1916_v8 }
0x1e5e   :  { %v1919_v63 = vadd.f32 %v1918_v4, %v1913_v2 }
0x1e60   :  { %v1928_v24 = vpop.permute.xlu1 %1927  ;;  %v1925_v11 = vadd.f32 %v1924_v34, %v1919_v63 }
0x1e61   :  { %v1930_v30 = vmul.f32 %v6607_v16, %v1928_v24 }
0x1e63   :  { %v1931_v62 = vadd.f32 %v1930_v30, %v1925_v11 }
0x1e65   :  { %v1934_v28 = vpop.permute.xlu1 %1933 }
0x1e66   :  { %v1936_v3 = vmul.f32 %v6613_v21, %v1934_v28 }
0x1e68   :  { %v1937_v40 = vadd.f32 %v1936_v3, %v1931_v62  ;;  %v1965_v3 = vld [vmem:[#allocation2 + $0xe] sm:$0x1] }
0x1e6a   :  { %5285 = vtanh.f32 %v1937_v40  ;;  %v1938_v9 = vmul.f32 0.5, %v1937_v40 }
0x1e6c   :  { %5287 = vtanh.f32 %v1938_v9 }
0x1e74   :  { %v5286_v29 = vpop.eup %5285 }
0x1e75   :  { %1945 = vrot.lane.b32.xlu0 %v5286_v29, %s5516_s30 }
0x1e76   :  { %v5288_v15 = vpop.eup %5287 }
0x1e77   :  { %v1940_v18 = vmul.f32 0.5, %v5288_v15 }
0x1e79   :  { %v1941_v8 = vadd.f32 0.5, %v1940_v18 }
0x1e7b   :  { %v1943_v61 = vmul.f32 %v1941_v8, %v6517_v22 }
0x1ee7   :  { %v1946_v2 = vpop.permute.xlu0 %1945 }
0x1ee8   :  { %v1948_v4 = vmul.f32 %v1946_v2, %v1941_v8 }
0x1eea   :  { %1950 = vrot.lane.b32.xlu1 %v1948_v4, %s5517_s11 }
0x1f5c   :  { %v1951_v63 = vpop.permute.xlu1 %1950 }
0x1f5d   :  { %v6619_v34 = vadd.f32 %v1951_v63, %v1943_v61 }
0x1f5f   :  { %5289 = vtanh.f32 %v6619_v34 }
0x1f69   :  { %v5290_v24 = vpop.eup %5289 }
0x1f6a   :  { %1956 = vrot.lane.b32.xlu0 %v5290_v24, %s5517_s11 }
0x1fdc   :  { %v1957_v11 = vpop.permute.xlu0 %1956 }
0x1fdd   :  { %v6623_v30 = vmul.f32 %v1957_v11, %v1941_v8 }
0x1fdf   :  { %8154 = vst [vmem:[#allocation12_spill] sm:$0xff] %v6623_v30  ;;  %1973 = vperm.xlu0 %4918, %v6623_v30   ;;  %1967 = vperm.xlu1 %4917, %v6623_v30  }
0x1fe3   :  { %4921 = vset.pattern.permute.xlu0 %v8131_v43  ;;  %4919 = vset.pattern.permute.xlu1 %v8129_v44 }
0x1fe4   :  { %1991 = vperm.xlu0 %4921, %v6623_v30   ;;  %1979 = vperm.xlu1 %4919, %v6623_v30  }
0x1fe8   :  { %4924 = vset.pattern.permute.xlu0 %v8127_v45  ;;  %4920 = vset.pattern.permute.xlu1 %v8125_v46 }
0x1fe9   :  { %2009 = vperm.xlu0 %4924, %v6623_v30   ;;  %1985 = vperm.xlu1 %4920, %v6623_v30  }
0x1fed   :  { %4927 = vset.pattern.permute.xlu0 %v8111_v47  ;;  %4922 = vset.pattern.permute.xlu1 %v8123_v48 }
0x1fee   :  { %2027 = vperm.xlu0 %4927, %v6623_v30   ;;  %1997 = vperm.xlu1 %4922, %v6623_v30  }
0x1ff2   :  { %4930 = vset.pattern.permute.xlu0 %v8107_v49  ;;  %4923 = vset.pattern.permute.xlu1 %v8121_v50 }
0x1ff3   :  { %2045 = vperm.xlu0 %4930, %v6623_v30   ;;  %2003 = vperm.xlu1 %4923, %v6623_v30  }
0x1ff7   :  { %4925 = vset.pattern.permute.xlu1 %v8119_v51  ;;  %4935 = vset.pattern.permute.xlu0 %v8101_v39 }
0x1ff8   :  { %2015 = vperm.xlu1 %4925, %v6623_v30  }
0x1ffc   :  { %4926 = vset.pattern.permute.xlu1 %v8117_v52 }
0x1ffd   :  { %2021 = vperm.xlu1 %4926, %v6623_v30  }
0x2001   :  { %4928 = vset.pattern.permute.xlu1 %v8109_v53 }
0x2002   :  { %2033 = vperm.xlu1 %4928, %v6623_v30  }
0x2006   :  { %4929 = vset.pattern.permute.xlu1 %v8115_v54 }
0x2007   :  { %2039 = vperm.xlu1 %4929, %v6623_v30  }
0x200b   :  { %4931 = vset.pattern.permute.xlu1 %v8105_v55 }
0x200c   :  { %2051 = vperm.xlu1 %4931, %v6623_v30  }
0x2010   :  { %4932 = vset.pattern.permute.xlu1 %v8113_v56 }
0x2011   :  { %2057 = vperm.xlu1 %4932, %v6623_v30  }
0x2015   :  { %4933 = vset.pattern.permute.xlu1 %v5514_v6 }
0x205e   :  { %v1968_v22 = vpop.permute.xlu1 %1967  ;;  %v1974_v62 = vpop.permute.xlu0 %1973 }
0x205f   :  { %v1970_v28 = vmul.f32 %v6466_v17, %v1968_v22  ;;  %v1976_v29 = vmul.f32 %v6472_v26, %v1974_v62 }
0x2061   :  { %v1971_v40 = vadd.f32 %v1970_v28, %v1965_v3 }
0x2063   :  { %v1980_v9 = vpop.permute.xlu1 %1979  ;;  %v1977_v15 = vadd.f32 %v1976_v29, %v1971_v40  ;;  %v1992_v61 = vpop.permute.xlu0 %1991 }
0x2064   :  { %v1982_v18 = vmul.f32 %v6478_v5, %v1980_v9  ;;  %v1994_v6 = vmul.f32 %v6490_v7, %v1992_v61 }
0x2066   :  { %v1983_v2 = vadd.f32 %v1982_v18, %v1977_v15 }
0x2068   :  { %v1986_v8 = vpop.permute.xlu1 %1985  ;;  %v2010_v3 = vpop.permute.xlu0 %2009 }
0x2069   :  { %v1988_v4 = vmul.f32 %v6484_v37, %v1986_v8  ;;  %v2012_v29 = vmul.f32 %v6565_v33, %v2010_v3 }
0x206b   :  { %v1989_v63 = vadd.f32 %v1988_v4, %v1983_v2 }
0x206d   :  { %v1998_v24 = vpop.permute.xlu1 %1997  ;;  %v1995_v11 = vadd.f32 %v1994_v6, %v1989_v63  ;;  %v2028_v61 = vpop.permute.xlu0 %2027 }
0x206e   :  { %v2000_v22 = vmul.f32 %v6496_v25, %v1998_v24  ;;  %v2030_v6 = vmul.f32 %v6583_v23, %v2028_v61 }
0x2070   :  { %v2001_v28 = vadd.f32 %v2000_v22, %v1995_v11 }
0x2072   :  { %v2004_v39 = vpop.permute.xlu1 %2003  ;;  %v2046_v3 = vpop.permute.xlu0 %2045 }
0x2073   :  { %v2006_v62 = vmul.f32 %v6502_v19, %v2004_v39 }
0x2075   :  { %v2007_v40 = vadd.f32 %v2006_v62, %v2001_v28 }
0x2077   :  { %v2016_v9 = vpop.permute.xlu1 %2015  ;;  %v2013_v15 = vadd.f32 %v2012_v29, %v2007_v40  ;;  %v2048_v29 = vmul.f32 %v6601_v60, %v2046_v3 }
0x2078   :  { %v2018_v18 = vmul.f32 %v6571_v59, %v2016_v9 }
0x207a   :  { %v2019_v2 = vadd.f32 %v2018_v18, %v2013_v15 }
0x207c   :  { %v2022_v8 = vpop.permute.xlu1 %2021 }
0x207d   :  { %v2024_v4 = vmul.f32 %v6577_v20, %v2022_v8 }
0x207f   :  { %v2025_v63 = vadd.f32 %v2024_v4, %v2019_v2 }
0x2081   :  { %v2034_v24 = vpop.permute.xlu1 %2033  ;;  %v2031_v11 = vadd.f32 %v2030_v6, %v2025_v63  ;;  %v38_v63 = vld [vmem:[%s8091_s1 + $0x10] sm:$0xff]  ;;  %v39_v6 = vld [vmem:[%s8091_s1 + $0x18] sm:$0xff] }
0x2082   :  { %v2036_v39 = vmul.f32 %v6589_v36, %v2034_v24  ;;  %4634 = vmatprep.mubr.msk.f32.mxu0 %vm67_vm0, %v38_v63 }
0x2083   :  { %4635 = vmatmul.mubr.msk.f32.gmra.mrb[2].mxu0 %vm67_vm0, %v39_v6 }
0x2084   :  { %v2037_v28 = vadd.f32 %v2036_v39, %v2031_v11 }
0x2086   :  { %v2040_v22 = vpop.permute.xlu1 %2039 }
0x2087   :  { %v2042_v62 = vmul.f32 %v6595_v12, %v2040_v22 }
0x2089   :  { %v2043_v40 = vadd.f32 %v2042_v62, %v2037_v28 }
0x208b   :  { %v2052_v9 = vpop.permute.xlu1 %2051  ;;  %v2049_v15 = vadd.f32 %v2048_v29, %v2043_v40  ;;  %v45_v40 = vld [vmem:[%s8092_s2 + $0x10] sm:$0xff]  ;;  %v46_v29 = vld [vmem:[%s8092_s2 + $0x18] sm:$0xff] }
0x208c   :  { %v2054_v18 = vmul.f32 %v6607_v16, %v2052_v9 }
0x208e   :  { %v2055_v2 = vadd.f32 %v2054_v18, %v2049_v15 }
0x2090   :  { %v2058_v8 = vpop.permute.xlu1 %2057 }
0x2091   :  { %v2060_v4 = vmul.f32 %v6613_v21, %v2058_v8 }
0x2093   :  { %v2061_v61 = vadd.f32 %v2060_v4, %v2055_v2 }
0x2095   :  { %5291 = vtanh.f32 %v2061_v61  ;;  %v2062_v11 = vmul.f32 0.5, %v2061_v61 }
0x2097   :  { %5293 = vtanh.f32 %v2062_v11 }
0x209f   :  { %v5292_v24 = vpop.eup %5291 }
0x20a0   :  { %2069 = vrot.lane.b32.xlu0 %v5292_v24, %s5516_s30 }
0x20a1   :  { %v5294_v39 = vpop.eup %5293 }
0x20a2   :  { %v2064_v22 = vmul.f32 0.5, %v5294_v39 }
0x20a4   :  { %v2065_v28 = vadd.f32 0.5, %v2064_v22 }
0x20a6   :  { %v2067_v9 = vmul.f32 %v2065_v28, %v6619_v34 }
0x2112   :  { %v2070_v62 = vpop.permute.xlu0 %2069 }
0x2113   :  { %v2072_v3 = vmul.f32 %v2070_v62, %v2065_v28 }
0x2115   :  { %2074 = vrot.lane.b32.xlu1 %v2072_v3, %s5517_s11 }
0x2119   :  { %59 = vperm.xlu1 %4933, %v45_v40  }
0x211d   :  { %64 = vperm.xlu1 %4933, %v46_v29   ;;  %v2089_v29 = vld [vmem:[#allocation2 + $0xf] sm:$0x1] }
0x2121   :  { %4934 = vset.pattern.permute.xlu1 %v8103_v38 }
0x2156   :  { %v4636_v2 = vpop.f32.mrb[2].mxu0 }
0x2157   :  { %v160_v4 = vpop.f32.mrb[3].mxu0 }
0x2187   :  { %v2075_v15 = vpop.permute.xlu1 %2074 }
0x2188   :  { %v6691_v18 = vadd.f32 %v2075_v15, %v2067_v9 }
0x218a   :  { %5295 = vtanh.f32 %v6691_v18 }
0x2194   :  { %v5296_v8 = vpop.eup %5295 }
0x2195   :  { %2080 = vrot.lane.b32.xlu0 %v5296_v8, %s5517_s11 }
0x2198   :  { %v60_v34 = vpop.permute.xlu1 %59 }
0x2199   :  { %v161_v39 = vadd.f32 %v160_v4, %v60_v34 }
0x219b   :  { %v171_v22 = vmax.f32 %v161_v39, 0.0 }
0x219c   :  { %v65_v6 = vpop.permute.xlu1 %64 }
0x219d   :  { %v6715_v24 = vadd.f32 %v4636_v2, %v65_v6 }
0x219f   :  { %v172_v11 = vmax.f32 %v6715_v24, 0.0  ;;  %v5441_v24 = vld [vmem:[%s8095_s5] ss:$0 sm:$0xff] }
0x2207   :  { %v2081_v61 = vpop.permute.xlu0 %2080 }
0x2208   :  { %v6695_v63 = vmul.f32 %v2081_v61, %v2065_v28  ;;  %v8155_v28 = vmov 33  }
0x220a   :  { %2097 = vperm.xlu0 %4935, %v6695_v63   ;;  %2091 = vperm.xlu1 %4934, %v6695_v63  }
0x220e   :  { %4938 = vset.pattern.permute.xlu0 %v8131_v43  ;;  %4936 = vset.pattern.permute.xlu1 %v8129_v44 }
0x220f   :  { %2115 = vperm.xlu0 %4938, %v6695_v63   ;;  %2103 = vperm.xlu1 %4936, %v6695_v63  }
0x2213   :  { %4941 = vset.pattern.permute.xlu0 %v8127_v45  ;;  %4937 = vset.pattern.permute.xlu1 %v8125_v46 }
0x2214   :  { %2133 = vperm.xlu0 %4941, %v6695_v63   ;;  %2109 = vperm.xlu1 %4937, %v6695_v63  }
0x2218   :  { %4942 = vset.pattern.permute.xlu0 %v8119_v51  ;;  %4939 = vset.pattern.permute.xlu1 %v8123_v48 }
0x2219   :  { %2139 = vperm.xlu0 %4942, %v6695_v63   ;;  %2121 = vperm.xlu1 %4939, %v6695_v63  }
0x221d   :  { %4945 = vset.pattern.permute.xlu0 %v8109_v53  ;;  %4940 = vset.pattern.permute.xlu1 %v8121_v50 }
0x221e   :  { %2157 = vperm.xlu0 %4945, %v6695_v63   ;;  %2127 = vperm.xlu1 %4940, %v6695_v63  }
0x2222   :  { %4948 = vset.pattern.permute.xlu0 %v8105_v55  ;;  %4943 = vset.pattern.permute.xlu1 %v8117_v52 }
0x2223   :  { %2175 = vperm.xlu0 %4948, %v6695_v63   ;;  %2145 = vperm.xlu1 %4943, %v6695_v63  }
0x2227   :  { %4944 = vset.pattern.permute.xlu1 %v8111_v47  ;;  %183 = vrot.lane.b32.xlu0 %v172_v11, %s5515_s28 }
0x2228   :  { %2151 = vperm.xlu1 %4944, %v6695_v63   ;;  %4950 = vset.pattern.permute.xlu0 %v8103_v38 }
0x222c   :  { %4946 = vset.pattern.permute.xlu1 %v8115_v54 }
0x222d   :  { %2163 = vperm.xlu1 %4946, %v6695_v63  }
0x2231   :  { %4947 = vset.pattern.permute.xlu1 %v8107_v49 }
0x2232   :  { %2169 = vperm.xlu1 %4947, %v6695_v63  }
0x2236   :  { %4949 = vset.pattern.permute.xlu1 %v8113_v56 }
0x2237   :  { %2181 = vperm.xlu1 %4949, %v6695_v63  }
0x223b   :  { %181 = vrot.lane.b32.xlu1 %v171_v22, %s5515_s28 }
0x223c   :  { %4951 = vset.pattern.permute.xlu1 %v8155_v28 }
0x2289   :  { %v2092_v62 = vpop.permute.xlu1 %2091  ;;  %v2098_v40 = vpop.permute.xlu0 %2097 }
0x228a   :  { %v2094_v3 = vmul.f32 %v6466_v17, %v2092_v62  ;;  %v2100_v15 = vmul.f32 %v6472_v26, %v2098_v40 }
0x228c   :  { %v2095_v9 = vadd.f32 %v2094_v3, %v2089_v29 }
0x228e   :  { %v2104_v8 = vpop.permute.xlu1 %2103  ;;  %v2101_v2 = vadd.f32 %v2100_v15, %v2095_v9  ;;  %v2116_v61 = vpop.permute.xlu0 %2115 }
0x228f   :  { %v2106_v4 = vmul.f32 %v6478_v5, %v2104_v8  ;;  %v2118_v55 = vmul.f32 %v6490_v7, %v2116_v61 }
0x2291   :  { %v2107_v6 = vadd.f32 %v2106_v4, %v2101_v2 }
0x2293   :  { %v2110_v34 = vpop.permute.xlu1 %2109  ;;  %v2134_v53 = vpop.permute.xlu0 %2133 }
0x2294   :  { %v2112_v39 = vmul.f32 %v6484_v37, %v2110_v34  ;;  %v2136_v15 = vmul.f32 %v6565_v33, %v2134_v53 }
0x2296   :  { %v2113_v38 = vadd.f32 %v2112_v39, %v2107_v6 }
0x2298   :  { %v2122_v49 = vpop.permute.xlu1 %2121  ;;  %v2119_v62 = vadd.f32 %v2118_v55, %v2113_v38  ;;  %v2140_v9 = vpop.permute.xlu0 %2139 }
0x2299   :  { %v2124_v47 = vmul.f32 %v6496_v25, %v2122_v49  ;;  %v2142_v2 = vmul.f32 %v6571_v59, %v2140_v9 }
0x229b   :  { %v2125_v29 = vadd.f32 %v2124_v47, %v2119_v62 }
0x229d   :  { %v2128_v3 = vpop.permute.xlu1 %2127  ;;  %v2158_v49 = vpop.permute.xlu0 %2157 }
0x229e   :  { %v2130_v40 = vmul.f32 %v6502_v19, %v2128_v3  ;;  %v2160_v47 = vmul.f32 %v6589_v36, %v2158_v49 }
0x22a0   :  { %v2131_v8 = vadd.f32 %v2130_v40, %v2125_v29 }
0x22a2   :  { %v2137_v4 = vadd.f32 %v2136_v15, %v2131_v8  ;;  %v2146_v34 = vpop.permute.xlu1 %2145  ;;  %v2176_v29 = vpop.permute.xlu0 %2175 }
0x22a3   :  { %v2148_v61 = vmul.f32 %v6577_v20, %v2146_v34  ;;  %v2178_v8 = vmul.f32 %v6607_v16, %v2176_v29 }
0x22a4   :  { %v2143_v6 = vadd.f32 %v2142_v2, %v2137_v4 }
0x22a6   :  { %v2149_v56 = vadd.f32 %v2148_v61, %v2143_v6  ;;  %v184_v61 = vpop.permute.xlu0 %183 }
0x22a7   :  { %v2152_v39 = vpop.permute.xlu1 %2151  ;;  %v192_v49 = vmax.f32 %v172_v11, %v184_v61 }
0x22a8   :  { %v2154_v38 = vmul.f32 %v6583_v23, %v2152_v39 }
0x22aa   :  { %v2155_v55 = vadd.f32 %v2154_v38, %v2149_v56 }
0x22ac   :  { %v2164_v62 = vpop.permute.xlu1 %2163  ;;  %v2161_v3 = vadd.f32 %v2160_v47, %v2155_v55 }
0x22ad   :  { %v2166_v53 = vmul.f32 %v6595_v12, %v2164_v62 }
0x22af   :  { %v2167_v9 = vadd.f32 %v2166_v53, %v2161_v3 }
0x22b1   :  { %v2170_v40 = vpop.permute.xlu1 %2169 }
0x22b2   :  { %v2172_v15 = vmul.f32 %v6601_v60, %v2170_v40 }
0x22b4   :  { %v2173_v2 = vadd.f32 %v2172_v15, %v2167_v9 }
0x22b6   :  { %v2179_v4 = vadd.f32 %v2178_v8, %v2173_v2  ;;  %v2182_v34 = vpop.permute.xlu1 %2181 }
0x22b7   :  { %v2184_v6 = vmul.f32 %v6613_v21, %v2182_v34 }
0x22b9   :  { %v2185_v56 = vadd.f32 %v2184_v6, %v2179_v4 }
0x22ba   :  { %v182_v39 = vpop.permute.xlu1 %181 }
0x22bb   :  { %5297 = vtanh.f32 %v2185_v56  ;;  %v191_v38 = vmax.f32 %v171_v22, %v182_v39  ;;  %v2186_v47 = vmul.f32 0.5, %v2185_v56  ;;  %v8158_v56 = vmov 42  }
0x22bc   :  { %v8159_v39 = vmov 43  }
0x22bd   :  { %4642 = vmatprep.mubr.msk.f32.mxu1 %vm201_vm3, %v191_v38  ;;  %5299 = vtanh.f32 %v2186_v47  ;;  %v8160_v38 = vmov 45  }
0x22be   :  { %4643 = vmatmul.mubr.msk.f32.gmra.mrb[2].mxu1 %vm201_vm3, %v192_v49  ;;  %v8161_v49 = vmov 46  }
0x22c5   :  { %v5298_v55 = vpop.eup %5297 }
0x22c6   :  { %2193 = vrot.lane.b32.xlu1 %v5298_v55, %s5516_s30  ;;  %v8162_v55 = vmov 32  }
0x22c7   :  { %v5300_v62 = vpop.eup %5299 }
0x22c8   :  { %v2188_v3 = vmul.f32 0.5, %v5300_v62 }
0x22ca   :  { %v2189_v53 = vadd.f32 0.5, %v2188_v3 }
0x22cc   :  { %v2191_v8 = vmul.f32 %v2189_v53, %v6691_v18  ;;  %v8157_v18 = vmov 47  }
0x2338   :  { %v2194_v29 = vpop.permute.xlu1 %2193 }
0x2339   :  { %v2196_v40 = vmul.f32 %v2194_v29, %v2189_v53 }
0x233b   :  { %2198 = vrot.lane.b32.xlu0 %v2196_v40, %s5517_s11 }
0x2391   :  { %v4644_v22 = vpop.f32.mrb[2].mxu1 }
0x2392   :  { %v300_v11 = vadd.f32 %v5441_v24, %v4644_v22  ;;  %v294_v9 = vpop.f32.mrb[3].mxu1 }
0x2393   :  { %v295_v15 = vadd.f32 %v5441_v24, %v294_v9 }
0x2394   :  { %307 = vst.msk [vmem:[#allocation2 + $0x18] sm:$0xff] %vm303_vm4, %v300_v11 }
0x2395   :  { %306 = vst.msk [vmem:[#allocation2 + $0x10] sm:$0xff] %vm303_vm4, %v295_v15 }
0x23ad   :  { %v2199_v2 = vpop.permute.xlu0 %2198 }
0x23ae   :  { %v6764_v4 = vadd.f32 %v2199_v2, %v2191_v8 }
0x23b0   :  { %5301 = vtanh.f32 %v6764_v4 }
0x23ba   :  { %v5302_v34 = vpop.eup %5301 }
0x23bb   :  { %2204 = vrot.lane.b32.xlu1 %v5302_v34, %s5517_s11 }
0x242d   :  { %v2205_v6 = vpop.permute.xlu1 %2204 }
0x242e   :  { %v6768_v61 = vmul.f32 %v2205_v6, %v2189_v53  ;;  %v2213_v53 = vld [vmem:[#allocation2 + $0x10] sm:$0x1] }
0x2430   :  { %8156 = vst [vmem:[#allocation13_spill] sm:$0xff] %v6768_v61  ;;  %2221 = vperm.xlu1 %4951, %v6768_v61   ;;  %2215 = vperm.xlu0 %4950, %v6768_v61  }
0x2434   :  { %4952 = vset.pattern.permute.xlu1 %v8129_v44  ;;  %4953 = vset.pattern.permute.xlu0 %v8125_v46 }
0x2435   :  { %2227 = vperm.xlu1 %4952, %v6768_v61   ;;  %2233 = vperm.xlu0 %4953, %v6768_v61  }
0x2439   :  { %4954 = vset.pattern.permute.xlu1 %v8131_v43  ;;  %4956 = vset.pattern.permute.xlu0 %v8121_v50 }
0x243a   :  { %2239 = vperm.xlu1 %4954, %v6768_v61   ;;  %2251 = vperm.xlu0 %4956, %v6768_v61  }
0x243e   :  { %4955 = vset.pattern.permute.xlu1 %v8123_v48  ;;  %4959 = vset.pattern.permute.xlu0 %v8117_v52 }
0x243f   :  { %2245 = vperm.xlu1 %4955, %v6768_v61   ;;  %2269 = vperm.xlu0 %4959, %v6768_v61  }
0x2443   :  { %4957 = vset.pattern.permute.xlu1 %v8127_v45  ;;  %4962 = vset.pattern.permute.xlu0 %v8115_v54 }
0x2444   :  { %2257 = vperm.xlu1 %4957, %v6768_v61   ;;  %2287 = vperm.xlu0 %4962, %v6768_v61  }
0x2448   :  { %4958 = vset.pattern.permute.xlu1 %v8119_v51  ;;  %4965 = vset.pattern.permute.xlu0 %v8157_v18 }
0x2449   :  { %2263 = vperm.xlu1 %4958, %v6768_v61   ;;  %2305 = vperm.xlu0 %4965, %v6768_v61  }
0x244d   :  { %4960 = vset.pattern.permute.xlu1 %v8158_v56  ;;  %4967 = vset.pattern.permute.xlu0 %v8155_v28 }
0x244e   :  { %2275 = vperm.xlu1 %4960, %v6768_v61  }
0x2452   :  { %4961 = vset.pattern.permute.xlu1 %v8159_v39 }
0x2453   :  { %2281 = vperm.xlu1 %4961, %v6768_v61  }
0x2457   :  { %4963 = vset.pattern.permute.xlu1 %v8160_v38 }
0x2458   :  { %2293 = vperm.xlu1 %4963, %v6768_v61  }
0x245c   :  { %4964 = vset.pattern.permute.xlu1 %v8161_v49 }
0x245d   :  { %2299 = vperm.xlu1 %4964, %v6768_v61  }
0x2461   :  { %4966 = vset.pattern.permute.xlu1 %v8162_v55 }
0x24af   :  { %v2222_v47 = vpop.permute.xlu1 %2221  ;;  %v2216_v62 = vpop.permute.xlu0 %2215 }
0x24b0   :  { %v2218_v3 = vmul.f32 %v6466_v17, %v2216_v62  ;;  %v2224_v29 = vmul.f32 %v6472_v26, %v2222_v47 }
0x24b2   :  { %v2219_v40 = vadd.f32 %v2218_v3, %v2213_v53 }
0x24b4   :  { %v2228_v22 = vpop.permute.xlu1 %2227  ;;  %v2225_v24 = vadd.f32 %v2224_v29, %v2219_v40  ;;  %v2234_v9 = vpop.permute.xlu0 %2233 }
0x24b5   :  { %v2230_v11 = vmul.f32 %v6478_v5, %v2228_v22  ;;  %v2236_v8 = vmul.f32 %v6484_v37, %v2234_v9 }
0x24b7   :  { %v2231_v15 = vadd.f32 %v2230_v11, %v2225_v24 }
0x24b9   :  { %v2240_v2 = vpop.permute.xlu1 %2239  ;;  %v2237_v34 = vadd.f32 %v2236_v8, %v2231_v15  ;;  %v2252_v62 = vpop.permute.xlu0 %2251 }
0x24ba   :  { %v2242_v6 = vmul.f32 %v6490_v7, %v2240_v2  ;;  %v2254_v26 = vmul.f32 %v6502_v19, %v2252_v62 }
0x24bc   :  { %v2243_v52 = vadd.f32 %v2242_v6, %v2237_v34 }
0x24be   :  { %v2246_v54 = vpop.permute.xlu1 %2245  ;;  %v2270_v40 = vpop.permute.xlu0 %2269 }
0x24bf   :  { %v2248_v17 = vmul.f32 %v6496_v25, %v2246_v54  ;;  %v2272_v7 = vmul.f32 %v6577_v20, %v2270_v40 }
0x24c1   :  { %v2249_v51 = vadd.f32 %v2248_v17, %v2243_v52 }
0x24c3   :  { %v2258_v47 = vpop.permute.xlu1 %2257  ;;  %v2255_v3 = vadd.f32 %v2254_v26, %v2249_v51  ;;  %v2288_v9 = vpop.permute.xlu0 %2287 }
0x24c4   :  { %v2260_v5 = vmul.f32 %v6565_v33, %v2258_v47  ;;  %v2290_v15 = vmul.f32 %v6595_v12, %v2288_v9 }
0x24c6   :  { %v2261_v29 = vadd.f32 %v2260_v5, %v2255_v3 }
0x24c8   :  { %v2264_v53 = vpop.permute.xlu1 %2263  ;;  %v2306_v6 = vpop.permute.xlu0 %2305 }
0x24c9   :  { %v2266_v37 = vmul.f32 %v6571_v59, %v2264_v53  ;;  %v2308_v47 = vmul.f32 %v6613_v21, %v2306_v6 }
0x24cb   :  { %v2267_v22 = vadd.f32 %v2266_v37, %v2261_v29 }
0x24cd   :  { %v2276_v24 = vpop.permute.xlu1 %2275  ;;  %v2273_v11 = vadd.f32 %v2272_v7, %v2267_v22 }
0x24ce   :  { %v2278_v54 = vmul.f32 %v6583_v23, %v2276_v24 }
0x24d0   :  { %v2279_v52 = vadd.f32 %v2278_v54, %v2273_v11 }
0x24d2   :  { %v2282_v25 = vpop.permute.xlu1 %2281 }
0x24d3   :  { %v2284_v19 = vmul.f32 %v6589_v36, %v2282_v25 }
0x24d5   :  { %v2285_v51 = vadd.f32 %v2284_v19, %v2279_v52 }
0x24d7   :  { %v2294_v8 = vpop.permute.xlu1 %2293  ;;  %v2291_v2 = vadd.f32 %v2290_v15, %v2285_v51  ;;  %v8164_v51 = vmov 41   ;;  %v8165_v15 = vmov 44  }
0x24d8   :  { %v2296_v34 = vmul.f32 %v6601_v60, %v2294_v8 }
0x24da   :  { %v2297_v62 = vadd.f32 %v2296_v34, %v2291_v2  ;;  %v6862_v2 = vld [vmem:[%s8094_s4] sm:$0x1] }
0x24dc   :  { %v2300_v17 = vpop.permute.xlu1 %2299 }
0x24dd   :  { %v2302_v26 = vmul.f32 %v6607_v16, %v2300_v17  ;;  %v2337_v17 = vld [vmem:[#allocation2 + $0x11] sm:$0x1] }
0x24df   :  { %v2303_v3 = vadd.f32 %v2302_v26, %v2297_v62  ;;  %v6868_v26 = vld [vmem:[%s8094_s4 + $0x1] sm:$0x1] }
0x24e1   :  { %v2309_v5 = vadd.f32 %v2308_v47, %v2303_v3 }
0x24e3   :  { %5303 = vtanh.f32 %v2309_v5  ;;  %v2310_v29 = vmul.f32 0.5, %v2309_v5 }
0x24e5   :  { %5305 = vtanh.f32 %v2310_v29 }
0x24ed   :  { %v5304_v53 = vpop.eup %5303 }
0x24ee   :  { %2317 = vrot.lane.b32.xlu1 %v5304_v53, %s5516_s30  ;;  %v6874_v53 = vld [vmem:[%s8094_s4 + $0x2] sm:$0x1] }
0x24ef   :  { %v5306_v37 = vpop.eup %5305 }
0x24f0   :  { %v2312_v40 = vmul.f32 0.5, %v5306_v37 }
0x24f2   :  { %v2313_v22 = vadd.f32 0.5, %v2312_v40 }
0x24f4   :  { %v2315_v11 = vmul.f32 %v2313_v22, %v6764_v4  ;;  %v8163_v4 = vmov 40  }
0x2560   :  { %v2318_v7 = vpop.permute.xlu1 %2317 }
0x2561   :  { %v2320_v24 = vmul.f32 %v2318_v7, %v2313_v22 }
0x2563   :  { %2322 = vrot.lane.b32.xlu1 %v2320_v24, %s5517_s11 }
0x25d5   :  { %v2323_v54 = vpop.permute.xlu1 %2322 }
0x25d6   :  { %v6821_v25 = vadd.f32 %v2323_v54, %v2315_v11  ;;  %v6886_v54 = vld [vmem:[%s8094_s4 + $0x4] sm:$0x1] }
0x25d8   :  { %5307 = vtanh.f32 %v6821_v25 }
0x25e2   :  { %v5308_v52 = vpop.eup %5307 }
0x25e3   :  { %2328 = vrot.lane.b32.xlu0 %v5308_v52, %s5517_s11 }
0x2655   :  { %v2329_v19 = vpop.permute.xlu0 %2328 }
0x2656   :  { %v6825_v9 = vmul.f32 %v2329_v19, %v2313_v22  ;;  %v6880_v22 = vld [vmem:[%s8094_s4 + $0x3] sm:$0x1] }
0x2658   :  { %2345 = vperm.xlu0 %4967, %v6825_v9   ;;  %2339 = vperm.xlu1 %4966, %v6825_v9  }
0x265c   :  { %4970 = vset.pattern.permute.xlu0 %v8131_v43  ;;  %4968 = vset.pattern.permute.xlu1 %v8129_v44 }
0x265d   :  { %2363 = vperm.xlu0 %4970, %v6825_v9   ;;  %2351 = vperm.xlu1 %4968, %v6825_v9  }
0x2661   :  { %4973 = vset.pattern.permute.xlu0 %v8127_v45  ;;  %4969 = vset.pattern.permute.xlu1 %v8125_v46 }
0x2662   :  { %2381 = vperm.xlu0 %4973, %v6825_v9   ;;  %2357 = vperm.xlu1 %4969, %v6825_v9  }
0x2666   :  { %4976 = vset.pattern.permute.xlu0 %v8158_v56  ;;  %4971 = vset.pattern.permute.xlu1 %v8123_v48 }
0x2667   :  { %2399 = vperm.xlu0 %4976, %v6825_v9   ;;  %2369 = vperm.xlu1 %4971, %v6825_v9  }
0x266b   :  { %4979 = vset.pattern.permute.xlu0 %v8160_v38  ;;  %4972 = vset.pattern.permute.xlu1 %v8121_v50 }
0x266c   :  { %2417 = vperm.xlu0 %4979, %v6825_v9   ;;  %2375 = vperm.xlu1 %4972, %v6825_v9  }
0x2670   :  { %4974 = vset.pattern.permute.xlu1 %v8163_v4  ;;  %4983 = vset.pattern.permute.xlu0 %v8155_v28 }
0x2671   :  { %2387 = vperm.xlu1 %4974, %v6825_v9  }
0x2675   :  { %4975 = vset.pattern.permute.xlu1 %v8164_v51 }
0x2676   :  { %2393 = vperm.xlu1 %4975, %v6825_v9  }
0x267a   :  { %4977 = vset.pattern.permute.xlu1 %v8159_v39 }
0x267b   :  { %2405 = vperm.xlu1 %4977, %v6825_v9  }
0x267f   :  { %4978 = vset.pattern.permute.xlu1 %v8165_v15 }
0x2680   :  { %2411 = vperm.xlu1 %4978, %v6825_v9  }
0x2684   :  { %4980 = vset.pattern.permute.xlu1 %v8161_v49 }
0x2685   :  { %2423 = vperm.xlu1 %4980, %v6825_v9  }
0x2689   :  { %4981 = vset.pattern.permute.xlu1 %v8157_v18 }
0x268a   :  { %2429 = vperm.xlu1 %4981, %v6825_v9  }
0x268e   :  { %4982 = vset.pattern.permute.xlu1 %v8162_v55 }
0x26d7   :  { %v2340_v8 = vpop.permute.xlu1 %2339  ;;  %v2346_v6 = vpop.permute.xlu0 %2345 }
0x26d8   :  { %v2342_v34 = vmul.f32 %v6862_v2, %v2340_v8  ;;  %v2348_v47 = vmul.f32 %v6868_v26, %v2346_v6 }
0x26da   :  { %v2343_v62 = vadd.f32 %v2342_v34, %v2337_v17  ;;  %v6892_v34 = vld [vmem:[%s8094_s4 + $0x5] sm:$0x1] }
0x26dc   :  { %v2352_v3 = vpop.permute.xlu1 %2351  ;;  %v2349_v5 = vadd.f32 %v2348_v47, %v2343_v62  ;;  %v2364_v24 = vpop.permute.xlu0 %2363  ;;  %v6898_v47 = vld [vmem:[%s8094_s4 + $0x6] sm:$0x1] }
0x26dd   :  { %v2354_v29 = vmul.f32 %v6874_v53, %v2352_v3  ;;  %v2366_v52 = vmul.f32 %v6886_v54, %v2364_v24 }
0x26df   :  { %v2355_v40 = vadd.f32 %v2354_v29, %v2349_v5 }
0x26e1   :  { %v2358_v37 = vpop.permute.xlu1 %2357  ;;  %v2382_v5 = vpop.permute.xlu0 %2381 }
0x26e2   :  { %v2360_v7 = vmul.f32 %v6880_v22, %v2358_v37  ;;  %v2384_v37 = vmul.f32 %v6565_v33, %v2382_v5 }
0x26e4   :  { %v2361_v11 = vadd.f32 %v2360_v7, %v2355_v40 }
0x26e6   :  { %v2370_v19 = vpop.permute.xlu1 %2369  ;;  %v2367_v8 = vadd.f32 %v2366_v52, %v2361_v11 }
0x26e7   :  { %v2372_v6 = vmul.f32 %v6892_v34, %v2370_v19 }
0x26e9   :  { %v2373_v62 = vadd.f32 %v2372_v6, %v2367_v8  ;;  %v2400_v8 = vpop.permute.xlu0 %2399 }
0x26ea   :  { %v2402_v50 = vmul.f32 %v6583_v23, %v2400_v8 }
0x26eb   :  { %v2376_v17 = vpop.permute.xlu1 %2375 }
0x26ec   :  { %v2378_v3 = vmul.f32 %v6898_v47, %v2376_v17 }
0x26ee   :  { %v2379_v29 = vadd.f32 %v2378_v3, %v2373_v62  ;;  %v2418_v3 = vpop.permute.xlu0 %2417 }
0x26f0   :  { %v2388_v40 = vpop.permute.xlu1 %2387  ;;  %v2385_v7 = vadd.f32 %v2384_v37, %v2379_v29 }
0x26f1   :  { %v2390_v24 = vmul.f32 %v6571_v59, %v2388_v40  ;;  %v2420_v59 = vmul.f32 %v6601_v60, %v2418_v3 }
0x26f3   :  { %v2391_v52 = vadd.f32 %v2390_v24, %v2385_v7 }
0x26f5   :  { %v2394_v11 = vpop.permute.xlu1 %2393 }
0x26f6   :  { %v2396_v19 = vmul.f32 %v6577_v20, %v2394_v11 }
0x26f8   :  { %v2397_v6 = vadd.f32 %v2396_v19, %v2391_v52 }
0x26fa   :  { %v2406_v48 = vpop.permute.xlu1 %2405  ;;  %v2403_v46 = vadd.f32 %v2402_v50, %v2397_v6  ;;  %v8168_v6 = vmov 35  }
0x26fb   :  { %v2408_v17 = vmul.f32 %v6589_v36, %v2406_v48 }
0x26fd   :  { %v2409_v62 = vadd.f32 %v2408_v17, %v2403_v46  ;;  %v8169_v17 = vmov 37  }
0x26ff   :  { %v2412_v45 = vpop.permute.xlu1 %2411 }
0x2700   :  { %v2414_v33 = vmul.f32 %v6595_v12, %v2412_v45 }
0x2702   :  { %v2415_v5 = vadd.f32 %v2414_v33, %v2409_v62  ;;  %v8170_v62 = vmov 38  }
0x2704   :  { %v2424_v29 = vpop.permute.xlu1 %2423  ;;  %v2421_v37 = vadd.f32 %v2420_v59, %v2415_v5  ;;  %v2461_v59 = vld [vmem:[#allocation2 + $0x12] sm:$0x1] }
0x2705   :  { %v2426_v20 = vmul.f32 %v6607_v16, %v2424_v29 }
0x2707   :  { %v2427_v7 = vadd.f32 %v2426_v20, %v2421_v37 }
0x2709   :  { %v2430_v40 = vpop.permute.xlu1 %2429 }
0x270a   :  { %v2432_v23 = vmul.f32 %v6613_v21, %v2430_v40 }
0x270c   :  { %v2433_v24 = vadd.f32 %v2432_v23, %v2427_v7 }
0x270e   :  { %5309 = vtanh.f32 %v2433_v24  ;;  %v2434_v46 = vmul.f32 0.5, %v2433_v24 }
0x2710   :  { %5311 = vtanh.f32 %v2434_v46 }
0x2718   :  { %v5310_v50 = vpop.eup %5309 }
0x2719   :  { %2441 = vrot.lane.b32.xlu0 %v5310_v50, %s5516_s30 }
0x271a   :  { %v5312_v45 = vpop.eup %5311 }
0x271b   :  { %v2436_v48 = vmul.f32 0.5, %v5312_v45 }
0x271d   :  { %v2437_v36 = vadd.f32 0.5, %v2436_v48 }
0x271f   :  { %v2439_v16 = vmul.f32 %v2437_v36, %v6821_v25  ;;  %v8167_v25 = vmov 39  }
0x278b   :  { %v2442_v12 = vpop.permute.xlu0 %2441 }
0x278c   :  { %v2444_v60 = vmul.f32 %v2442_v12, %v2437_v36 }
0x278e   :  { %2446 = vrot.lane.b32.xlu1 %v2444_v60, %s5517_s11 }
0x2800   :  { %v2447_v11 = vpop.permute.xlu1 %2446 }
0x2801   :  { %v6913_v52 = vadd.f32 %v2447_v11, %v2439_v16 }
0x2803   :  { %5313 = vtanh.f32 %v6913_v52 }
0x280d   :  { %v5314_v21 = vpop.eup %5313 }
0x280e   :  { %2452 = vrot.lane.b32.xlu0 %v5314_v21, %s5517_s11 }
0x2880   :  { %v2453_v19 = vpop.permute.xlu0 %2452 }
0x2881   :  { %v6917_v8 = vmul.f32 %v2453_v19, %v2437_v36 }
0x2883   :  { %8166 = vst [vmem:[#allocation14_spill] sm:$0xff] %v6917_v8  ;;  %2469 = vperm.xlu0 %4983, %v6917_v8   ;;  %2463 = vperm.xlu1 %4982, %v6917_v8  }
0x2887   :  { %4986 = vset.pattern.permute.xlu0 %v8131_v43  ;;  %4984 = vset.pattern.permute.xlu1 %v8129_v44 }
0x2888   :  { %2487 = vperm.xlu0 %4986, %v6917_v8   ;;  %2475 = vperm.xlu1 %4984, %v6917_v8  }
0x288c   :  { %4989 = vset.pattern.permute.xlu0 %v8167_v25  ;;  %4985 = vset.pattern.permute.xlu1 %v8168_v6 }
0x288d   :  { %2505 = vperm.xlu0 %4989, %v6917_v8   ;;  %2481 = vperm.xlu1 %4985, %v6917_v8  }
0x2891   :  { %4992 = vset.pattern.permute.xlu0 %v8158_v56  ;;  %4987 = vset.pattern.permute.xlu1 %v8169_v17 }
0x2892   :  { %2523 = vperm.xlu0 %4992, %v6917_v8   ;;  %2493 = vperm.xlu1 %4987, %v6917_v8  }
0x2896   :  { %4995 = vset.pattern.permute.xlu0 %v8160_v38  ;;  %4988 = vset.pattern.permute.xlu1 %v8170_v62 }
0x2897   :  { %2541 = vperm.xlu0 %4995, %v6917_v8   ;;  %2499 = vperm.xlu1 %4988, %v6917_v8  }
0x289b   :  { %4990 = vset.pattern.permute.xlu1 %v8163_v4  ;;  %4999 = vset.pattern.permute.xlu0 %v8155_v28 }
0x289c   :  { %2511 = vperm.xlu1 %4990, %v6917_v8  }
0x28a0   :  { %4991 = vset.pattern.permute.xlu1 %v8164_v51 }
0x28a1   :  { %2517 = vperm.xlu1 %4991, %v6917_v8  }
0x28a5   :  { %4993 = vset.pattern.permute.xlu1 %v8159_v39 }
0x28a6   :  { %2529 = vperm.xlu1 %4993, %v6917_v8  }
0x28aa   :  { %4994 = vset.pattern.permute.xlu1 %v8165_v15 }
0x28ab   :  { %2535 = vperm.xlu1 %4994, %v6917_v8  }
0x28af   :  { %4996 = vset.pattern.permute.xlu1 %v8161_v49 }
0x28b0   :  { %2547 = vperm.xlu1 %4996, %v6917_v8  }
0x28b4   :  { %4997 = vset.pattern.permute.xlu1 %v8157_v18 }
0x28b5   :  { %2553 = vperm.xlu1 %4997, %v6917_v8  }
0x28b9   :  { %4998 = vset.pattern.permute.xlu1 %v8162_v55 }
0x2902   :  { %v2464_v33 = vpop.permute.xlu1 %2463  ;;  %v2470_v5 = vpop.permute.xlu0 %2469 }
0x2903   :  { %v2466_v3 = vmul.f32 %v6862_v2, %v2464_v33  ;;  %v2472_v37 = vmul.f32 %v6868_v26, %v2470_v5 }
0x2905   :  { %v2467_v29 = vadd.f32 %v2466_v3, %v2461_v59  ;;  %v6961_v3 = vld [vmem:[%s8094_s4 + $0x7] sm:$0x1] }
0x2907   :  { %v2476_v20 = vpop.permute.xlu1 %2475  ;;  %v2473_v40 = vadd.f32 %v2472_v37, %v2467_v29  ;;  %v2488_v46 = vpop.permute.xlu0 %2487  ;;  %v6967_v37 = vld [vmem:[%s8094_s4 + $0x8] sm:$0x1] }
0x2908   :  { %v2478_v7 = vmul.f32 %v6874_v53, %v2476_v20  ;;  %v2490_v48 = vmul.f32 %v6886_v54, %v2488_v46 }
0x290a   :  { %v2479_v24 = vadd.f32 %v2478_v7, %v2473_v40 }
0x290c   :  { %v2482_v23 = vpop.permute.xlu1 %2481  ;;  %v2506_v19 = vpop.permute.xlu0 %2505 }
0x290d   :  { %v2484_v50 = vmul.f32 %v6880_v22, %v2482_v23  ;;  %v2508_v5 = vmul.f32 %v6961_v3, %v2506_v19  ;;  %v6973_v23 = vld [vmem:[%s8094_s4 + $0x9] sm:$0x1]  ;;  %v6991_v19 = vld [vmem:[%s8094_s4 + $0xc] sm:$0x1] }
0x290f   :  { %v2485_v45 = vadd.f32 %v2484_v50, %v2479_v24 }
0x2911   :  { %v2494_v36 = vpop.permute.xlu1 %2493  ;;  %v2491_v12 = vadd.f32 %v2490_v48, %v2485_v45  ;;  %v2524_v50 = vpop.permute.xlu0 %2523  ;;  %v6979_v45 = vld [vmem:[%s8094_s4 + $0xa] sm:$0x1] }
0x2912   :  { %v2496_v60 = vmul.f32 %v6892_v34, %v2494_v36  ;;  %v2526_v48 = vmul.f32 %v6979_v45, %v2524_v50 }
0x2914   :  { %v2497_v11 = vadd.f32 %v2496_v60, %v2491_v12  ;;  %v6985_v60 = vld [vmem:[%s8094_s4 + $0xb] sm:$0x1] }
0x2916   :  { %v2500_v16 = vpop.permute.xlu1 %2499 }
0x2917   :  { %v2502_v21 = vmul.f32 %v6898_v47, %v2500_v16 }
0x2919   :  { %v2503_v33 = vadd.f32 %v2502_v21, %v2497_v11 }
0x291b   :  { %v2512_v59 = vpop.permute.xlu1 %2511  ;;  %v2509_v29 = vadd.f32 %v2508_v5, %v2503_v33  ;;  %v2542_v5 = vpop.permute.xlu0 %2541 }
0x291c   :  { %v2514_v20 = vmul.f32 %v6967_v37, %v2512_v59 }
0x291e   :  { %v2515_v7 = vadd.f32 %v2514_v20, %v2509_v29  ;;  %v6997_v29 = vld [vmem:[%s8094_s4 + $0xd] sm:$0x1] }
0x291f   :  { %v2544_v20 = vmul.f32 %v6997_v29, %v2542_v5 }
0x2920   :  { %v2518_v40 = vpop.permute.xlu1 %2517 }
0x2921   :  { %v2520_v24 = vmul.f32 %v6973_v23, %v2518_v40 }
0x2923   :  { %v2521_v46 = vadd.f32 %v2520_v24, %v2515_v7  ;;  %v7003_v24 = vld [vmem:[%s8094_s4 + $0xe] sm:$0x1] }
0x2925   :  { %v2530_v36 = vpop.permute.xlu1 %2529  ;;  %v2527_v12 = vadd.f32 %v2526_v48, %v2521_v46 }
0x2926   :  { %v2532_v16 = vmul.f32 %v6985_v60, %v2530_v36  ;;  %v7009_v36 = vld [vmem:[%s8094_s4 + $0xf] sm:$0x1] }
0x2928   :  { %v2533_v21 = vadd.f32 %v2532_v16, %v2527_v12 }
0x292a   :  { %v2536_v11 = vpop.permute.xlu1 %2535 }
0x292b   :  { %v2538_v33 = vmul.f32 %v6991_v19, %v2536_v11 }
0x292d   :  { %v2539_v59 = vadd.f32 %v2538_v33, %v2533_v21 }
0x292f   :  { %v2548_v40 = vpop.permute.xlu1 %2547  ;;  %v2545_v7 = vadd.f32 %v2544_v20, %v2539_v59 }
0x2930   :  { %v2550_v50 = vmul.f32 %v7003_v24, %v2548_v40 }
0x2932   :  { %v2551_v48 = vadd.f32 %v2550_v50, %v2545_v7 }
0x2934   :  { %v2554_v46 = vpop.permute.xlu1 %2553 }
0x2935   :  { %v2556_v12 = vmul.f32 %v7009_v36, %v2554_v46 }
0x2937   :  { %v2557_v16 = vadd.f32 %v2556_v12, %v2551_v48 }
0x2939   :  { %5315 = vtanh.f32 %v2557_v16  ;;  %v2558_v21 = vmul.f32 0.5, %v2557_v16  ;;  %v8171_v16 = vmov 34  }
0x293b   :  { %5317 = vtanh.f32 %v2558_v21 }
0x2943   :  { %v5316_v11 = vpop.eup %5315 }
0x2944   :  { %2565 = vrot.lane.b32.xlu0 %v5316_v11, %s5516_s30 }
0x2945   :  { %v5318_v33 = vpop.eup %5317 }
0x2946   :  { %v2560_v5 = vmul.f32 0.5, %v5318_v33  ;;  %v2585_v33 = vld [vmem:[#allocation2 + $0x13] sm:$0x1] }
0x2948   :  { %v2561_v59 = vadd.f32 0.5, %v2560_v5 }
0x294a   :  { %v2563_v7 = vmul.f32 %v2561_v59, %v6913_v52 }
0x29b6   :  { %v2566_v20 = vpop.permute.xlu0 %2565 }
0x29b7   :  { %v2568_v40 = vmul.f32 %v2566_v20, %v2561_v59 }
0x29b9   :  { %2570 = vrot.lane.b32.xlu1 %v2568_v40, %s5517_s11 }
0x2a2b   :  { %v2571_v50 = vpop.permute.xlu1 %2570 }
0x2a2c   :  { %v7015_v44 = vadd.f32 %v2571_v50, %v2563_v7 }
0x2a2e   :  { %5319 = vtanh.f32 %v7015_v44 }
0x2a38   :  { %v5320_v46 = vpop.eup %5319 }
0x2a39   :  { %2576 = vrot.lane.b32.xlu0 %v5320_v46, %s5517_s11 }
0x2aab   :  { %v2577_v48 = vpop.permute.xlu0 %2576 }
0x2aac   :  { %v7019_v12 = vmul.f32 %v2577_v48, %v2561_v59 }
0x2aae   :  { %2593 = vperm.xlu0 %4999, %v7019_v12   ;;  %2587 = vperm.xlu1 %4998, %v7019_v12  }
0x2ab2   :  { %5002 = vset.pattern.permute.xlu0 %v8131_v43  ;;  %5000 = vset.pattern.permute.xlu1 %v8171_v16 }
0x2ab3   :  { %2611 = vperm.xlu0 %5002, %v7019_v12   ;;  %2599 = vperm.xlu1 %5000, %v7019_v12  }
0x2ab7   :  { %5005 = vset.pattern.permute.xlu0 %v8167_v25  ;;  %5001 = vset.pattern.permute.xlu1 %v8168_v6 }
0x2ab8   :  { %2629 = vperm.xlu0 %5005, %v7019_v12   ;;  %2605 = vperm.xlu1 %5001, %v7019_v12  }
0x2abc   :  { %5008 = vset.pattern.permute.xlu0 %v8158_v56  ;;  %5003 = vset.pattern.permute.xlu1 %v8169_v17 }
0x2abd   :  { %2647 = vperm.xlu0 %5008, %v7019_v12   ;;  %2617 = vperm.xlu1 %5003, %v7019_v12  }
0x2ac1   :  { %5011 = vset.pattern.permute.xlu0 %v8160_v38  ;;  %5004 = vset.pattern.permute.xlu1 %v8170_v62 }
0x2ac2   :  { %2665 = vperm.xlu0 %5011, %v7019_v12   ;;  %2623 = vperm.xlu1 %5004, %v7019_v12  }
0x2ac6   :  { %5006 = vset.pattern.permute.xlu1 %v8163_v4  ;;  %5015 = vset.pattern.permute.xlu0 %v8155_v28 }
0x2ac7   :  { %2635 = vperm.xlu1 %5006, %v7019_v12  }
0x2acb   :  { %5007 = vset.pattern.permute.xlu1 %v8164_v51 }
0x2acc   :  { %2641 = vperm.xlu1 %5007, %v7019_v12  }
0x2ad0   :  { %5009 = vset.pattern.permute.xlu1 %v8159_v39 }
0x2ad1   :  { %2653 = vperm.xlu1 %5009, %v7019_v12  }
0x2ad5   :  { %5010 = vset.pattern.permute.xlu1 %v8165_v15 }
0x2ad6   :  { %2659 = vperm.xlu1 %5010, %v7019_v12  }
0x2ada   :  { %5012 = vset.pattern.permute.xlu1 %v8161_v49 }
0x2adb   :  { %2671 = vperm.xlu1 %5012, %v7019_v12  }
0x2adf   :  { %5013 = vset.pattern.permute.xlu1 %v8157_v18 }
0x2ae0   :  { %2677 = vperm.xlu1 %5013, %v7019_v12  }
0x2ae4   :  { %5014 = vset.pattern.permute.xlu1 %v8162_v55 }
0x2b2d   :  { %v2588_v52 = vpop.permute.xlu1 %2587  ;;  %v2594_v21 = vpop.permute.xlu0 %2593 }
0x2b2e   :  { %v2590_v11 = vmul.f32 %v6862_v2, %v2588_v52  ;;  %v2596_v59 = vmul.f32 %v6868_v26, %v2594_v21 }
0x2b30   :  { %v2591_v5 = vadd.f32 %v2590_v11, %v2585_v33 }
0x2b32   :  { %v2600_v20 = vpop.permute.xlu1 %2599  ;;  %v2597_v40 = vadd.f32 %v2596_v59, %v2591_v5  ;;  %v2612_v43 = vpop.permute.xlu0 %2611 }
0x2b33   :  { %v2602_v7 = vmul.f32 %v6874_v53, %v2600_v20  ;;  %v2614_v61 = vmul.f32 %v6886_v54, %v2612_v43 }
0x2b35   :  { %v2603_v46 = vadd.f32 %v2602_v7, %v2597_v40 }
0x2b37   :  { %v2606_v50 = vpop.permute.xlu1 %2605  ;;  %v2630_v33 = vpop.permute.xlu0 %2629 }
0x2b38   :  { %v2608_v48 = vmul.f32 %v6880_v22, %v2606_v50  ;;  %v2632_v59 = vmul.f32 %v6961_v3, %v2630_v33 }
0x2b3a   :  { %v2609_v8 = vadd.f32 %v2608_v48, %v2603_v46 }
0x2b3c   :  { %v2618_v30 = vpop.permute.xlu1 %2617  ;;  %v2615_v0 = vadd.f32 %v2614_v61, %v2609_v8  ;;  %v2648_v48 = vpop.permute.xlu0 %2647 }
0x2b3d   :  { %v2620_v52 = vmul.f32 %v6892_v34, %v2618_v30  ;;  %v2650_v30 = vmul.f32 %v6979_v45, %v2648_v48 }
0x2b3f   :  { %v2621_v11 = vadd.f32 %v2620_v52, %v2615_v0 }
0x2b41   :  { %v2624_v32 = vpop.permute.xlu1 %2623  ;;  %v2666_v33 = vpop.permute.xlu0 %2665 }
0x2b42   :  { %v2626_v21 = vmul.f32 %v6898_v47, %v2624_v32 }
0x2b44   :  { %v2627_v5 = vadd.f32 %v2626_v21, %v2621_v11 }
0x2b46   :  { %v2636_v20 = vpop.permute.xlu1 %2635  ;;  %v2633_v40 = vadd.f32 %v2632_v59, %v2627_v5  ;;  %v2668_v59 = vmul.f32 %v6997_v29, %v2666_v33 }
0x2b47   :  { %v2638_v7 = vmul.f32 %v6967_v37, %v2636_v20 }
0x2b49   :  { %v2639_v46 = vadd.f32 %v2638_v7, %v2633_v40 }
0x2b4b   :  { %v2642_v50 = vpop.permute.xlu1 %2641 }
0x2b4c   :  { %v2644_v43 = vmul.f32 %v6973_v23, %v2642_v50 }
0x2b4e   :  { %v2645_v61 = vadd.f32 %v2644_v43, %v2639_v46 }
0x2b50   :  { %v2654_v8 = vpop.permute.xlu1 %2653  ;;  %v2651_v0 = vadd.f32 %v2650_v30, %v2645_v61 }
0x2b51   :  { %v2656_v32 = vmul.f32 %v6985_v60, %v2654_v8 }
0x2b53   :  { %v2657_v11 = vadd.f32 %v2656_v32, %v2651_v0 }
0x2b55   :  { %v2660_v52 = vpop.permute.xlu1 %2659 }
0x2b56   :  { %v2662_v21 = vmul.f32 %v6991_v19, %v2660_v52 }
0x2b58   :  { %v2663_v5 = vadd.f32 %v2662_v21, %v2657_v11 }
0x2b5a   :  { %v2672_v20 = vpop.permute.xlu1 %2671  ;;  %v2669_v40 = vadd.f32 %v2668_v59, %v2663_v5 }
0x2b5b   :  { %v2674_v7 = vmul.f32 %v7003_v24, %v2672_v20 }
0x2b5d   :  { %v2675_v46 = vadd.f32 %v2674_v7, %v2669_v40  ;;  %v8173_v7 = vmov 36  }
0x2b5f   :  { %v2678_v50 = vpop.permute.xlu1 %2677 }
0x2b60   :  { %v2680_v43 = vmul.f32 %v7009_v36, %v2678_v50 }
0x2b62   :  { %v2681_v48 = vadd.f32 %v2680_v43, %v2675_v46  ;;  %v2709_v43 = vld [vmem:[#allocation2 + $0x14] sm:$0x1] }
0x2b64   :  { %5321 = vtanh.f32 %v2681_v48  ;;  %v2682_v30 = vmul.f32 0.5, %v2681_v48 }
0x2b66   :  { %5323 = vtanh.f32 %v2682_v30 }
0x2b6e   :  { %v5322_v61 = vpop.eup %5321 }
0x2b6f   :  { %2689 = vrot.lane.b32.xlu0 %v5322_v61, %s5516_s30 }
0x2b70   :  { %v5324_v8 = vpop.eup %5323 }
0x2b71   :  { %v2684_v0 = vmul.f32 0.5, %v5324_v8 }
0x2b73   :  { %v2685_v32 = vadd.f32 0.5, %v2684_v0 }
0x2b75   :  { %v2687_v21 = vmul.f32 %v2685_v32, %v7015_v44 }
0x2be1   :  { %v2690_v52 = vpop.permute.xlu0 %2689 }
0x2be2   :  { %v2692_v11 = vmul.f32 %v2690_v52, %v2685_v32 }
0x2be4   :  { %2694 = vrot.lane.b32.xlu1 %v2692_v11, %s5517_s11 }
0x2c56   :  { %v2695_v33 = vpop.permute.xlu1 %2694 }
0x2c57   :  { %v7072_v5 = vadd.f32 %v2695_v33, %v2687_v21 }
0x2c59   :  { %5325 = vtanh.f32 %v7072_v5 }
0x2c63   :  { %v5326_v59 = vpop.eup %5325 }
0x2c64   :  { %2700 = vrot.lane.b32.xlu0 %v5326_v59, %s5517_s11 }
0x2cd6   :  { %v2701_v20 = vpop.permute.xlu0 %2700 }
0x2cd7   :  { %v7076_v40 = vmul.f32 %v2701_v20, %v2685_v32 }
0x2cd9   :  { %8172 = vst [vmem:[#allocation15_spill] sm:$0xff] %v7076_v40  ;;  %2717 = vperm.xlu0 %5015, %v7076_v40   ;;  %2711 = vperm.xlu1 %5014, %v7076_v40  }
0x2cdd   :  { %5018 = vset.pattern.permute.xlu0 %v8173_v7  ;;  %5016 = vset.pattern.permute.xlu1 %v8171_v16 }
0x2cde   :  { %2735 = vperm.xlu0 %5018, %v7076_v40   ;;  %2723 = vperm.xlu1 %5016, %v7076_v40  }
0x2ce2   :  { %5021 = vset.pattern.permute.xlu0 %v8167_v25  ;;  %5017 = vset.pattern.permute.xlu1 %v8168_v6 }
0x2ce3   :  { %2753 = vperm.xlu0 %5021, %v7076_v40   ;;  %2729 = vperm.xlu1 %5017, %v7076_v40  }
0x2ce7   :  { %5024 = vset.pattern.permute.xlu0 %v8158_v56  ;;  %5019 = vset.pattern.permute.xlu1 %v8169_v17 }
0x2ce8   :  { %2771 = vperm.xlu0 %5024, %v7076_v40   ;;  %2741 = vperm.xlu1 %5019, %v7076_v40  }
0x2cec   :  { %5027 = vset.pattern.permute.xlu0 %v8160_v38  ;;  %5020 = vset.pattern.permute.xlu1 %v8170_v62 }
0x2ced   :  { %2789 = vperm.xlu0 %5027, %v7076_v40   ;;  %2747 = vperm.xlu1 %5020, %v7076_v40  }
0x2cf1   :  { %5022 = vset.pattern.permute.xlu1 %v8163_v4  ;;  %5031 = vset.pattern.permute.xlu0 %v8155_v28 }
0x2cf2   :  { %2759 = vperm.xlu1 %5022, %v7076_v40  }
0x2cf6   :  { %5023 = vset.pattern.permute.xlu1 %v8164_v51 }
0x2cf7   :  { %2765 = vperm.xlu1 %5023, %v7076_v40  }
0x2cfb   :  { %5025 = vset.pattern.permute.xlu1 %v8159_v39 }
0x2cfc   :  { %2777 = vperm.xlu1 %5025, %v7076_v40  }
0x2d00   :  { %5026 = vset.pattern.permute.xlu1 %v8165_v15 }
0x2d01   :  { %2783 = vperm.xlu1 %5026, %v7076_v40  }
0x2d05   :  { %5028 = vset.pattern.permute.xlu1 %v8161_v49 }
0x2d06   :  { %2795 = vperm.xlu1 %5028, %v7076_v40  }
0x2d0a   :  { %5029 = vset.pattern.permute.xlu1 %v8157_v18 }
0x2d0b   :  { %2801 = vperm.xlu1 %5029, %v7076_v40  }
0x2d0f   :  { %5030 = vset.pattern.permute.xlu1 %v8162_v55 }
0x2d58   :  { %v2712_v44 = vpop.permute.xlu1 %2711  ;;  %v2718_v46 = vpop.permute.xlu0 %2717 }
0x2d59   :  { %v2714_v50 = vmul.f32 %v6862_v2, %v2712_v44  ;;  %v2720_v61 = vmul.f32 %v6868_v26, %v2718_v46 }
0x2d5b   :  { %v2715_v48 = vadd.f32 %v2714_v50, %v2709_v43 }
0x2d5d   :  { %v2724_v30 = vpop.permute.xlu1 %2723  ;;  %v2721_v8 = vadd.f32 %v2720_v61, %v2715_v48  ;;  %v2736_v21 = vpop.permute.xlu0 %2735 }
0x2d5e   :  { %v2726_v0 = vmul.f32 %v6874_v53, %v2724_v30  ;;  %v2738_v59 = vmul.f32 %v6886_v54, %v2736_v21 }
0x2d60   :  { %v2727_v52 = vadd.f32 %v2726_v0, %v2721_v8 }
0x2d62   :  { %v2730_v32 = vpop.permute.xlu1 %2729  ;;  %v2754_v43 = vpop.permute.xlu0 %2753 }
0x2d63   :  { %v2732_v11 = vmul.f32 %v6880_v22, %v2730_v32  ;;  %v2756_v61 = vmul.f32 %v6961_v3, %v2754_v43 }
0x2d65   :  { %v2733_v33 = vadd.f32 %v2732_v11, %v2727_v52 }
0x2d67   :  { %v2742_v20 = vpop.permute.xlu1 %2741  ;;  %v2739_v40 = vadd.f32 %v2738_v59, %v2733_v33  ;;  %v2772_v21 = vpop.permute.xlu0 %2771 }
0x2d68   :  { %v2744_v44 = vmul.f32 %v6892_v34, %v2742_v20  ;;  %v2774_v59 = vmul.f32 %v6979_v45, %v2772_v21 }
0x2d6a   :  { %v2745_v50 = vadd.f32 %v2744_v44, %v2739_v40 }
0x2d6c   :  { %v2748_v57 = vpop.permute.xlu1 %2747  ;;  %v2790_v43 = vpop.permute.xlu0 %2789 }
0x2d6d   :  { %v2750_v46 = vmul.f32 %v6898_v47, %v2748_v57 }
0x2d6f   :  { %v2751_v48 = vadd.f32 %v2750_v46, %v2745_v50 }
0x2d71   :  { %v2760_v30 = vpop.permute.xlu1 %2759  ;;  %v2757_v8 = vadd.f32 %v2756_v61, %v2751_v48  ;;  %v2792_v61 = vmul.f32 %v6997_v29, %v2790_v43 }
0x2d72   :  { %v2762_v0 = vmul.f32 %v6967_v37, %v2760_v30 }
0x2d74   :  { %v2763_v52 = vadd.f32 %v2762_v0, %v2757_v8 }
0x2d76   :  { %v2766_v32 = vpop.permute.xlu1 %2765 }
0x2d77   :  { %v2768_v11 = vmul.f32 %v6973_v23, %v2766_v32 }
0x2d79   :  { %v2769_v33 = vadd.f32 %v2768_v11, %v2763_v52 }
0x2d7b   :  { %v2778_v20 = vpop.permute.xlu1 %2777  ;;  %v2775_v40 = vadd.f32 %v2774_v59, %v2769_v33 }
0x2d7c   :  { %v2780_v57 = vmul.f32 %v6985_v60, %v2778_v20 }
0x2d7e   :  { %v2781_v50 = vadd.f32 %v2780_v57, %v2775_v40 }
0x2d80   :  { %v2784_v44 = vpop.permute.xlu1 %2783 }
0x2d81   :  { %v2786_v46 = vmul.f32 %v6991_v19, %v2784_v44 }
0x2d83   :  { %v2787_v48 = vadd.f32 %v2786_v46, %v2781_v50 }
0x2d85   :  { %v2796_v30 = vpop.permute.xlu1 %2795  ;;  %v2793_v8 = vadd.f32 %v2792_v61, %v2787_v48 }
0x2d86   :  { %v2798_v0 = vmul.f32 %v7003_v24, %v2796_v30 }
0x2d88   :  { %v2799_v52 = vadd.f32 %v2798_v0, %v2793_v8 }
0x2d8a   :  { %v2802_v32 = vpop.permute.xlu1 %2801 }
0x2d8b   :  { %v2804_v11 = vmul.f32 %v7009_v36, %v2802_v32 }
0x2d8d   :  { %v2805_v21 = vadd.f32 %v2804_v11, %v2799_v52  ;;  %v2833_v52 = vld [vmem:[#allocation2 + $0x15] sm:$0x1] }
0x2d8f   :  { %5327 = vtanh.f32 %v2805_v21  ;;  %v2806_v59 = vmul.f32 0.5, %v2805_v21 }
0x2d91   :  { %5329 = vtanh.f32 %v2806_v59 }
0x2d99   :  { %v5328_v33 = vpop.eup %5327 }
0x2d9a   :  { %2813 = vrot.lane.b32.xlu0 %v5328_v33, %s5516_s30 }
0x2d9b   :  { %v5330_v20 = vpop.eup %5329 }
0x2d9c   :  { %v2808_v40 = vmul.f32 0.5, %v5330_v20 }
0x2d9e   :  { %v2809_v57 = vadd.f32 0.5, %v2808_v40 }
0x2da0   :  { %v2811_v46 = vmul.f32 %v2809_v57, %v7072_v5 }
0x2e0c   :  { %v2814_v44 = vpop.permute.xlu0 %2813 }
0x2e0d   :  { %v2816_v50 = vmul.f32 %v2814_v44, %v2809_v57 }
0x2e0f   :  { %2818 = vrot.lane.b32.xlu1 %v2816_v50, %s5517_s11 }
0x2e81   :  { %v2819_v43 = vpop.permute.xlu1 %2818 }
0x2e82   :  { %v7129_v48 = vadd.f32 %v2819_v43, %v2811_v46 }
0x2e84   :  { %5331 = vtanh.f32 %v7129_v48 }
0x2e8e   :  { %v5332_v61 = vpop.eup %5331 }
0x2e8f   :  { %2824 = vrot.lane.b32.xlu0 %v5332_v61, %s5517_s11 }
0x2f01   :  { %v2825_v30 = vpop.permute.xlu0 %2824 }
0x2f02   :  { %v7133_v8 = vmul.f32 %v2825_v30, %v2809_v57 }
0x2f04   :  { %2841 = vperm.xlu0 %5031, %v7133_v8   ;;  %2835 = vperm.xlu1 %5030, %v7133_v8  }
0x2f08   :  { %5034 = vset.pattern.permute.xlu0 %v8173_v7  ;;  %5032 = vset.pattern.permute.xlu1 %v8171_v16 }
0x2f09   :  { %2859 = vperm.xlu0 %5034, %v7133_v8   ;;  %2847 = vperm.xlu1 %5032, %v7133_v8  }
0x2f0d   :  { %5037 = vset.pattern.permute.xlu0 %v8167_v25  ;;  %5033 = vset.pattern.permute.xlu1 %v8168_v6 }
0x2f0e   :  { %2877 = vperm.xlu0 %5037, %v7133_v8   ;;  %2853 = vperm.xlu1 %5033, %v7133_v8  }
0x2f12   :  { %5040 = vset.pattern.permute.xlu0 %v8158_v56  ;;  %5035 = vset.pattern.permute.xlu1 %v8169_v17 }
0x2f13   :  { %2895 = vperm.xlu0 %5040, %v7133_v8   ;;  %2865 = vperm.xlu1 %5035, %v7133_v8  }
0x2f17   :  { %5043 = vset.pattern.permute.xlu0 %v8160_v38  ;;  %5036 = vset.pattern.permute.xlu1 %v8170_v62 }
0x2f18   :  { %2913 = vperm.xlu0 %5043, %v7133_v8   ;;  %2871 = vperm.xlu1 %5036, %v7133_v8  }
0x2f1c   :  { %5038 = vset.pattern.permute.xlu1 %v8163_v4  ;;  %5047 = vset.pattern.permute.xlu0 %v8155_v28 }
0x2f1d   :  { %2883 = vperm.xlu1 %5038, %v7133_v8  }
0x2f21   :  { %5039 = vset.pattern.permute.xlu1 %v8164_v51 }
0x2f22   :  { %2889 = vperm.xlu1 %5039, %v7133_v8  }
0x2f26   :  { %5041 = vset.pattern.permute.xlu1 %v8159_v39 }
0x2f27   :  { %2901 = vperm.xlu1 %5041, %v7133_v8  }
0x2f2b   :  { %5042 = vset.pattern.permute.xlu1 %v8165_v15 }
0x2f2c   :  { %2907 = vperm.xlu1 %5042, %v7133_v8  }
0x2f30   :  { %5044 = vset.pattern.permute.xlu1 %v8161_v49 }
0x2f31   :  { %2919 = vperm.xlu1 %5044, %v7133_v8  }
0x2f35   :  { %5045 = vset.pattern.permute.xlu1 %v8157_v18 }
0x2f36   :  { %2925 = vperm.xlu1 %5045, %v7133_v8  }
0x2f3a   :  { %5046 = vset.pattern.permute.xlu1 %v8162_v55 }
0x2f83   :  { %v2836_v5 = vpop.permute.xlu1 %2835  ;;  %v2842_v32 = vpop.permute.xlu0 %2841 }
0x2f84   :  { %v2838_v0 = vmul.f32 %v6862_v2, %v2836_v5  ;;  %v2844_v21 = vmul.f32 %v6868_v26, %v2842_v32 }
0x2f86   :  { %v2839_v11 = vadd.f32 %v2838_v0, %v2833_v52 }
0x2f88   :  { %v2848_v33 = vpop.permute.xlu1 %2847  ;;  %v2845_v59 = vadd.f32 %v2844_v21, %v2839_v11  ;;  %v2860_v50 = vpop.permute.xlu0 %2859 }
0x2f89   :  { %v2850_v20 = vmul.f32 %v6874_v53, %v2848_v33  ;;  %v2862_v43 = vmul.f32 %v6886_v54, %v2860_v50 }
0x2f8b   :  { %v2851_v57 = vadd.f32 %v2850_v20, %v2845_v59 }
0x2f8d   :  { %v2854_v40 = vpop.permute.xlu1 %2853  ;;  %v2878_v52 = vpop.permute.xlu0 %2877 }
0x2f8e   :  { %v2856_v44 = vmul.f32 %v6880_v22, %v2854_v40  ;;  %v2880_v21 = vmul.f32 %v6961_v3, %v2878_v52 }
0x2f90   :  { %v2857_v46 = vadd.f32 %v2856_v44, %v2851_v57 }
0x2f92   :  { %v2866_v61 = vpop.permute.xlu1 %2865  ;;  %v2863_v30 = vadd.f32 %v2862_v43, %v2857_v46  ;;  %v2896_v50 = vpop.permute.xlu0 %2895 }
0x2f93   :  { %v2868_v5 = vmul.f32 %v6892_v34, %v2866_v61  ;;  %v2898_v43 = vmul.f32 %v6979_v45, %v2896_v50 }
0x2f95   :  { %v2869_v0 = vadd.f32 %v2868_v5, %v2863_v30 }
0x2f97   :  { %v2872_v10 = vpop.permute.xlu1 %2871  ;;  %v2914_v52 = vpop.permute.xlu0 %2913 }
0x2f98   :  { %v2874_v32 = vmul.f32 %v6898_v47, %v2872_v10 }
0x2f9a   :  { %v2875_v11 = vadd.f32 %v2874_v32, %v2869_v0 }
0x2f9c   :  { %v2884_v33 = vpop.permute.xlu1 %2883  ;;  %v2881_v59 = vadd.f32 %v2880_v21, %v2875_v11  ;;  %v2916_v21 = vmul.f32 %v6997_v29, %v2914_v52 }
0x2f9d   :  { %v2886_v20 = vmul.f32 %v6967_v37, %v2884_v33 }
0x2f9f   :  { %v2887_v57 = vadd.f32 %v2886_v20, %v2881_v59 }
0x2fa1   :  { %v2890_v40 = vpop.permute.xlu1 %2889 }
0x2fa2   :  { %v2892_v44 = vmul.f32 %v6973_v23, %v2890_v40 }
0x2fa4   :  { %v2893_v46 = vadd.f32 %v2892_v44, %v2887_v57 }
0x2fa6   :  { %v2902_v61 = vpop.permute.xlu1 %2901  ;;  %v2899_v30 = vadd.f32 %v2898_v43, %v2893_v46 }
0x2fa7   :  { %v2904_v10 = vmul.f32 %v6985_v60, %v2902_v61 }
0x2fa9   :  { %v2905_v0 = vadd.f32 %v2904_v10, %v2899_v30 }
0x2fab   :  { %v2908_v5 = vpop.permute.xlu1 %2907 }
0x2fac   :  { %v2910_v32 = vmul.f32 %v6991_v19, %v2908_v5 }
0x2fae   :  { %v2911_v11 = vadd.f32 %v2910_v32, %v2905_v0 }
0x2fb0   :  { %v2920_v33 = vpop.permute.xlu1 %2919  ;;  %v2917_v59 = vadd.f32 %v2916_v21, %v2911_v11 }
0x2fb1   :  { %v2922_v20 = vmul.f32 %v7003_v24, %v2920_v33 }
0x2fb3   :  { %v2923_v57 = vadd.f32 %v2922_v20, %v2917_v59 }
0x2fb5   :  { %v2926_v40 = vpop.permute.xlu1 %2925 }
0x2fb6   :  { %v2928_v44 = vmul.f32 %v7009_v36, %v2926_v40 }
0x2fb8   :  { %v2929_v50 = vadd.f32 %v2928_v44, %v2923_v57  ;;  %v2957_v57 = vld [vmem:[#allocation2 + $0x16] sm:$0x1] }
0x2fba   :  { %5333 = vtanh.f32 %v2929_v50  ;;  %v2930_v43 = vmul.f32 0.5, %v2929_v50 }
0x2fbc   :  { %5335 = vtanh.f32 %v2930_v43 }
0x2fc4   :  { %v5334_v46 = vpop.eup %5333 }
0x2fc5   :  { %2937 = vrot.lane.b32.xlu0 %v5334_v46, %s5516_s30 }
0x2fc6   :  { %v5336_v61 = vpop.eup %5335 }
0x2fc7   :  { %v2932_v30 = vmul.f32 0.5, %v5336_v61 }
0x2fc9   :  { %v2933_v10 = vadd.f32 0.5, %v2932_v30 }
0x2fcb   :  { %v2935_v32 = vmul.f32 %v2933_v10, %v7129_v48 }
0x3037   :  { %v2938_v5 = vpop.permute.xlu0 %2937 }
0x3038   :  { %v2940_v0 = vmul.f32 %v2938_v5, %v2933_v10 }
0x303a   :  { %2942 = vrot.lane.b32.xlu1 %v2940_v0, %s5517_s11 }
0x30ac   :  { %v2943_v52 = vpop.permute.xlu1 %2942 }
0x30ad   :  { %v7186_v11 = vadd.f32 %v2943_v52, %v2935_v32 }
0x30af   :  { %5337 = vtanh.f32 %v7186_v11 }
0x30b9   :  { %v5338_v21 = vpop.eup %5337 }
0x30ba   :  { %2948 = vrot.lane.b32.xlu0 %v5338_v21, %s5517_s11 }
0x312c   :  { %v2949_v33 = vpop.permute.xlu0 %2948 }
0x312d   :  { %v7190_v59 = vmul.f32 %v2949_v33, %v2933_v10 }
0x312f   :  { %8174 = vst [vmem:[#allocation16_spill] sm:$0xff] %v7190_v59  ;;  %2965 = vperm.xlu0 %5047, %v7190_v59   ;;  %2959 = vperm.xlu1 %5046, %v7190_v59  }
0x3133   :  { %5050 = vset.pattern.permute.xlu0 %v8173_v7  ;;  %5048 = vset.pattern.permute.xlu1 %v8171_v16 }
0x3134   :  { %2983 = vperm.xlu0 %5050, %v7190_v59   ;;  %2971 = vperm.xlu1 %5048, %v7190_v59  }
0x3138   :  { %5053 = vset.pattern.permute.xlu0 %v8167_v25  ;;  %5049 = vset.pattern.permute.xlu1 %v8168_v6 }
0x3139   :  { %3001 = vperm.xlu0 %5053, %v7190_v59   ;;  %2977 = vperm.xlu1 %5049, %v7190_v59  }
0x313d   :  { %5056 = vset.pattern.permute.xlu0 %v8158_v56  ;;  %5051 = vset.pattern.permute.xlu1 %v8169_v17 }
0x313e   :  { %3019 = vperm.xlu0 %5056, %v7190_v59   ;;  %2989 = vperm.xlu1 %5051, %v7190_v59  }
0x3142   :  { %5059 = vset.pattern.permute.xlu0 %v8160_v38  ;;  %5052 = vset.pattern.permute.xlu1 %v8170_v62 }
0x3143   :  { %3037 = vperm.xlu0 %5059, %v7190_v59   ;;  %2995 = vperm.xlu1 %5052, %v7190_v59  }
0x3147   :  { %5054 = vset.pattern.permute.xlu1 %v8163_v4  ;;  %5063 = vset.pattern.permute.xlu0 %v8155_v28 }
0x3148   :  { %3007 = vperm.xlu1 %5054, %v7190_v59  }
0x314c   :  { %5055 = vset.pattern.permute.xlu1 %v8164_v51 }
0x314d   :  { %3013 = vperm.xlu1 %5055, %v7190_v59  }
0x3151   :  { %5057 = vset.pattern.permute.xlu1 %v8159_v39 }
0x3152   :  { %3025 = vperm.xlu1 %5057, %v7190_v59  }
0x3156   :  { %5058 = vset.pattern.permute.xlu1 %v8165_v15 }
0x3157   :  { %3031 = vperm.xlu1 %5058, %v7190_v59  }
0x315b   :  { %5060 = vset.pattern.permute.xlu1 %v8161_v49 }
0x315c   :  { %3043 = vperm.xlu1 %5060, %v7190_v59  }
0x3160   :  { %5061 = vset.pattern.permute.xlu1 %v8157_v18 }
0x3161   :  { %3049 = vperm.xlu1 %5061, %v7190_v59  }
0x3165   :  { %5062 = vset.pattern.permute.xlu1 %v8162_v55 }
0x31ae   :  { %v2960_v48 = vpop.permute.xlu1 %2959  ;;  %v2966_v40 = vpop.permute.xlu0 %2965 }
0x31af   :  { %v2962_v20 = vmul.f32 %v6862_v2, %v2960_v48  ;;  %v2968_v50 = vmul.f32 %v6868_v26, %v2966_v40 }
0x31b1   :  { %v2963_v44 = vadd.f32 %v2962_v20, %v2957_v57 }
0x31b3   :  { %v2972_v46 = vpop.permute.xlu1 %2971  ;;  %v2969_v43 = vadd.f32 %v2968_v50, %v2963_v44  ;;  %v2984_v0 = vpop.permute.xlu0 %2983 }
0x31b4   :  { %v2974_v61 = vmul.f32 %v6874_v53, %v2972_v46  ;;  %v2986_v52 = vmul.f32 %v6886_v54, %v2984_v0 }
0x31b6   :  { %v2975_v10 = vadd.f32 %v2974_v61, %v2969_v43 }
0x31b8   :  { %v2978_v30 = vpop.permute.xlu1 %2977  ;;  %v3002_v40 = vpop.permute.xlu0 %3001 }
0x31b9   :  { %v2980_v5 = vmul.f32 %v6880_v22, %v2978_v30  ;;  %v3004_v53 = vmul.f32 %v6961_v3, %v3002_v40 }
0x31bb   :  { %v2981_v32 = vadd.f32 %v2980_v5, %v2975_v10 }
0x31bd   :  { %v2990_v21 = vpop.permute.xlu1 %2989  ;;  %v2987_v33 = vadd.f32 %v2986_v52, %v2981_v32  ;;  %v3020_v61 = vpop.permute.xlu0 %3019 }
0x31be   :  { %v2992_v2 = vmul.f32 %v6892_v34, %v2990_v21  ;;  %v3022_v34 = vmul.f32 %v6979_v45, %v3020_v61 }
0x31c0   :  { %v2993_v20 = vadd.f32 %v2992_v2, %v2987_v33 }
0x31c2   :  { %v2996_v48 = vpop.permute.xlu1 %2995  ;;  %v3038_v21 = vpop.permute.xlu0 %3037 }
0x31c3   :  { %v2998_v26 = vmul.f32 %v6898_v47, %v2996_v48  ;;  %v3040_v2 = vmul.f32 %v6997_v29, %v3038_v21 }
0x31c5   :  { %v2999_v57 = vadd.f32 %v2998_v26, %v2993_v20 }
0x31c7   :  { %v3008_v44 = vpop.permute.xlu1 %3007  ;;  %v3005_v50 = vadd.f32 %v3004_v53, %v2999_v57 }
0x31c8   :  { %v3010_v22 = vmul.f32 %v6967_v37, %v3008_v44 }
0x31ca   :  { %v3011_v43 = vadd.f32 %v3010_v22, %v3005_v50 }
0x31cc   :  { %v3014_v46 = vpop.permute.xlu1 %3013 }
0x31cd   :  { %v3016_v54 = vmul.f32 %v6973_v23, %v3014_v46 }
0x31cf   :  { %v3017_v30 = vadd.f32 %v3016_v54, %v3011_v43 }
0x31d1   :  { %v3026_v10 = vpop.permute.xlu1 %3025  ;;  %v3023_v5 = vadd.f32 %v3022_v34, %v3017_v30 }
0x31d2   :  { %v3028_v47 = vmul.f32 %v6985_v60, %v3026_v10 }
0x31d4   :  { %v3029_v32 = vadd.f32 %v3028_v47, %v3023_v5 }
0x31d6   :  { %v3032_v0 = vpop.permute.xlu1 %3031 }
0x31d7   :  { %v3034_v52 = vmul.f32 %v6991_v19, %v3032_v0 }
0x31d9   :  { %v3035_v33 = vadd.f32 %v3034_v52, %v3029_v32  ;;  %v7284_v52 = vld [vmem:[%s8094_s4] sm:$0x1] }
0x31db   :  { %v3044_v48 = vpop.permute.xlu1 %3043  ;;  %v3041_v20 = vadd.f32 %v3040_v2, %v3035_v33  ;;  %v3081_v2 = vld [vmem:[#allocation2 + $0x17] sm:$0x1] }
0x31dc   :  { %v3046_v26 = vmul.f32 %v7003_v24, %v3044_v48 }
0x31de   :  { %v3047_v57 = vadd.f32 %v3046_v26, %v3041_v20  ;;  %v7290_v20 = vld [vmem:[%s8094_s4 + $0x1] sm:$0x1] }
0x31e0   :  { %v3050_v40 = vpop.permute.xlu1 %3049 }
0x31e1   :  { %v3052_v53 = vmul.f32 %v7009_v36, %v3050_v40 }
0x31e3   :  { %v3053_v44 = vadd.f32 %v3052_v53, %v3047_v57  ;;  %v7296_v53 = vld [vmem:[%s8094_s4 + $0x2] sm:$0x1] }
0x31e5   :  { %5339 = vtanh.f32 %v3053_v44  ;;  %v3054_v22 = vmul.f32 0.5, %v3053_v44 }
0x31e7   :  { %5341 = vtanh.f32 %v3054_v22 }
0x31ef   :  { %v5340_v50 = vpop.eup %5339 }
0x31f0   :  { %3061 = vrot.lane.b32.xlu0 %v5340_v50, %s5516_s30 }
0x31f1   :  { %v5342_v46 = vpop.eup %5341 }
0x31f2   :  { %v3056_v43 = vmul.f32 0.5, %v5342_v46  ;;  %v7302_v46 = vld [vmem:[%s8094_s4 + $0x3] sm:$0x1] }
0x31f4   :  { %v3057_v54 = vadd.f32 0.5, %v3056_v43 }
0x31f6   :  { %v3059_v34 = vmul.f32 %v3057_v54, %v7186_v11 }
0x3262   :  { %v3062_v61 = vpop.permute.xlu0 %3061 }
0x3263   :  { %v3064_v30 = vmul.f32 %v3062_v61, %v3057_v54 }
0x3265   :  { %3066 = vrot.lane.b32.xlu1 %v3064_v30, %s5517_s11  ;;  %v7308_v30 = vld [vmem:[%s8094_s4 + $0x4] sm:$0x1] }
0x32d7   :  { %v3067_v10 = vpop.permute.xlu1 %3066 }
0x32d8   :  { %v7243_v5 = vadd.f32 %v3067_v10, %v3059_v34 }
0x32da   :  { %5343 = vtanh.f32 %v7243_v5 }
0x32e4   :  { %v5344_v47 = vpop.eup %5343 }
0x32e5   :  { %3072 = vrot.lane.b32.xlu0 %v5344_v47, %s5517_s11 }
0x3357   :  { %v3073_v0 = vpop.permute.xlu0 %3072 }
0x3358   :  { %v7247_v32 = vmul.f32 %v3073_v0, %v3057_v54  ;;  %v7314_v0 = vld [vmem:[%s8094_s4 + $0x5] sm:$0x1] }
0x335a   :  { %3089 = vperm.xlu0 %5063, %v7247_v32   ;;  %3083 = vperm.xlu1 %5062, %v7247_v32  }
0x335e   :  { %5066 = vset.pattern.permute.xlu0 %v8173_v7  ;;  %5064 = vset.pattern.permute.xlu1 %v8171_v16 }
0x335f   :  { %3107 = vperm.xlu0 %5066, %v7247_v32   ;;  %3095 = vperm.xlu1 %5064, %v7247_v32  }
0x3363   :  { %5069 = vset.pattern.permute.xlu0 %v8167_v25  ;;  %5065 = vset.pattern.permute.xlu1 %v8168_v6 }
0x3364   :  { %3125 = vperm.xlu0 %5069, %v7247_v32   ;;  %3101 = vperm.xlu1 %5065, %v7247_v32  }
0x3368   :  { %5072 = vset.pattern.permute.xlu0 %v8158_v56  ;;  %5067 = vset.pattern.permute.xlu1 %v8169_v17 }
0x3369   :  { %3143 = vperm.xlu0 %5072, %v7247_v32   ;;  %3113 = vperm.xlu1 %5067, %v7247_v32  }
0x336d   :  { %5075 = vset.pattern.permute.xlu0 %v8160_v38  ;;  %5068 = vset.pattern.permute.xlu1 %v8170_v62 }
0x336e   :  { %3161 = vperm.xlu0 %5075, %v7247_v32   ;;  %3119 = vperm.xlu1 %5068, %v7247_v32  }
0x3372   :  { %5070 = vset.pattern.permute.xlu1 %v8163_v4  ;;  %5079 = vset.pattern.permute.xlu0 %v8155_v28 }
0x3373   :  { %3131 = vperm.xlu1 %5070, %v7247_v32  }
0x3377   :  { %5071 = vset.pattern.permute.xlu1 %v8164_v51 }
0x3378   :  { %3137 = vperm.xlu1 %5071, %v7247_v32  }
0x337c   :  { %5073 = vset.pattern.permute.xlu1 %v8159_v39 }
0x337d   :  { %3149 = vperm.xlu1 %5073, %v7247_v32  }
0x3381   :  { %5074 = vset.pattern.permute.xlu1 %v8165_v15 }
0x3382   :  { %3155 = vperm.xlu1 %5074, %v7247_v32  }
0x3386   :  { %5076 = vset.pattern.permute.xlu1 %v8161_v49 }
0x3387   :  { %3167 = vperm.xlu1 %5076, %v7247_v32  }
0x338b   :  { %5077 = vset.pattern.permute.xlu1 %v8157_v18 }
0x338c   :  { %3173 = vperm.xlu1 %5077, %v7247_v32  }
0x3390   :  { %5078 = vset.pattern.permute.xlu1 %v8162_v55 }
0x33d9   :  { %v3084_v11 = vpop.permute.xlu1 %3083  ;;  %v3090_v33 = vpop.permute.xlu0 %3089 }
0x33da   :  { %v3086_v21 = vmul.f32 %v7284_v52, %v3084_v11  ;;  %v3092_v26 = vmul.f32 %v7290_v20, %v3090_v33 }
0x33dc   :  { %v3087_v48 = vadd.f32 %v3086_v21, %v3081_v2  ;;  %v7320_v2 = vld [vmem:[%s8094_s4 + $0x6] sm:$0x1] }
0x33de   :  { %v3096_v40 = vpop.permute.xlu1 %3095  ;;  %v3093_v57 = vadd.f32 %v3092_v26, %v3087_v48  ;;  %v3108_v54 = vpop.permute.xlu0 %3107 }
0x33df   :  { %v3098_v44 = vmul.f32 %v7296_v53, %v3096_v40  ;;  %v3110_v34 = vmul.f32 %v7308_v30, %v3108_v54 }
0x33e1   :  { %v3099_v22 = vadd.f32 %v3098_v44, %v3093_v57 }
0x33e3   :  { %v3102_v50 = vpop.permute.xlu1 %3101  ;;  %v3126_v26 = vpop.permute.xlu0 %3125 }
0x33e4   :  { %v3104_v43 = vmul.f32 %v7302_v46, %v3102_v50  ;;  %v3128_v57 = vmul.f32 %v6961_v3, %v3126_v26 }
0x33e6   :  { %v3105_v61 = vadd.f32 %v3104_v43, %v3099_v22 }
0x33e8   :  { %v3114_v10 = vpop.permute.xlu1 %3113  ;;  %v3111_v47 = vadd.f32 %v3110_v34, %v3105_v61  ;;  %v3144_v34 = vpop.permute.xlu0 %3143 }
0x33e9   :  { %v3116_v11 = vmul.f32 %v7314_v0, %v3114_v10 }
0x33eb   :  { %v3117_v33 = vadd.f32 %v3116_v11, %v3111_v47  ;;  %v3146_v47 = vmul.f32 %v6979_v45, %v3144_v34 }
0x33ed   :  { %v3120_v21 = vpop.permute.xlu1 %3119 }
0x33ee   :  { %v3122_v48 = vmul.f32 %v7320_v2, %v3120_v21 }
0x33f0   :  { %v3123_v40 = vadd.f32 %v3122_v48, %v3117_v33  ;;  %v3162_v48 = vpop.permute.xlu0 %3161 }
0x33f2   :  { %v3132_v44 = vpop.permute.xlu1 %3131  ;;  %v3129_v50 = vadd.f32 %v3128_v57, %v3123_v40 }
0x33f3   :  { %v3134_v22 = vmul.f32 %v6967_v37, %v3132_v44  ;;  %v3164_v37 = vmul.f32 %v6997_v29, %v3162_v48 }
0x33f5   :  { %v3135_v54 = vadd.f32 %v3134_v22, %v3129_v50 }
0x33f7   :  { %v3138_v43 = vpop.permute.xlu1 %3137 }
0x33f8   :  { %v3140_v61 = vmul.f32 %v6973_v23, %v3138_v43 }
0x33fa   :  { %v3141_v10 = vadd.f32 %v3140_v61, %v3135_v54 }
0x33fc   :  { %v3150_v11 = vpop.permute.xlu1 %3149  ;;  %v3147_v59 = vadd.f32 %v3146_v47, %v3141_v10 }
0x33fd   :  { %v3152_v21 = vmul.f32 %v6985_v60, %v3150_v11 }
0x33ff   :  { %v3153_v33 = vadd.f32 %v3152_v21, %v3147_v59 }
0x3401   :  { %v3156_v14 = vpop.permute.xlu1 %3155 }
0x3402   :  { %v3158_v3 = vmul.f32 %v6991_v19, %v3156_v14 }
0x3404   :  { %v3159_v26 = vadd.f32 %v3158_v3, %v3153_v33  ;;  %v3205_v33 = vld [vmem:[#allocation2 + $0x18] sm:$0x1] }
0x3406   :  { %v3168_v40 = vpop.permute.xlu1 %3167  ;;  %v3165_v57 = vadd.f32 %v3164_v37, %v3159_v26 }
0x3407   :  { %v3170_v23 = vmul.f32 %v7003_v24, %v3168_v40 }
0x3409   :  { %v3171_v50 = vadd.f32 %v3170_v23, %v3165_v57 }
0x340b   :  { %v3174_v44 = vpop.permute.xlu1 %3173 }
0x340c   :  { %v3176_v45 = vmul.f32 %v7009_v36, %v3174_v44 }
0x340e   :  { %v3177_v22 = vadd.f32 %v3176_v45, %v3171_v50 }
0x3410   :  { %5345 = vtanh.f32 %v3177_v22  ;;  %v3178_v60 = vmul.f32 0.5, %v3177_v22 }
0x3412   :  { %5347 = vtanh.f32 %v3178_v60 }
0x341a   :  { %v5346_v43 = vpop.eup %5345 }
0x341b   :  { %3185 = vrot.lane.b32.xlu0 %v5346_v43, %s5516_s30 }
0x341c   :  { %v5348_v14 = vpop.eup %5347 }
0x341d   :  { %v3180_v19 = vmul.f32 0.5, %v5348_v14 }
0x341f   :  { %v3181_v59 = vadd.f32 0.5, %v3180_v19 }
0x3421   :  { %v3183_v24 = vmul.f32 %v3181_v59, %v7243_v5 }
0x348d   :  { %v3186_v54 = vpop.permute.xlu0 %3185 }
0x348e   :  { %v3188_v29 = vmul.f32 %v3186_v54, %v3181_v59 }
0x3490   :  { %3190 = vrot.lane.b32.xlu1 %v3188_v29, %s5517_s11 }
0x3502   :  { %v3191_v61 = vpop.permute.xlu1 %3190 }
0x3503   :  { %v7335_v34 = vadd.f32 %v3191_v61, %v3183_v24  ;;  %v7383_v61 = vld [vmem:[%s8094_s4 + $0x7] sm:$0x1] }
0x3505   :  { %5349 = vtanh.f32 %v7335_v34 }
0x350f   :  { %v5350_v36 = vpop.eup %5349 }
0x3510   :  { %3196 = vrot.lane.b32.xlu0 %v5350_v36, %s5517_s11 }
0x3582   :  { %v3197_v10 = vpop.permute.xlu0 %3196 }
0x3583   :  { %v7339_v47 = vmul.f32 %v3197_v10, %v3181_v59 }
0x3585   :  { %8175 = vst [vmem:[#allocation17_spill] sm:$0xff] %v7339_v47  ;;  %3213 = vperm.xlu0 %5079, %v7339_v47   ;;  %3207 = vperm.xlu1 %5078, %v7339_v47  }
0x3589   :  { %5082 = vset.pattern.permute.xlu0 %v8173_v7  ;;  %5080 = vset.pattern.permute.xlu1 %v8171_v16 }
0x358a   :  { %3231 = vperm.xlu0 %5082, %v7339_v47   ;;  %3219 = vperm.xlu1 %5080, %v7339_v47  }
0x358e   :  { %5085 = vset.pattern.permute.xlu0 %v8167_v25  ;;  %5081 = vset.pattern.permute.xlu1 %v8168_v6 }
0x358f   :  { %3249 = vperm.xlu0 %5085, %v7339_v47   ;;  %3225 = vperm.xlu1 %5081, %v7339_v47  }
0x3593   :  { %5088 = vset.pattern.permute.xlu0 %v8158_v56  ;;  %5083 = vset.pattern.permute.xlu1 %v8169_v17 }
0x3594   :  { %3267 = vperm.xlu0 %5088, %v7339_v47   ;;  %3237 = vperm.xlu1 %5083, %v7339_v47  }
0x3598   :  { %5091 = vset.pattern.permute.xlu0 %v8160_v38  ;;  %5084 = vset.pattern.permute.xlu1 %v8170_v62 }
0x3599   :  { %3285 = vperm.xlu0 %5091, %v7339_v47   ;;  %3243 = vperm.xlu1 %5084, %v7339_v47  }
0x359d   :  { %5086 = vset.pattern.permute.xlu1 %v8163_v4  ;;  %5095 = vset.pattern.permute.xlu0 %v8155_v28 }
0x359e   :  { %3255 = vperm.xlu1 %5086, %v7339_v47  }
0x35a2   :  { %5087 = vset.pattern.permute.xlu1 %v8164_v51 }
0x35a3   :  { %3261 = vperm.xlu1 %5087, %v7339_v47  }
0x35a7   :  { %5089 = vset.pattern.permute.xlu1 %v8159_v39 }
0x35a8   :  { %3273 = vperm.xlu1 %5089, %v7339_v47  }
0x35ac   :  { %5090 = vset.pattern.permute.xlu1 %v8165_v15 }
0x35ad   :  { %3279 = vperm.xlu1 %5090, %v7339_v47  }
0x35b1   :  { %5092 = vset.pattern.permute.xlu1 %v8161_v49 }
0x35b2   :  { %3291 = vperm.xlu1 %5092, %v7339_v47  }
0x35b6   :  { %5093 = vset.pattern.permute.xlu1 %v8157_v18 }
0x35b7   :  { %3297 = vperm.xlu1 %5093, %v7339_v47  }
0x35bb   :  { %5094 = vset.pattern.permute.xlu1 %v8162_v55 }
0x3604   :  { %v3208_v5 = vpop.permute.xlu1 %3207  ;;  %v3214_v21 = vpop.permute.xlu0 %3213 }
0x3605   :  { %v3210_v11 = vmul.f32 %v7284_v52, %v3208_v5  ;;  %v3216_v48 = vmul.f32 %v7290_v20, %v3214_v21 }
0x3607   :  { %v3211_v3 = vadd.f32 %v3210_v11, %v3205_v33  ;;  %v7389_v11 = vld [vmem:[%s8094_s4 + $0x8] sm:$0x1] }
0x3609   :  { %v3220_v26 = vpop.permute.xlu1 %3219  ;;  %v3217_v37 = vadd.f32 %v3216_v48, %v3211_v3  ;;  %v3232_v50 = vpop.permute.xlu0 %3231  ;;  %v7395_v48 = vld [vmem:[%s8094_s4 + $0x9] sm:$0x1] }
0x360a   :  { %v3222_v40 = vmul.f32 %v7296_v53, %v3220_v26  ;;  %v3234_v22 = vmul.f32 %v7308_v30, %v3232_v50 }
0x360c   :  { %v3223_v23 = vadd.f32 %v3222_v40, %v3217_v37 }
0x360e   :  { %v3226_v57 = vpop.permute.xlu1 %3225  ;;  %v3250_v29 = vpop.permute.xlu0 %3249 }
0x360f   :  { %v3228_v44 = vmul.f32 %v7302_v46, %v3226_v57  ;;  %v3252_v36 = vmul.f32 %v7383_v61, %v3250_v29  ;;  %v7401_v57 = vld [vmem:[%s8094_s4 + $0xa] sm:$0x1]  ;;  %v7419_v29 = vld [vmem:[%s8094_s4 + $0xd] sm:$0x1] }
0x3611   :  { %v3229_v45 = vadd.f32 %v3228_v44, %v3223_v23 }
0x3613   :  { %v3238_v43 = vpop.permute.xlu1 %3237  ;;  %v3235_v60 = vadd.f32 %v3234_v22, %v3229_v45  ;;  %v3268_v37 = vpop.permute.xlu0 %3267  ;;  %v7407_v45 = vld [vmem:[%s8094_s4 + $0xb] sm:$0x1] }
0x3614   :  { %v3240_v14 = vmul.f32 %v7314_v0, %v3238_v43  ;;  %v3270_v23 = vmul.f32 %v7401_v57, %v3268_v37 }
0x3616   :  { %v3241_v59 = vadd.f32 %v3240_v14, %v3235_v60  ;;  %v7413_v14 = vld [vmem:[%s8094_s4 + $0xc] sm:$0x1] }
0x3618   :  { %v3244_v19 = vpop.permute.xlu1 %3243 }
0x3619   :  { %v3246_v54 = vmul.f32 %v7320_v2, %v3244_v19 }
0x361b   :  { %v3247_v24 = vadd.f32 %v3246_v54, %v3241_v59  ;;  %v3286_v59 = vpop.permute.xlu0 %3285 }
0x361d   :  { %v3256_v10 = vpop.permute.xlu1 %3255  ;;  %v3253_v5 = vadd.f32 %v3252_v36, %v3247_v24  ;;  %v3288_v24 = vmul.f32 %v7419_v29, %v3286_v59 }
0x361e   :  { %v3258_v21 = vmul.f32 %v7389_v11, %v3256_v10 }
0x3620   :  { %v3259_v3 = vadd.f32 %v3258_v21, %v3253_v5  ;;  %v7425_v5 = vld [vmem:[%s8094_s4 + $0xe] sm:$0x1] }
0x3622   :  { %v3262_v33 = vpop.permute.xlu1 %3261 }
0x3623   :  { %v3264_v26 = vmul.f32 %v7395_v48, %v3262_v33 }
0x3625   :  { %v3265_v40 = vadd.f32 %v3264_v26, %v3259_v3  ;;  %v7431_v26 = vld [vmem:[%s8094_s4 + $0xf] sm:$0x1] }
0x3627   :  { %v3274_v44 = vpop.permute.xlu1 %3273  ;;  %v3271_v50 = vadd.f32 %v3270_v23, %v3265_v40 }
0x3628   :  { %v3276_v22 = vmul.f32 %v7407_v45, %v3274_v44 }
0x362a   :  { %v3277_v60 = vadd.f32 %v3276_v22, %v3271_v50 }
0x362c   :  { %v3280_v43 = vpop.permute.xlu1 %3279 }
0x362d   :  { %v3282_v19 = vmul.f32 %v7413_v14, %v3280_v43 }
0x362f   :  { %v3283_v54 = vadd.f32 %v3282_v19, %v3277_v60 }
0x3631   :  { %v3292_v36 = vpop.permute.xlu1 %3291  ;;  %v3289_v10 = vadd.f32 %v3288_v24, %v3283_v54 }
0x3632   :  { %v3294_v21 = vmul.f32 %v7425_v5, %v3292_v36 }
0x3634   :  { %v3295_v3 = vadd.f32 %v3294_v21, %v3289_v10 }
0x3636   :  { %v3298_v33 = vpop.permute.xlu1 %3297 }
0x3637   :  { %v3300_v37 = vmul.f32 %v7431_v26, %v3298_v33 }
0x3639   :  { %v3301_v40 = vadd.f32 %v3300_v37, %v3295_v3  ;;  %v3329_v37 = vld [vmem:[#allocation2 + $0x19] sm:$0x1] }
0x363b   :  { %5351 = vtanh.f32 %v3301_v40  ;;  %v3302_v44 = vmul.f32 0.5, %v3301_v40 }
0x363d   :  { %5353 = vtanh.f32 %v3302_v44 }
0x3645   :  { %v5352_v23 = vpop.eup %5351 }
0x3646   :  { %3309 = vrot.lane.b32.xlu0 %v5352_v23, %s5516_s30 }
0x3647   :  { %v5354_v50 = vpop.eup %5353 }
0x3648   :  { %v3304_v22 = vmul.f32 0.5, %v5354_v50 }
0x364a   :  { %v3305_v43 = vadd.f32 0.5, %v3304_v22 }
0x364c   :  { %v3307_v59 = vmul.f32 %v3305_v43, %v7335_v34 }
0x36b8   :  { %v3310_v60 = vpop.permute.xlu0 %3309 }
0x36b9   :  { %v3312_v19 = vmul.f32 %v3310_v60, %v3305_v43 }
0x36bb   :  { %3314 = vrot.lane.b32.xlu1 %v3312_v19, %s5517_s11 }
0x372d   :  { %v3315_v54 = vpop.permute.xlu1 %3314 }
0x372e   :  { %v7437_v24 = vadd.f32 %v3315_v54, %v3307_v59 }
0x3730   :  { %5355 = vtanh.f32 %v7437_v24 }
0x373a   :  { %v5356_v36 = vpop.eup %5355 }
0x373b   :  { %3320 = vrot.lane.b32.xlu0 %v5356_v36, %s5517_s11 }
0x37ad   :  { %v3321_v10 = vpop.permute.xlu0 %3320 }
0x37ae   :  { %v7441_v21 = vmul.f32 %v3321_v10, %v3305_v43 }
0x37b0   :  { %8176 = vst [vmem:[#allocation18_spill] sm:$0xff] %v7441_v21  ;;  %3337 = vperm.xlu0 %5095, %v7441_v21   ;;  %3331 = vperm.xlu1 %5094, %v7441_v21  }
0x37b4   :  { %5098 = vset.pattern.permute.xlu0 %v8173_v7  ;;  %5096 = vset.pattern.permute.xlu1 %v8171_v16 }
0x37b5   :  { %3355 = vperm.xlu0 %5098, %v7441_v21   ;;  %3343 = vperm.xlu1 %5096, %v7441_v21  }
0x37b9   :  { %5101 = vset.pattern.permute.xlu0 %v8167_v25  ;;  %5097 = vset.pattern.permute.xlu1 %v8168_v6 }
0x37ba   :  { %3373 = vperm.xlu0 %5101, %v7441_v21   ;;  %3349 = vperm.xlu1 %5097, %v7441_v21  }
0x37be   :  { %5104 = vset.pattern.permute.xlu0 %v8158_v56  ;;  %5099 = vset.pattern.permute.xlu1 %v8169_v17 }
0x37bf   :  { %3391 = vperm.xlu0 %5104, %v7441_v21   ;;  %3361 = vperm.xlu1 %5099, %v7441_v21  }
0x37c3   :  { %5107 = vset.pattern.permute.xlu0 %v8160_v38  ;;  %5100 = vset.pattern.permute.xlu1 %v8170_v62 }
0x37c4   :  { %3409 = vperm.xlu0 %5107, %v7441_v21   ;;  %3367 = vperm.xlu1 %5100, %v7441_v21  }
0x37c8   :  { %5102 = vset.pattern.permute.xlu1 %v8163_v4  ;;  %5111 = vset.pattern.permute.xlu0 %v8155_v28 }
0x37c9   :  { %3379 = vperm.xlu1 %5102, %v7441_v21  }
0x37cd   :  { %5103 = vset.pattern.permute.xlu1 %v8164_v51 }
0x37ce   :  { %3385 = vperm.xlu1 %5103, %v7441_v21  }
0x37d2   :  { %5105 = vset.pattern.permute.xlu1 %v8159_v39 }
0x37d3   :  { %3397 = vperm.xlu1 %5105, %v7441_v21  }
0x37d7   :  { %5106 = vset.pattern.permute.xlu1 %v8165_v15 }
0x37d8   :  { %3403 = vperm.xlu1 %5106, %v7441_v21  }
0x37dc   :  { %5108 = vset.pattern.permute.xlu1 %v8161_v49 }
0x37dd   :  { %3415 = vperm.xlu1 %5108, %v7441_v21  }
0x37e1   :  { %5109 = vset.pattern.permute.xlu1 %v8157_v18 }
0x37e2   :  { %3421 = vperm.xlu1 %5109, %v7441_v21  }
0x37e6   :  { %5110 = vset.pattern.permute.xlu1 %v8162_v55 }
0x382f   :  { %v3332_v34 = vpop.permute.xlu1 %3331  ;;  %v3338_v3 = vpop.permute.xlu0 %3337 }
0x3830   :  { %v3334_v33 = vmul.f32 %v7284_v52, %v3332_v34  ;;  %v3340_v23 = vmul.f32 %v7290_v20, %v3338_v3 }
0x3832   :  { %v3335_v40 = vadd.f32 %v3334_v33, %v3329_v37 }
0x3834   :  { %v3344_v44 = vpop.permute.xlu1 %3343  ;;  %v3341_v50 = vadd.f32 %v3340_v23, %v3335_v40  ;;  %v3356_v59 = vpop.permute.xlu0 %3355 }
0x3835   :  { %v3346_v22 = vmul.f32 %v7296_v53, %v3344_v44  ;;  %v3358_v36 = vmul.f32 %v7308_v30, %v3356_v59 }
0x3837   :  { %v3347_v60 = vadd.f32 %v3346_v22, %v3341_v50 }
0x3839   :  { %v3350_v43 = vpop.permute.xlu1 %3349  ;;  %v3374_v37 = vpop.permute.xlu0 %3373 }
0x383a   :  { %v3352_v19 = vmul.f32 %v7302_v46, %v3350_v43  ;;  %v3376_v23 = vmul.f32 %v7383_v61, %v3374_v37 }
0x383c   :  { %v3353_v54 = vadd.f32 %v3352_v19, %v3347_v60 }
0x383e   :  { %v3362_v10 = vpop.permute.xlu1 %3361  ;;  %v3359_v47 = vadd.f32 %v3358_v36, %v3353_v54  ;;  %v3392_v59 = vpop.permute.xlu0 %3391 }
0x383f   :  { %v3364_v34 = vmul.f32 %v7314_v0, %v3362_v10  ;;  %v3394_v36 = vmul.f32 %v7401_v57, %v3392_v59 }
0x3841   :  { %v3365_v33 = vadd.f32 %v3364_v34, %v3359_v47 }
0x3843   :  { %v3368_v21 = vpop.permute.xlu1 %3367  ;;  %v3410_v37 = vpop.permute.xlu0 %3409 }
0x3844   :  { %v3370_v3 = vmul.f32 %v7320_v2, %v3368_v21 }
0x3846   :  { %v3371_v40 = vadd.f32 %v3370_v3, %v3365_v33 }
0x3848   :  { %v3380_v44 = vpop.permute.xlu1 %3379  ;;  %v3377_v50 = vadd.f32 %v3376_v23, %v3371_v40  ;;  %v3412_v23 = vmul.f32 %v7419_v29, %v3410_v37 }
0x3849   :  { %v3382_v22 = vmul.f32 %v7389_v11, %v3380_v44 }
0x384b   :  { %v3383_v60 = vadd.f32 %v3382_v22, %v3377_v50 }
0x384d   :  { %v3386_v43 = vpop.permute.xlu1 %3385 }
0x384e   :  { %v3388_v19 = vmul.f32 %v7395_v48, %v3386_v43 }
0x3850   :  { %v3389_v54 = vadd.f32 %v3388_v19, %v3383_v60 }
0x3852   :  { %v3398_v10 = vpop.permute.xlu1 %3397  ;;  %v3395_v47 = vadd.f32 %v3394_v36, %v3389_v54 }
0x3853   :  { %v3400_v21 = vmul.f32 %v7407_v45, %v3398_v10 }
0x3855   :  { %v3401_v33 = vadd.f32 %v3400_v21, %v3395_v47 }
0x3857   :  { %v3404_v34 = vpop.permute.xlu1 %3403 }
0x3858   :  { %v3406_v3 = vmul.f32 %v7413_v14, %v3404_v34 }
0x385a   :  { %v3407_v40 = vadd.f32 %v3406_v3, %v3401_v33 }
0x385c   :  { %v3416_v44 = vpop.permute.xlu1 %3415  ;;  %v3413_v50 = vadd.f32 %v3412_v23, %v3407_v40 }
0x385d   :  { %v3418_v22 = vmul.f32 %v7425_v5, %v3416_v44 }
0x385f   :  { %v3419_v60 = vadd.f32 %v3418_v22, %v3413_v50 }
0x3861   :  { %v3422_v43 = vpop.permute.xlu1 %3421 }
0x3862   :  { %v3424_v19 = vmul.f32 %v7431_v26, %v3422_v43 }
0x3864   :  { %v3425_v59 = vadd.f32 %v3424_v19, %v3419_v60  ;;  %v3453_v60 = vld [vmem:[#allocation2 + $0x1a] sm:$0x1] }
0x3866   :  { %5357 = vtanh.f32 %v3425_v59  ;;  %v3426_v36 = vmul.f32 0.5, %v3425_v59 }
0x3868   :  { %5359 = vtanh.f32 %v3426_v36 }
0x3870   :  { %v5358_v54 = vpop.eup %5357 }
0x3871   :  { %3433 = vrot.lane.b32.xlu0 %v5358_v54, %s5516_s30 }
0x3872   :  { %v5360_v10 = vpop.eup %5359 }
0x3873   :  { %v3428_v47 = vmul.f32 0.5, %v5360_v10 }
0x3875   :  { %v3429_v21 = vadd.f32 0.5, %v3428_v47 }
0x3877   :  { %v3431_v3 = vmul.f32 %v3429_v21, %v7437_v24 }
0x38e3   :  { %v3434_v34 = vpop.permute.xlu0 %3433 }
0x38e4   :  { %v3436_v33 = vmul.f32 %v3434_v34, %v3429_v21 }
0x38e6   :  { %3438 = vrot.lane.b32.xlu1 %v3436_v33, %s5517_s11 }
0x3958   :  { %v3439_v37 = vpop.permute.xlu1 %3438 }
0x3959   :  { %v7494_v40 = vadd.f32 %v3439_v37, %v3431_v3 }
0x395b   :  { %5361 = vtanh.f32 %v7494_v40 }
0x3965   :  { %v5362_v23 = vpop.eup %5361 }
0x3966   :  { %3444 = vrot.lane.b32.xlu0 %v5362_v23, %s5517_s11 }
0x39d8   :  { %v3445_v44 = vpop.permute.xlu0 %3444 }
0x39d9   :  { %v7498_v50 = vmul.f32 %v3445_v44, %v3429_v21 }
0x39db   :  { %8177 = vst [vmem:[#allocation19_spill] sm:$0xff] %v7498_v50  ;;  %3461 = vperm.xlu0 %5111, %v7498_v50   ;;  %3455 = vperm.xlu1 %5110, %v7498_v50  }
0x39df   :  { %5114 = vset.pattern.permute.xlu0 %v8173_v7  ;;  %5112 = vset.pattern.permute.xlu1 %v8171_v16 }
0x39e0   :  { %3479 = vperm.xlu0 %5114, %v7498_v50   ;;  %3467 = vperm.xlu1 %5112, %v7498_v50  }
0x39e4   :  { %5117 = vset.pattern.permute.xlu0 %v8167_v25  ;;  %5113 = vset.pattern.permute.xlu1 %v8168_v6 }
0x39e5   :  { %3497 = vperm.xlu0 %5117, %v7498_v50   ;;  %3473 = vperm.xlu1 %5113, %v7498_v50  }
0x39e9   :  { %5120 = vset.pattern.permute.xlu0 %v8158_v56  ;;  %5115 = vset.pattern.permute.xlu1 %v8169_v17 }
0x39ea   :  { %3515 = vperm.xlu0 %5120, %v7498_v50   ;;  %3485 = vperm.xlu1 %5115, %v7498_v50  }
0x39ee   :  { %5123 = vset.pattern.permute.xlu0 %v8160_v38  ;;  %5116 = vset.pattern.permute.xlu1 %v8170_v62 }
0x39ef   :  { %3533 = vperm.xlu0 %5123, %v7498_v50   ;;  %3491 = vperm.xlu1 %5116, %v7498_v50  }
0x39f3   :  { %5118 = vset.pattern.permute.xlu1 %v8163_v4  ;;  %5127 = vset.pattern.permute.xlu0 %v8155_v28 }
0x39f4   :  { %3503 = vperm.xlu1 %5118, %v7498_v50  }
0x39f8   :  { %5119 = vset.pattern.permute.xlu1 %v8164_v51 }
0x39f9   :  { %3509 = vperm.xlu1 %5119, %v7498_v50  }
0x39fd   :  { %5121 = vset.pattern.permute.xlu1 %v8159_v39 }
0x39fe   :  { %3521 = vperm.xlu1 %5121, %v7498_v50  }
0x3a02   :  { %5122 = vset.pattern.permute.xlu1 %v8165_v15 }
0x3a03   :  { %3527 = vperm.xlu1 %5122, %v7498_v50  }
0x3a07   :  { %5124 = vset.pattern.permute.xlu1 %v8161_v49 }
0x3a08   :  { %3539 = vperm.xlu1 %5124, %v7498_v50  }
0x3a0c   :  { %5125 = vset.pattern.permute.xlu1 %v8157_v18 }
0x3a0d   :  { %3545 = vperm.xlu1 %5125, %v7498_v50  }
0x3a11   :  { %5126 = vset.pattern.permute.xlu1 %v8162_v55 }
0x3a5a   :  { %v3456_v24 = vpop.permute.xlu1 %3455  ;;  %v3462_v43 = vpop.permute.xlu0 %3461 }
0x3a5b   :  { %v3458_v22 = vmul.f32 %v7284_v52, %v3456_v24  ;;  %v3464_v59 = vmul.f32 %v7290_v20, %v3462_v43 }
0x3a5d   :  { %v3459_v19 = vadd.f32 %v3458_v22, %v3453_v60 }
0x3a5f   :  { %v3468_v54 = vpop.permute.xlu1 %3467  ;;  %v3465_v36 = vadd.f32 %v3464_v59, %v3459_v19  ;;  %v3480_v33 = vpop.permute.xlu0 %3479 }
0x3a60   :  { %v3470_v10 = vmul.f32 %v7296_v53, %v3468_v54  ;;  %v3482_v37 = vmul.f32 %v7308_v30, %v3480_v33 }
0x3a62   :  { %v3471_v21 = vadd.f32 %v3470_v10, %v3465_v36 }
0x3a64   :  { %v3474_v47 = vpop.permute.xlu1 %3473  ;;  %v3498_v60 = vpop.permute.xlu0 %3497 }
0x3a65   :  { %v3476_v34 = vmul.f32 %v7302_v46, %v3474_v47  ;;  %v3500_v59 = vmul.f32 %v7383_v61, %v3498_v60 }
0x3a67   :  { %v3477_v3 = vadd.f32 %v3476_v34, %v3471_v21 }
0x3a69   :  { %v3486_v23 = vpop.permute.xlu1 %3485  ;;  %v3483_v44 = vadd.f32 %v3482_v37, %v3477_v3  ;;  %v3516_v33 = vpop.permute.xlu0 %3515 }
0x3a6a   :  { %v3488_v24 = vmul.f32 %v7314_v0, %v3486_v23  ;;  %v3518_v37 = vmul.f32 %v7401_v57, %v3516_v33 }
0x3a6c   :  { %v3489_v22 = vadd.f32 %v3488_v24, %v3483_v44 }
0x3a6e   :  { %v3492_v50 = vpop.permute.xlu1 %3491  ;;  %v3534_v60 = vpop.permute.xlu0 %3533 }
0x3a6f   :  { %v3494_v43 = vmul.f32 %v7320_v2, %v3492_v50 }
0x3a71   :  { %v3495_v19 = vadd.f32 %v3494_v43, %v3489_v22 }
0x3a73   :  { %v3504_v54 = vpop.permute.xlu1 %3503  ;;  %v3501_v36 = vadd.f32 %v3500_v59, %v3495_v19  ;;  %v3536_v59 = vmul.f32 %v7419_v29, %v3534_v60 }
0x3a74   :  { %v3506_v10 = vmul.f32 %v7389_v11, %v3504_v54 }
0x3a76   :  { %v3507_v21 = vadd.f32 %v3506_v10, %v3501_v36 }
0x3a78   :  { %v3510_v47 = vpop.permute.xlu1 %3509 }
0x3a79   :  { %v3512_v34 = vmul.f32 %v7395_v48, %v3510_v47 }
0x3a7b   :  { %v3513_v3 = vadd.f32 %v3512_v34, %v3507_v21 }
0x3a7d   :  { %v3522_v23 = vpop.permute.xlu1 %3521  ;;  %v3519_v44 = vadd.f32 %v3518_v37, %v3513_v3 }
0x3a7e   :  { %v3524_v50 = vmul.f32 %v7407_v45, %v3522_v23 }
0x3a80   :  { %v3525_v22 = vadd.f32 %v3524_v50, %v3519_v44 }
0x3a82   :  { %v3528_v24 = vpop.permute.xlu1 %3527 }
0x3a83   :  { %v3530_v43 = vmul.f32 %v7413_v14, %v3528_v24 }
0x3a85   :  { %v3531_v19 = vadd.f32 %v3530_v43, %v3525_v22 }
0x3a87   :  { %v3540_v54 = vpop.permute.xlu1 %3539  ;;  %v3537_v36 = vadd.f32 %v3536_v59, %v3531_v19 }
0x3a88   :  { %v3542_v10 = vmul.f32 %v7425_v5, %v3540_v54 }
0x3a8a   :  { %v3543_v21 = vadd.f32 %v3542_v10, %v3537_v36 }
0x3a8c   :  { %v3546_v47 = vpop.permute.xlu1 %3545 }
0x3a8d   :  { %v3548_v34 = vmul.f32 %v7431_v26, %v3546_v47 }
0x3a8f   :  { %v3549_v33 = vadd.f32 %v3548_v34, %v3543_v21  ;;  %v3577_v21 = vld [vmem:[#allocation2 + $0x1b] sm:$0x1] }
0x3a91   :  { %5363 = vtanh.f32 %v3549_v33  ;;  %v3550_v37 = vmul.f32 0.5, %v3549_v33 }
0x3a93   :  { %5365 = vtanh.f32 %v3550_v37 }
0x3a9b   :  { %v5364_v3 = vpop.eup %5363 }
0x3a9c   :  { %3557 = vrot.lane.b32.xlu0 %v5364_v3, %s5516_s30 }
0x3a9d   :  { %v5366_v23 = vpop.eup %5365 }
0x3a9e   :  { %v3552_v44 = vmul.f32 0.5, %v5366_v23 }
0x3aa0   :  { %v3553_v50 = vadd.f32 0.5, %v3552_v44 }
0x3aa2   :  { %v3555_v43 = vmul.f32 %v3553_v50, %v7494_v40 }
0x3b0e   :  { %v3558_v24 = vpop.permute.xlu0 %3557 }
0x3b0f   :  { %v3560_v22 = vmul.f32 %v3558_v24, %v3553_v50 }
0x3b11   :  { %3562 = vrot.lane.b32.xlu1 %v3560_v22, %s5517_s11 }
0x3b83   :  { %v3563_v60 = vpop.permute.xlu1 %3562 }
0x3b84   :  { %v7551_v19 = vadd.f32 %v3563_v60, %v3555_v43 }
0x3b86   :  { %5367 = vtanh.f32 %v7551_v19 }
0x3b90   :  { %v5368_v59 = vpop.eup %5367 }
0x3b91   :  { %3568 = vrot.lane.b32.xlu0 %v5368_v59, %s5517_s11 }
0x3c03   :  { %v3569_v54 = vpop.permute.xlu0 %3568 }
0x3c04   :  { %v7555_v36 = vmul.f32 %v3569_v54, %v3553_v50 }
0x3c06   :  { %8178 = vst [vmem:[#allocation20_spill] sm:$0xff] %v7555_v36  ;;  %3585 = vperm.xlu0 %5127, %v7555_v36   ;;  %3579 = vperm.xlu1 %5126, %v7555_v36  }
0x3c0a   :  { %5130 = vset.pattern.permute.xlu0 %v8173_v7  ;;  %5128 = vset.pattern.permute.xlu1 %v8171_v16 }
0x3c0b   :  { %3603 = vperm.xlu0 %5130, %v7555_v36   ;;  %3591 = vperm.xlu1 %5128, %v7555_v36  }
0x3c0f   :  { %5133 = vset.pattern.permute.xlu0 %v8167_v25  ;;  %5129 = vset.pattern.permute.xlu1 %v8168_v6 }
0x3c10   :  { %3621 = vperm.xlu0 %5133, %v7555_v36   ;;  %3597 = vperm.xlu1 %5129, %v7555_v36  }
0x3c14   :  { %5136 = vset.pattern.permute.xlu0 %v8158_v56  ;;  %5131 = vset.pattern.permute.xlu1 %v8169_v17 }
0x3c15   :  { %3639 = vperm.xlu0 %5136, %v7555_v36   ;;  %3609 = vperm.xlu1 %5131, %v7555_v36  }
0x3c19   :  { %5139 = vset.pattern.permute.xlu0 %v8160_v38  ;;  %5132 = vset.pattern.permute.xlu1 %v8170_v62 }
0x3c1a   :  { %3657 = vperm.xlu0 %5139, %v7555_v36   ;;  %3615 = vperm.xlu1 %5132, %v7555_v36  }
0x3c1e   :  { %5134 = vset.pattern.permute.xlu1 %v8163_v4  ;;  %5143 = vset.pattern.permute.xlu0 %v8155_v28 }
0x3c1f   :  { %3627 = vperm.xlu1 %5134, %v7555_v36  }
0x3c23   :  { %5135 = vset.pattern.permute.xlu1 %v8164_v51 }
0x3c24   :  { %3633 = vperm.xlu1 %5135, %v7555_v36  }
0x3c28   :  { %5137 = vset.pattern.permute.xlu1 %v8159_v39 }
0x3c29   :  { %3645 = vperm.xlu1 %5137, %v7555_v36  }
0x3c2d   :  { %5138 = vset.pattern.permute.xlu1 %v8165_v15 }
0x3c2e   :  { %3651 = vperm.xlu1 %5138, %v7555_v36  }
0x3c32   :  { %5140 = vset.pattern.permute.xlu1 %v8161_v49 }
0x3c33   :  { %3663 = vperm.xlu1 %5140, %v7555_v36  }
0x3c37   :  { %5141 = vset.pattern.permute.xlu1 %v8157_v18 }
0x3c38   :  { %3669 = vperm.xlu1 %5141, %v7555_v36  }
0x3c3c   :  { %5142 = vset.pattern.permute.xlu1 %v8162_v55 }
0x3c85   :  { %v3580_v40 = vpop.permute.xlu1 %3579  ;;  %v3586_v47 = vpop.permute.xlu0 %3585 }
0x3c86   :  { %v3582_v10 = vmul.f32 %v7284_v52, %v3580_v40  ;;  %v3588_v33 = vmul.f32 %v7290_v20, %v3586_v47 }
0x3c88   :  { %v3583_v34 = vadd.f32 %v3582_v10, %v3577_v21 }
0x3c8a   :  { %v3592_v3 = vpop.permute.xlu1 %3591  ;;  %v3589_v37 = vadd.f32 %v3588_v33, %v3583_v34  ;;  %v3604_v22 = vpop.permute.xlu0 %3603 }
0x3c8b   :  { %v3594_v23 = vmul.f32 %v7296_v53, %v3592_v3  ;;  %v3606_v60 = vmul.f32 %v7308_v30, %v3604_v22 }
0x3c8d   :  { %v3595_v50 = vadd.f32 %v3594_v23, %v3589_v37 }
0x3c8f   :  { %v3598_v44 = vpop.permute.xlu1 %3597  ;;  %v3622_v21 = vpop.permute.xlu0 %3621 }
0x3c90   :  { %v3600_v24 = vmul.f32 %v7302_v46, %v3598_v44  ;;  %v3624_v33 = vmul.f32 %v7383_v61, %v3622_v21 }
0x3c92   :  { %v3601_v43 = vadd.f32 %v3600_v24, %v3595_v50 }
0x3c94   :  { %v3610_v59 = vpop.permute.xlu1 %3609  ;;  %v3607_v54 = vadd.f32 %v3606_v60, %v3601_v43  ;;  %v3640_v22 = vpop.permute.xlu0 %3639 }
0x3c95   :  { %v3612_v40 = vmul.f32 %v7314_v0, %v3610_v59  ;;  %v3642_v60 = vmul.f32 %v7401_v57, %v3640_v22 }
0x3c97   :  { %v3613_v10 = vadd.f32 %v3612_v40, %v3607_v54 }
0x3c99   :  { %v3616_v36 = vpop.permute.xlu1 %3615  ;;  %v3658_v21 = vpop.permute.xlu0 %3657 }
0x3c9a   :  { %v3618_v47 = vmul.f32 %v7320_v2, %v3616_v36 }
0x3c9c   :  { %v3619_v34 = vadd.f32 %v3618_v47, %v3613_v10 }
0x3c9e   :  { %v3628_v3 = vpop.permute.xlu1 %3627  ;;  %v3625_v37 = vadd.f32 %v3624_v33, %v3619_v34  ;;  %v3660_v33 = vmul.f32 %v7419_v29, %v3658_v21 }
0x3c9f   :  { %v3630_v23 = vmul.f32 %v7389_v11, %v3628_v3 }
0x3ca1   :  { %v3631_v50 = vadd.f32 %v3630_v23, %v3625_v37 }
0x3ca3   :  { %v3634_v44 = vpop.permute.xlu1 %3633 }
0x3ca4   :  { %v3636_v24 = vmul.f32 %v7395_v48, %v3634_v44 }
0x3ca6   :  { %v3637_v43 = vadd.f32 %v3636_v24, %v3631_v50 }
0x3ca8   :  { %v3646_v59 = vpop.permute.xlu1 %3645  ;;  %v3643_v54 = vadd.f32 %v3642_v60, %v3637_v43 }
0x3ca9   :  { %v3648_v36 = vmul.f32 %v7407_v45, %v3646_v59 }
0x3cab   :  { %v3649_v10 = vadd.f32 %v3648_v36, %v3643_v54 }
0x3cad   :  { %v3652_v40 = vpop.permute.xlu1 %3651 }
0x3cae   :  { %v3654_v47 = vmul.f32 %v7413_v14, %v3652_v40 }
0x3cb0   :  { %v3655_v34 = vadd.f32 %v3654_v47, %v3649_v10 }
0x3cb2   :  { %v3664_v3 = vpop.permute.xlu1 %3663  ;;  %v3661_v37 = vadd.f32 %v3660_v33, %v3655_v34 }
0x3cb3   :  { %v3666_v23 = vmul.f32 %v7425_v5, %v3664_v3 }
0x3cb5   :  { %v3667_v50 = vadd.f32 %v3666_v23, %v3661_v37 }
0x3cb7   :  { %v3670_v44 = vpop.permute.xlu1 %3669 }
0x3cb8   :  { %v3672_v24 = vmul.f32 %v7431_v26, %v3670_v44 }
0x3cba   :  { %v3673_v22 = vadd.f32 %v3672_v24, %v3667_v50  ;;  %v3701_v50 = vld [vmem:[#allocation2 + $0x1c] sm:$0x1] }
0x3cbc   :  { %5369 = vtanh.f32 %v3673_v22  ;;  %v3674_v60 = vmul.f32 0.5, %v3673_v22 }
0x3cbe   :  { %5371 = vtanh.f32 %v3674_v60 }
0x3cc6   :  { %v5370_v43 = vpop.eup %5369 }
0x3cc7   :  { %3681 = vrot.lane.b32.xlu0 %v5370_v43, %s5516_s30 }
0x3cc8   :  { %v5372_v59 = vpop.eup %5371 }
0x3cc9   :  { %v3676_v54 = vmul.f32 0.5, %v5372_v59 }
0x3ccb   :  { %v3677_v36 = vadd.f32 0.5, %v3676_v54 }
0x3ccd   :  { %v3679_v47 = vmul.f32 %v3677_v36, %v7551_v19 }
0x3d39   :  { %v3682_v40 = vpop.permute.xlu0 %3681 }
0x3d3a   :  { %v3684_v10 = vmul.f32 %v3682_v40, %v3677_v36 }
0x3d3c   :  { %3686 = vrot.lane.b32.xlu1 %v3684_v10, %s5517_s11 }
0x3dae   :  { %v3687_v21 = vpop.permute.xlu1 %3686 }
0x3daf   :  { %v7608_v34 = vadd.f32 %v3687_v21, %v3679_v47 }
0x3db1   :  { %5373 = vtanh.f32 %v7608_v34 }
0x3dbb   :  { %v5374_v33 = vpop.eup %5373 }
0x3dbc   :  { %3692 = vrot.lane.b32.xlu0 %v5374_v33, %s5517_s11 }
0x3e2e   :  { %v3693_v3 = vpop.permute.xlu0 %3692 }
0x3e2f   :  { %v7612_v37 = vmul.f32 %v3693_v3, %v3677_v36 }
0x3e31   :  { %8179 = vst [vmem:[#allocation21_spill] sm:$0xff] %v7612_v37  ;;  %3709 = vperm.xlu0 %5143, %v7612_v37   ;;  %3703 = vperm.xlu1 %5142, %v7612_v37  }
0x3e35   :  { %5146 = vset.pattern.permute.xlu0 %v8173_v7  ;;  %5144 = vset.pattern.permute.xlu1 %v8171_v16 }
0x3e36   :  { %3727 = vperm.xlu0 %5146, %v7612_v37   ;;  %3715 = vperm.xlu1 %5144, %v7612_v37  }
0x3e3a   :  { %5149 = vset.pattern.permute.xlu0 %v8167_v25  ;;  %5145 = vset.pattern.permute.xlu1 %v8168_v6 }
0x3e3b   :  { %3745 = vperm.xlu0 %5149, %v7612_v37   ;;  %3721 = vperm.xlu1 %5145, %v7612_v37  }
0x3e3f   :  { %5152 = vset.pattern.permute.xlu0 %v8158_v56  ;;  %5147 = vset.pattern.permute.xlu1 %v8169_v17 }
0x3e40   :  { %3763 = vperm.xlu0 %5152, %v7612_v37   ;;  %3733 = vperm.xlu1 %5147, %v7612_v37  }
0x3e44   :  { %5155 = vset.pattern.permute.xlu0 %v8160_v38  ;;  %5148 = vset.pattern.permute.xlu1 %v8170_v62 }
0x3e45   :  { %3781 = vperm.xlu0 %5155, %v7612_v37   ;;  %3739 = vperm.xlu1 %5148, %v7612_v37  }
0x3e49   :  { %5150 = vset.pattern.permute.xlu1 %v8163_v4  ;;  %5159 = vset.pattern.permute.xlu0 %v8155_v28 }
0x3e4a   :  { %3751 = vperm.xlu1 %5150, %v7612_v37  }
0x3e4e   :  { %5151 = vset.pattern.permute.xlu1 %v8164_v51 }
0x3e4f   :  { %3757 = vperm.xlu1 %5151, %v7612_v37  }
0x3e53   :  { %5153 = vset.pattern.permute.xlu1 %v8159_v39 }
0x3e54   :  { %3769 = vperm.xlu1 %5153, %v7612_v37  }
0x3e58   :  { %5154 = vset.pattern.permute.xlu1 %v8165_v15 }
0x3e59   :  { %3775 = vperm.xlu1 %5154, %v7612_v37  }
0x3e5d   :  { %5156 = vset.pattern.permute.xlu1 %v8161_v49 }
0x3e5e   :  { %3787 = vperm.xlu1 %5156, %v7612_v37  }
0x3e62   :  { %5157 = vset.pattern.permute.xlu1 %v8157_v18 }
0x3e63   :  { %3793 = vperm.xlu1 %5157, %v7612_v37  }
0x3e67   :  { %5158 = vset.pattern.permute.xlu1 %v8162_v55 }
0x3eb0   :  { %v3704_v19 = vpop.permute.xlu1 %3703  ;;  %v3710_v44 = vpop.permute.xlu0 %3709 }
0x3eb1   :  { %v3706_v23 = vmul.f32 %v7284_v52, %v3704_v19  ;;  %v3712_v22 = vmul.f32 %v7290_v20, %v3710_v44 }
0x3eb3   :  { %v3707_v24 = vadd.f32 %v3706_v23, %v3701_v50 }
0x3eb5   :  { %v3716_v43 = vpop.permute.xlu1 %3715  ;;  %v3713_v60 = vadd.f32 %v3712_v22, %v3707_v24  ;;  %v3728_v10 = vpop.permute.xlu0 %3727 }
0x3eb6   :  { %v3718_v59 = vmul.f32 %v7296_v53, %v3716_v43  ;;  %v3730_v21 = vmul.f32 %v7308_v30, %v3728_v10 }
0x3eb8   :  { %v3719_v36 = vadd.f32 %v3718_v59, %v3713_v60 }
0x3eba   :  { %v3722_v54 = vpop.permute.xlu1 %3721  ;;  %v3746_v44 = vpop.permute.xlu0 %3745 }
0x3ebb   :  { %v3724_v40 = vmul.f32 %v7302_v46, %v3722_v54  ;;  %v3748_v53 = vmul.f32 %v7383_v61, %v3746_v44 }
0x3ebd   :  { %v3725_v47 = vadd.f32 %v3724_v40, %v3719_v36 }
0x3ebf   :  { %v3734_v33 = vpop.permute.xlu1 %3733  ;;  %v3731_v3 = vadd.f32 %v3730_v21, %v3725_v47  ;;  %v3764_v59 = vpop.permute.xlu0 %3763 }
0x3ec0   :  { %v3736_v52 = vmul.f32 %v7314_v0, %v3734_v33  ;;  %v3766_v0 = vmul.f32 %v7401_v57, %v3764_v59 }
0x3ec2   :  { %v3737_v23 = vadd.f32 %v3736_v52, %v3731_v3 }
0x3ec4   :  { %v3740_v19 = vpop.permute.xlu1 %3739  ;;  %v3782_v33 = vpop.permute.xlu0 %3781 }
0x3ec5   :  { %v3742_v20 = vmul.f32 %v7320_v2, %v3740_v19  ;;  %v3784_v52 = vmul.f32 %v7419_v29, %v3782_v33 }
0x3ec7   :  { %v3743_v50 = vadd.f32 %v3742_v20, %v3737_v23 }
0x3ec9   :  { %v3752_v24 = vpop.permute.xlu1 %3751  ;;  %v3749_v22 = vadd.f32 %v3748_v53, %v3743_v50 }
0x3eca   :  { %v3754_v46 = vmul.f32 %v7389_v11, %v3752_v24 }
0x3ecc   :  { %v3755_v60 = vadd.f32 %v3754_v46, %v3749_v22 }
0x3ece   :  { %v3758_v43 = vpop.permute.xlu1 %3757 }
0x3ecf   :  { %v3760_v30 = vmul.f32 %v7395_v48, %v3758_v43 }
0x3ed1   :  { %v3761_v54 = vadd.f32 %v3760_v30, %v3755_v60 }
0x3ed3   :  { %v3770_v36 = vpop.permute.xlu1 %3769  ;;  %v3767_v40 = vadd.f32 %v3766_v0, %v3761_v54 }
0x3ed4   :  { %v3772_v2 = vmul.f32 %v7407_v45, %v3770_v36 }
0x3ed6   :  { %v3773_v47 = vadd.f32 %v3772_v2, %v3767_v40 }
0x3ed8   :  { %v3776_v10 = vpop.permute.xlu1 %3775 }
0x3ed9   :  { %v3778_v21 = vmul.f32 %v7413_v14, %v3776_v10 }
0x3edb   :  { %v3779_v3 = vadd.f32 %v3778_v21, %v3773_v47  ;;  %v7706_v21 = vld [vmem:[%s8094_s4] sm:$0x1] }
0x3edd   :  { %v3788_v19 = vpop.permute.xlu1 %3787  ;;  %v3785_v23 = vadd.f32 %v3784_v52, %v3779_v3  ;;  %v3825_v52 = vld [vmem:[#allocation2 + $0x1d] sm:$0x1] }
0x3ede   :  { %v3790_v20 = vmul.f32 %v7425_v5, %v3788_v19 }
0x3ee0   :  { %v3791_v50 = vadd.f32 %v3790_v20, %v3785_v23  ;;  %v7712_v23 = vld [vmem:[%s8094_s4 + $0x1] sm:$0x1] }
0x3ee2   :  { %v3794_v44 = vpop.permute.xlu1 %3793 }
0x3ee3   :  { %v3796_v53 = vmul.f32 %v7431_v26, %v3794_v44 }
0x3ee5   :  { %v3797_v24 = vadd.f32 %v3796_v53, %v3791_v50  ;;  %v7718_v53 = vld [vmem:[%s8094_s4 + $0x2] sm:$0x1] }
0x3ee7   :  { %5375 = vtanh.f32 %v3797_v24  ;;  %v3798_v46 = vmul.f32 0.5, %v3797_v24 }
0x3ee9   :  { %5377 = vtanh.f32 %v3798_v46 }
0x3ef1   :  { %v5376_v22 = vpop.eup %5375 }
0x3ef2   :  { %3805 = vrot.lane.b32.xlu0 %v5376_v22, %s5516_s30 }
0x3ef3   :  { %v5378_v43 = vpop.eup %5377 }
0x3ef4   :  { %v3800_v60 = vmul.f32 0.5, %v5378_v43  ;;  %v7724_v43 = vld [vmem:[%s8094_s4 + $0x3] sm:$0x1] }
0x3ef6   :  { %v3801_v30 = vadd.f32 0.5, %v3800_v60 }
0x3ef8   :  { %v3803_v0 = vmul.f32 %v3801_v30, %v7608_v34 }
0x3f64   :  { %v3806_v59 = vpop.permute.xlu0 %3805 }
0x3f65   :  { %v3808_v54 = vmul.f32 %v3806_v59, %v3801_v30 }
0x3f67   :  { %3810 = vrot.lane.b32.xlu1 %v3808_v54, %s5517_s11  ;;  %v7730_v54 = vld [vmem:[%s8094_s4 + $0x4] sm:$0x1] }
0x3fd9   :  { %v3811_v36 = vpop.permute.xlu1 %3810 }
0x3fda   :  { %v7665_v40 = vadd.f32 %v3811_v36, %v3803_v0 }
0x3fdc   :  { %5379 = vtanh.f32 %v7665_v40 }
0x3fe6   :  { %v5380_v2 = vpop.eup %5379 }
0x3fe7   :  { %3816 = vrot.lane.b32.xlu0 %v5380_v2, %s5517_s11 }
0x4059   :  { %v3817_v10 = vpop.permute.xlu0 %3816 }
0x405a   :  { %v7669_v47 = vmul.f32 %v3817_v10, %v3801_v30  ;;  %v7736_v10 = vld [vmem:[%s8094_s4 + $0x5] sm:$0x1] }
0x405c   :  { %8180 = vst [vmem:[#allocation22_spill] sm:$0xff] %v7669_v47  ;;  %3833 = vperm.xlu0 %5159, %v7669_v47   ;;  %3827 = vperm.xlu1 %5158, %v7669_v47  }
0x4060   :  { %5162 = vset.pattern.permute.xlu0 %v8173_v7  ;;  %5160 = vset.pattern.permute.xlu1 %v8171_v16 }
0x4061   :  { %3851 = vperm.xlu0 %5162, %v7669_v47   ;;  %3839 = vperm.xlu1 %5160, %v7669_v47  }
0x4065   :  { %5165 = vset.pattern.permute.xlu0 %v8167_v25  ;;  %5161 = vset.pattern.permute.xlu1 %v8168_v6 }
0x4066   :  { %3869 = vperm.xlu0 %5165, %v7669_v47   ;;  %3845 = vperm.xlu1 %5161, %v7669_v47  }
0x406a   :  { %5168 = vset.pattern.permute.xlu0 %v8158_v56  ;;  %5163 = vset.pattern.permute.xlu1 %v8169_v17 }
0x406b   :  { %3887 = vperm.xlu0 %5168, %v7669_v47   ;;  %3857 = vperm.xlu1 %5163, %v7669_v47  }
0x406f   :  { %5171 = vset.pattern.permute.xlu0 %v8160_v38  ;;  %5164 = vset.pattern.permute.xlu1 %v8170_v62 }
0x4070   :  { %3905 = vperm.xlu0 %5171, %v7669_v47   ;;  %3863 = vperm.xlu1 %5164, %v7669_v47  }
0x4074   :  { %5166 = vset.pattern.permute.xlu1 %v8163_v4  ;;  %5175 = vset.pattern.permute.xlu0 %v8155_v28 }
0x4075   :  { %3875 = vperm.xlu1 %5166, %v7669_v47  }
0x4079   :  { %5167 = vset.pattern.permute.xlu1 %v8164_v51 }
0x407a   :  { %3881 = vperm.xlu1 %5167, %v7669_v47  }
0x407e   :  { %5169 = vset.pattern.permute.xlu1 %v8159_v39 }
0x407f   :  { %3893 = vperm.xlu1 %5169, %v7669_v47  }
0x4083   :  { %5170 = vset.pattern.permute.xlu1 %v8165_v15 }
0x4084   :  { %3899 = vperm.xlu1 %5170, %v7669_v47  }
0x4088   :  { %5172 = vset.pattern.permute.xlu1 %v8161_v49 }
0x4089   :  { %3911 = vperm.xlu1 %5172, %v7669_v47  }
0x408d   :  { %5173 = vset.pattern.permute.xlu1 %v8157_v18 }
0x408e   :  { %3917 = vperm.xlu1 %5173, %v7669_v47  }
0x4092   :  { %5174 = vset.pattern.permute.xlu1 %v8162_v55 }
0x40db   :  { %v3828_v34 = vpop.permute.xlu1 %3827  ;;  %v3834_v3 = vpop.permute.xlu0 %3833 }
0x40dc   :  { %v3830_v33 = vmul.f32 %v7706_v21, %v3828_v34  ;;  %v3836_v20 = vmul.f32 %v7712_v23, %v3834_v3 }
0x40de   :  { %v3831_v19 = vadd.f32 %v3830_v33, %v3825_v52  ;;  %v7742_v52 = vld [vmem:[%s8094_s4 + $0x6] sm:$0x1] }
0x40e0   :  { %v3840_v44 = vpop.permute.xlu1 %3839  ;;  %v3837_v50 = vadd.f32 %v3836_v20, %v3831_v19  ;;  %v3852_v30 = vpop.permute.xlu0 %3851 }
0x40e1   :  { %v3842_v24 = vmul.f32 %v7718_v53, %v3840_v44  ;;  %v3854_v0 = vmul.f32 %v7730_v54, %v3852_v30 }
0x40e3   :  { %v3843_v46 = vadd.f32 %v3842_v24, %v3837_v50 }
0x40e5   :  { %v3846_v22 = vpop.permute.xlu1 %3845  ;;  %v3870_v20 = vpop.permute.xlu0 %3869 }
0x40e6   :  { %v3848_v60 = vmul.f32 %v7724_v43, %v3846_v22  ;;  %v3872_v50 = vmul.f32 %v7383_v61, %v3870_v20 }
0x40e8   :  { %v3849_v59 = vadd.f32 %v3848_v60, %v3843_v46 }
0x40ea   :  { %v3858_v36 = vpop.permute.xlu1 %3857  ;;  %v3855_v2 = vadd.f32 %v3854_v0, %v3849_v59  ;;  %v3888_v0 = vpop.permute.xlu0 %3887 }
0x40eb   :  { %v3860_v34 = vmul.f32 %v7736_v10, %v3858_v36 }
0x40ed   :  { %v3861_v3 = vadd.f32 %v3860_v34, %v3855_v2  ;;  %v3890_v2 = vmul.f32 %v7401_v57, %v3888_v0 }
0x40ef   :  { %v3864_v33 = vpop.permute.xlu1 %3863 }
0x40f0   :  { %v3866_v19 = vmul.f32 %v7742_v52, %v3864_v33 }
0x40f2   :  { %v3867_v44 = vadd.f32 %v3866_v19, %v3861_v3  ;;  %v3906_v19 = vpop.permute.xlu0 %3905 }
0x40f4   :  { %v3876_v24 = vpop.permute.xlu1 %3875  ;;  %v3873_v22 = vadd.f32 %v3872_v50, %v3867_v44 }
0x40f5   :  { %v3878_v46 = vmul.f32 %v7389_v11, %v3876_v24  ;;  %v3908_v11 = vmul.f32 %v7419_v29, %v3906_v19 }
0x40f7   :  { %v3879_v30 = vadd.f32 %v3878_v46, %v3873_v22 }
0x40f9   :  { %v3882_v60 = vpop.permute.xlu1 %3881 }
0x40fa   :  { %v3884_v59 = vmul.f32 %v7395_v48, %v3882_v60 }
0x40fc   :  { %v3885_v36 = vadd.f32 %v3884_v59, %v3879_v30 }
0x40fe   :  { %v3894_v34 = vpop.permute.xlu1 %3893  ;;  %v3891_v37 = vadd.f32 %v3890_v2, %v3885_v36 }
0x40ff   :  { %v3896_v33 = vmul.f32 %v7407_v45, %v3894_v34 }
0x4101   :  { %v3897_v3 = vadd.f32 %v3896_v33, %v3891_v37  ;;  %v3949_v33 = vld [vmem:[#allocation2 + $0x1e] sm:$0x1] }
0x4103   :  { %v3900_v47 = vpop.permute.xlu1 %3899 }
0x4104   :  { %v3902_v61 = vmul.f32 %v7413_v14, %v3900_v47 }
0x4106   :  { %v3903_v20 = vadd.f32 %v3902_v61, %v3897_v3 }
0x4108   :  { %v3912_v44 = vpop.permute.xlu1 %3911  ;;  %v3909_v50 = vadd.f32 %v3908_v11, %v3903_v20 }
0x4109   :  { %v3914_v48 = vmul.f32 %v7425_v5, %v3912_v44 }
0x410b   :  { %v3915_v22 = vadd.f32 %v3914_v48, %v3909_v50 }
0x410d   :  { %v3918_v24 = vpop.permute.xlu1 %3917 }
0x410e   :  { %v3920_v57 = vmul.f32 %v7431_v26, %v3918_v24 }
0x4110   :  { %v3921_v46 = vadd.f32 %v3920_v57, %v3915_v22 }
0x4112   :  { %5381 = vtanh.f32 %v3921_v46  ;;  %v3922_v45 = vmul.f32 0.5, %v3921_v46 }
0x4114   :  { %5383 = vtanh.f32 %v3922_v45 }
0x411c   :  { %v5382_v60 = vpop.eup %5381 }
0x411d   :  { %3929 = vrot.lane.b32.xlu0 %v5382_v60, %s5516_s30 }
0x411e   :  { %v5384_v14 = vpop.eup %5383 }
0x411f   :  { %v3924_v37 = vmul.f32 0.5, %v5384_v14 }
0x4121   :  { %v3925_v47 = vadd.f32 0.5, %v3924_v37 }
0x4123   :  { %v3927_v5 = vmul.f32 %v3925_v47, %v7665_v40 }
0x418f   :  { %v3930_v30 = vpop.permute.xlu0 %3929 }
0x4190   :  { %v3932_v29 = vmul.f32 %v3930_v30, %v3925_v47 }
0x4192   :  { %3934 = vrot.lane.b32.xlu1 %v3932_v29, %s5517_s11  ;;  %v7805_v29 = vld [vmem:[%s8094_s4 + $0x7] sm:$0x1] }
0x4204   :  { %v3935_v59 = vpop.permute.xlu1 %3934 }
0x4205   :  { %v7757_v0 = vadd.f32 %v3935_v59, %v3927_v5 }
0x4207   :  { %5385 = vtanh.f32 %v7757_v0 }
0x4211   :  { %v5386_v26 = vpop.eup %5385 }
0x4212   :  { %3940 = vrot.lane.b32.xlu0 %v5386_v26, %s5517_s11 }
0x4284   :  { %v3941_v36 = vpop.permute.xlu0 %3940 }
0x4285   :  { %v7761_v2 = vmul.f32 %v3941_v36, %v3925_v47  ;;  %v7811_v36 = vld [vmem:[%s8094_s4 + $0x8] sm:$0x1] }
0x4287   :  { %3957 = vperm.xlu0 %5175, %v7761_v2   ;;  %3951 = vperm.xlu1 %5174, %v7761_v2  }
0x428b   :  { %5178 = vset.pattern.permute.xlu0 %v8173_v7  ;;  %5176 = vset.pattern.permute.xlu1 %v8171_v16 }
0x428c   :  { %3975 = vperm.xlu0 %5178, %v7761_v2   ;;  %3963 = vperm.xlu1 %5176, %v7761_v2  }
0x4290   :  { %5181 = vset.pattern.permute.xlu0 %v8167_v25  ;;  %5177 = vset.pattern.permute.xlu1 %v8168_v6 }
0x4291   :  { %3993 = vperm.xlu0 %5181, %v7761_v2   ;;  %3969 = vperm.xlu1 %5177, %v7761_v2  }
0x4295   :  { %5184 = vset.pattern.permute.xlu0 %v8158_v56  ;;  %5179 = vset.pattern.permute.xlu1 %v8169_v17 }
0x4296   :  { %4011 = vperm.xlu0 %5184, %v7761_v2   ;;  %3981 = vperm.xlu1 %5179, %v7761_v2  }
0x429a   :  { %5187 = vset.pattern.permute.xlu0 %v8160_v38  ;;  %5180 = vset.pattern.permute.xlu1 %v8170_v62 }
0x429b   :  { %4029 = vperm.xlu0 %5187, %v7761_v2   ;;  %3987 = vperm.xlu1 %5180, %v7761_v2  }
0x429f   :  { %5182 = vset.pattern.permute.xlu1 %v8163_v4  ;;  %5191 = vset.pattern.permute.xlu0 %v8155_v28 }
0x42a0   :  { %3999 = vperm.xlu1 %5182, %v7761_v2  }
0x42a4   :  { %5183 = vset.pattern.permute.xlu1 %v8164_v51 }
0x42a5   :  { %4005 = vperm.xlu1 %5183, %v7761_v2  }
0x42a9   :  { %5185 = vset.pattern.permute.xlu1 %v8159_v39 }
0x42aa   :  { %4017 = vperm.xlu1 %5185, %v7761_v2  }
0x42ae   :  { %5186 = vset.pattern.permute.xlu1 %v8165_v15 }
0x42af   :  { %4023 = vperm.xlu1 %5186, %v7761_v2  }
0x42b3   :  { %5188 = vset.pattern.permute.xlu1 %v8161_v49 }
0x42b4   :  { %4035 = vperm.xlu1 %5188, %v7761_v2  }
0x42b8   :  { %5189 = vset.pattern.permute.xlu1 %v8157_v18 }
0x42b9   :  { %4041 = vperm.xlu1 %5189, %v7761_v2  }
0x42bd   :  { %5190 = vset.pattern.permute.xlu1 %v8162_v55 }
0x4306   :  { %v3952_v28 = vpop.permute.xlu1 %3951  ;;  %v3958_v34 = vpop.permute.xlu0 %3957 }
0x4307   :  { %v3954_v40 = vmul.f32 %v7706_v21, %v3952_v28  ;;  %v3960_v61 = vmul.f32 %v7712_v23, %v3958_v34 }
0x4309   :  { %v3955_v3 = vadd.f32 %v3954_v40, %v3949_v33  ;;  %v7817_v33 = vld [vmem:[%s8094_s4 + $0x9] sm:$0x1] }
0x430b   :  { %v3964_v19 = vpop.permute.xlu1 %3963  ;;  %v3961_v20 = vadd.f32 %v3960_v61, %v3955_v3  ;;  %v3976_v24 = vpop.permute.xlu0 %3975 }
0x430c   :  { %v3966_v11 = vmul.f32 %v7718_v53, %v3964_v19  ;;  %v3978_v55 = vmul.f32 %v7730_v54, %v3976_v24 }
0x430e   :  { %v3967_v50 = vadd.f32 %v3966_v11, %v3961_v20  ;;  %v7823_v20 = vld [vmem:[%s8094_s4 + $0xa] sm:$0x1] }
0x4310   :  { %v3970_v44 = vpop.permute.xlu1 %3969  ;;  %v3994_v47 = vpop.permute.xlu0 %3993 }
0x4311   :  { %v3972_v48 = vmul.f32 %v7724_v43, %v3970_v44  ;;  %v3996_v5 = vmul.f32 %v7805_v29, %v3994_v47 }
0x4313   :  { %v3973_v22 = vadd.f32 %v3972_v48, %v3967_v50  ;;  %v7829_v48 = vld [vmem:[%s8094_s4 + $0xb] sm:$0x1] }
0x4315   :  { %v3982_v57 = vpop.permute.xlu1 %3981  ;;  %v3979_v46 = vadd.f32 %v3978_v55, %v3973_v22  ;;  %v4012_v61 = vpop.permute.xlu0 %4011 }
0x4316   :  { %v3984_v60 = vmul.f32 %v7736_v10, %v3982_v57  ;;  %v4014_v11 = vmul.f32 %v7823_v20, %v4012_v61  ;;  %v7835_v57 = vld [vmem:[%s8094_s4 + $0xc] sm:$0x1] }
0x4318   :  { %v3985_v14 = vadd.f32 %v3984_v60, %v3979_v46 }
0x431a   :  { %v3988_v45 = vpop.permute.xlu1 %3987  ;;  %v4030_v60 = vpop.permute.xlu0 %4029 }
0x431b   :  { %v3990_v37 = vmul.f32 %v7742_v52, %v3988_v45 }
0x431d   :  { %v3991_v30 = vadd.f32 %v3990_v37, %v3985_v14  ;;  %v7841_v14 = vld [vmem:[%s8094_s4 + $0xd] sm:$0x1] }
0x431e   :  { %v4032_v37 = vmul.f32 %v7841_v14, %v4030_v60 }
0x431f   :  { %v4000_v59 = vpop.permute.xlu1 %3999  ;;  %v3997_v26 = vadd.f32 %v3996_v5, %v3991_v30  ;;  %v7847_v5 = vld [vmem:[%s8094_s4 + $0xe] sm:$0x1] }
0x4320   :  { %v4002_v28 = vmul.f32 %v7811_v36, %v4000_v59 }
0x4322   :  { %v4003_v34 = vadd.f32 %v4002_v28, %v3997_v26 }
0x4324   :  { %v4006_v40 = vpop.permute.xlu1 %4005 }
0x4325   :  { %v4008_v3 = vmul.f32 %v7817_v33, %v4006_v40  ;;  %v7853_v40 = vld [vmem:[%s8094_s4 + $0xf] sm:$0x1]  ;;  %s5534_s4 = smov 96  }
0x4327   :  { %v4009_v19 = vadd.f32 %v4008_v3, %v4003_v34 }
0x4329   :  { %v4018_v44 = vpop.permute.xlu1 %4017  ;;  %v4015_v50 = vadd.f32 %v4014_v11, %v4009_v19 }
0x432a   :  { %v4020_v24 = vmul.f32 %v7829_v48, %v4018_v44 }
0x432c   :  { %v4021_v55 = vadd.f32 %v4020_v24, %v4015_v50 }
0x432e   :  { %v4024_v22 = vpop.permute.xlu1 %4023 }
0x432f   :  { %v4026_v46 = vmul.f32 %v7835_v57, %v4024_v22 }
0x4331   :  { %v4027_v45 = vadd.f32 %v4026_v46, %v4021_v55 }
0x4333   :  { %v4036_v47 = vpop.permute.xlu1 %4035  ;;  %v4033_v30 = vadd.f32 %v4032_v37, %v4027_v45 }
0x4334   :  { %v4038_v59 = vmul.f32 %v7847_v5, %v4036_v47 }
0x4336   :  { %v4039_v28 = vadd.f32 %v4038_v59, %v4033_v30 }
0x4338   :  { %v4042_v26 = vpop.permute.xlu1 %4041 }
0x4339   :  { %v4044_v34 = vmul.f32 %v7853_v40, %v4042_v26 }
0x433b   :  { %v4045_v3 = vadd.f32 %v4044_v34, %v4039_v28 }
0x433d   :  { %5387 = vtanh.f32 %v4045_v3  ;;  %v4046_v19 = vmul.f32 0.5, %v4045_v3 }
0x433f   :  { %5389 = vtanh.f32 %v4046_v19 }
0x4347   :  { %v5388_v61 = vpop.eup %5387 }
0x4348   :  { %4053 = vrot.lane.b32.xlu0 %v5388_v61, %s5516_s30 }
0x4349   :  { %v5390_v11 = vpop.eup %5389 }
0x434a   :  { %v4048_v44 = vmul.f32 0.5, %v5390_v11 }
0x434c   :  { %v4049_v50 = vadd.f32 0.5, %v4048_v44 }
0x434e   :  { %v4051_v55 = vmul.f32 %v4049_v50, %v7757_v0 }
0x43ba   :  { %v4054_v24 = vpop.permute.xlu0 %4053 }
0x43bb   :  { %v4056_v22 = vmul.f32 %v4054_v24, %v4049_v50 }
0x43bd   :  { %4058 = vrot.lane.b32.xlu1 %v4056_v22, %s5517_s11 }
0x442f   :  { %v4059_v46 = vpop.permute.xlu1 %4058 }
0x4430   :  { %v7859_v60 = vadd.f32 %v4059_v46, %v4051_v55 }
0x4432   :  { %5391 = vtanh.f32 %v7859_v60 }
0x443c   :  { %v5392_v45 = vpop.eup %5391 }
0x443d   :  { %4064 = vrot.lane.b32.xlu0 %v5392_v45, %s5517_s11 }
0x44af   :  { %v4065_v37 = vpop.permute.xlu0 %4064 }
0x44b0   :  { %v7863_v47 = vmul.f32 %v4065_v37, %v4049_v50 }
0x44b2   :  { %4081 = vperm.xlu0 %5191, %v7863_v47   ;;  %4075 = vperm.xlu1 %5190, %v7863_v47  }
0x44b6   :  { %5194 = vset.pattern.permute.xlu0 %v8173_v7  ;;  %5192 = vset.pattern.permute.xlu1 %v8171_v16 }
0x44b7   :  { %4099 = vperm.xlu0 %5194, %v7863_v47   ;;  %4087 = vperm.xlu1 %5192, %v7863_v47  }
0x44bb   :  { %5197 = vset.pattern.permute.xlu0 %v8167_v25  ;;  %5193 = vset.pattern.permute.xlu1 %v8168_v6 }
0x44bc   :  { %4117 = vperm.xlu0 %5197, %v7863_v47   ;;  %4093 = vperm.xlu1 %5193, %v7863_v47  }
0x44c0   :  { %5200 = vset.pattern.permute.xlu0 %v8158_v56  ;;  %5195 = vset.pattern.permute.xlu1 %v8169_v17 }
0x44c1   :  { %4135 = vperm.xlu0 %5200, %v7863_v47   ;;  %4105 = vperm.xlu1 %5195, %v7863_v47  }
0x44c5   :  { %5203 = vset.pattern.permute.xlu0 %v8160_v38  ;;  %5196 = vset.pattern.permute.xlu1 %v8170_v62 }
0x44c6   :  { %4153 = vperm.xlu0 %5203, %v7863_v47   ;;  %4111 = vperm.xlu1 %5196, %v7863_v47  }
0x44ca   :  { %5198 = vset.pattern.permute.xlu1 %v8163_v4  ;;  %5206 = vset.pattern.permute.xlu0 %v8157_v18 }
0x44cb   :  { %4123 = vperm.xlu1 %5198, %v7863_v47  }
0x44cf   :  { %5199 = vset.pattern.permute.xlu1 %v8164_v51  ;;  %v4073_v51 = vld [vmem:[#allocation2 + $0x1f] sm:$0x1] }
0x44d0   :  { %4129 = vperm.xlu1 %5199, %v7863_v47  }
0x44d4   :  { %5201 = vset.pattern.permute.xlu1 %v8159_v39 }
0x44d5   :  { %4141 = vperm.xlu1 %5201, %v7863_v47  }
0x44d9   :  { %5202 = vset.pattern.permute.xlu1 %v8165_v15 }
0x44da   :  { %4147 = vperm.xlu1 %5202, %v7863_v47  }
0x44de   :  { %5204 = vset.pattern.permute.xlu1 %v8161_v49 }
0x44df   :  { %4159 = vperm.xlu1 %5204, %v7863_v47  }
0x44e3   :  { %5205 = vset.pattern.permute.xlu1 %v8157_v18 }
0x44e4   :  { %4165 = vperm.xlu1 %5205, %v7863_v47  }
0x4531   :  { %v4076_v56 = vpop.permute.xlu1 %4075  ;;  %v4082_v4 = vpop.permute.xlu0 %4081 }
0x4532   :  { %v4078_v38 = vmul.f32 %v7706_v21, %v4076_v56  ;;  %v4084_v25 = vmul.f32 %v7712_v23, %v4082_v4 }
0x4534   :  { %v4079_v39 = vadd.f32 %v4078_v38, %v4073_v51 }
0x4536   :  { %v4088_v6 = vpop.permute.xlu1 %4087  ;;  %v4085_v15 = vadd.f32 %v4084_v25, %v4079_v39  ;;  %v4100_v7 = vpop.permute.xlu0 %4099 }
0x4537   :  { %v4090_v17 = vmul.f32 %v7718_v53, %v4088_v6  ;;  %v4102_v0 = vmul.f32 %v7730_v54, %v4100_v7 }
0x4539   :  { %v4091_v49 = vadd.f32 %v4090_v17, %v4085_v15 }
0x453b   :  { %v4094_v62 = vpop.permute.xlu1 %4093  ;;  %v4118_v34 = vpop.permute.xlu0 %4117 }
0x453c   :  { %v4096_v16 = vmul.f32 %v7724_v43, %v4094_v62  ;;  %v4120_v53 = vmul.f32 %v7805_v29, %v4118_v34  ;;  %v8186_v62 = vld [vmem:[#allocation9_spill] sm:$0xff]  ;;  %v8192_v34 = vld [vmem:[#allocation15_spill] sm:$0xff] }
0x453e   :  { %v4097_v18 = vadd.f32 %v4096_v16, %v4091_v49  ;;  %v8187_v16 = vld [vmem:[#allocation10_spill] sm:$0xff] }
0x4540   :  { %v4106_v30 = vpop.permute.xlu1 %4105  ;;  %v4103_v59 = vadd.f32 %v4102_v0, %v4097_v18  ;;  %v4136_v50 = vpop.permute.xlu0 %4135  ;;  %v8188_v18 = vld [vmem:[#allocation11_spill] sm:$0xff] }
0x4541   :  { %v4108_v21 = vmul.f32 %v7736_v10, %v4106_v30  ;;  %v4138_v10 = vmul.f32 %v7823_v20, %v4136_v50  ;;  %v8189_v30 = vld [vmem:[#allocation12_spill] sm:$0xff]  ;;  %v8195_v50 = vld [vmem:[#allocation19_spill] sm:$0xff] }
0x4543   :  { %v4109_v28 = vadd.f32 %v4108_v21, %v4103_v59  ;;  %v8190_v21 = vld [vmem:[#allocation13_spill] sm:$0xff] }
0x4545   :  { %v4112_v26 = vpop.permute.xlu1 %4111  ;;  %v4154_v37 = vpop.permute.xlu0 %4153 }
0x4546   :  { %v4114_v23 = vmul.f32 %v7742_v52, %v4112_v26 }
0x4548   :  { %v4115_v3 = vadd.f32 %v4114_v23, %v4109_v28  ;;  %v8191_v28 = vld [vmem:[#allocation14_spill] sm:$0xff] }
0x454a   :  { %v4124_v61 = vpop.permute.xlu1 %4123  ;;  %v4121_v19 = vadd.f32 %v4120_v53, %v4115_v3  ;;  %v8193_v53 = vld [vmem:[#allocation16_spill] sm:$0xff] }
0x454b   :  { %v4126_v43 = vmul.f32 %v7811_v36, %v4124_v61  ;;  %v4156_v36 = vmul.f32 %v7841_v14, %v4154_v37 }
0x454d   :  { %v4127_v44 = vadd.f32 %v4126_v43, %v4121_v19  ;;  %v4213_v19 = vld [vmem:[%s8096_s6] sm:$0xff]  ;;  %v4214_v43 = vld [vmem:[%s8096_s6 + $0x8] sm:$0xff]  ;;  %s5535_s6 = smov 104  }
0x454f   :  { %v4130_v11 = vpop.permute.xlu1 %4129 }
0x4550   :  { %v4132_v54 = vmul.f32 %v7817_v33, %v4130_v11  ;;  %v8194_v11 = vld [vmem:[#allocation17_spill] sm:$0xff] }
0x4552   :  { %v4133_v24 = vadd.f32 %v4132_v54, %v4127_v44  ;;  %v4674_v44 = vpack.c.bf16 %v4214_v43, %v4213_v19 }
0x4554   :  { %v4142_v22 = vpop.permute.xlu1 %4141  ;;  %v4139_v55 = vadd.f32 %v4138_v10, %v4133_v24  ;;  %4675 = vmatprep.subr.bf16.mxu1 %v4674_v44  ;;  %v8196_v10 = vld [vmem:[#allocation21_spill] sm:$0xff] }
0x4555   :  { %v4144_v52 = vmul.f32 %v7829_v48, %v4142_v22  ;;  %4677 = vmatpush3.bf16.msra.mxu1 %v4674_v44  ;;  %v4201_v22 = vlaneseq }
0x4557   :  { %v4145_v45 = vadd.f32 %v4144_v52, %v4139_v55  ;;  %v4202_v55 = vshrl.u32 %v4201_v22, 7 }
0x4559   :  { %v4148_v46 = vpop.permute.xlu1 %4147  ;;  %v4203_v52 = vsub.s32 0, %v4202_v55 }
0x455a   :  { %v4150_v29 = vmul.f32 %v7835_v57, %v4148_v46 }
0x455c   :  { %v4151_v56 = vadd.f32 %v4150_v29, %v4145_v45 }
0x455e   :  { %v4160_v38 = vpop.permute.xlu1 %4159  ;;  %v4157_v4 = vadd.f32 %v4156_v36, %v4151_v56 }
0x455f   :  { %v4162_v33 = vmul.f32 %v7847_v5, %v4160_v38 }
0x4561   :  { %v4163_v39 = vadd.f32 %v4162_v33, %v4157_v4 }
0x4563   :  { %v4166_v51 = vpop.permute.xlu1 %4165 }
0x4564   :  { %v4168_v20 = vmul.f32 %v7853_v40, %v4166_v51 }
0x4566   :  { %v4169_v25 = vadd.f32 %v4168_v20, %v4163_v39 }
0x4568   :  { %5393 = vtanh.f32 %v4169_v25  ;;  %v4170_v48 = vmul.f32 0.5, %v4169_v25 }
0x456a   :  { %5395 = vtanh.f32 %v4170_v48 }
0x4572   :  { %v5394_v6 = vpop.eup %5393 }
0x4573   :  { %4177 = vrot.lane.b32.xlu0 %v5394_v6, %s5516_s30 }
0x4574   :  { %v5396_v57 = vpop.eup %5395 }
0x4575   :  { %v4172_v14 = vmul.f32 0.5, %v5396_v57 }
0x4577   :  { %473 = vrot.lane.b32.xlu0 %v5779_v41, %s5534_s4  ;;  %v7915_v15 = vadd.f32 0.5, %v4172_v14  ;;  %v8182_v41 = vld [vmem:[#allocation20_spill] sm:$0xff] }
0x45e5   :  { %v4178_v5 = vpop.permute.xlu0 %4177 }
0x45e6   :  { %v4180_v17 = vmul.f32 %v4178_v5, %v7915_v15 }
0x45e8   :  { %4182 = vrot.lane.b32.xlu1 %v4180_v17, %s5517_s11 }
0x45e9   :  { %v474_v40 = vpop.permute.xlu0 %473 }
0x45ea   :  { %476 = vst.msk [vmem:[#allocation3 + $0x1] sm:$0x1] %vm351_vm5, %v474_v40 }
0x45ec   :  { %348 = vrot.lane.b32.xlu1 %v5642_v42, %s5534_s4  ;;  %v8181_v42 = vld [vmem:[#allocation18_spill] sm:$0xff] }
0x45f0   :  { %597 = vrot.lane.b32.xlu1 %v5836_v1, %s5534_s4  ;;  %v8183_v1 = vld [vmem:[#allocation22_spill] sm:$0xff] }
0x45f4   :  { %845 = vrot.lane.b32.xlu1 %v5950_v27, %s5534_s4  ;;  %v4175_v27 = vmul.f32 %v7915_v15, %v7859_v60  ;;  %v8185_v60 = vld [vmem:[#allocation8_spill] sm:$0xff] }
0x45f8   :  { %1093 = vrot.lane.b32.xlu1 %v6099_v31, %s5534_s4 }
0x45fc   :  { %1341 = vrot.lane.b32.xlu1 %v6258_v58, %s5534_s4 }
0x4600   :  { %1589 = vrot.lane.b32.xlu1 %v6372_v35, %s5534_s4 }
0x4604   :  { %1837 = vrot.lane.b32.xlu1 %v6521_v13, %s5534_s4 }
0x4608   :  { %2085 = vrot.lane.b32.xlu1 %v6695_v63, %s5534_s4 }
0x460c   :  { %2333 = vrot.lane.b32.xlu1 %v6825_v9, %s5534_s4 }
0x4610   :  { %2581 = vrot.lane.b32.xlu1 %v7019_v12, %s5534_s4 }
0x4614   :  { %2829 = vrot.lane.b32.xlu1 %v7133_v8, %s5534_s4  ;;  %v8184_v8 = vld [vmem:[#allocation7_spill] sm:$0xff] }
0x4618   :  { %3077 = vrot.lane.b32.xlu1 %v7247_v32, %s5534_s4 }
0x461c   :  { %3325 = vrot.lane.b32.xlu1 %v8181_v42, %s5534_s4 }
0x4620   :  { %3573 = vrot.lane.b32.xlu1 %v8182_v41, %s5534_s4 }
0x4624   :  { %3821 = vrot.lane.b32.xlu1 %v8183_v1, %s5534_s4 }
0x4628   :  { %4069 = vrot.lane.b32.xlu1 %v7863_v47, %s5534_s4 }
0x465a   :  { %v4183_v31 = vpop.permute.xlu1 %4182 }
0x465b   :  { %v7954_v58 = vadd.f32 %v4183_v31, %v4175_v27 }
0x465d   :  { %5397 = vtanh.f32 %v7954_v58 }
0x465e   :  { %v349_v35 = vpop.permute.xlu1 %348 }
0x465f   :  { %352 = vst.msk [vmem:[#allocation3] sm:$0x1] %vm351_vm5, %v349_v35 }
0x4662   :  { %v598_v13 = vpop.permute.xlu1 %597 }
0x4663   :  { %600 = vst.msk [vmem:[#allocation3 + $0x2] sm:$0x1] %vm351_vm5, %v598_v13 }
0x4666   :  { %v846_v63 = vpop.permute.xlu1 %845 }
0x4667   :  { %v5398_v9 = vpop.eup %5397  ;;  %848 = vst.msk [vmem:[#allocation3 + $0x4] sm:$0x1] %vm351_vm5, %v846_v63 }
0x4668   :  { %4188 = vrot.lane.b32.xlu0 %v5398_v9, %s5517_s11 }
0x466a   :  { %v1094_v12 = vpop.permute.xlu1 %1093 }
0x466b   :  { %1096 = vst.msk [vmem:[#allocation3 + $0x6] sm:$0x1] %vm351_vm5, %v1094_v12 }
0x466c   :  { %721 = vrot.lane.b32.xlu0 %v8184_v8, %s5534_s4 }
0x466e   :  { %v1342_v32 = vpop.permute.xlu1 %1341 }
0x466f   :  { %1344 = vst.msk [vmem:[#allocation3 + $0x8] sm:$0x1] %vm351_vm5, %v1342_v32 }
0x4670   :  { %969 = vrot.lane.b32.xlu0 %v8185_v60, %s5534_s4 }
0x4672   :  { %v1590_v47 = vpop.permute.xlu1 %1589 }
0x4673   :  { %1592 = vst.msk [vmem:[#allocation3 + $0xa] sm:$0x1] %vm351_vm5, %v1590_v47 }
0x4674   :  { %1217 = vrot.lane.b32.xlu0 %v8186_v62, %s5534_s4 }
0x4676   :  { %v1838_v49 = vpop.permute.xlu1 %1837 }
0x4677   :  { %1840 = vst.msk [vmem:[#allocation3 + $0xc] sm:$0x1] %vm351_vm5, %v1838_v49 }
0x4678   :  { %1465 = vrot.lane.b32.xlu0 %v8187_v16, %s5534_s4 }
0x467a   :  { %v2086_v7 = vpop.permute.xlu1 %2085 }
0x467b   :  { %2088 = vst.msk [vmem:[#allocation3 + $0xe] sm:$0x1] %vm351_vm5, %v2086_v7 }
0x467c   :  { %1713 = vrot.lane.b32.xlu0 %v8188_v18, %s5534_s4 }
0x467e   :  { %v2334_v0 = vpop.permute.xlu1 %2333 }
0x467f   :  { %2336 = vst.msk [vmem:[#allocation3 + $0x10] sm:$0x1] %vm351_vm5, %v2334_v0 }
0x4680   :  { %1961 = vrot.lane.b32.xlu0 %v8189_v30, %s5534_s4 }
0x4682   :  { %v2582_v59 = vpop.permute.xlu1 %2581 }
0x4683   :  { %2584 = vst.msk [vmem:[#allocation3 + $0x12] sm:$0x1] %vm351_vm5, %v2582_v59 }
0x4684   :  { %2209 = vrot.lane.b32.xlu0 %v8190_v21, %s5534_s4 }
0x4686   :  { %v2830_v26 = vpop.permute.xlu1 %2829 }
0x4687   :  { %2832 = vst.msk [vmem:[#allocation3 + $0x14] sm:$0x1] %vm351_vm5, %v2830_v26 }
0x4688   :  { %2457 = vrot.lane.b32.xlu0 %v8191_v28, %s5534_s4 }
0x468a   :  { %v3078_v23 = vpop.permute.xlu1 %3077 }
0x468b   :  { %3080 = vst.msk [vmem:[#allocation3 + $0x16] sm:$0x1] %vm351_vm5, %v3078_v23 }
0x468c   :  { %2705 = vrot.lane.b32.xlu0 %v8192_v34, %s5534_s4 }
0x468e   :  { %v3326_v3 = vpop.permute.xlu1 %3325 }
0x468f   :  { %3328 = vst.msk [vmem:[#allocation3 + $0x18] sm:$0x1] %vm351_vm5, %v3326_v3 }
0x4690   :  { %2953 = vrot.lane.b32.xlu0 %v8193_v53, %s5534_s4 }
0x4692   :  { %v3574_v61 = vpop.permute.xlu1 %3573 }
0x4693   :  { %3576 = vst.msk [vmem:[#allocation3 + $0x1a] sm:$0x1] %vm351_vm5, %v3574_v61 }
0x4694   :  { %3201 = vrot.lane.b32.xlu0 %v8194_v11, %s5534_s4 }
0x4696   :  { %v3822_v54 = vpop.permute.xlu1 %3821 }
0x4697   :  { %3824 = vst.msk [vmem:[#allocation3 + $0x1c] sm:$0x1] %vm351_vm5, %v3822_v54 }
0x4698   :  { %3449 = vrot.lane.b32.xlu0 %v8195_v50, %s5534_s4 }
0x469a   :  { %v4070_v24 = vpop.permute.xlu1 %4069 }
0x469b   :  { %4072 = vst.msk [vmem:[#allocation3 + $0x1e] sm:$0x1] %vm351_vm5, %v4070_v24 }
0x469c   :  { %3697 = vrot.lane.b32.xlu0 %v8196_v10, %s5534_s4 }
0x46a0   :  { %3945 = vrot.lane.b32.xlu0 %v7761_v2, %s5534_s4 }
0x46da   :  { %v4189_v46 = vpop.permute.xlu0 %4188 }
0x46db   :  { %v4191_v45 = vmul.f32 %v4189_v46, %v7915_v15 }
0x46dd   :  { %v4204_v29 = vrot.slane %v4191_v45, %v4203_v52  ;;  %4193 = vrot.lane.b32.xlu0 %v4191_v45, %s5534_s4 }
0x46de   :  { %v722_v37 = vpop.permute.xlu0 %721 }
0x46df   :  { %724 = vst.msk [vmem:[#allocation3 + $0x3] sm:$0x1] %vm351_vm5, %v722_v37  ;;  %4206 = vrot.lane.b32.xlu1 %v4204_v29, %s5534_s4 }
0x46e1   :  { %4553 = vrot.lane.b32.xlu0 %v4191_v45, %s5535_s6 }
0x46e2   :  { %v970_v56 = vpop.permute.xlu0 %969 }
0x46e3   :  { %972 = vst.msk [vmem:[#allocation3 + $0x5] sm:$0x1] %vm351_vm5, %v970_v56  ;;  %4559 = vrot.lane.b32.xlu1 %v7954_v58, %s5536_s25  ;;  %v4357_v58 = vld [vmem:[%s8097_s7] sm:$0x3] }
0x46e4   :  { %4655 = vmatprep.subr.msk.mxu0 %vm80_vm1, %v4357_v58 }
0x46e5   :  { %4656 = vmatpush3.msk.msra.mxu0 %vm80_vm1, %v4357_v58 }
0x46e6   :  { %v1218_v2 = vpop.permute.xlu0 %1217 }
0x46e7   :  { %1220 = vst.msk [vmem:[#allocation3 + $0x7] sm:$0x1] %vm351_vm5, %v1218_v2 }
0x46ea   :  { %v1466_v36 = vpop.permute.xlu0 %1465 }
0x46eb   :  { %1468 = vst.msk [vmem:[#allocation3 + $0x9] sm:$0x1] %vm351_vm5, %v1466_v36 }
0x46ee   :  { %v1714_v38 = vpop.permute.xlu0 %1713  ;;  %v8027_v5 = vld [vmem:[#allocation3] sm:$0xff] }
0x46ef   :  { %1716 = vst.msk [vmem:[#allocation3 + $0xb] sm:$0x1] %vm351_vm5, %v1714_v38 }
0x46f2   :  { %v1962_v4 = vpop.permute.xlu0 %1961 }
0x46f3   :  { %1964 = vst.msk [vmem:[#allocation3 + $0xd] sm:$0x1] %vm351_vm5, %v1962_v4 }
0x46f6   :  { %v2210_v33 = vpop.permute.xlu0 %2209 }
0x46f7   :  { %2212 = vst.msk [vmem:[#allocation3 + $0xf] sm:$0x1] %vm351_vm5, %v2210_v33 }
0x46fa   :  { %v2458_v51 = vpop.permute.xlu0 %2457 }
0x46fb   :  { %2460 = vst.msk [vmem:[#allocation3 + $0x11] sm:$0x1] %vm351_vm5, %v2458_v51 }
0x46fe   :  { %v2706_v39 = vpop.permute.xlu0 %2705  ;;  %v8029_v17 = vld [vmem:[#allocation3 + $0x8] sm:$0xff] }
0x46ff   :  { %2708 = vst.msk [vmem:[#allocation3 + $0x13] sm:$0x1] %vm351_vm5, %v2706_v39  ;;  %v4475_v39 = vld [vmem:[%s8098_s8] sm:$0xff] }
0x4702   :  { %v2954_v20 = vpop.permute.xlu0 %2953 }
0x4703   :  { %2956 = vst.msk [vmem:[#allocation3 + $0x15] sm:$0x1] %vm351_vm5, %v2954_v20  ;;  %v4476_v20 = vld [vmem:[%s8098_s8 + $0x8] sm:$0xff] }
0x4706   :  { %v3202_v25 = vpop.permute.xlu0 %3201 }
0x4707   :  { %3204 = vst.msk [vmem:[#allocation3 + $0x17] sm:$0x1] %vm351_vm5, %v3202_v25  ;;  %v5537_v25 = vmov 0.0|0.0  }
0x4708   :  { %4678 = vmatprep.subr.bf16.mxu1 %v5537_v25 }
0x470a   :  { %v3450_v6 = vpop.permute.xlu0 %3449 }
0x470b   :  { %3452 = vst.msk [vmem:[#allocation3 + $0x19] sm:$0x1] %vm351_vm5, %v3450_v6  ;;  %v4679_v6 = vpack.c.bf16 %v4476_v20, %v4475_v39 }
0x470e   :  { %v3698_v48 = vpop.permute.xlu0 %3697  ;;  %v8033_v41 = vld [vmem:[#allocation3 + $0x10] sm:$0xff] }
0x470f   :  { %3700 = vst.msk [vmem:[#allocation3 + $0x1b] sm:$0x1] %vm351_vm5, %v3698_v48  ;;  %v5539_v48 = vmov 0.0  }
0x4712   :  { %v3946_v57 = vpop.permute.xlu0 %3945 }
0x4713   :  { %3948 = vst.msk [vmem:[#allocation3 + $0x1d] sm:$0x1] %vm351_vm5, %v3946_v57 }
0x474f   :  { %v4194_v14 = vpop.permute.xlu0 %4193 }
0x4750   :  { %4196 = vst.msk [vmem:[#allocation3 + $0x1f] sm:$0x1] %vm351_vm5, %v4194_v14 }
0x4751   :  { %v4207_v15 = vpop.permute.xlu1 %4206 }
0x4752   :  { %v4209_v40 = vmul.f32 %v4207_v15, %v8027_v5  ;;  %v4210_v42 = vmul.f32 %v4207_v15, %v8029_v17  ;;  %v4211_v1 = vmul.f32 %v4207_v15, %v8033_v41 }
0x4754   :  { %4649 = vmatprep.mubr.msk.f32.mxu1 %vm4215_vm6, %v4209_v40 }
0x4755   :  { %4650 = vmatmul.mubr.msk.f32.vlgmr.msra.gmra.mrb[4].mxu1 %vm4215_vm6, %v4210_v42 }
0x4756   :  { %4652 = vmatprep.mubr.msk.f32.mxu1 %vm4215_vm6, %v4211_v1  ;;  %4680 = vmatpush3.bf16.msra.mxu1 %v4679_v6 }
0x4757   :  { %v8039_v27 = vld [vmem:[#allocation3 + $0x18] sm:$0xff] }
0x4758   :  { %v4212_v31 = vmul.f32 %v4207_v15, %v8039_v27 }
0x475a   :  { %4653 = vmatmul.mubr.msk.f32.gmra.mrb[6].mxu1 %vm4215_vm6, %v4212_v31 }
0x475b   :  { %4667 = vmatprep.mubr.msk.f32.mxu1 %vm5538_vm8, %v5539_v48 }
0x4828   :  { %v4651_v35 = vpop.f32.mrb[4].mxu1 }
0x4829   :  { %v4315_v13 = vsel %vm4313_vm7, %v4651_v35, -inf  ;;  %v4294_v63 = vpop.f32.mrb[5].mxu1 }
0x482a   :  { %v4314_v9 = vsel %vm4313_vm7, %v4294_v63, -inf }
0x482b   :  { %v4318_v12 = vmax.f32 %v4314_v9, %v4315_v13 }
0x482d   :  { %v4654_v8 = vpop.f32.mrb[6].mxu1 }
0x482e   :  { %v4317_v32 = vsel %vm4313_vm7, %v4654_v8, -inf  ;;  %v4304_v60 = vpop.f32.mrb[7].mxu1 }
0x482f   :  { %v4316_v47 = vsel %vm4313_vm7, %v4304_v60, -inf }
0x4830   :  { %v4319_v62 = vmax.f32 %v4316_v47, %v4317_v32 }
0x4832   :  { %v4320_v49 = vmax.f32 %v4318_v12, %v4319_v62 }
0x4834   :  { %v4321_v16 = vrot.slane %v4320_v49, 4 }
0x4836   :  { %v4322_v7 = vmax.f32 %v4320_v49, %v4321_v16 }
0x4838   :  { %v4323_v18 = vrot.slane %v4322_v7, 2 }
0x483a   :  { %v4324_v0 = vmax.f32 %v4322_v7, %v4323_v18  ;;  %v4554_v18 = vpop.permute.xlu0 %4553 }
0x483c   :  { %v4325_v30 = vrot.slane %v4324_v0, 1 }
0x483e   :  { %v4326_v59 = vmax.f32 %v4324_v0, %v4325_v30  ;;  %v4560_v0 = vpop.permute.xlu1 %4559 }
0x4840   :  { %v4327_v21 = vsub.f32 %v4294_v63, %v4326_v59  ;;  %v4328_v26 = vsub.f32 %v4651_v35, %v4326_v59  ;;  %v4329_v28 = vsub.f32 %v4304_v60, %v4326_v59  ;;  %v4330_v23 = vsub.f32 %v4654_v8, %v4326_v59 }
0x4842   :  { %v4331_v34 = vmul.f32 1.442695, %v4327_v21  ;;  %v4333_v3 = vmul.f32 1.442695, %v4328_v26  ;;  %v4335_v53 = vmul.f32 1.442695, %v4329_v28 }
0x4843   :  { %v4337_v61 = vmul.f32 1.442695, %v4330_v23 }
0x4844   :  { %5399 = vpow2.f32 %v4331_v34 }
0x4845   :  { %5401 = vpow2.f32 %v4333_v3 }
0x4846   :  { %5403 = vpow2.f32 %v4335_v53 }
0x4847   :  { %5405 = vpow2.f32 %v4337_v61 }
0x484e   :  { %v5400_v19 = vpop.eup %5399 }
0x484f   :  { %v5402_v43 = vpop.eup %5401  ;;  %v4339_v11 = vsel %vm4313_vm7, %v5400_v19, 0.0 }
0x4850   :  { %v5404_v44 = vpop.eup %5403  ;;  %v4340_v54 = vsel %vm4313_vm7, %v5402_v43, 0.0 }
0x4851   :  { %v5406_v50 = vpop.eup %5405  ;;  %v4341_v24 = vadd.f32 %v4340_v54, %v4339_v11  ;;  %v4342_v10 = vsel %vm4313_vm7, %v5404_v44, 0.0 }
0x4852   :  { %v4344_v55 = vsel %vm4313_vm7, %v5406_v50, 0.0 }
0x4853   :  { %v4343_v22 = vadd.f32 %v4342_v10, %v4341_v24 }
0x4855   :  { %v4345_v52 = vadd.f32 %v4344_v55, %v4343_v22 }
0x4857   :  { %v4346_v46 = vrot.slane %v4345_v52, 4 }
0x4859   :  { %v4347_v45 = vadd.f32 %v4346_v46, %v4345_v52 }
0x485b   :  { %v4348_v29 = vrot.slane %v4347_v45, 2 }
0x485d   :  { %v4349_v37 = vadd.f32 %v4348_v29, %v4347_v45 }
0x485f   :  { %v4350_v56 = vrot.slane %v4349_v37, 1 }
0x4861   :  { %v4351_v2 = vadd.f32 %v4350_v56, %v4349_v37 }
0x4863   :  { %5407 = vrcp.f32 %v4351_v2 }
0x486d   :  { %v5408_v36 = vpop.eup %5407 }
0x486e   :  { %v4353_v38 = vmul.f32 %v5408_v36, %v5400_v19  ;;  %v4354_v4 = vmul.f32 %v5408_v36, %v5402_v43  ;;  %v4355_v33 = vmul.f32 %v5408_v36, %v5404_v44  ;;  %v4356_v51 = vmul.f32 %v5408_v36, %v5406_v50 }
0x4870   :  { %4657 = vmatprep.mubr.msk.f32.mxu0 %vm4313_vm7, %v4353_v38 }
0x4871   :  { %4658 = vmatmul.mubr.msk.f32.vlgmr.msra.gmra.mrb[4].mxu0 %vm4313_vm7, %v4354_v4 }
0x4872   :  { %4660 = vmatprep.mubr.msk.f32.mxu0 %vm4313_vm7, %v4355_v33 }
0x4875   :  { %4661 = vmatmul.mubr.msk.f32.gmra.mrb[6].mxu0 %vm4313_vm7, %v4356_v51 }
0x4944   :  { %v4659_v57 = vpop.f32.mrb[4].mxu0 }
0x4945   :  { %v4459_v14 = vmul.f32 %v4659_v57, %v8029_v17  ;;  %v4439_v15 = vpop.f32.mrb[5].mxu0 }
0x4946   :  { %v4458_v40 = vmul.f32 %v4439_v15, %v8027_v5 }
0x4947   :  { %v4463_v42 = vsel %vm4215_vm6, %v4459_v14, 0.0 }
0x4948   :  { %v4462_v1 = vsel %vm4215_vm6, %v4458_v40, 0.0  ;;  %v4662_v31 = vpop.f32.mrb[6].mxu0 }
0x4949   :  { %v4464_v58 = vadd.f32 %v4463_v42, %v4462_v1  ;;  %v4449_v35 = vpop.f32.mrb[7].mxu0  ;;  %v4461_v13 = vmul.f32 %v4662_v31, %v8039_v27  ;;  %v4477_v27 = vld [vmem:[%s8099_s9] sm:$0x1] }
0x494a   :  { %v4460_v63 = vmul.f32 %v4449_v35, %v8033_v41 }
0x494b   :  { %v4467_v8 = vsel %vm4215_vm6, %v4461_v13, 0.0 }
0x494c   :  { %v4465_v9 = vsel %vm4215_vm6, %v4460_v63, 0.0 }
0x494d   :  { %v4466_v12 = vadd.f32 %v4465_v9, %v4464_v58 }
0x494f   :  { %v4468_v17 = vadd.f32 %v4467_v8, %v4466_v12 }
0x4951   :  { %v4469_v32 = vrot.slane %v4468_v17, 4 }
0x4953   :  { %v4470_v60 = vadd.f32 %v4469_v32, %v4468_v17 }
0x4955   :  { %v4471_v5 = vrot.slane %v4470_v60, 2 }
0x4957   :  { %v4472_v47 = vadd.f32 %v4471_v5, %v4470_v60 }
0x4959   :  { %v4473_v62 = vrot.slane %v4472_v47, 1 }
0x495b   :  { %v4474_v49 = vadd.f32 %v4473_v62, %v4472_v47 }
0x495d   :  { %4668 = vmatmul.mubr.msk.f32.vlgmr.msra.gmra.mrb[8].mxu1 %vm4215_vm6, %v4474_v49 }
0x4a30   :  { %v4547_v16 = vpop.f32.mrb[8].mxu1 }
0x4a31   :  { %v4548_v41 = vadd.f32 %v4547_v16, %v4477_v27  ;;  %v4669_v7 = vpop.f32.mrb[9].mxu1 }
0x4a33   :  { %4552 = vst.msk [vmem:[#allocation4] sm:$0x1] %vm4551_vm9, %v4548_v41 }
0x4a34   :  { %4557 = vst.msk [vmem:[#allocation4] sm:$0x1] %vm4556_vm10, %v4554_v18 }
0x4a35   :  { %4563 = vst.msk [vmem:[#allocation4] sm:$0x1] %vm4562_vm11, %v4560_v0 }
0x4a36   :  { %5501 = shalt.err (!%p5498_p4)
}
0x4a37   :  { %s5502_s18 = scalar_lea.hbm %s8100_s10, 16 }
0x4a38   :  { %p5503_p5 = scmp.ne.s32.totalorder %s8100_s10, %s5502_s18  ;;  %p5506_p6 = scmp.lt.u32.totalorder %s5502_s18, %s8100_s10 }
0x4a3a   :  { %p5508_p7 = pnand %p5506_p6, %p5503_p5 }
0x4a3c   :  { %5511 = shalt.err (!%p5508_p7)
}
0x4a3d   :  { %4573 = dma.vmem_to_hbm [thread:$0]  %s4571_s14, 16, %s8100_s10, [#allocation5]  }
0x4a3e   :  { %5512 = dma.done.wait [#allocation5], 16  }
0x4a3f   :  { %5513 = vsyncadd [#allocation5], 4294967280 }
0x4a40   :  { %4577 = vsyncpa [#allocation5], 1 }

</bundles_post_ra>
